<compile_context>
chip_gen: v5e
topology: v5e:2x2
jax: 0.10.0
libtpu: 0.0.40
codegen_flags: <defaults>
</compile_context>

<pallas_src>
import math

import numpy as np
import jax
import jax.numpy as jnp
from jax import lax
from jax.experimental import pallas as pl
from jax.experimental.pallas import tpu as pltpu


def _rup(x, m):
    return ((x + m - 1) // m) * m


# ----------------------------- Pallas kernels ------------------------------

def _make_conv_kernel(tap_offsets, r_out):
    """4-tap shifted-row matmul accumulation + fused BN (scale/bias) + SiLU.

    p_ref holds the top/left-padded, space-to-depth'd activation flattened to
    rows (with `max(tap_offsets)` zero rows prepended); for tap t the rows
    [off_t : off_t + r_out) line up with the output rows.
    """

    def kernel(p_ref, w_ref, scale_ref, bias_ref, out_ref):
        p = p_ref[...]
        acc = jnp.zeros(out_ref.shape, jnp.float32)
        for t, off in enumerate(tap_offsets):
            acc = acc + jnp.dot(p[off:off + r_out, :], w_ref[t],
                                preferred_element_type=jnp.float32)
        y = acc * scale_ref[...] + bias_ref[...]
        out_ref[...] = y * jax.nn.sigmoid(y)  # SiLU

    return kernel


def _detect_kernel(feat_ref, w_ref, b_ref, q_ref, l_ref, add_ref,
                   raw_ref, y_ref):
    """1x1 detect conv (matmul + bias) fused with sigmoid + box decode.

    All index math is precomputed:  y = s*s*Q + s*L + ADD  where s = sigmoid.
    (Q = 4*anchor on wh cols, L = 2*stride on xy cols / 1 on conf cols,
     ADD = (grid - 0.5)*stride on xy cols.)
    """
    logits = jnp.dot(feat_ref[...], w_ref[...],
                     preferred_element_type=jnp.float32) + b_ref[...]
    raw_ref[...] = logits
    s = jax.nn.sigmoid(logits)
    y_ref[...] = s * (s * q_ref[...] + l_ref[...]) + add_ref[...]


# ------------------------------- pallas wrappers ---------------------------

def conv_pallas(pf, w_taps, scale, bias, r_out, tap_offsets):
    rows_in, k4 = pf.shape
    cout = w_taps.shape[-1]
    kern = _make_conv_kernel(tap_offsets, r_out)
    return pl.pallas_call(
        kern,
        out_shape=jax.ShapeDtypeStruct((r_out, cout), jnp.float32),
        grid=(1,),
        in_specs=[
            pl.BlockSpec((rows_in, k4), lambda i: (0, 0)),
            pl.BlockSpec((4, k4, cout), lambda i: (0, 0, 0)),
            pl.BlockSpec((1, cout), lambda i: (0, 0)),
            pl.BlockSpec((1, cout), lambda i: (0, 0)),
        ],
        out_specs=pl.BlockSpec((r_out, cout), lambda i: (0, 0)),
        compiler_params=pltpu.CompilerParams(
            dimension_semantics=("arbitrary",)),
    )(pf, w_taps, scale.reshape(1, cout), bias.reshape(1, cout))


def detect_pallas(feats, w, b, qtab, ltab, addtab):
    B, R, K = feats.shape
    C = w.shape[-1]
    return pl.pallas_call(
        _detect_kernel,
        out_shape=(jax.ShapeDtypeStruct((B, R, C), jnp.float32),
                   jax.ShapeDtypeStruct((B, R, C), jnp.float32)),
        grid=(B,),
        in_specs=[
            pl.BlockSpec((None, R, K), lambda i: (i, 0, 0)),
            pl.BlockSpec((None, K, C), lambda i: (i, 0, 0)),
            pl.BlockSpec((None, 1, C), lambda i: (i, 0, 0)),
            pl.BlockSpec((None, 1, C), lambda i: (i, 0, 0)),
            pl.BlockSpec((None, 1, C), lambda i: (i, 0, 0)),
            pl.BlockSpec((None, R, C), lambda i: (i, 0, 0)),
        ],
        out_specs=(pl.BlockSpec((None, R, C), lambda i: (i, 0, 0)),
                   pl.BlockSpec((None, R, C), lambda i: (i, 0, 0))),
        compiler_params=pltpu.CompilerParams(
            dimension_semantics=("parallel",)),
    )(feats, w, b, qtab, ltab, addtab)


# ------------------------------- XLA-side glue ------------------------------

def _space_to_depth_pad(x_nhwc):
    """NHWC -> phase tensor (stride-2 -> stride-1), top/left halo, flatten."""
    N, H, W, C = x_nhwc.shape
    assert H % 2 == 0 and W % 2 == 0
    Ho, Wo = H // 2, W // 2
    p = x_nhwc.reshape(N, Ho, 2, Wo, 2, C).transpose(0, 1, 3, 2, 4, 5)
    p = p.reshape(N, Ho, Wo, 4 * C)
    pp = jnp.pad(p, ((0, 0), (1, 0), (1, 0), (0, 0)))     # top/left halo
    Wo1 = Wo + 1
    r = N * (Ho + 1) * Wo1
    r8 = _rup(r, 8)
    s = Wo1 + 1                                            # prepended zero rows
    pf = pp.reshape(r, 4 * C)
    pf = jnp.pad(pf, ((s, r8 - r), (0, 0)))
    tap_offsets = (0, 1, Wo1, Wo1 + 1)                     # (dy, dx) in row-major
    return pf, r8, tap_offsets, (N, Ho, Wo)


def _extract_valid(og, N, Ho, Wo):
    cout = og.shape[-1]
    og = og[:N * (Ho + 1) * (Wo + 1)].reshape(N, Ho + 1, Wo + 1, cout)
    return og[:, 1:, 1:, :]                                # (N, Ho, Wo, Cout)


def _pack_conv_weights(w_oihw):
    """OIHW 3x3 weights -> 4 per-tap (4*Cin, Cout) phase matrices."""
    cout, cin, kh_, kw_ = w_oihw.shape
    assert kh_ == 3 and kw_ == 3
    wmat = jnp.transpose(w_oihw, (2, 3, 1, 0))             # (kh, kw, Cin, Cout)
    zero = jnp.zeros((cin, cout), w_oihw.dtype)

    def blk(dy, p, dx, q):
        if dy == 0:
            if p == 0:
                return zero
            kh = 0
        else:
            kh = 1 if p == 0 else 2
        if dx == 0:
            if q == 0:
                return zero
            kw = 0
        else:
            kw = 1 if q == 0 else 2
        return wmat[kh, kw]

    taps = []
    for dy in (0, 1):
        for dx in (0, 1):
            blocks = [blk(dy, p, dx, q) for p in (0, 1) for q in (0, 1)]
            taps.append(jnp.concatenate(blocks, axis=0))   # (4*Cin, Cout)
    return jnp.stack(taps, axis=0)                         # (4, 4*Cin, Cout)


def _detect_tables_np(ny, nx, n_batch, na, no, stride, anchors, Rmax, Cp):
    """Precomputed decode tables (hoisted out of the kernel)."""
    C = na * no
    q = np.zeros((Cp,), np.float32)
    l = np.zeros((Cp,), np.float32)
    for c in range(C):
        a, o = c // no, c % no
        if o in (0, 1):
            l[c] = 2.0 * stride
        elif o == 2:
            q[c] = 4.0 * float(anchors[a][0])
        elif o == 3:
            q[c] = 4.0 * float(anchors[a][1])
        else:
            l[c] = 1.0
    add = np.zeros((Rmax, Cp), np.float32)
    nrows = n_batch * ny * nx
    for r in range(nrows):
        pix = r % (ny * nx)
        gx = float(pix % nx)
        gy = float(pix // nx)
        for c in range(C):
            o = c % no
            if o == 0:
                add[r, c] = (gx - 0.5) * stride
            elif o == 1:
                add[r, c] = (gy - 0.5) * stride
    return q, l, add


# -------------------------- config / parse / params ------------------------

CFG = {
    'nc': 4,
    'depth_multiple': 1.0,
    'width_multiple': 1.0,
    'anchors': [[10, 13, 16, 30, 33, 23],
                [30, 61, 62, 45, 59, 119]],
    'ch': 3,
    'backbone': [
        [-1, 1, 'Conv', [16, 3, 2]],   # 0: P1/2
        [-1, 1, 'Conv', [32, 3, 2]],   # 1: P2/4
        [-1, 1, 'Conv', [64, 3, 2]],   # 2: P3/8
    ],
    'head': [
        [[1, 2], 1, 'Detect', ['nc', 'anchors']],
    ],
}


def parse_model_cfg(d):
    """Mirror of parse_model() channel/width arithmetic for Conv + Detect."""
    ch_in = d['ch']
    anchors, nc = d['anchors'], d['nc']
    gw = d['width_multiple']
    na = len(anchors[0]) // 2
    no = nc + 5
    num_outputs = na * no
    ch = [ch_in]
    strides = []
    layers = []
    for i, (f, n, m, args) in enumerate(d['backbone'] + d['head']):
        if m == 'Conv':
            c1 = ch[f]
            c2 = args[0]
            if c2 != num_outputs:
                c2 = math.ceil(c2 * gw / 8) * 8
            k, s = args[1], args[2]
            in_stride = 1 if i == 0 else strides[i - 1 if f == -1 else f]
            layers.append(dict(type='Conv', f=f, c1=c1, c2=c2, k=k, s=s))
            c_out = c2
            strides.append(in_stride * s)
        elif m == 'Detect':
            det_ch = [ch[x] for x in f]
            det_strides = [float(strides[x]) for x in f]
            anchors_pairs = [[(float(a[2 * j]), float(a[2 * j + 1]))
                              for j in range(na)] for a in anchors]
            layers.append(dict(type='Detect', f=list(f), ch=det_ch, nc=nc,
                               na=na, no=no, strides=det_strides,
                               anchors_pairs=anchors_pairs))
            c_out = num_outputs
            strides.append(det_strides[0])
        else:
            # TODO(synk): Focus / C3 / SPP / Concat / Upsample not needed here.
            raise NotImplementedError(m)
        if i == 0:
            ch = []
        ch.append(c_out)
    return layers


def init_params(layers, key):
    params = []
    for L in layers:
        if L['type'] == 'Conv':
            key, k1 = jax.random.split(key)
            w = jax.random.normal(k1, (L['c2'], L['c1'], L['k'], L['k']),
                                  jnp.float32) * 0.05
            # BatchNorm at PyTorch init: gamma=1, beta=0, mean=0, var=1, eps=1e-3
            scale = jnp.full((L['c2'],), 1.0 / math.sqrt(1.0 + 1e-3), jnp.float32)
            bias = jnp.zeros((L['c2'],), jnp.float32)
            params.append(dict(w=w, scale=scale, bias=bias))
        else:  # Detect: one 1x1 conv per scale, bias init as _initialize_biases
            na, no, nc = L['na'], L['no'], L['nc']
            branches = []
            for cin, s in zip(L['ch'], L['strides']):
                key, k1 = jax.random.split(key)
                w = jax.random.normal(k1, (na * no, cin, 1, 1), jnp.float32) * 0.05
                b = jnp.zeros((na, no), jnp.float32)
                b = b.at[:, 4].add(math.log(8.0 / (640.0 / s) ** 2))
                b = b.at[:, 5:].add(math.log(0.6 / (nc - 0.99)))
                branches.append(dict(w=w, b=b.reshape(-1)))
            params.append(branches)
    return params


def pack_params(layers, params, img_hw, batch):
    """One-time repack of torch-layout params into kernel-ready tensors."""
    packed = {'convs': {}, 'detect': None}
    cur_hw = img_hw
    spatial = {}
    for idx, (L, P) in enumerate(zip(layers, params)):
        if L['type'] == 'Conv':
            assert L['k'] == 3 and L['s'] == 2
            packed['convs'][idx] = dict(w=_pack_conv_weights(P['w']),
                                        scale=P['scale'], bias=P['bias'])
            cur_hw = (cur_hw[0] // L['s'], cur_hw[1] // L['s'])
            spatial[idx] = cur_hw
        else:
            na, no = L['na'], L['no']
            C = na * no
            Cp = _rup(C, 128)
            Kmax = _rup(max(L['ch']), 8)
            nrows = [batch * spatial[j][0] * spatial[j][1] for j in L['f']]
            Rmax = _rup(max(nrows), 8)
            Ws, Bs, Qs, Ls, As = [], [], [], [], []
            for bi, j in enumerate(L['f']):
                ny, nx = spatial[j]
                cin = L['ch'][bi]
                w = jnp.transpose(P[bi]['w'][:, :, 0, 0], (1, 0))   # (cin, C)
                w = jnp.pad(w, ((0, Kmax - cin), (0, Cp - C)))
                b = jnp.pad(P[bi]['b'], (0, Cp - C)).reshape(1, Cp)
                q, l, add = _detect_tables_np(ny, nx, batch, na, no,
                                              L['strides'][bi],
                                              L['anchors_pairs'][bi], Rmax, Cp)
                Ws.append(w)
                Bs.append(b)
                Qs.append(jnp.asarray(q).reshape(1, Cp))
                Ls.append(jnp.asarray(l).reshape(1, Cp))
                As.append(jnp.asarray(add))
            packed['detect'] = dict(w=jnp.stack(Ws, 0), b=jnp.stack(Bs, 0),
                                    q=jnp.stack(Qs, 0), l=jnp.stack(Ls, 0),
                                    add=jnp.stack(As, 0),
                                    Rmax=Rmax, Kmax=Kmax, Cp=Cp)
    return packed


# --------------------------------- forward ---------------------------------

def model_forward(x_nchw, layers, packed):
    """Model._forward_once semantics (inference mode -> (cat(z,1), x_list))."""
    cur = jnp.transpose(x_nchw, (0, 2, 3, 1))      # NCHW -> NHWC once at entry
    feats = {}
    for idx, L in enumerate(layers):
        if L['type'] == 'Conv':
            pk = packed['convs'][idx]
            inp = cur if L['f'] == -1 else feats[L['f']]
            pf, r8, taps, (N, Ho, Wo) = _space_to_depth_pad(inp)
            og = conv_pallas(pf, pk['w'], pk['scale'], pk['bias'], r8, taps)
            cur = _extract_valid(og, N, Ho, Wo)
            feats[idx] = cur
        else:  # Detect (all branches in one pallas_call)
            dk = packed['detect']
            na, no = L['na'], L['no']
            C = na * no
            branch_feats = []
            for bi, j in enumerate(L['f']):
                f = feats[j]
                n_, hy, hx, cch = f.shape
                fr = f.reshape(n_ * hy * hx, cch)
                fr = jnp.pad(fr, ((0, dk['Rmax'] - fr.shape[0]),
                                  (0, dk['Kmax'] - cch)))
                branch_feats.append(fr)
            stacked = jnp.stack(branch_feats, axis=0)
            raw, ydec = detect_pallas(stacked, dk['w'], dk['b'],
                                      dk['q'], dk['l'], dk['add'])
            zs, xs = [], []
            for bi, j in enumerate(L['f']):
                n_, hy, hx, _ = feats[j].shape
                nr = n_ * hy * hx
                r5 = raw[bi, :nr, :C].reshape(n_, hy, hx, na, no)
                r5 = r5.transpose(0, 3, 1, 2, 4)
                y5 = ydec[bi, :nr, :C].reshape(n_, hy, hx, na, no)
                y5 = y5.transpose(0, 3, 1, 2, 4)
                xs.append(r5)
                zs.append(y5.reshape(n_, -1, no))
            return jnp.concatenate(zs, axis=1), xs
    return cur


# ----------------------------- plain-JAX reference -------------------------

def ref_forward(x, layers, params):
    y = []
    out = x
    for L, P in zip(layers, params):
        if L['type'] == 'Conv':
            inp = out if L['f'] == -1 else y[L['f']]
            k, s = L['k'], L['s']
            p = k // 2
            c = lax.conv_general_dilated(
                inp, P['w'], (s, s), [(p, p), (p, p)],
                dimension_numbers=('NCHW', 'OIHW', 'NCHW'),
                precision=lax.Precision.HIGHEST)
            c = c * P['scale'][None, :, None, None] + P['bias'][None, :, None, None]
            out = c * jax.nn.sigmoid(c)
            y.append(out)
        else:
            na, no = L['na'], L['no']
            zs, xs = [], []
            for bi, j in enumerate(L['f']):
                conv = lax.conv_general_dilated(
                    y[j], P[bi]['w'], (1, 1), [(0, 0), (0, 0)],
                    dimension_numbers=('NCHW', 'OIHW', 'NCHW'),
                    precision=lax.Precision.HIGHEST)
                conv = conv + P[bi]['b'][None, :, None, None]
                bs, _, ny, nx = conv.shape
                xi = conv.reshape(bs, na, no, ny, nx).transpose(0, 1, 3, 4, 2)
                sig = jax.nn.sigmoid(xi)
                yv, xv = jnp.meshgrid(jnp.arange(ny), jnp.arange(nx), indexing='ij')
                grid = jnp.stack((xv, yv), 2).reshape(1, 1, ny, nx, 2).astype(jnp.float32)
                ag = jnp.asarray(L['anchors_pairs'][bi], jnp.float32).reshape(1, na, 1, 1, 2)
                xy = (sig[..., 0:2] * 2.0 - 0.5 + grid) * L['strides'][bi]
                wh = (sig[..., 2:4] * 2.0) ** 2 * ag
                yi = jnp.concatenate([xy, wh, sig[..., 4:]], -1)
                zs.append(yi.reshape(bs, -1, no))
                xs.append(xi)
            return jnp.concatenate(zs, 1), xs
    return out


# ----------------------------------- main -----------------------------------

if __name__ == "__main__":
    key = jax.random.PRNGKey(0)
    layers = parse_model_cfg(CFG)
    kp, kx = jax.random.split(key)
    params = init_params(layers, kp)

    N, H, W = 2, 32, 32
    x = jax.random.normal(kx, (N, CFG['ch'], H, W), jnp.float32)

    packed = pack_params(layers, params, (H, W), N)
    fwd = jax.jit(lambda inp: model_forward(inp, layers, packed))

    z, xs = fwd(x)
    z = jax.block_until_ready(z)
    xs = [jax.block_until_ready(t) for t in xs]

    z_ref, xs_ref = ref_forward(x, layers, params)
    assert z.shape == z_ref.shape, (z.shape, z_ref.shape)
    assert jnp.allclose(z, z_ref, rtol=1e-2, atol=1e-2), \
        float(jnp.max(jnp.abs(z - z_ref)))
    for a, b in zip(xs, xs_ref):
        assert a.shape == b.shape, (a.shape, b.shape)
        assert jnp.allclose(a, b, rtol=1e-2, atol=1e-2), \
            float(jnp.max(jnp.abs(a - b)))

    print("KERNEL_OK")
</pallas_src>

<mosaic_0001>
module attributes {stable_mosaic.version = 11 : i64} {
  func.func @kernel(%arg0: i32, %arg1: memref<602x12xf32, #tpu.memory_space<vmem>>, %arg2: memref<4x12x16xf32, #tpu.memory_space<vmem>>, %arg3: memref<1x16xf32, #tpu.memory_space<vmem>>, %arg4: memref<1x16xf32, #tpu.memory_space<vmem>>, %arg5: memref<584x16xf32, #tpu.memory_space<vmem>>) attributes {dimension_semantics = [#tpu.dimension_semantics<arbitrary>], iteration_bounds = array<i64: 1>, scalar_prefetch = 0 : i64, scratch_operands = 0 : i64, tpu.core_type = #tpu.core_type<tc>, window_params = [{pipeline_mode = #tpu.pipeline_mode<synchronous>, transform_indices = @transform_0, window_bounds = array<i64: 602, 12>}, {pipeline_mode = #tpu.pipeline_mode<synchronous>, transform_indices = @transform_1, window_bounds = array<i64: 4, 12, 16>}, {pipeline_mode = #tpu.pipeline_mode<synchronous>, transform_indices = @transform_2, window_bounds = array<i64: 1, 16>}, {pipeline_mode = #tpu.pipeline_mode<synchronous>, transform_indices = @transform_3, window_bounds = array<i64: 1, 16>}, {pipeline_mode = #tpu.pipeline_mode<synchronous>, transform_indices = @transform_4, window_bounds = array<i64: 584, 16>}]} {
    %c0 = arith.constant 0 : index
    %c0_0 = arith.constant 0 : index
    %0 = vector.load %arg1[%c0, %c0_0] : memref<602x12xf32, #tpu.memory_space<vmem>>, vector<602x12xf32>
    %cst = arith.constant 0.000000e+00 : f32
    %1 = vector.broadcast %cst : f32 to vector<584x16xf32>
    %2 = vector.extract_strided_slice %0 {offsets = [0, 0], sizes = [584, 12], strides = [1, 1]} : vector<602x12xf32> to vector<584x12xf32>
    %c0_1 = arith.constant 0 : index
    %c0_2 = arith.constant 0 : index
    %c0_3 = arith.constant 0 : index
    %3 = vector.load %arg2[%c0_1, %c0_2, %c0_3] : memref<4x12x16xf32, #tpu.memory_space<vmem>>, vector<1x12x16xf32>
    %4 = vector.shape_cast %3 : vector<1x12x16xf32> to vector<12x16xf32>
    %cst_4 = arith.constant dense<0.000000e+00> : vector<584x16xf32>
    %5 = tpu.matmul %2, %4, %cst_4 {dimension_numbers = #tpu.dot_dimension_numbers<[1], [0], [0], [1], [0, 0, 1, 1], [], []>} : vector<584x12xf32>, vector<12x16xf32>, vector<584x16xf32> -> vector<584x16xf32>
    %6 = arith.addf %1, %5 : vector<584x16xf32>
    %7 = vector.extract_strided_slice %0 {offsets = [1, 0], sizes = [584, 12], strides = [1, 1]} : vector<602x12xf32> to vector<584x12xf32>
    %c1 = arith.constant 1 : index
    %c0_5 = arith.constant 0 : index
    %c0_6 = arith.constant 0 : index
    %8 = vector.load %arg2[%c1, %c0_5, %c0_6] : memref<4x12x16xf32, #tpu.memory_space<vmem>>, vector<1x12x16xf32>
    %9 = vector.shape_cast %8 : vector<1x12x16xf32> to vector<12x16xf32>
    %cst_7 = arith.constant dense<0.000000e+00> : vector<584x16xf32>
    %10 = tpu.matmul %7, %9, %cst_7 {dimension_numbers = #tpu.dot_dimension_numbers<[1], [0], [0], [1], [0, 0, 1, 1], [], []>} : vector<584x12xf32>, vector<12x16xf32>, vector<584x16xf32> -> vector<584x16xf32>
    %11 = arith.addf %6, %10 : vector<584x16xf32>
    %12 = vector.extract_strided_slice %0 {offsets = [17, 0], sizes = [584, 12], strides = [1, 1]} : vector<602x12xf32> to vector<584x12xf32>
    %c2 = arith.constant 2 : index
    %c0_8 = arith.constant 0 : index
    %c0_9 = arith.constant 0 : index
    %13 = vector.load %arg2[%c2, %c0_8, %c0_9] : memref<4x12x16xf32, #tpu.memory_space<vmem>>, vector<1x12x16xf32>
    %14 = vector.shape_cast %13 : vector<1x12x16xf32> to vector<12x16xf32>
    %cst_10 = arith.constant dense<0.000000e+00> : vector<584x16xf32>
    %15 = tpu.matmul %12, %14, %cst_10 {dimension_numbers = #tpu.dot_dimension_numbers<[1], [0], [0], [1], [0, 0, 1, 1], [], []>} : vector<584x12xf32>, vector<12x16xf32>, vector<584x16xf32> -> vector<584x16xf32>
    %16 = arith.addf %11, %15 : vector<584x16xf32>
    %17 = vector.extract_strided_slice %0 {offsets = [18, 0], sizes = [584, 12], strides = [1, 1]} : vector<602x12xf32> to vector<584x12xf32>
    %c3 = arith.constant 3 : index
    %c0_11 = arith.constant 0 : index
    %c0_12 = arith.constant 0 : index
    %18 = vector.load %arg2[%c3, %c0_11, %c0_12] : memref<4x12x16xf32, #tpu.memory_space<vmem>>, vector<1x12x16xf32>
    %19 = vector.shape_cast %18 : vector<1x12x16xf32> to vector<12x16xf32>
    %cst_13 = arith.constant dense<0.000000e+00> : vector<584x16xf32>
    %20 = tpu.matmul %17, %19, %cst_13 {dimension_numbers = #tpu.dot_dimension_numbers<[1], [0], [0], [1], [0, 0, 1, 1], [], []>} : vector<584x12xf32>, vector<12x16xf32>, vector<584x16xf32> -> vector<584x16xf32>
    %21 = arith.addf %16, %20 : vector<584x16xf32>
    %c0_14 = arith.constant 0 : index
    %c0_15 = arith.constant 0 : index
    %22 = vector.load %arg3[%c0_14, %c0_15] : memref<1x16xf32, #tpu.memory_space<vmem>>, vector<1x16xf32>
    %23 = vector.broadcast %22 : vector<1x16xf32> to vector<584x16xf32>
    %24 = arith.mulf %21, %23 : vector<584x16xf32>
    %c0_16 = arith.constant 0 : index
    %c0_17 = arith.constant 0 : index
    %25 = vector.load %arg4[%c0_16, %c0_17] : memref<1x16xf32, #tpu.memory_space<vmem>>, vector<1x16xf32>
    %26 = vector.broadcast %25 : vector<1x16xf32> to vector<584x16xf32>
    %27 = arith.addf %24, %26 : vector<584x16xf32>
    %28 = arith.negf %27 : vector<584x16xf32>
    %29 = math.exp %28 : vector<584x16xf32>
    %cst_18 = arith.constant 1.000000e+00 : f32
    %30 = vector.broadcast %cst_18 : f32 to vector<584x16xf32>
    %31 = arith.addf %30, %29 : vector<584x16xf32>
    %32 = arith.divf %30, %31 : vector<584x16xf32>
    %33 = arith.mulf %27, %32 : vector<584x16xf32>
    %c0_19 = arith.constant 0 : index
    %c0_20 = arith.constant 0 : index
    %34 = vector.load %arg5[%c0_19, %c0_20] : memref<584x16xf32, #tpu.memory_space<vmem>>, vector<584x16xf32>
    tpu.vector_store %arg5[%c0_19, %c0_20], %33 {strides = array<i32>} : memref<584x16xf32, #tpu.memory_space<vmem>>, vector<584x16xf32>,
    return
  }
  func.func @transform_0(%arg0: i32) -> (i32, i32) {
    %c0_i32 = arith.constant 0 : i32
    %c0_i32_0 = arith.constant 0 : i32
    %c0_i32_1 = arith.constant 0 : i32
    return %c0_i32, %c0_i32_0 : i32, i32
  }
  func.func @transform_1(%arg0: i32) -> (i32, i32, i32) {
    %c0_i32 = arith.constant 0 : i32
    %c0_i32_0 = arith.constant 0 : i32
    %c0_i32_1 = arith.constant 0 : i32
    %c0_i32_2 = arith.constant 0 : i32
    return %c0_i32, %c0_i32_0, %c0_i32_1 : i32, i32, i32
  }
  func.func @transform_2(%arg0: i32) -> (i32, i32) {
    %c0_i32 = arith.constant 0 : i32
    %c0_i32_0 = arith.constant 0 : i32
    %c0_i32_1 = arith.constant 0 : i32
    return %c0_i32, %c0_i32_0 : i32, i32
  }
  func.func @transform_3(%arg0: i32) -> (i32, i32) {
    %c0_i32 = arith.constant 0 : i32
    %c0_i32_0 = arith.constant 0 : i32
    %c0_i32_1 = arith.constant 0 : i32
    return %c0_i32, %c0_i32_0 : i32, i32
  }
  func.func @transform_4(%arg0: i32) -> (i32, i32) {
    %c0_i32 = arith.constant 0 : i32
    %c0_i32_0 = arith.constant 0 : i32
    %c0_i32_1 = arith.constant 0 : i32
    return %c0_i32, %c0_i32_0 : i32, i32
  }
}

module attributes {stable_mosaic.version = 11 : i64} {
  func.func @kernel(%arg0: i32, %arg1: memref<178x64xf32, #tpu.memory_space<vmem>>, %arg2: memref<4x64x32xf32, #tpu.memory_space<vmem>>, %arg3: memref<1x32xf32, #tpu.memory_space<vmem>>, %arg4: memref<1x32xf32, #tpu.memory_space<vmem>>, %arg5: memref<168x32xf32, #tpu.memory_space<vmem>>) attributes {dimension_semantics = [#tpu.dimension_semantics<arbitrary>], iteration_bounds = array<i64: 1>, scalar_prefetch = 0 : i64, scratch_operands = 0 : i64, tpu.core_type = #tpu.core_type<tc>, window_params = [{pipeline_mode = #tpu.pipeline_mode<synchronous>, transform_indices = @transform_0, window_bounds = array<i64: 178, 64>}, {pipeline_mode = #tpu.pipeline_mode<synchronous>, transform_indices = @transform_1, window_bounds = array<i64: 4, 64, 32>}, {pipeline_mode = #tpu.pipeline_mode<synchronous>, transform_indices = @transform_2, window_bounds = array<i64: 1, 32>}, {pipeline_mode = #tpu.pipeline_mode<synchronous>, transform_indices = @transform_3, window_bounds = array<i64: 1, 32>}, {pipeline_mode = #tpu.pipeline_mode<synchronous>, transform_indices = @transform_4, window_bounds = array<i64: 168, 32>}]} {
    %c0 = arith.constant 0 : index
    %c0_0 = arith.constant 0 : index
    %0 = vector.load %arg1[%c0, %c0_0] : memref<178x64xf32, #tpu.memory_space<vmem>>, vector<178x64xf32>
    %cst = arith.constant 0.000000e+00 : f32
    %1 = vector.broadcast %cst : f32 to vector<168x32xf32>
    %2 = vector.extract_strided_slice %0 {offsets = [0, 0], sizes = [168, 64], strides = [1, 1]} : vector<178x64xf32> to vector<168x64xf32>
    %c0_1 = arith.constant 0 : index
    %c0_2 = arith.constant 0 : index
    %c0_3 = arith.constant 0 : index
    %3 = vector.load %arg2[%c0_1, %c0_2, %c0_3] : memref<4x64x32xf32, #tpu.memory_space<vmem>>, vector<1x64x32xf32>
    %4 = vector.shape_cast %3 : vector<1x64x32xf32> to vector<64x32xf32>
    %cst_4 = arith.constant dense<0.000000e+00> : vector<168x32xf32>
    %5 = tpu.matmul %2, %4, %cst_4 {dimension_numbers = #tpu.dot_dimension_numbers<[1], [0], [0], [1], [0, 0, 1, 1], [], []>} : vector<168x64xf32>, vector<64x32xf32>, vector<168x32xf32> -> vector<168x32xf32>
    %6 = arith.addf %1, %5 : vector<168x32xf32>
    %7 = vector.extract_strided_slice %0 {offsets = [1, 0], sizes = [168, 64], strides = [1, 1]} : vector<178x64xf32> to vector<168x64xf32>
    %c1 = arith.constant 1 : index
    %c0_5 = arith.constant 0 : index
    %c0_6 = arith.constant 0 : index
    %8 = vector.load %arg2[%c1, %c0_5, %c0_6] : memref<4x64x32xf32, #tpu.memory_space<vmem>>, vector<1x64x32xf32>
    %9 = vector.shape_cast %8 : vector<1x64x32xf32> to vector<64x32xf32>
    %cst_7 = arith.constant dense<0.000000e+00> : vector<168x32xf32>
    %10 = tpu.matmul %7, %9, %cst_7 {dimension_numbers = #tpu.dot_dimension_numbers<[1], [0], [0], [1], [0, 0, 1, 1], [], []>} : vector<168x64xf32>, vector<64x32xf32>, vector<168x32xf32> -> vector<168x32xf32>
    %11 = arith.addf %6, %10 : vector<168x32xf32>
    %12 = vector.extract_strided_slice %0 {offsets = [9, 0], sizes = [168, 64], strides = [1, 1]} : vector<178x64xf32> to vector<168x64xf32>
    %c2 = arith.constant 2 : index
    %c0_8 = arith.constant 0 : index
    %c0_9 = arith.constant 0 : index
    %13 = vector.load %arg2[%c2, %c0_8, %c0_9] : memref<4x64x32xf32, #tpu.memory_space<vmem>>, vector<1x64x32xf32>
    %14 = vector.shape_cast %13 : vector<1x64x32xf32> to vector<64x32xf32>
    %cst_10 = arith.constant dense<0.000000e+00> : vector<168x32xf32>
    %15 = tpu.matmul %12, %14, %cst_10 {dimension_numbers = #tpu.dot_dimension_numbers<[1], [0], [0], [1], [0, 0, 1, 1], [], []>} : vector<168x64xf32>, vector<64x32xf32>, vector<168x32xf32> -> vector<168x32xf32>
    %16 = arith.addf %11, %15 : vector<168x32xf32>
    %17 = vector.extract_strided_slice %0 {offsets = [10, 0], sizes = [168, 64], strides = [1, 1]} : vector<178x64xf32> to vector<168x64xf32>
    %c3 = arith.constant 3 : index
    %c0_11 = arith.constant 0 : index
    %c0_12 = arith.constant 0 : index
    %18 = vector.load %arg2[%c3, %c0_11, %c0_12] : memref<4x64x32xf32, #tpu.memory_space<vmem>>, vector<1x64x32xf32>
    %19 = vector.shape_cast %18 : vector<1x64x32xf32> to vector<64x32xf32>
    %cst_13 = arith.constant dense<0.000000e+00> : vector<168x32xf32>
    %20 = tpu.matmul %17, %19, %cst_13 {dimension_numbers = #tpu.dot_dimension_numbers<[1], [0], [0], [1], [0, 0, 1, 1], [], []>} : vector<168x64xf32>, vector<64x32xf32>, vector<168x32xf32> -> vector<168x32xf32>
    %21 = arith.addf %16, %20 : vector<168x32xf32>
    %c0_14 = arith.constant 0 : index
    %c0_15 = arith.constant 0 : index
    %22 = vector.load %arg3[%c0_14, %c0_15] : memref<1x32xf32, #tpu.memory_space<vmem>>, vector<1x32xf32>
    %23 = vector.broadcast %22 : vector<1x32xf32> to vector<168x32xf32>
    %24 = arith.mulf %21, %23 : vector<168x32xf32>
    %c0_16 = arith.constant 0 : index
    %c0_17 = arith.constant 0 : index
    %25 = vector.load %arg4[%c0_16, %c0_17] : memref<1x32xf32, #tpu.memory_space<vmem>>, vector<1x32xf32>
    %26 = vector.broadcast %25 : vector<1x32xf32> to vector<168x32xf32>
    %27 = arith.addf %24, %26 : vector<168x32xf32>
    %28 = arith.negf %27 : vector<168x32xf32>
    %29 = math.exp %28 : vector<168x32xf32>
    %cst_18 = arith.constant 1.000000e+00 : f32
    %30 = vector.broadcast %cst_18 : f32 to vector<168x32xf32>
    %31 = arith.addf %30, %29 : vector<168x32xf32>
    %32 = arith.divf %30, %31 : vector<168x32xf32>
    %33 = arith.mulf %27, %32 : vector<168x32xf32>
    %c0_19 = arith.constant 0 : index
    %c0_20 = arith.constant 0 : index
    %34 = vector.load %arg5[%c0_19, %c0_20] : memref<168x32xf32, #tpu.memory_space<vmem>>, vector<168x32xf32>
    tpu.vector_store %arg5[%c0_19, %c0_20], %33 {strides = array<i32>} : memref<168x32xf32, #tpu.memory_space<vmem>>, vector<168x32xf32>,
    return
  }
  func.func @transform_0(%arg0: i32) -> (i32, i32) {
    %c0_i32 = arith.constant 0 : i32
    %c0_i32_0 = arith.constant 0 : i32
    %c0_i32_1 = arith.constant 0 : i32
    return %c0_i32, %c0_i32_0 : i32, i32
  }
  func.func @transform_1(%arg0: i32) -> (i32, i32, i32) {
    %c0_i32 = arith.constant 0 : i32
    %c0_i32_0 = arith.constant 0 : i32
    %c0_i32_1 = arith.constant 0 : i32
    %c0_i32_2 = arith.constant 0 : i32
    return %c0_i32, %c0_i32_0, %c0_i32_1 : i32, i32, i32
  }
  func.func @transform_2(%arg0: i32) -> (i32, i32) {
    %c0_i32 = arith.constant 0 : i32
    %c0_i32_0 = arith.constant 0 : i32
    %c0_i32_1 = arith.constant 0 : i32
    return %c0_i32, %c0_i32_0 : i32, i32
  }
  func.func @transform_3(%arg0: i32) -> (i32, i32) {
    %c0_i32 = arith.constant 0 : i32
    %c0_i32_0 = arith.constant 0 : i32
    %c0_i32_1 = arith.constant 0 : i32
    return %c0_i32, %c0_i32_0 : i32, i32
  }
  func.func @transform_4(%arg0: i32) -> (i32, i32) {
    %c0_i32 = arith.constant 0 : i32
    %c0_i32_0 = arith.constant 0 : i32
    %c0_i32_1 = arith.constant 0 : i32
    return %c0_i32, %c0_i32_0 : i32, i32
  }
}

module attributes {stable_mosaic.version = 11 : i64} {
  func.func @kernel(%arg0: i32, %arg1: memref<62x128xf32, #tpu.memory_space<vmem>>, %arg2: memref<4x128x64xf32, #tpu.memory_space<vmem>>, %arg3: memref<1x64xf32, #tpu.memory_space<vmem>>, %arg4: memref<1x64xf32, #tpu.memory_space<vmem>>, %arg5: memref<56x64xf32, #tpu.memory_space<vmem>>) attributes {dimension_semantics = [#tpu.dimension_semantics<arbitrary>], iteration_bounds = array<i64: 1>, scalar_prefetch = 0 : i64, scratch_operands = 0 : i64, tpu.core_type = #tpu.core_type<tc>, window_params = [{pipeline_mode = #tpu.pipeline_mode<synchronous>, transform_indices = @transform_0, window_bounds = array<i64: 62, 128>}, {pipeline_mode = #tpu.pipeline_mode<synchronous>, transform_indices = @transform_1, window_bounds = array<i64: 4, 128, 64>}, {pipeline_mode = #tpu.pipeline_mode<synchronous>, transform_indices = @transform_2, window_bounds = array<i64: 1, 64>}, {pipeline_mode = #tpu.pipeline_mode<synchronous>, transform_indices = @transform_3, window_bounds = array<i64: 1, 64>}, {pipeline_mode = #tpu.pipeline_mode<synchronous>, transform_indices = @transform_4, window_bounds = array<i64: 56, 64>}]} {
    %c0 = arith.constant 0 : index
    %c0_0 = arith.constant 0 : index
    %0 = vector.load %arg1[%c0, %c0_0] : memref<62x128xf32, #tpu.memory_space<vmem>>, vector<62x128xf32>
    %cst = arith.constant 0.000000e+00 : f32
    %1 = vector.broadcast %cst : f32 to vector<56x64xf32>
    %2 = vector.extract_strided_slice %0 {offsets = [0, 0], sizes = [56, 128], strides = [1, 1]} : vector<62x128xf32> to vector<56x128xf32>
    %c0_1 = arith.constant 0 : index
    %c0_2 = arith.constant 0 : index
    %c0_3 = arith.constant 0 : index
    %3 = vector.load %arg2[%c0_1, %c0_2, %c0_3] : memref<4x128x64xf32, #tpu.memory_space<vmem>>, vector<1x128x64xf32>
    %4 = vector.shape_cast %3 : vector<1x128x64xf32> to vector<128x64xf32>
    %cst_4 = arith.constant dense<0.000000e+00> : vector<56x64xf32>
    %5 = tpu.matmul %2, %4, %cst_4 {dimension_numbers = #tpu.dot_dimension_numbers<[1], [0], [0], [1], [0, 0, 1, 1], [], []>} : vector<56x128xf32>, vector<128x64xf32>, vector<56x64xf32> -> vector<56x64xf32>
    %6 = arith.addf %1, %5 : vector<56x64xf32>
    %7 = vector.extract_strided_slice %0 {offsets = [1, 0], sizes = [56, 128], strides = [1, 1]} : vector<62x128xf32> to vector<56x128xf32>
    %c1 = arith.constant 1 : index
    %c0_5 = arith.constant 0 : index
    %c0_6 = arith.constant 0 : index
    %8 = vector.load %arg2[%c1, %c0_5, %c0_6] : memref<4x128x64xf32, #tpu.memory_space<vmem>>, vector<1x128x64xf32>
    %9 = vector.shape_cast %8 : vector<1x128x64xf32> to vector<128x64xf32>
    %cst_7 = arith.constant dense<0.000000e+00> : vector<56x64xf32>
    %10 = tpu.matmul %7, %9, %cst_7 {dimension_numbers = #tpu.dot_dimension_numbers<[1], [0], [0], [1], [0, 0, 1, 1], [], []>} : vector<56x128xf32>, vector<128x64xf32>, vector<56x64xf32> -> vector<56x64xf32>
    %11 = arith.addf %6, %10 : vector<56x64xf32>
    %12 = vector.extract_strided_slice %0 {offsets = [5, 0], sizes = [56, 128], strides = [1, 1]} : vector<62x128xf32> to vector<56x128xf32>
    %c2 = arith.constant 2 : index
    %c0_8 = arith.constant 0 : index
    %c0_9 = arith.constant 0 : index
    %13 = vector.load %arg2[%c2, %c0_8, %c0_9] : memref<4x128x64xf32, #tpu.memory_space<vmem>>, vector<1x128x64xf32>
    %14 = vector.shape_cast %13 : vector<1x128x64xf32> to vector<128x64xf32>
    %cst_10 = arith.constant dense<0.000000e+00> : vector<56x64xf32>
    %15 = tpu.matmul %12, %14, %cst_10 {dimension_numbers = #tpu.dot_dimension_numbers<[1], [0], [0], [1], [0, 0, 1, 1], [], []>} : vector<56x128xf32>, vector<128x64xf32>, vector<56x64xf32> -> vector<56x64xf32>
    %16 = arith.addf %11, %15 : vector<56x64xf32>
    %17 = vector.extract_strided_slice %0 {offsets = [6, 0], sizes = [56, 128], strides = [1, 1]} : vector<62x128xf32> to vector<56x128xf32>
    %c3 = arith.constant 3 : index
    %c0_11 = arith.constant 0 : index
    %c0_12 = arith.constant 0 : index
    %18 = vector.load %arg2[%c3, %c0_11, %c0_12] : memref<4x128x64xf32, #tpu.memory_space<vmem>>, vector<1x128x64xf32>
    %19 = vector.shape_cast %18 : vector<1x128x64xf32> to vector<128x64xf32>
    %cst_13 = arith.constant dense<0.000000e+00> : vector<56x64xf32>
    %20 = tpu.matmul %17, %19, %cst_13 {dimension_numbers = #tpu.dot_dimension_numbers<[1], [0], [0], [1], [0, 0, 1, 1], [], []>} : vector<56x128xf32>, vector<128x64xf32>, vector<56x64xf32> -> vector<56x64xf32>
    %21 = arith.addf %16, %20 : vector<56x64xf32>
    %c0_14 = arith.constant 0 : index
    %c0_15 = arith.constant 0 : index
    %22 = vector.load %arg3[%c0_14, %c0_15] : memref<1x64xf32, #tpu.memory_space<vmem>>, vector<1x64xf32>
    %23 = vector.broadcast %22 : vector<1x64xf32> to vector<56x64xf32>
    %24 = arith.mulf %21, %23 : vector<56x64xf32>
    %c0_16 = arith.constant 0 : index
    %c0_17 = arith.constant 0 : index
    %25 = vector.load %arg4[%c0_16, %c0_17] : memref<1x64xf32, #tpu.memory_space<vmem>>, vector<1x64xf32>
    %26 = vector.broadcast %25 : vector<1x64xf32> to vector<56x64xf32>
    %27 = arith.addf %24, %26 : vector<56x64xf32>
    %28 = arith.negf %27 : vector<56x64xf32>
    %29 = math.exp %28 : vector<56x64xf32>
    %cst_18 = arith.constant 1.000000e+00 : f32
    %30 = vector.broadcast %cst_18 : f32 to vector<56x64xf32>
    %31 = arith.addf %30, %29 : vector<56x64xf32>
    %32 = arith.divf %30, %31 : vector<56x64xf32>
    %33 = arith.mulf %27, %32 : vector<56x64xf32>
    %c0_19 = arith.constant 0 : index
    %c0_20 = arith.constant 0 : index
    %34 = vector.load %arg5[%c0_19, %c0_20] : memref<56x64xf32, #tpu.memory_space<vmem>>, vector<56x64xf32>
    tpu.vector_store %arg5[%c0_19, %c0_20], %33 {strides = array<i32>} : memref<56x64xf32, #tpu.memory_space<vmem>>, vector<56x64xf32>,
    return
  }
  func.func @transform_0(%arg0: i32) -> (i32, i32) {
    %c0_i32 = arith.constant 0 : i32
    %c0_i32_0 = arith.constant 0 : i32
    %c0_i32_1 = arith.constant 0 : i32
    return %c0_i32, %c0_i32_0 : i32, i32
  }
  func.func @transform_1(%arg0: i32) -> (i32, i32, i32) {
    %c0_i32 = arith.constant 0 : i32
    %c0_i32_0 = arith.constant 0 : i32
    %c0_i32_1 = arith.constant 0 : i32
    %c0_i32_2 = arith.constant 0 : i32
    return %c0_i32, %c0_i32_0, %c0_i32_1 : i32, i32, i32
  }
  func.func @transform_2(%arg0: i32) -> (i32, i32) {
    %c0_i32 = arith.constant 0 : i32
    %c0_i32_0 = arith.constant 0 : i32
    %c0_i32_1 = arith.constant 0 : i32
    return %c0_i32, %c0_i32_0 : i32, i32
  }
  func.func @transform_3(%arg0: i32) -> (i32, i32) {
    %c0_i32 = arith.constant 0 : i32
    %c0_i32_0 = arith.constant 0 : i32
    %c0_i32_1 = arith.constant 0 : i32
    return %c0_i32, %c0_i32_0 : i32, i32
  }
  func.func @transform_4(%arg0: i32) -> (i32, i32) {
    %c0_i32 = arith.constant 0 : i32
    %c0_i32_0 = arith.constant 0 : i32
    %c0_i32_1 = arith.constant 0 : i32
    return %c0_i32, %c0_i32_0 : i32, i32
  }
}

module attributes {stable_mosaic.version = 11 : i64} {
  func.func @_detect_kernel(%arg0: i32, %arg1: memref<1x128x64xf32, #tpu.memory_space<vmem>>, %arg2: memref<1x64x128xf32, #tpu.memory_space<vmem>>, %arg3: memref<1x1x128xf32, #tpu.memory_space<vmem>>, %arg4: memref<1x1x128xf32, #tpu.memory_space<vmem>>, %arg5: memref<1x1x128xf32, #tpu.memory_space<vmem>>, %arg6: memref<1x128x128xf32, #tpu.memory_space<vmem>>, %arg7: memref<1x128x128xf32, #tpu.memory_space<vmem>>, %arg8: memref<1x128x128xf32, #tpu.memory_space<vmem>>) attributes {dimension_semantics = [#tpu.dimension_semantics<parallel>], iteration_bounds = array<i64: 2>, scalar_prefetch = 0 : i64, scratch_operands = 0 : i64, tpu.core_type = #tpu.core_type<tc>, window_params = [{transform_indices = @transform_0, window_bounds = array<i64: 1, 128, 64>}, {transform_indices = @transform_1, window_bounds = array<i64: 1, 64, 128>}, {transform_indices = @transform_2, window_bounds = array<i64: 1, 1, 128>}, {transform_indices = @transform_3, window_bounds = array<i64: 1, 1, 128>}, {transform_indices = @transform_4, window_bounds = array<i64: 1, 1, 128>}, {transform_indices = @transform_5, window_bounds = array<i64: 1, 128, 128>}, {transform_indices = @transform_6, window_bounds = array<i64: 1, 128, 128>}, {transform_indices = @transform_7, window_bounds = array<i64: 1, 128, 128>}]} {
    %c0 = arith.constant 0 : index
    %c0_0 = arith.constant 0 : index
    %c0_1 = arith.constant 0 : index
    %0 = vector.load %arg1[%c0, %c0_0, %c0_1] : memref<1x128x64xf32, #tpu.memory_space<vmem>>, vector<1x128x64xf32>
    %1 = vector.shape_cast %0 : vector<1x128x64xf32> to vector<128x64xf32>
    %c0_2 = arith.constant 0 : index
    %c0_3 = arith.constant 0 : index
    %c0_4 = arith.constant 0 : index
    %2 = vector.load %arg2[%c0_2, %c0_3, %c0_4] : memref<1x64x128xf32, #tpu.memory_space<vmem>>, vector<1x64x128xf32>
    %3 = vector.shape_cast %2 : vector<1x64x128xf32> to vector<64x128xf32>
    %cst = arith.constant dense<0.000000e+00> : vector<128x128xf32>
    %4 = tpu.matmul %1, %3, %cst {dimension_numbers = #tpu.dot_dimension_numbers<[1], [0], [0], [1], [0, 0, 1, 1], [], []>} : vector<128x64xf32>, vector<64x128xf32>, vector<128x128xf32> -> vector<128x128xf32>
    %c0_5 = arith.constant 0 : index
    %c0_6 = arith.constant 0 : index
    %c0_7 = arith.constant 0 : index
    %5 = vector.load %arg3[%c0_5, %c0_6, %c0_7] : memref<1x1x128xf32, #tpu.memory_space<vmem>>, vector<1x1x128xf32>
    %6 = vector.shape_cast %5 : vector<1x1x128xf32> to vector<1x128xf32>
    %7 = vector.broadcast %6 : vector<1x128xf32> to vector<128x128xf32>
    %8 = arith.addf %4, %7 : vector<128x128xf32>
    %c0_8 = arith.constant 0 : index
    %c0_9 = arith.constant 0 : index
    %c0_10 = arith.constant 0 : index
    %9 = vector.load %arg7[%c0_8, %c0_9, %c0_10] : memref<1x128x128xf32, #tpu.memory_space<vmem>>, vector<1x128x128xf32>
    %10 = vector.shape_cast %9 : vector<1x128x128xf32> to vector<128x128xf32>
    %11 = vector.shape_cast %8 : vector<128x128xf32> to vector<1x128x128xf32>
    tpu.vector_store %arg7[%c0_8, %c0_9, %c0_10], %11 {strides = array<i32>} : memref<1x128x128xf32, #tpu.memory_space<vmem>>, vector<1x128x128xf32>,
    %12 = arith.negf %8 : vector<128x128xf32>
    %13 = math.exp %12 : vector<128x128xf32>
    %cst_11 = arith.constant 1.000000e+00 : f32
    %14 = vector.broadcast %cst_11 : f32 to vector<128x128xf32>
    %15 = arith.addf %14, %13 : vector<128x128xf32>
    %16 = arith.divf %14, %15 : vector<128x128xf32>
    %c0_12 = arith.constant 0 : index
    %c0_13 = arith.constant 0 : index
    %c0_14 = arith.constant 0 : index
    %17 = vector.load %arg4[%c0_12, %c0_13, %c0_14] : memref<1x1x128xf32, #tpu.memory_space<vmem>>, vector<1x1x128xf32>
    %18 = vector.shape_cast %17 : vector<1x1x128xf32> to vector<1x128xf32>
    %19 = vector.broadcast %18 : vector<1x128xf32> to vector<128x128xf32>
    %20 = arith.mulf %16, %19 : vector<128x128xf32>
    %c0_15 = arith.constant 0 : index
    %c0_16 = arith.constant 0 : index
    %c0_17 = arith.constant 0 : index
    %21 = vector.load %arg5[%c0_15, %c0_16, %c0_17] : memref<1x1x128xf32, #tpu.memory_space<vmem>>, vector<1x1x128xf32>
    %22 = vector.shape_cast %21 : vector<1x1x128xf32> to vector<1x128xf32>
    %23 = vector.broadcast %22 : vector<1x128xf32> to vector<128x128xf32>
    %24 = arith.addf %20, %23 : vector<128x128xf32>
    %25 = arith.mulf %16, %24 : vector<128x128xf32>
    %c0_18 = arith.constant 0 : index
    %c0_19 = arith.constant 0 : index
    %c0_20 = arith.constant 0 : index
    %26 = vector.load %arg6[%c0_18, %c0_19, %c0_20] : memref<1x128x128xf32, #tpu.memory_space<vmem>>, vector<1x128x128xf32>
    %27 = vector.shape_cast %26 : vector<1x128x128xf32> to vector<128x128xf32>
    %28 = arith.addf %25, %27 : vector<128x128xf32>
    %c0_21 = arith.constant 0 : index
    %c0_22 = arith.constant 0 : index
    %c0_23 = arith.constant 0 : index
    %29 = vector.load %arg8[%c0_21, %c0_22, %c0_23] : memref<1x128x128xf32, #tpu.memory_space<vmem>>, vector<1x128x128xf32>
    %30 = vector.shape_cast %29 : vector<1x128x128xf32> to vector<128x128xf32>
    %31 = vector.shape_cast %28 : vector<128x128xf32> to vector<1x128x128xf32>
    tpu.vector_store %arg8[%c0_21, %c0_22, %c0_23], %31 {strides = array<i32>} : memref<1x128x128xf32, #tpu.memory_space<vmem>>, vector<1x128x128xf32>,
    return
  }
  func.func @transform_0(%arg0: i32) -> (i32, i32, i32) {
    %c0_i32 = arith.constant 0 : i32
    %c0_i32_0 = arith.constant 0 : i32
    %c0_i32_1 = arith.constant 0 : i32
    return %arg0, %c0_i32, %c0_i32_0 : i32, i32, i32
  }
  func.func @transform_1(%arg0: i32) -> (i32, i32, i32) {
    %c0_i32 = arith.constant 0 : i32
    %c0_i32_0 = arith.constant 0 : i32
    %c0_i32_1 = arith.constant 0 : i32
    return %arg0, %c0_i32, %c0_i32_0 : i32, i32, i32
  }
  func.func @transform_2(%arg0: i32) -> (i32, i32, i32) {
    %c0_i32 = arith.constant 0 : i32
    %c0_i32_0 = arith.constant 0 : i32
    %c0_i32_1 = arith.constant 0 : i32
    return %arg0, %c0_i32, %c0_i32_0 : i32, i32, i32
  }
  func.func @transform_3(%arg0: i32) -> (i32, i32, i32) {
    %c0_i32 = arith.constant 0 : i32
    %c0_i32_0 = arith.constant 0 : i32
    %c0_i32_1 = arith.constant 0 : i32
    return %arg0, %c0_i32, %c0_i32_0 : i32, i32, i32
  }
  func.func @transform_4(%arg0: i32) -> (i32, i32, i32) {
    %c0_i32 = arith.constant 0 : i32
    %c0_i32_0 = arith.constant 0 : i32
    %c0_i32_1 = arith.constant 0 : i32
    return %arg0, %c0_i32, %c0_i32_0 : i32, i32, i32
  }
  func.func @transform_5(%arg0: i32) -> (i32, i32, i32) {
    %c0_i32 = arith.constant 0 : i32
    %c0_i32_0 = arith.constant 0 : i32
    %c0_i32_1 = arith.constant 0 : i32
    return %arg0, %c0_i32, %c0_i32_0 : i32, i32, i32
  }
  func.func @transform_6(%arg0: i32) -> (i32, i32, i32) {
    %c0_i32 = arith.constant 0 : i32
    %c0_i32_0 = arith.constant 0 : i32
    %c0_i32_1 = arith.constant 0 : i32
    return %arg0, %c0_i32, %c0_i32_0 : i32, i32, i32
  }
  func.func @transform_7(%arg0: i32) -> (i32, i32, i32) {
    %c0_i32 = arith.constant 0 : i32
    %c0_i32_0 = arith.constant 0 : i32
    %c0_i32_1 = arith.constant 0 : i32
    return %arg0, %c0_i32, %c0_i32_0 : i32, i32, i32
  }
}

</mosaic_0001>

<bundles_post_ra>
// kernel: _lambda_.4
= control target key start
LH: loop header
LB: loop body
LE: loop exit
PB: predicated region body
PF: predicated region fallthrough
CT: control target
= control target key end

     0   :  { %vm467_vm0 = vcmask 1043456   ;;  %vm172_vm1 = vcmask 1046528   ;;  %vm320_vm2 = vcmask 97280   ;;  %vm1420_vm3 = vcmask 1045504   ;;  %s7030_s1 = inlined_call_operand.vmem [shape: f32[4,12,16], index: 1, kind: input, shape index: {}]   ;;  %s7031_s0 = inlined_call_operand.vmem [shape: f32[602,12], index: 0, kind: input, shape index: {}]   ;;  %s7032_s2 = inlined_call_operand.vmem [shape: f32[1,16], index: 2, kind: input, shape index: {}]   ;;  %s7033_s3 = inlined_call_operand.vmem [shape: f32[1,16], index: 3, kind: input, shape index: {}]   ;;  %s7034_s4 = inlined_call_operand.vmem [shape: f32[584,16], index: 4, kind: output, shape index: {}]  }
   0x1   :  { %v3869_v0 = vld [vmem:[%s7030_s1 + $0x28] sm:$0xf]  ;;  %v3868_v1 = vld [vmem:[%s7030_s1 + $0x20] sm:$0xff]  ;;  %v3945_v2 = vld [vmem:[%s7030_s1 + $0x38] sm:$0xf]  ;;  %vm3640_vm8 = vcmask 130048  }
   0x2   :  { %3870 = vmatpush.msk.msra.mxu2 %vm467_vm0, %v3869_v0  ;;  %3946 = vmatpush.msk.msra.mxu3 %vm467_vm0, %v3945_v2  ;;  %v19_v3 = vld [vmem:[%s7031_s0 + $0x10] sm:$0xff]  ;;  %v20_v4 = vld [vmem:[%s7031_s0 + $0x18] sm:$0xff]  ;;  %v94_v8 = vld [vmem:[%s7030_s1 + $0x8] sm:$0xf] }
   0x3   :  { %v3719_v5 = vld [vmem:[%s7030_s1 + $0x18] sm:$0xf]  ;;  %v176_v6 = vrot.slane %v19_v3, 1  ;;  %v178_v7 = vrot.slane %v20_v4, 1  ;;  %v3944_v9 = vld [vmem:[%s7030_s1 + $0x30] sm:$0xff]  ;;  %v1421_v10 = vrot.slane %v19_v3, 2  ;;  %3794 = vmatpush.msk.msra.mxu1 %vm467_vm0, %v94_v8 }
   0x4   :  { %3720 = vmatpush.msk.msra.mxu0 %vm467_vm0, %v3719_v5  ;;  %1123 = vmatpush.msra.mxu2 %v3868_v1  ;;  %v1422_v11 = vrot.slane %v20_v4, 2  ;;  %v3718_v12 = vld [vmem:[%s7030_s1 + $0x10] sm:$0xff]  ;;  %v93_v13 = vld [vmem:[%s7030_s1] sm:$0xff]  ;;  %v18_v16 = vld [vmem:[%s7031_s0 + $0x8] sm:$0xff] }
   0x5   :  { %v17_v14 = vld [vmem:[%s7031_s0] sm:$0xff]  ;;  %v179_v15 = vsel %vm172_vm1, %v176_v6, %v178_v7  ;;  %1732 = vmatpush.msra.mxu3 %v3944_v9  ;;  %871 = vmatpush.msra.mxu1 %v93_v13  ;;  %v174_v20 = vrot.slane %v18_v16, 1  ;;  %v22_v26 = vld [vmem:[%s7031_s0 + $0x28] sm:$0xff]  ;;  %v23_v32 = vld [vmem:[%s7031_s0 + $0x30] sm:$0xff] }
   0x6   :  { %486 = vmatpush.msra.mxu0 %v3718_v12  ;;  %v173_v17 = vrot.slane %v17_v14, 1  ;;  %v21_v18 = vld [vmem:[%s7031_s0 + $0x20] sm:$0xff]  ;;  %3871 = vmatmul.msk.f32.vlgmr.msra.gmra.mxu2 %vm320_vm2, %v179_v15  ;;  %v1423_v19 = vsel %vm1420_vm3, %v1421_v10, %v1422_v11  ;;  %v182_v28 = vrot.slane %v22_v26, 1  ;;  %v1426_v29 = vrot.slane %v22_v26, 2  ;;  %v24_v37 = vld [vmem:[%s7031_s0 + $0x38] sm:$0xff]  ;;  %v26_v47 = vld [vmem:[%s7031_s0 + $0x48] sm:$0xff] }
   0x7   :  { %3947 = vmatmul.msk.f32.vlgmr.msra.gmra.mxu3 %vm320_vm2, %v1423_v19  ;;  %3795 = vmatmul.msk.f32.vlgmr.msra.gmra.mxu1 %vm320_vm2, %v17_v14  ;;  %v180_v21 = vrot.slane %v21_v18, 1  ;;  %v1424_v23 = vrot.slane %v21_v18, 2  ;;  %v177_v27 = vsel %vm172_vm1, %v174_v20, %v176_v6  ;;  %v184_v33 = vrot.slane %v23_v32, 1  ;;  %v25_v42 = vld [vmem:[%s7031_s0 + $0x40] sm:$0xff]  ;;  %v27_v52 = vld [vmem:[%s7031_s0 + $0x50] sm:$0xff]  ;;  %v28_v57 = vld [vmem:[%s7031_s0 + $0x58] sm:$0xff] }
   0x8   :  { %v175_v22 = vsel %vm172_vm1, %v173_v17, %v174_v20  ;;  %v1428_v34 = vrot.slane %v23_v32, 2  ;;  %v186_v38 = vrot.slane %v24_v37, 1  ;;  %v1430_v39 = vrot.slane %v24_v37, 2  ;;  %v29_v62 = vld [vmem:[%s7031_s0 + $0x60] sm:$0xff]  ;;  %v31_v8 = vld [vmem:[%s7031_s0 + $0x70] sm:$0xff]  ;;  %v32_v13 = vld [vmem:[%s7031_s0 + $0x78] sm:$0xff] }
   0x9   :  { %3721 = vmatmul.msk.f32.vlgmr.msra.gmra.mxu0 %vm320_vm2, %v175_v22  ;;  %v181_v24 = vsel %vm172_vm1, %v178_v7, %v180_v21  ;;  %v1425_v25 = vsel %vm1420_vm3, %v1422_v11, %v1424_v23  ;;  %v183_v30 = vsel %vm172_vm1, %v180_v21, %v182_v28  ;;  %v1427_v31 = vsel %vm1420_vm3, %v1424_v23, %v1426_v29  ;;  %v34_v23 = vld [vmem:[%s7031_s0 + $0x88] sm:$0xff] }
   0xa   :  { %v185_v35 = vsel %vm172_vm1, %v182_v28, %v184_v33  ;;  %v1429_v36 = vsel %vm1420_vm3, %v1426_v29, %v1428_v34  ;;  %v187_v40 = vsel %vm172_vm1, %v184_v33, %v186_v38  ;;  %v1431_v41 = vsel %vm1420_vm3, %v1428_v34, %v1430_v39  ;;  %v4594_v28 = vld [vmem:[%s7031_s0 + $0x90] sm:$0xff]  ;;  %v4607_v33 = vld [vmem:[%s7031_s0 + $0x98] sm:$0xff] }
   0xb   :  { %v188_v43 = vrot.slane %v25_v42, 1  ;;  %v1432_v44 = vrot.slane %v25_v42, 2  ;;  %v190_v48 = vrot.slane %v26_v47, 1  ;;  %v1434_v49 = vrot.slane %v26_v47, 2 }
   0xc   :  { %v192_v53 = vrot.slane %v27_v52, 1  ;;  %v1436_v54 = vrot.slane %v27_v52, 2  ;;  %v194_v58 = vrot.slane %v28_v57, 1  ;;  %v1438_v59 = vrot.slane %v28_v57, 2 }
   0xd   :  { %v189_v45 = vsel %vm172_vm1, %v186_v38, %v188_v43  ;;  %v1433_v46 = vsel %vm1420_vm3, %v1430_v39, %v1432_v44  ;;  %v191_v50 = vsel %vm172_vm1, %v188_v43, %v190_v48  ;;  %v1435_v51 = vsel %vm1420_vm3, %v1432_v44, %v1434_v49  ;;  %v4620_v39 = vld [vmem:[%s7031_s0 + $0xa0] sm:$0xff] }
   0xe   :  { %3872 = vmatmul.msk.f32.gmra.mxu2 %vm320_vm2, %v181_v24  ;;  %v193_v55 = vsel %vm172_vm1, %v190_v48, %v192_v53  ;;  %v1437_v56 = vsel %vm1420_vm3, %v1434_v49, %v1436_v54  ;;  %v195_v60 = vsel %vm172_vm1, %v192_v53, %v194_v58  ;;  %v1439_v61 = vsel %vm1420_vm3, %v1436_v54, %v1438_v59  ;;  %v4643_v53 = vld [vmem:[%s7031_s0 + $0xa8] sm:$0xff] }
   0xf   :  { %3948 = vmatmul.msk.f32.gmra.mxu3 %vm320_vm2, %v1425_v25  ;;  %3796 = vmatmul.msk.f32.gmra.mxu1 %vm320_vm2, %v18_v16  ;;  %v196_v63 = vrot.slane %v29_v62, 1  ;;  %v1440_v0 = vrot.slane %v29_v62, 2  ;;  %v200_v9 = vrot.slane %v31_v8, 1  ;;  %v1444_v10 = vrot.slane %v31_v8, 2 }
  0x10   :  { %v202_v14 = vrot.slane %v32_v13, 1  ;;  %v1450_v25 = vrot.slane %v34_v23, 2  ;;  %v208_v29 = vrot.slane %v4594_v28, 1  ;;  %v210_v34 = vrot.slane %v4607_v33, 1 }
  0x11   :  { %3722 = vmatmul.msk.f32.gmra.mxu0 %vm320_vm2, %v177_v27  ;;  %v197_v1 = vsel %vm172_vm1, %v194_v58, %v196_v63  ;;  %v1441_v2 = vsel %vm1420_vm3, %v1438_v59, %v1440_v0  ;;  %v1456_v43 = vrot.slane %v4620_v39, 2  ;;  %v1458_v59 = vrot.slane %v4643_v53, 2 }
  0x12   :  { %v203_v16 = vsel %vm172_vm1, %v200_v9, %v202_v14 }
  0x16   :  { %3873 = vmatmul.msk.f32.gmra.mxu2 %vm320_vm2, %v183_v30 }
  0x17   :  { %3949 = vmatmul.msk.f32.gmra.mxu3 %vm320_vm2, %v1427_v31  ;;  %3797 = vmatmul.msk.f32.gmra.mxu1 %vm320_vm2, %v19_v3  ;;  %v30_v3 = vld [vmem:[%s7031_s0 + $0x68] sm:$0xff] }
  0x18   :  { %v1442_v5 = vrot.slane %v30_v3, 2 }
  0x19   :  { %3723 = vmatmul.msk.f32.gmra.mxu0 %vm320_vm2, %v179_v15  ;;  %v1446_v15 = vrot.slane %v32_v13, 2 }
  0x1a   :  { %v1443_v7 = vsel %vm1420_vm3, %v1440_v0, %v1442_v5  ;;  %v1445_v12 = vsel %vm1420_vm3, %v1442_v5, %v1444_v10 }
  0x1b   :  { %v1447_v17 = vsel %vm1420_vm3, %v1444_v10, %v1446_v15 }
  0x1e   :  { %3874 = vmatmul.msk.f32.gmra.mxu2 %vm320_vm2, %v185_v35 }
  0x1f   :  { %3950 = vmatmul.msk.f32.gmra.mxu3 %vm320_vm2, %v1429_v36  ;;  %3798 = vmatmul.msk.f32.gmra.mxu1 %vm320_vm2, %v20_v4  ;;  %v198_v4 = vrot.slane %v30_v3, 1  ;;  %v211_v36 = vsel %vm172_vm1, %v208_v29, %v210_v34 }
  0x21   :  { %3724 = vmatmul.msk.f32.gmra.mxu0 %vm320_vm2, %v181_v24  ;;  %v199_v6 = vsel %vm172_vm1, %v196_v63, %v198_v4  ;;  %v201_v11 = vsel %vm172_vm1, %v198_v4, %v200_v9  ;;  %v206_v24 = vrot.slane %v34_v23, 1  ;;  %v4663_v4 = vld [vmem:[%s7031_s0 + $0xb0] sm:$0xff] }
  0x22   :  { %v1460_v10 = vrot.slane %v4663_v4, 2 }
  0x23   :  { %v209_v31 = vsel %vm172_vm1, %v206_v24, %v208_v29 }
  0x26   :  { %3875 = vmatmul.msk.f32.gmra.mxu2 %vm320_vm2, %v187_v40 }
  0x27   :  { %3951 = vmatmul.msk.f32.gmra.mxu3 %vm320_vm2, %v1431_v41  ;;  %3799 = vmatmul.msk.f32.gmra.mxu1 %vm320_vm2, %v21_v18  ;;  %v33_v18 = vld [vmem:[%s7031_s0 + $0x80] sm:$0xff] }
  0x28   :  { %v204_v19 = vrot.slane %v33_v18, 1  ;;  %v1448_v20 = vrot.slane %v33_v18, 2 }
  0x29   :  { %3725 = vmatmul.msk.f32.gmra.mxu0 %vm320_vm2, %v183_v30  ;;  %v1452_v30 = vrot.slane %v4594_v28, 2 }
  0x2a   :  { %v205_v21 = vsel %vm172_vm1, %v202_v14, %v204_v19  ;;  %v1449_v22 = vsel %vm1420_vm3, %v1446_v15, %v1448_v20  ;;  %v1451_v27 = vsel %vm1420_vm3, %v1448_v20, %v1450_v25  ;;  %v1461_v20 = vsel %vm1420_vm3, %v1458_v59, %v1460_v10 }
  0x2e   :  { %3876 = vmatmul.msk.f32.gmra.mxu2 %vm320_vm2, %v189_v45 }
  0x2f   :  { %3952 = vmatmul.msk.f32.gmra.mxu3 %vm320_vm2, %v1433_v46  ;;  %3800 = vmatmul.msk.f32.gmra.mxu1 %vm320_vm2, %v22_v26  ;;  %v207_v26 = vsel %vm172_vm1, %v204_v19, %v206_v24 }
  0x31   :  { %3726 = vmatmul.msk.f32.gmra.mxu0 %vm320_vm2, %v185_v35  ;;  %v1454_v35 = vrot.slane %v4607_v33, 2 }
  0x33   :  { %v1455_v38 = vsel %vm1420_vm3, %v1452_v30, %v1454_v35 }
  0x36   :  { %3877 = vmatmul.msk.f32.gmra.mxu2 %vm320_vm2, %v191_v50 }
  0x37   :  { %3953 = vmatmul.msk.f32.gmra.mxu3 %vm320_vm2, %v1435_v51  ;;  %3801 = vmatmul.msk.f32.gmra.mxu1 %vm320_vm2, %v23_v32  ;;  %v1453_v32 = vsel %vm1420_vm3, %v1450_v25, %v1452_v30 }
  0x39   :  { %3727 = vmatmul.msk.f32.gmra.mxu0 %vm320_vm2, %v187_v40 }
  0x3e   :  { %3878 = vmatmul.msk.f32.gmra.mxu2 %vm320_vm2, %v193_v55 }
  0x3f   :  { %3954 = vmatmul.msk.f32.gmra.mxu3 %vm320_vm2, %v1437_v56  ;;  %3802 = vmatmul.msk.f32.gmra.mxu1 %vm320_vm2, %v24_v37 }
  0x41   :  { %3728 = vmatmul.msk.f32.gmra.mxu0 %vm320_vm2, %v189_v45 }
  0x46   :  { %3879 = vmatmul.msk.f32.gmra.mxu2 %vm320_vm2, %v195_v60 }
  0x47   :  { %3955 = vmatmul.msk.f32.gmra.mxu3 %vm320_vm2, %v1439_v61  ;;  %3803 = vmatmul.msk.f32.gmra.mxu1 %vm320_vm2, %v25_v42  ;;  %v212_v42 = vrot.slane %v4620_v39, 1 }
  0x49   :  { %3729 = vmatmul.msk.f32.gmra.mxu0 %vm320_vm2, %v191_v50  ;;  %v213_v48 = vsel %vm172_vm1, %v210_v34, %v212_v42  ;;  %v4637_v50 = vld [vmem:[%s7033_s3] ss:$0 sm:$0xff] }
  0x4e   :  { %3880 = vmatmul.msk.f32.gmra.mxu2 %vm320_vm2, %v197_v1 }
  0x4f   :  { %3956 = vmatmul.msk.f32.gmra.mxu3 %vm320_vm2, %v1441_v2  ;;  %3804 = vmatmul.msk.f32.gmra.mxu1 %vm320_vm2, %v26_v47  ;;  %v4631_v47 = vld [vmem:[%s7032_s2] ss:$0 sm:$0xff] }
  0x51   :  { %3730 = vmatmul.msk.f32.gmra.mxu0 %vm320_vm2, %v193_v55 }
  0x56   :  { %3881 = vmatmul.msk.f32.gmra.mxu2 %vm320_vm2, %v199_v6 }
  0x57   :  { %3957 = vmatmul.msk.f32.gmra.mxu3 %vm320_vm2, %v1443_v7  ;;  %3805 = vmatmul.msk.f32.gmra.mxu1 %vm320_vm2, %v27_v52  ;;  %v1457_v52 = vsel %vm1420_vm3, %v1454_v35, %v1456_v43 }
  0x59   :  { %3731 = vmatmul.msk.f32.gmra.mxu0 %vm320_vm2, %v195_v60 }
  0x5e   :  { %3882 = vmatmul.msk.f32.gmra.mxu2 %vm320_vm2, %v201_v11 }
  0x5f   :  { %3958 = vmatmul.msk.f32.gmra.mxu3 %vm320_vm2, %v1445_v12  ;;  %3806 = vmatmul.msk.f32.gmra.mxu1 %vm320_vm2, %v28_v57  ;;  %v214_v57 = vrot.slane %v4643_v53, 1 }
  0x61   :  { %3732 = vmatmul.msk.f32.gmra.mxu0 %vm320_vm2, %v197_v1  ;;  %v4657_v0 = vsel %vm172_vm1, %v212_v42, %v214_v57 }
  0x66   :  { %3883 = vmatmul.msk.f32.gmra.mxu2 %vm320_vm2, %v203_v16 }
  0x67   :  { %3959 = vmatmul.msk.f32.gmra.mxu3 %vm320_vm2, %v1447_v17  ;;  %3807 = vmatmul.msk.f32.gmra.mxu1 %vm320_vm2, %v29_v62 }
  0x69   :  { %3733 = vmatmul.msk.f32.gmra.mxu0 %vm320_vm2, %v199_v6 }
  0x6e   :  { %3884 = vmatmul.msk.f32.gmra.mxu2 %vm320_vm2, %v205_v21 }
  0x6f   :  { %3960 = vmatmul.msk.f32.gmra.mxu3 %vm320_vm2, %v1449_v22  ;;  %3808 = vmatmul.msk.f32.gmra.mxu1 %vm320_vm2, %v30_v3  ;;  %v1459_v3 = vsel %vm1420_vm3, %v1456_v43, %v1458_v59 }
  0x71   :  { %3734 = vmatmul.msk.f32.gmra.mxu0 %vm320_vm2, %v201_v11 }
  0x76   :  { %3885 = vmatmul.msk.f32.gmra.mxu2 %vm320_vm2, %v207_v26 }
  0x77   :  { %3961 = vmatmul.msk.f32.gmra.mxu3 %vm320_vm2, %v1451_v27  ;;  %3809 = vmatmul.msk.f32.gmra.mxu1 %vm320_vm2, %v31_v8  ;;  %v216_v8 = vrot.slane %v4663_v4, 1 }
  0x79   :  { %3735 = vmatmul.msk.f32.gmra.mxu0 %vm320_vm2, %v203_v16  ;;  %v4681_v17 = vsel %vm172_vm1, %v214_v57, %v216_v8 }
  0x7e   :  { %3886 = vmatmul.msk.f32.gmra.mxu2 %vm320_vm2, %v209_v31 }
  0x7f   :  { %3962 = vmatmul.msk.f32.gmra.mxu3 %vm320_vm2, %v1453_v32  ;;  %3810 = vmatmul.msk.f32.gmra.mxu1 %vm320_vm2, %v32_v13 }
  0x81   :  { %3736 = vmatmul.msk.f32.gmra.mxu0 %vm320_vm2, %v205_v21  ;;  %v4687_v21 = vld [vmem:[%s7031_s0 + $0xb8] sm:$0xff] }
  0x82   :  { %v218_v25 = vrot.slane %v4687_v21, 1  ;;  %v1462_v27 = vrot.slane %v4687_v21, 2 }
  0x84   :  { %v873_v37 = vpop.f32.mrf.mxu1 }
  0x86   :  { %3887 = vmatmul.msk.f32.gmra.mxu2 %vm320_vm2, %v211_v36  ;;  %v488_v40 = vpop.f32.mrf.mxu0 }
  0x87   :  { %v874_v41 = vadd.f32 %v873_v37, %v488_v40  ;;  %3963 = vmatmul.msk.f32.gmra.mxu3 %vm320_vm2, %v1455_v38  ;;  %3811 = vmatmul.msk.f32.gmra.mxu1 %vm320_vm2, %v33_v18  ;;  %v1463_v40 = vsel %vm1420_vm3, %v1460_v10, %v1462_v27 }
  0x89   :  { %v1125_v44 = vpop.f32.mrf.mxu2  ;;  %3737 = vmatmul.msk.f32.gmra.mxu0 %vm320_vm2, %v207_v26 }
  0x8a   :  { %v1344_v45 = vadd.f32 %v1125_v44, %v874_v41  ;;  %v1734_v46 = vpop.f32.mrf.mxu3  ;;  %v4713_v41 = vld [vmem:[%s7031_s0 + $0xc0] sm:$0xff] }
  0x8c   :  { %v1953_v49 = vadd.f32 %v1734_v46, %v1344_v45  ;;  %v876_v51 = vpop.f32.mrf.mxu1 }
  0x8e   :  { %v2030_v54 = vmul.f32 %v4631_v47, %v1953_v49  ;;  %3888 = vmatmul.msk.f32.gmra.mxu2 %vm320_vm2, %v213_v48  ;;  %v491_v55 = vpop.f32.mrf.mxu0  ;;  %v1464_v49 = vrot.slane %v4713_v41, 2 }
  0x8f   :  { %v877_v56 = vadd.f32 %v876_v51, %v491_v55  ;;  %3964 = vmatmul.msk.f32.gmra.mxu3 %vm320_vm2, %v1457_v52  ;;  %3812 = vmatmul.msk.f32.gmra.mxu1 %vm320_vm2, %v34_v23 }
  0x90   :  { %v4651_v58 = vadd.f32 %v4637_v50, %v2030_v54 }
  0x91   :  { %v1128_v60 = vpop.f32.mrf.mxu2  ;;  %3738 = vmatmul.msk.f32.gmra.mxu0 %vm320_vm2, %v209_v31 }
  0x92   :  { %v4020_v61 = vmul.f32 -1.442695, %v4651_v58  ;;  %v1345_v62 = vadd.f32 %v1128_v60, %v877_v56  ;;  %v1737_v63 = vpop.f32.mrf.mxu3 }
  0x94   :  { %4095 = vpow2.f32 %v4020_v61  ;;  %v1954_v1 = vadd.f32 %v1737_v63, %v1345_v62  ;;  %v879_v2 = vpop.f32.mrf.mxu1 }
  0x96   :  { %v2031_v5 = vmul.f32 %v4631_v47, %v1954_v1  ;;  %3889 = vmatmul.msk.f32.gmra.mxu2 %vm320_vm2, %v4657_v0  ;;  %v494_v6 = vpop.f32.mrf.mxu0 }
  0x97   :  { %v880_v7 = vadd.f32 %v879_v2, %v494_v6  ;;  %3965 = vmatmul.msk.f32.gmra.mxu3 %vm320_vm2, %v1459_v3  ;;  %3813 = vmatmul.msk.f32.gmra.mxu1 %vm320_vm2, %v4594_v28  ;;  %v1465_v2 = vsel %vm1420_vm3, %v1462_v27, %v1464_v49 }
  0x98   :  { %v4673_v9 = vadd.f32 %v4637_v50, %v2031_v5 }
  0x99   :  { %v1131_v11 = vpop.f32.mrf.mxu2  ;;  %3739 = vmatmul.msk.f32.gmra.mxu0 %vm320_vm2, %v211_v36 }
  0x9a   :  { %v4096_v12 = vpop.eup %4095  ;;  %v4021_v13 = vmul.f32 -1.442695, %v4673_v9  ;;  %v1346_v14 = vadd.f32 %v1131_v11, %v880_v7  ;;  %v1740_v15 = vpop.f32.mrf.mxu3 }
  0x9b   :  { %v4678_v16 = vadd.f32 1.0, %v4096_v12 }
  0x9c   :  { %4097 = vpow2.f32 %v4021_v13  ;;  %v1955_v18 = vadd.f32 %v1740_v15, %v1346_v14  ;;  %v882_v19 = vpop.f32.mrf.mxu1 }
  0x9d   :  { %4099 = vrcp.f32 %v4678_v16  ;;  %v2483_v45 = vand.u32 2147483648, %v4678_v16  ;;  %v2481_v52 = vand.u32 2147483647, %v4678_v16  ;;  %vm2477_vm5 = vweird.f32 %v4678_v16 }
  0x9e   :  { %v2032_v22 = vmul.f32 %v4631_v47, %v1955_v18  ;;  %3890 = vmatmul.msk.f32.gmra.mxu2 %vm320_vm2, %v4681_v17  ;;  %v497_v23 = vpop.f32.mrf.mxu0 }
  0x9f   :  { %v883_v24 = vadd.f32 %v882_v19, %v497_v23  ;;  %3966 = vmatmul.msk.f32.gmra.mxu3 %vm320_vm2, %v1461_v20  ;;  %3814 = vmatmul.msk.f32.gmra.mxu1 %vm320_vm2, %v4607_v33  ;;  %v4706_v33 = vsel %vm172_vm1, %v216_v8, %v218_v25  ;;  %v2484_v62 = vor.u32 1.1754944e-38, %v2483_v45  ;;  %vm2482_vm7 = vcmp.eq.f32.partialorder %v2481_v52, 8.507059e+37 }
  0xa0   :  { %v4698_v26 = vadd.f32 %v4637_v50, %v2032_v22 }
  0xa1   :  { %v1134_v28 = vpop.f32.mrf.mxu2  ;;  %3740 = vmatmul.msk.f32.gmra.mxu0 %vm320_vm2, %v213_v48  ;;  %v220_v48 = vrot.slane %v4713_v41, 1 }
  0xa2   :  { %v4098_v29 = vpop.eup %4097  ;;  %v4022_v30 = vmul.f32 -1.442695, %v4698_v26  ;;  %v1347_v31 = vadd.f32 %v1134_v28, %v883_v24  ;;  %v1743_v32 = vpop.f32.mrf.mxu3 }
  0xa3   :  { %v4100_v34 = vpop.eup %4099  ;;  %v4703_v35 = vadd.f32 1.0, %v4098_v29  ;;  %v4736_v1 = vsel %vm172_vm1, %v218_v25, %v220_v48 }
  0xa4   :  { %v2473_v36 = vmul.f32 %v4100_v34, %v4678_v16  ;;  %4101 = vpow2.f32 %v4022_v30  ;;  %v1956_v37 = vadd.f32 %v1743_v32, %v1347_v31  ;;  %v885_v38 = vpop.f32.mrf.mxu1  ;;  %vm2478_vm4 = vweird.f32 %v4100_v34 }
  0xa5   :  { %4103 = vrcp.f32 %v4703_v35  ;;  %vm2479_vm6 = vmor %vm2477_vm5, %vm2478_vm4  ;;  %v2498_v14 = vand.u32 2147483648, %v4703_v35  ;;  %v2496_v18 = vand.u32 2147483647, %v4703_v35  ;;  %vm2492_vm10 = vweird.f32 %v4703_v35 }
  0xa6   :  { %v2474_v42 = vsub.f32 1.0, %v2473_v36  ;;  %v2033_v43 = vmul.f32 %v4631_v47, %v1956_v37  ;;  %3891 = vmatmul.msk.f32.gmra.mxu2 %vm320_vm2, %v4706_v33  ;;  %v500_v44 = vpop.f32.mrf.mxu0 }
  0xa7   :  { %v886_v46 = vadd.f32 %v885_v38, %v500_v44  ;;  %3967 = vmatmul.msk.f32.gmra.mxu3 %vm320_vm2, %v1463_v40  ;;  %3815 = vmatmul.msk.f32.gmra.mxu1 %vm320_vm2, %v4620_v39  ;;  %v2499_v28 = vor.u32 1.1754944e-38, %v2498_v14  ;;  %vm2497_vm12 = vcmp.eq.f32.partialorder %v2496_v18, 8.507059e+37 }
  0xa8   :  { %v2475_v51 = vmul.f32 %v4100_v34, %v2474_v42  ;;  %v4727_v54 = vadd.f32 %v4637_v50, %v2033_v43 }
  0xa9   :  { %v1137_v55 = vpop.f32.mrf.mxu2  ;;  %3741 = vmatmul.msk.f32.gmra.mxu0 %vm320_vm2, %v4657_v0  ;;  %v4742_v0 = vld [vmem:[%s7031_s0 + $0xc8] sm:$0xff] }
  0xaa   :  { %v4102_v56 = vpop.eup %4101  ;;  %v2476_v57 = vadd.f32 %v4100_v34, %v2475_v51  ;;  %v4023_v39 = vmul.f32 -1.442695, %v4727_v54  ;;  %v1348_v59 = vadd.f32 %v1137_v55, %v886_v46  ;;  %v1746_v60 = vpop.f32.mrf.mxu3  ;;  %v222_v13 = vrot.slane %v4742_v0, 1 }
  0xab   :  { %v4104_v61 = vpop.eup %4103  ;;  %v4733_v63 = vadd.f32 1.0, %v4102_v56  ;;  %v1466_v16 = vrot.slane %v4742_v0, 2 }
  0xac   :  { %v2480_v3 = vsel %vm2479_vm6, %v4100_v34, %v2476_v57  ;;  %v2488_v5 = vmul.f32 %v4104_v61, %v4703_v35  ;;  %4105 = vpow2.f32 %v4023_v39  ;;  %v888_v6 = vpop.f32.mrf.mxu1  ;;  %v1957_v11 = vadd.f32 %v1746_v60, %v1348_v59  ;;  %v4802_v57 = vld [vmem:[%s7031_s0 + $0xd8] sm:$0xff] }
  0xad   :  { %v2485_v7 = vsel %vm2482_vm7, %v2484_v62, %v2480_v3  ;;  %4107 = vrcp.f32 %v4733_v63  ;;  %vm2493_vm9 = vweird.f32 %v4104_v61  ;;  %v4768_v25 = vsel %vm172_vm1, %v220_v48, %v222_v13 }
  0xae   :  { %v3567_v8 = vmul.f32 %v2485_v7, %v4651_v58  ;;  %v2489_v10 = vsub.f32 1.0, %v2488_v5  ;;  %3892 = vmatmul.msk.f32.gmra.mxu2 %vm320_vm2, %v4736_v1  ;;  %v503_v12 = vpop.f32.mrf.mxu0  ;;  %v2034_v19 = vmul.f32 %v4631_v47, %v1957_v11  ;;  %vm2494_vm11 = vmor %vm2492_vm10, %vm2493_vm9  ;;  %v1467_v31 = vsel %vm1420_vm3, %v1464_v49, %v1466_v16 }
  0xaf   :  { %v889_v15 = vadd.f32 %v888_v6, %v503_v12  ;;  %3968 = vmatmul.msk.f32.gmra.mxu3 %vm320_vm2, %v1465_v2  ;;  %3816 = vmatmul.msk.f32.gmra.mxu1 %vm320_vm2, %v4643_v53  ;;  %v2513_v44 = vand.u32 2147483648, %v4733_v63  ;;  %v2511_v49 = vand.u32 2147483647, %v4733_v63  ;;  %vm2507_vm14 = vweird.f32 %v4733_v63 }
  0xb0   :  { %3641 = vst.msk [vmem:[%s7034_s4] sm:$0xff] %vm3640_vm8, %v3567_v8  ;;  %v2490_v58 = vmul.f32 %v4104_v61, %v2489_v10  ;;  %v4765_v53 = vadd.f32 %v4637_v50, %v2034_v19  ;;  %v226_v10 = vrot.slane %v4802_v57, 1 }
  0xb1   :  { %v1140_v20 = vpop.f32.mrf.mxu2  ;;  %3742 = vmatmul.msk.f32.gmra.mxu0 %vm320_vm2, %v4681_v17  ;;  %v4776_v17 = vld [vmem:[%s7031_s0 + $0xd0] sm:$0xff]  ;;  %v2514_v59 = vor.u32 1.1754944e-38, %v2513_v44  ;;  %vm2512_vm0 = vcmp.eq.f32.partialorder %v2511_v49, 8.507059e+37 }
  0xb2   :  { %v4106_v22 = vpop.eup %4105  ;;  %v2491_v23 = vadd.f32 %v4104_v61, %v2490_v58  ;;  %v1749_v24 = vpop.f32.mrf.mxu3  ;;  %v1349_v30 = vadd.f32 %v1140_v20, %v889_v15  ;;  %v4024_v35 = vmul.f32 -1.442695, %v4765_v53  ;;  %v224_v43 = vrot.slane %v4776_v17, 1 }
  0xb3   :  { %v4108_v27 = vpop.eup %4107  ;;  %v4770_v29 = vadd.f32 1.0, %v4106_v22  ;;  %v1468_v48 = vrot.slane %v4776_v17, 2  ;;  %v1470_v15 = vrot.slane %v4802_v57, 2 }
  0xb4   :  { %v2495_v32 = vsel %vm2494_vm11, %v4104_v61, %v2491_v23  ;;  %v2503_v34 = vmul.f32 %v4108_v27, %v4733_v63  ;;  %v891_v36 = vpop.f32.mrf.mxu1  ;;  %v1958_v45 = vadd.f32 %v1749_v24, %v1349_v30  ;;  %vm2508_vm13 = vweird.f32 %v4108_v27 }
  0xb5   :  { %v2500_v37 = vsel %vm2497_vm12, %v2499_v28, %v2495_v32  ;;  %4109 = vrcp.f32 %v4770_v29  ;;  %vm2509_vm15 = vmor %vm2507_vm14, %vm2508_vm13  ;;  %v4808_v61 = vsel %vm172_vm1, %v222_v13, %v224_v43  ;;  %v2528_v58 = vand.u32 2147483648, %v4770_v29 }
  0xb6   :  { %v3568_v38 = vmul.f32 %v2500_v37, %v4673_v9  ;;  %v2504_v40 = vsub.f32 1.0, %v2503_v34  ;;  %4111 = vpow2.f32 %v4024_v35  ;;  %3893 = vmatmul.msk.f32.gmra.mxu2 %vm320_vm2, %v4768_v25  ;;  %v506_v42 = vpop.f32.mrf.mxu0  ;;  %v2035_v51 = vmul.f32 %v4631_v47, %v1958_v45 }
  0xb7   :  { %v892_v46 = vadd.f32 %v891_v36, %v506_v42  ;;  %3969 = vmatmul.msk.f32.gmra.mxu3 %vm320_vm2, %v1467_v31  ;;  %3817 = vmatmul.msk.f32.gmra.mxu1 %vm320_vm2, %v4663_v4  ;;  %vm2522_vm5 = vweird.f32 %v4770_v29  ;;  %v4842_v28 = vsel %vm172_vm1, %v224_v43, %v226_v10  ;;  %v1471_v30 = vsel %vm1420_vm3, %v1468_v48, %v1470_v15 }
  0xb8   :  { %3642 = vst.msk [vmem:[%s7034_s4 + $0x8] sm:$0xff] %vm3640_vm8, %v3568_v38  ;;  %v2505_v9 = vmul.f32 %v4108_v27, %v2504_v40  ;;  %v4805_v60 = vadd.f32 %v4637_v50, %v2035_v51 }
  0xb9   :  { %v1143_v52 = vpop.f32.mrf.mxu2  ;;  %3743 = vmatmul.msk.f32.gmra.mxu0 %vm320_vm2, %v4706_v33  ;;  %v1469_v33 = vsel %vm1420_vm3, %v1466_v16, %v1468_v48  ;;  %v2526_v16 = vand.u32 2147483647, %v4770_v29 }
  0xba   :  { %v2506_v55 = vadd.f32 %v4108_v27, %v2505_v9  ;;  %v1350_v4 = vadd.f32 %v1143_v52, %v892_v46  ;;  %v1752_v56 = vpop.f32.mrf.mxu3  ;;  %v4025_v8 = vmul.f32 -1.442695, %v4805_v60 }
  0xbb   :  { %v4110_v39 = vpop.eup %4109  ;;  %vm2527_vm7 = vcmp.eq.f32.partialorder %v2526_v16, 8.507059e+37 }
  0xbc   :  { %v4112_v62 = vpop.eup %4111  ;;  %v2510_v63 = vsel %vm2509_vm15, %v4108_v27, %v2506_v55  ;;  %v2518_v2 = vmul.f32 %v4110_v39, %v4770_v29  ;;  %v1959_v3 = vadd.f32 %v1752_v56, %v1350_v4  ;;  %v894_v5 = vpop.f32.mrf.mxu1  ;;  %vm2523_vm4 = vweird.f32 %v4110_v39  ;;  %v4848_v29 = vld [vmem:[%s7031_s0 + $0xe0] sm:$0xff] }
  0xbd   :  { %v2515_v6 = vsel %vm2512_vm0, %v2514_v59, %v2510_v63  ;;  %v4812_v7 = vadd.f32 1.0, %v4112_v62  ;;  %vm2524_vm6 = vmor %vm2522_vm5, %vm2523_vm4  ;;  %v2529_v27 = vor.u32 1.1754944e-38, %v2528_v58  ;;  %v228_v45 = vrot.slane %v4848_v29, 1 }
  0xbe   :  { %v3569_v11 = vmul.f32 %v2515_v6, %v4698_v26  ;;  %v2519_v12 = vsub.f32 1.0, %v2518_v2  ;;  %v2036_v13 = vmul.f32 %v4631_v47, %v1959_v3  ;;  %3894 = vmatmul.msk.f32.gmra.mxu2 %vm320_vm2, %v4808_v61  ;;  %v509_v14 = vpop.f32.mrf.mxu0  ;;  %v4887_v2 = vld [vmem:[%s7031_s0 + $0xe8] sm:$0xff] }
  0xbf   :  { %4113 = vrcp.f32 %v4812_v7  ;;  %3970 = vmatmul.msk.f32.gmra.mxu3 %vm320_vm2, %v1469_v33  ;;  %3818 = vmatmul.msk.f32.gmra.mxu1 %vm320_vm2, %v4687_v21  ;;  %v895_v19 = vadd.f32 %v894_v5, %v509_v14  ;;  %v2541_v9 = vand.u32 2147483647, %v4812_v7  ;;  %v2543_v49 = vand.u32 2147483648, %v4812_v7 }
  0xc0   :  { %3643 = vst.msk [vmem:[%s7034_s4 + $0x10] sm:$0xff] %vm3640_vm8, %v3569_v11  ;;  %v2520_v26 = vmul.f32 %v4110_v39, %v2519_v12  ;;  %4115 = vpow2.f32 %v4025_v8  ;;  %v4832_v18 = vadd.f32 %v4637_v50, %v2036_v13  ;;  %v4880_v59 = vsel %vm172_vm1, %v226_v10, %v228_v45 }
  0xc1   :  { %v1146_v20 = vpop.f32.mrf.mxu2  ;;  %3744 = vmatmul.msk.f32.gmra.mxu0 %vm320_vm2, %v4736_v1  ;;  %vm2537_vm10 = vweird.f32 %v4812_v7  ;;  %v2544_v3 = vor.u32 1.1754944e-38, %v2543_v49  ;;  %vm2542_vm12 = vcmp.eq.f32.partialorder %v2541_v9, 8.507059e+37  ;;  %v230_v12 = vrot.slane %v4887_v2, 1 }
  0xc2   :  { %v2521_v22 = vadd.f32 %v4110_v39, %v2520_v26  ;;  %v4026_v21 = vmul.f32 -1.442695, %v4832_v18  ;;  %v1351_v23 = vadd.f32 %v1146_v20, %v895_v19  ;;  %v1755_v24 = vpop.f32.mrf.mxu3  ;;  %v1474_v13 = vrot.slane %v4887_v2, 2  ;;  %v4908_v26 = vld [vmem:[%s7031_s0 + $0xf0] sm:$0xff] }
  0xc4   :  { %v2525_v31 = vsel %vm2524_vm6, %v4110_v39, %v2521_v22  ;;  %4117 = vpow2.f32 %v4026_v21  ;;  %v1960_v1 = vadd.f32 %v1755_v24, %v1351_v23  ;;  %v897_v32 = vpop.f32.mrf.mxu1 }
  0xc5   :  { %v4114_v34 = vpop.eup %4113  ;;  %v2530_v35 = vsel %vm2527_vm7, %v2529_v27, %v2525_v31  ;;  %v4920_v27 = vsel %vm172_vm1, %v228_v45, %v230_v12 }
  0xc6   :  { %v4116_v36 = vpop.eup %4115  ;;  %v3570_v37 = vmul.f32 %v2530_v35, %v4727_v54  ;;  %v2533_v38 = vmul.f32 %v4114_v34, %v4812_v7  ;;  %v2037_v40 = vmul.f32 %v4631_v47, %v1960_v1  ;;  %3895 = vmatmul.msk.f32.gmra.mxu2 %vm320_vm2, %v4842_v28  ;;  %v512_v42 = vpop.f32.mrf.mxu0  ;;  %v1472_v54 = vrot.slane %v4848_v29, 2 }
  0xc7   :  { %v4855_v43 = vadd.f32 1.0, %v4116_v36  ;;  %v898_v44 = vadd.f32 %v897_v32, %v512_v42  ;;  %3971 = vmatmul.msk.f32.gmra.mxu3 %vm320_vm2, %v1471_v30  ;;  %3819 = vmatmul.msk.f32.gmra.mxu1 %vm320_vm2, %v4713_v41  ;;  %vm2538_vm9 = vweird.f32 %v4114_v34  ;;  %v1476_v35 = vrot.slane %v4908_v26, 2 }
  0xc8   :  { %3644 = vst.msk [vmem:[%s7034_s4 + $0x18] sm:$0xff] %vm3640_vm8, %v3570_v37  ;;  %v2534_v46 = vsub.f32 1.0, %v2533_v38  ;;  %v4867_v48 = vadd.f32 %v4637_v50, %v2037_v40  ;;  %v1473_v33 = vsel %vm1420_vm3, %v1470_v15, %v1472_v54  ;;  %vm2539_vm11 = vmor %vm2537_vm10, %vm2538_vm9  ;;  %v1475_v30 = vsel %vm1420_vm3, %v1472_v54, %v1474_v13 }
  0xc9   :  { %4119 = vrcp.f32 %v4855_v43  ;;  %v1149_v41 = vpop.f32.mrf.mxu2  ;;  %3745 = vmatmul.msk.f32.gmra.mxu0 %vm320_vm2, %v4768_v25  ;;  %v2556_v19 = vand.u32 2147483647, %v4855_v43  ;;  %vm2552_vm14 = vweird.f32 %v4855_v43 }
  0xca   :  { %v4118_v51 = vpop.eup %4117  ;;  %v2535_v52 = vmul.f32 %v4114_v34, %v2534_v46  ;;  %v4027_v55 = vmul.f32 -1.442695, %v4867_v48  ;;  %v1352_v4 = vadd.f32 %v1149_v41, %v898_v44  ;;  %v1758_v56 = vpop.f32.mrf.mxu3 }
  0xcb   :  { %v4875_v39 = vadd.f32 1.0, %v4118_v51  ;;  %vm4928_vm15 = vcmp.eq.f32.partialorder %v2556_v19, 8.507059e+37 }
  0xcc   :  { %v2536_v62 = vadd.f32 %v4114_v34, %v2535_v52  ;;  %4121 = vpow2.f32 %v4027_v55  ;;  %v1961_v25 = vadd.f32 %v1758_v56, %v1352_v4  ;;  %v900_v63 = vpop.f32.mrf.mxu1 }
  0xcd   :  { %4123 = vrcp.f32 %v4875_v39  ;;  %v2573_v45 = vand.u32 2147483648, %v4875_v39  ;;  %vm2567_vm5 = vweird.f32 %v4875_v39 }
  0xce   :  { %v2540_v5 = vsel %vm2539_vm11, %v4114_v34, %v2536_v62  ;;  %v2038_v6 = vmul.f32 %v4631_v47, %v1961_v25  ;;  %3896 = vmatmul.msk.f32.gmra.mxu2 %vm320_vm2, %v4880_v59  ;;  %v515_v7 = vpop.f32.mrf.mxu0  ;;  %v232_v34 = vrot.slane %v4908_v26, 1 }
  0xcf   :  { %v4120_v8 = vpop.eup %4119  ;;  %v2545_v10 = vsel %vm2542_vm12, %v2544_v3, %v2540_v5  ;;  %v901_v11 = vadd.f32 %v900_v63, %v515_v7  ;;  %3972 = vmatmul.msk.f32.gmra.mxu3 %vm320_vm2, %v1473_v33  ;;  %3820 = vmatmul.msk.f32.gmra.mxu1 %vm320_vm2, %v4742_v0  ;;  %v2574_v25 = vor.u32 1.1754944e-38, %v2573_v45  ;;  %v1477_v3 = vsel %vm1420_vm3, %v1474_v13, %v1476_v35 }
  0xd0   :  { %v3571_v14 = vmul.f32 %v2545_v10, %v4765_v53  ;;  %v2548_v15 = vmul.f32 %v4120_v8, %v4855_v43  ;;  %v4901_v16 = vadd.f32 %v4637_v50, %v2038_v6  ;;  %vm2553_vm13 = vweird.f32 %v4120_v8 }
  0xd1   :  { %v1152_v58 = vpop.f32.mrf.mxu2  ;;  %3746 = vmatmul.msk.f32.gmra.mxu0 %vm320_vm2, %v4808_v61  ;;  %v2558_v61 = vand.u32 2147483648, %v4855_v43  ;;  %vm2554_vm0 = vmor %vm2552_vm14, %vm2553_vm13  ;;  %v2571_v43 = vand.u32 2147483647, %v4875_v39  ;;  %v4947_v52 = vsel %vm172_vm1, %v230_v12, %v232_v34 }
  0xd2   :  { %v4122_v0 = vpop.eup %4121  ;;  %3645 = vst.msk [vmem:[%s7034_s4 + $0x20] sm:$0xff] %vm3640_vm8, %v3571_v14  ;;  %v2549_v53 = vsub.f32 1.0, %v2548_v15  ;;  %v4028_v20 = vmul.f32 -1.442695, %v4901_v16  ;;  %v1353_v22 = vadd.f32 %v1152_v58, %v901_v11  ;;  %v1761_v21 = vpop.f32.mrf.mxu3 }
  0xd3   :  { %v4124_v23 = vpop.eup %4123  ;;  %v4917_v24 = vadd.f32 1.0, %v4122_v0  ;;  %v2559_v44 = vor.u32 1.1754944e-38, %v2558_v61  ;;  %vm2572_vm7 = vcmp.eq.f32.partialorder %v2571_v43, 8.507059e+37 }
  0xd4   :  { %v2550_v31 = vmul.f32 %v4120_v8, %v2549_v53  ;;  %v2563_v1 = vmul.f32 %v4124_v23, %v4875_v39  ;;  %4125 = vpow2.f32 %v4028_v20  ;;  %v903_v32 = vpop.f32.mrf.mxu1  ;;  %v1962_v40 = vadd.f32 %v1761_v21, %v1353_v22 }
  0xd5   :  { %4127 = vrcp.f32 %v4917_v24  ;;  %vm2568_vm4 = vweird.f32 %v4124_v23  ;;  %v2588_v14 = vand.u32 2147483648, %v4917_v24  ;;  %v2586_v53 = vand.u32 2147483647, %v4917_v24 }
  0xd6   :  { %v2551_v36 = vadd.f32 %v4120_v8, %v2550_v31  ;;  %v2564_v38 = vsub.f32 1.0, %v2563_v1  ;;  %3897 = vmatmul.msk.f32.gmra.mxu2 %vm320_vm2, %v4920_v27  ;;  %v518_v42 = vpop.f32.mrf.mxu0  ;;  %v2039_v49 = vmul.f32 %v4631_v47, %v1962_v40  ;;  %vm2569_vm6 = vmor %vm2567_vm5, %vm2568_vm4  ;;  %vm2582_vm10 = vweird.f32 %v4917_v24 }
  0xd7   :  { %v904_v54 = vadd.f32 %v903_v32, %v518_v42  ;;  %3973 = vmatmul.msk.f32.gmra.mxu3 %vm320_vm2, %v1475_v30  ;;  %3821 = vmatmul.msk.f32.gmra.mxu1 %vm320_vm2, %v4776_v17  ;;  %v2589_v30 = vor.u32 1.1754944e-38, %v2588_v14  ;;  %vm2587_vm12 = vcmp.eq.f32.partialorder %v2586_v53, 8.507059e+37 }
  0xd8   :  { %v2555_v46 = vsel %vm2554_vm0, %v4120_v8, %v2551_v36  ;;  %v2565_v9 = vmul.f32 %v4124_v23, %v2564_v38  ;;  %v4952_v56 = vadd.f32 %v4637_v50, %v2039_v49 }
  0xd9   :  { %v2560_v41 = vsel %vm4928_vm15, %v2559_v44, %v2555_v46  ;;  %v1155_v51 = vpop.f32.mrf.mxu2  ;;  %3747 = vmatmul.msk.f32.gmra.mxu0 %vm320_vm2, %v4842_v28 }
  0xda   :  { %v4126_v55 = vpop.eup %4125  ;;  %v3572_v17 = vmul.f32 %v2560_v41, %v4805_v60  ;;  %v2566_v4 = vadd.f32 %v4124_v23, %v2565_v9  ;;  %v1764_v33 = vpop.f32.mrf.mxu3  ;;  %v1354_v28 = vadd.f32 %v1155_v51, %v904_v54  ;;  %v4962_v60 = vld [vmem:[%s7031_s0 + $0xf8] sm:$0xff]  ;;  %v4029_v6 = vmul.f32 -1.442695, %v4952_v56 }
  0xdb   :  { %v4128_v62 = vpop.eup %4127  ;;  %v4954_v63 = vadd.f32 1.0, %v4126_v55  ;;  %v234_v13 = vrot.slane %v4962_v60, 1  ;;  %v1478_v0 = vrot.slane %v4962_v60, 2 }
  0xdc   :  { %3646 = vst.msk [vmem:[%s7034_s4 + $0x28] sm:$0xff] %vm3640_vm8, %v3572_v17  ;;  %v2570_v39 = vsel %vm2569_vm6, %v4124_v23, %v2566_v4  ;;  %v2578_v5 = vmul.f32 %v4128_v62, %v4917_v24  ;;  %v906_v7 = vpop.f32.mrf.mxu1  ;;  %v1963_v15 = vadd.f32 %v1764_v33, %v1354_v28  ;;  %vm2583_vm9 = vweird.f32 %v4128_v62  ;;  %v4992_v23 = vld [vmem:[%s7031_s0 + $0x100] sm:$0xff] }
  0xdd   :  { %v2575_v8 = vsel %vm2572_vm7, %v2574_v25, %v2570_v39  ;;  %4129 = vrcp.f32 %v4954_v63  ;;  %vm2584_vm11 = vmor %vm2582_vm10, %vm2583_vm9  ;;  %v1479_v24 = vsel %vm1420_vm3, %v1476_v35, %v1478_v0  ;;  %v236_v43 = vrot.slane %v4992_v23, 1 }
  0xde   :  { %v3573_v10 = vmul.f32 %v2575_v8, %v4832_v18  ;;  %v2579_v11 = vsub.f32 1.0, %v2578_v5  ;;  %4131 = vpow2.f32 %v4029_v6  ;;  %3898 = vmatmul.msk.f32.gmra.mxu2 %vm320_vm2, %v4947_v52  ;;  %v521_v12 = vpop.f32.mrf.mxu0  ;;  %v2040_v19 = vmul.f32 %v4631_v47, %v1963_v15 }
  0xdf   :  { %v907_v58 = vadd.f32 %v906_v7, %v521_v12  ;;  %3974 = vmatmul.msk.f32.gmra.mxu3 %vm320_vm2, %v1477_v3  ;;  %3822 = vmatmul.msk.f32.gmra.mxu1 %vm320_vm2, %v4802_v57  ;;  %v1480_v46 = vrot.slane %v4992_v23, 2  ;;  %v2601_v9 = vand.u32 2147483647, %v4954_v63  ;;  %v2603_v49 = vand.u32 2147483648, %v4954_v63 }
  0xe0   :  { %3647 = vst.msk [vmem:[%s7034_s4 + $0x30] sm:$0xff] %vm3640_vm8, %v3573_v10  ;;  %v2580_v18 = vmul.f32 %v4128_v62, %v2579_v11  ;;  %v4995_v31 = vadd.f32 %v4637_v50, %v2040_v19  ;;  %vm2597_vm14 = vweird.f32 %v4954_v63  ;;  %v5036_v25 = vsel %vm172_vm1, %v234_v13, %v236_v43 }
  0xe1   :  { %v1158_v20 = vpop.f32.mrf.mxu2  ;;  %3748 = vmatmul.msk.f32.gmra.mxu0 %vm320_vm2, %v4880_v59  ;;  %v5000_v59 = vsel %vm172_vm1, %v232_v34, %v234_v13  ;;  %v1481_v28 = vsel %vm1420_vm3, %v1478_v0, %v1480_v46  ;;  %vm2602_vm0 = vcmp.eq.f32.partialorder %v2601_v9, 8.507059e+37 }
  0xe2   :  { %v2581_v22 = vadd.f32 %v4128_v62, %v2580_v18  ;;  %v1355_v57 = vadd.f32 %v1158_v20, %v907_v58  ;;  %v1767_v21 = vpop.f32.mrf.mxu3  ;;  %v4030_v44 = vmul.f32 -1.442695, %v4995_v31 }
  0xe3   :  { %v4130_v61 = vpop.eup %4129 }
  0xe4   :  { %v4132_v1 = vpop.eup %4131  ;;  %v2585_v32 = vsel %vm2584_vm11, %v4128_v62, %v2581_v22  ;;  %v2593_v36 = vmul.f32 %v4130_v61, %v4954_v63  ;;  %v1964_v37 = vadd.f32 %v1767_v21, %v1355_v57  ;;  %v909_v38 = vpop.f32.mrf.mxu1  ;;  %vm2598_vm13 = vweird.f32 %v4130_v61  ;;  %v5042_v63 = vld [vmem:[%s7031_s0 + $0x108] sm:$0xff] }
  0xe5   :  { %v2590_v40 = vsel %vm2587_vm12, %v2589_v30, %v2585_v32  ;;  %v5006_v42 = vadd.f32 1.0, %v4132_v1  ;;  %vm2599_vm15 = vmor %vm2597_vm14, %vm2598_vm13  ;;  %v2604_v62 = vor.u32 1.1754944e-38, %v2603_v49  ;;  %v238_v15 = vrot.slane %v5042_v63, 1  ;;  %v5102_v49 = vld [vmem:[%s7031_s0 + $0x118] sm:$0xff] }
  0xe6   :  { %v3574_v34 = vmul.f32 %v2590_v40, %v4867_v48  ;;  %v2594_v45 = vsub.f32 1.0, %v2593_v36  ;;  %v2041_v54 = vmul.f32 %v4631_v47, %v1964_v37  ;;  %3899 = vmatmul.msk.f32.gmra.mxu2 %vm320_vm2, %v5000_v59  ;;  %v524_v35 = vpop.f32.mrf.mxu0  ;;  %v5081_v36 = vld [vmem:[%s7031_s0 + $0x110] sm:$0xff] }
  0xe7   :  { %4133 = vrcp.f32 %v5006_v42  ;;  %3975 = vmatmul.msk.f32.gmra.mxu3 %vm320_vm2, %v1479_v24  ;;  %3823 = vmatmul.msk.f32.gmra.mxu1 %vm320_vm2, %v4848_v29  ;;  %v910_v51 = vadd.f32 %v909_v38, %v524_v35  ;;  %v2616_v18 = vand.u32 2147483647, %v5006_v42  ;;  %v2618_v53 = vand.u32 2147483648, %v5006_v42 }
  0xe8   :  { %3648 = vst.msk [vmem:[%s7034_s4 + $0x38] sm:$0xff] %vm3640_vm8, %v3574_v34  ;;  %v2595_v48 = vmul.f32 %v4130_v61, %v2594_v45  ;;  %4135 = vpow2.f32 %v4030_v44  ;;  %v5026_v41 = vadd.f32 %v4637_v50, %v2041_v54  ;;  %v5074_v30 = vsel %vm172_vm1, %v236_v43, %v238_v15 }
  0xe9   :  { %v1161_v55 = vpop.f32.mrf.mxu2  ;;  %3749 = vmatmul.msk.f32.gmra.mxu0 %vm320_vm2, %v4920_v27  ;;  %vm2612_vm5 = vweird.f32 %v5006_v42  ;;  %v2619_v37 = vor.u32 1.1754944e-38, %v2618_v53  ;;  %vm2617_vm7 = vcmp.eq.f32.partialorder %v2616_v18, 8.507059e+37  ;;  %v240_v45 = vrot.slane %v5081_v36, 1 }
  0xea   :  { %v2596_v17 = vadd.f32 %v4130_v61, %v2595_v48  ;;  %v4031_v29 = vmul.f32 -1.442695, %v5026_v41  ;;  %v1356_v4 = vadd.f32 %v1161_v55, %v910_v51  ;;  %v1770_v33 = vpop.f32.mrf.mxu3  ;;  %v1484_v54 = vrot.slane %v5081_v36, 2 }
  0xec   :  { %v2600_v3 = vsel %vm2599_vm15, %v4130_v61, %v2596_v17  ;;  %4137 = vpow2.f32 %v4031_v29  ;;  %v1965_v27 = vadd.f32 %v1770_v33, %v1356_v4  ;;  %v912_v39 = vpop.f32.mrf.mxu1  ;;  %v5114_v4 = vsel %vm172_vm1, %v238_v15, %v240_v45 }
  0xed   :  { %v4134_v5 = vpop.eup %4133  ;;  %v2605_v6 = vsel %vm2602_vm0, %v2604_v62, %v2600_v3 }
  0xee   :  { %v4136_v7 = vpop.eup %4135  ;;  %v3575_v8 = vmul.f32 %v2605_v6, %v4901_v16  ;;  %v2608_v10 = vmul.f32 %v4134_v5, %v5006_v42  ;;  %v2042_v11 = vmul.f32 %v4631_v47, %v1965_v27  ;;  %3900 = vmatmul.msk.f32.gmra.mxu2 %vm320_vm2, %v5036_v25  ;;  %v527_v12 = vpop.f32.mrf.mxu0  ;;  %v1482_v16 = vrot.slane %v5042_v63, 2 }
  0xef   :  { %v5049_v13 = vadd.f32 1.0, %v4136_v7  ;;  %v913_v14 = vadd.f32 %v912_v39, %v527_v12  ;;  %3976 = vmatmul.msk.f32.gmra.mxu3 %vm320_vm2, %v1481_v28  ;;  %3824 = vmatmul.msk.f32.gmra.mxu1 %vm320_vm2, %v4887_v2  ;;  %vm2613_vm4 = vweird.f32 %v4134_v5  ;;  %v242_v27 = vrot.slane %v5102_v49, 1 }
  0xf0   :  { %3649 = vst.msk [vmem:[%s7034_s4 + $0x40] sm:$0xff] %vm3640_vm8, %v3575_v8  ;;  %v2609_v58 = vsub.f32 1.0, %v2608_v10  ;;  %v5061_v0 = vadd.f32 %v4637_v50, %v2042_v11  ;;  %v1483_v24 = vsel %vm1420_vm3, %v1480_v46, %v1482_v16  ;;  %vm2614_vm6 = vmor %vm2612_vm5, %vm2613_vm4  ;;  %v1485_v33 = vsel %vm1420_vm3, %v1482_v16, %v1484_v54 }
  0xf1   :  { %4139 = vrcp.f32 %v5049_v13  ;;  %v1164_v2 = vpop.f32.mrf.mxu2  ;;  %3750 = vmatmul.msk.f32.gmra.mxu0 %vm320_vm2, %v4947_v52  ;;  %v2631_v48 = vand.u32 2147483647, %v5049_v13  ;;  %vm2627_vm10 = vweird.f32 %v5049_v13  ;;  %v1486_v39 = vrot.slane %v5102_v49, 2 }
  0xf2   :  { %v4138_v19 = vpop.eup %4137  ;;  %v2610_v20 = vmul.f32 %v4134_v5, %v2609_v58  ;;  %v4032_v22 = vmul.f32 -1.442695, %v5061_v0  ;;  %v1357_v57 = vadd.f32 %v1164_v2, %v913_v14  ;;  %v1773_v21 = vpop.f32.mrf.mxu3  ;;  %v5138_v58 = vld [vmem:[%s7032_s2] ss:$0 sm:$0xff] }
  0xf3   :  { %v5069_v61 = vadd.f32 1.0, %v4138_v19  ;;  %vm5124_vm11 = vcmp.eq.f32.partialorder %v2631_v48, 8.507059e+37 }
  0xf4   :  { %v2611_v1 = vadd.f32 %v4134_v5, %v2610_v20  ;;  %4141 = vpow2.f32 %v4032_v22  ;;  %v1966_v52 = vadd.f32 %v1773_v21, %v1357_v57  ;;  %v915_v32 = vpop.f32.mrf.mxu1  ;;  %v5155_v57 = vld [vmem:[%s7033_s3] ss:$0 sm:$0xff] }
  0xf5   :  { %4143 = vrcp.f32 %v5069_v61  ;;  %v2646_v12 = vand.u32 2147483647, %v5069_v61  ;;  %vm2642_vm14 = vweird.f32 %v5069_v61 }
  0xf6   :  { %v2615_v38 = vsel %vm2614_vm6, %v4134_v5, %v2611_v1  ;;  %v2043_v40 = vmul.f32 %v4631_v47, %v1966_v52  ;;  %3901 = vmatmul.msk.f32.gmra.mxu2 %vm320_vm2, %v5074_v30  ;;  %v530_v42 = vpop.f32.mrf.mxu0 }
  0xf7   :  { %v4140_v44 = vpop.eup %4139  ;;  %v2620_v43 = vsel %vm2617_vm7, %v2619_v37, %v2615_v38  ;;  %v916_v34 = vadd.f32 %v915_v32, %v530_v42  ;;  %3977 = vmatmul.msk.f32.gmra.mxu3 %vm320_vm2, %v1483_v24  ;;  %3825 = vmatmul.msk.f32.gmra.mxu1 %vm320_vm2, %v4908_v26  ;;  %vm2647_vm0 = vcmp.eq.f32.partialorder %v2646_v12, 8.507059e+37 }
  0xf8   :  { %v3576_v35 = vmul.f32 %v2620_v43, %v4952_v56  ;;  %v2623_v47 = vmul.f32 %v4140_v44, %v5049_v13  ;;  %v5095_v46 = vadd.f32 %v4637_v50, %v2043_v40  ;;  %vm2628_vm9 = vweird.f32 %v4140_v44 }
  0xf9   :  { %v1167_v9 = vpop.f32.mrf.mxu2  ;;  %3751 = vmatmul.msk.f32.gmra.mxu0 %vm320_vm2, %v5000_v59  ;;  %v2633_v59 = vand.u32 2147483648, %v5049_v13  ;;  %vm2629_vm12 = vmor %vm2627_vm10, %vm2628_vm9  ;;  %v2648_v13 = vand.u32 2147483648, %v5069_v61 }
  0xfa   :  { %v4142_v26 = vpop.eup %4141  ;;  %3650 = vst.msk [vmem:[%s7034_s4 + $0x48] sm:$0xff] %vm3640_vm8, %v3576_v35  ;;  %v2624_v56 = vsub.f32 1.0, %v2623_v47  ;;  %v4033_v50 = vmul.f32 -1.442695, %v5095_v46  ;;  %v1358_v51 = vadd.f32 %v1167_v9, %v916_v34  ;;  %v1776_v55 = vpop.f32.mrf.mxu3 }
  0xfb   :  { %v4144_v17 = vpop.eup %4143  ;;  %v5111_v29 = vadd.f32 1.0, %v4142_v26  ;;  %v2634_v11 = vor.u32 1.1754944e-38, %v2633_v59  ;;  %v2649_v1 = vor.u32 1.1754944e-38, %v2648_v13 }
  0xfc   :  { %v2625_v62 = vmul.f32 %v4140_v44, %v2624_v56  ;;  %v2638_v28 = vmul.f32 %v4144_v17, %v5069_v61  ;;  %4145 = vpow2.f32 %v4033_v50  ;;  %v918_v3 = vpop.f32.mrf.mxu1  ;;  %v1967_v8 = vadd.f32 %v1776_v55, %v1358_v51  ;;  %v5171_v61 = vld [vmem:[%s7031_s0 + $0x120] sm:$0xff] }
  0xfd   :  { %4147 = vrcp.f32 %v5111_v29  ;;  %vm2643_vm13 = vweird.f32 %v4144_v17  ;;  %v2663_v35 = vand.u32 2147483648, %v5111_v29  ;;  %v1488_v26 = vrot.slane %v5171_v61, 2 }
  0xfe   :  { %v2626_v5 = vadd.f32 %v4140_v44, %v2625_v62  ;;  %v2639_v7 = vsub.f32 1.0, %v2638_v28  ;;  %3902 = vmatmul.msk.f32.gmra.mxu2 %vm320_vm2, %v5114_v4  ;;  %v533_v10 = vpop.f32.mrf.mxu0  ;;  %v2044_v18 = vmul.f32 %v5138_v58, %v1967_v8  ;;  %vm2644_vm15 = vmor %vm2642_vm14, %vm2643_vm13  ;;  %v2661_v56 = vand.u32 2147483647, %v5111_v29 }
  0xff   :  { %v919_v14 = vadd.f32 %v918_v3, %v533_v10  ;;  %3978 = vmatmul.msk.f32.gmra.mxu3 %vm320_vm2, %v1485_v33  ;;  %3826 = vmatmul.msk.f32.gmra.mxu1 %vm320_vm2, %v4962_v60  ;;  %v5148_v60 = vsel %vm172_vm1, %v240_v45, %v242_v27  ;;  %vm2657_vm5 = vweird.f32 %v5111_v29  ;;  %v2664_v33 = vor.u32 1.1754944e-38, %v2663_v35 }
 0x100   :  { %v2630_v15 = vsel %vm2629_vm12, %v4140_v44, %v2626_v5  ;;  %v2640_v16 = vmul.f32 %v4144_v17, %v2639_v7  ;;  %v5158_v21 = vadd.f32 %v5155_v57, %v2044_v18  ;;  %vm2662_vm7 = vcmp.eq.f32.partialorder %v2661_v56, 8.507059e+37 }
 0x101   :  { %v2635_v53 = vsel %vm5124_vm11, %v2634_v11, %v2630_v15  ;;  %v1170_v2 = vpop.f32.mrf.mxu2  ;;  %3752 = vmatmul.msk.f32.gmra.mxu0 %vm320_vm2, %v5036_v25 }
 0x102   :  { %v4146_v19 = vpop.eup %4145  ;;  %v3577_v20 = vmul.f32 %v2635_v53, %v4995_v31  ;;  %v2641_v22 = vadd.f32 %v4144_v17, %v2640_v16  ;;  %v1779_v25 = vpop.f32.mrf.mxu3  ;;  %v1359_v32 = vadd.f32 %v1170_v2, %v919_v14  ;;  %v1487_v31 = vsel %vm1420_vm3, %v1484_v54, %v1486_v39 }
 0x103   :  { %v4148_v24 = vpop.eup %4147  ;;  %v5161_v52 = vadd.f32 1.0, %v4146_v19  ;;  %v4034_v40 = vmul.f32 -1.442695, %v5158_v21  ;;  %v244_v54 = vrot.slane %v5171_v61, 1 }
 0x104   :  { %3651 = vst.msk [vmem:[%s7034_s4 + $0x50] sm:$0xff] %vm3640_vm8, %v3577_v20  ;;  %v2645_v37 = vsel %vm2644_vm15, %v4144_v17, %v2641_v22  ;;  %v2653_v38 = vmul.f32 %v4148_v24, %v5111_v29  ;;  %v921_v42 = vpop.f32.mrf.mxu1  ;;  %v1968_v47 = vadd.f32 %v1779_v25, %v1359_v32  ;;  %vm2658_vm4 = vweird.f32 %v4148_v24  ;;  %v5201_v17 = vld [vmem:[%s7031_s0 + $0x128] sm:$0xff] }
 0x105   :  { %v2650_v44 = vsel %vm2647_vm0, %v2649_v1, %v2645_v37  ;;  %4149 = vrcp.f32 %v5161_v52  ;;  %vm2659_vm6 = vmor %vm2657_vm5, %vm2658_vm4  ;;  %v1489_v29 = vsel %vm1420_vm3, %v1486_v39, %v1488_v26  ;;  %v246_v12 = vrot.slane %v5201_v17, 1 }
 0x106   :  { %v3578_v43 = vmul.f32 %v2650_v44, %v5026_v41  ;;  %v2654_v34 = vsub.f32 1.0, %v2653_v38  ;;  %4151 = vpow2.f32 %v4034_v40  ;;  %3903 = vmatmul.msk.f32.gmra.mxu2 %vm320_vm2, %v5148_v60  ;;  %v536_v45 = vpop.f32.mrf.mxu0  ;;  %v2045_v48 = vmul.f32 %v5138_v58, %v1968_v47 }
 0x107   :  { %v922_v9 = vadd.f32 %v921_v42, %v536_v45  ;;  %3979 = vmatmul.msk.f32.gmra.mxu3 %vm320_vm2, %v1487_v31  ;;  %3827 = vmatmul.msk.f32.gmra.mxu1 %vm320_vm2, %v4992_v23  ;;  %v1490_v15 = vrot.slane %v5201_v17, 2  ;;  %v2676_v16 = vand.u32 2147483647, %v5161_v52  ;;  %v2678_v18 = vand.u32 2147483648, %v5161_v52 }
 0x108   :  { %3652 = vst.msk [vmem:[%s7034_s4 + $0x58] sm:$0xff] %vm3640_vm8, %v3578_v43  ;;  %v2655_v41 = vmul.f32 %v4148_v24, %v2654_v34  ;;  %v5204_v62 = vadd.f32 %v5155_v57, %v2045_v48  ;;  %vm2672_vm10 = vweird.f32 %v5161_v52  ;;  %v5245_v1 = vsel %vm172_vm1, %v244_v54, %v246_v12 }
 0x109   :  { %v1173_v50 = vpop.f32.mrf.mxu2  ;;  %3753 = vmatmul.msk.f32.gmra.mxu0 %vm320_vm2, %v5074_v30  ;;  %v5209_v30 = vsel %vm172_vm1, %v242_v27, %v244_v54  ;;  %v1491_v32 = vsel %vm1420_vm3, %v1488_v26, %v1490_v15  ;;  %vm2677_vm12 = vcmp.eq.f32.partialorder %v2676_v16, 8.507059e+37 }
 0x10a   :  { %v2656_v51 = vadd.f32 %v4148_v24, %v2655_v41  ;;  %v1360_v23 = vadd.f32 %v1173_v50, %v922_v9  ;;  %v1782_v55 = vpop.f32.mrf.mxu3  ;;  %v4035_v11 = vmul.f32 -1.442695, %v5204_v62 }
 0x10b   :  { %v4150_v59 = vpop.eup %4149 }
 0x10c   :  { %v4152_v28 = vpop.eup %4151  ;;  %v2660_v3 = vsel %vm2659_vm6, %v4148_v24, %v2656_v51  ;;  %v2668_v5 = vmul.f32 %v4150_v59, %v5161_v52  ;;  %v1969_v6 = vadd.f32 %v1782_v55, %v1360_v23  ;;  %v924_v7 = vpop.f32.mrf.mxu1  ;;  %vm2673_vm9 = vweird.f32 %v4150_v59  ;;  %v5251_v52 = vld [vmem:[%s7031_s0 + $0x130] sm:$0xff] }
 0x10d   :  { %v2665_v8 = vsel %vm2662_vm7, %v2664_v33, %v2660_v3  ;;  %v5215_v10 = vadd.f32 1.0, %v4152_v28  ;;  %vm2674_vm11 = vmor %vm2672_vm10, %vm2673_vm9  ;;  %v2679_v24 = vor.u32 1.1754944e-38, %v2678_v18  ;;  %v248_v47 = vrot.slane %v5251_v52, 1 }
 0x10e   :  { %v3579_v27 = vmul.f32 %v2665_v8, %v5061_v0  ;;  %v2669_v13 = vsub.f32 1.0, %v2668_v5  ;;  %v2046_v14 = vmul.f32 %v5138_v58, %v1969_v6  ;;  %3904 = vmatmul.msk.f32.gmra.mxu2 %vm320_vm2, %v5209_v30  ;;  %v539_v39 = vpop.f32.mrf.mxu0  ;;  %v5290_v5 = vld [vmem:[%s7031_s0 + $0x138] sm:$0xff] }
 0x10f   :  { %4153 = vrcp.f32 %v5215_v10  ;;  %3980 = vmatmul.msk.f32.gmra.mxu3 %vm320_vm2, %v1489_v29  ;;  %3828 = vmatmul.msk.f32.gmra.mxu1 %vm320_vm2, %v5042_v63  ;;  %v925_v2 = vadd.f32 %v924_v7, %v539_v39  ;;  %v2691_v41 = vand.u32 2147483647, %v5215_v10  ;;  %v2693_v56 = vand.u32 2147483648, %v5215_v10 }
 0x110   :  { %3653 = vst.msk [vmem:[%s7034_s4 + $0x60] sm:$0xff] %vm3640_vm8, %v3579_v27  ;;  %v2670_v0 = vmul.f32 %v4150_v59, %v2669_v13  ;;  %4155 = vpow2.f32 %v4035_v11  ;;  %v5235_v53 = vadd.f32 %v5155_v57, %v2046_v14  ;;  %v5283_v33 = vsel %vm172_vm1, %v246_v12, %v248_v47 }
 0x111   :  { %v1176_v19 = vpop.f32.mrf.mxu2  ;;  %3754 = vmatmul.msk.f32.gmra.mxu0 %vm320_vm2, %v5114_v4  ;;  %vm2687_vm14 = vweird.f32 %v5215_v10  ;;  %v2694_v6 = vor.u32 1.1754944e-38, %v2693_v56  ;;  %vm2692_vm0 = vcmp.eq.f32.partialorder %v2691_v41, 8.507059e+37  ;;  %v250_v13 = vrot.slane %v5290_v5, 1 }
 0x112   :  { %v2671_v20 = vadd.f32 %v4150_v59, %v2670_v0  ;;  %v4036_v63 = vmul.f32 -1.442695, %v5235_v53  ;;  %v1361_v22 = vadd.f32 %v1176_v19, %v925_v2  ;;  %v1785_v25 = vpop.f32.mrf.mxu3  ;;  %v1494_v14 = vrot.slane %v5290_v5, 2  ;;  %v5311_v0 = vld [vmem:[%s7031_s0 + $0x140] sm:$0xff] }
 0x114   :  { %v2675_v31 = vsel %vm2674_vm11, %v4150_v59, %v2671_v20  ;;  %4157 = vpow2.f32 %v4036_v63  ;;  %v1970_v4 = vadd.f32 %v1785_v25, %v1361_v22  ;;  %v927_v37 = vpop.f32.mrf.mxu1 }
 0x115   :  { %v4154_v38 = vpop.eup %4153  ;;  %v2680_v40 = vsel %vm2677_vm12, %v2679_v24, %v2675_v31  ;;  %v5323_v24 = vsel %vm172_vm1, %v248_v47, %v250_v13 }
 0x116   :  { %v4156_v42 = vpop.eup %4155  ;;  %v3580_v44 = vmul.f32 %v2680_v40, %v5095_v46  ;;  %v2683_v43 = vmul.f32 %v4154_v38, %v5215_v10  ;;  %v2047_v34 = vmul.f32 %v5138_v58, %v1970_v4  ;;  %3905 = vmatmul.msk.f32.gmra.mxu2 %vm320_vm2, %v5245_v1  ;;  %v542_v45 = vpop.f32.mrf.mxu0  ;;  %v1492_v46 = vrot.slane %v5251_v52, 2 }
 0x117   :  { %v5258_v54 = vadd.f32 1.0, %v4156_v42  ;;  %v928_v35 = vadd.f32 %v927_v37, %v542_v45  ;;  %3981 = vmatmul.msk.f32.gmra.mxu3 %vm320_vm2, %v1491_v32  ;;  %3829 = vmatmul.msk.f32.gmra.mxu1 %vm320_vm2, %v5081_v36  ;;  %vm2688_vm13 = vweird.f32 %v4154_v38  ;;  %v1496_v40 = vrot.slane %v5311_v0, 2 }
 0x118   :  { %3654 = vst.msk [vmem:[%s7034_s4 + $0x68] sm:$0xff] %vm3640_vm8, %v3580_v44  ;;  %v2684_v9 = vsub.f32 1.0, %v2683_v43  ;;  %v5270_v26 = vadd.f32 %v5155_v57, %v2047_v34  ;;  %v1493_v29 = vsel %vm1420_vm3, %v1490_v15, %v1492_v46  ;;  %vm2689_vm15 = vmor %vm2687_vm14, %vm2688_vm13  ;;  %v1495_v32 = vsel %vm1420_vm3, %v1492_v46, %v1494_v14 }
 0x119   :  { %4159 = vrcp.f32 %v5258_v54  ;;  %v1179_v36 = vpop.f32.mrf.mxu2  ;;  %3755 = vmatmul.msk.f32.gmra.mxu0 %vm320_vm2, %v5148_v60  ;;  %v2706_v2 = vand.u32 2147483647, %v5258_v54  ;;  %vm2702_vm5 = vweird.f32 %v5258_v54 }
 0x11a   :  { %v4158_v48 = vpop.eup %4157  ;;  %v2685_v50 = vmul.f32 %v4154_v38, %v2684_v9  ;;  %v4037_v51 = vmul.f32 -1.442695, %v5270_v26  ;;  %v1362_v23 = vadd.f32 %v1179_v36, %v928_v35  ;;  %v1788_v55 = vpop.f32.mrf.mxu3 }
 0x11b   :  { %v5278_v59 = vadd.f32 1.0, %v4158_v48  ;;  %vm5331_vm6 = vcmp.eq.f32.partialorder %v2706_v2, 8.507059e+37 }
 0x11c   :  { %v2686_v28 = vadd.f32 %v4154_v38, %v2685_v50  ;;  %4161 = vpow2.f32 %v4037_v51  ;;  %v1971_v60 = vadd.f32 %v1788_v55, %v1362_v23  ;;  %v930_v3 = vpop.f32.mrf.mxu1 }
 0x11d   :  { %4163 = vrcp.f32 %v5278_v59  ;;  %v2723_v47 = vand.u32 2147483648, %v5278_v59  ;;  %vm2717_vm10 = vweird.f32 %v5278_v59 }
 0x11e   :  { %v2690_v7 = vsel %vm2689_vm15, %v4154_v38, %v2686_v28  ;;  %v2048_v8 = vmul.f32 %v5138_v58, %v1971_v60  ;;  %3906 = vmatmul.msk.f32.gmra.mxu2 %vm320_vm2, %v5283_v33  ;;  %v545_v10 = vpop.f32.mrf.mxu0  ;;  %v252_v38 = vrot.slane %v5311_v0, 1 }
 0x11f   :  { %v4160_v11 = vpop.eup %4159  ;;  %v2695_v12 = vsel %vm2692_vm0, %v2694_v6, %v2690_v7  ;;  %v931_v27 = vadd.f32 %v930_v3, %v545_v10  ;;  %3982 = vmatmul.msk.f32.gmra.mxu3 %vm320_vm2, %v1493_v29  ;;  %3830 = vmatmul.msk.f32.gmra.mxu1 %vm320_vm2, %v5102_v49  ;;  %v2724_v60 = vor.u32 1.1754944e-38, %v2723_v47  ;;  %v1497_v6 = vsel %vm1420_vm3, %v1494_v14, %v1496_v40 }
 0x120   :  { %v3581_v39 = vmul.f32 %v2695_v12, %v5158_v21  ;;  %v2698_v15 = vmul.f32 %v4160_v11, %v5258_v54  ;;  %v5304_v16 = vadd.f32 %v5155_v57, %v2048_v8  ;;  %vm2703_vm4 = vweird.f32 %v4160_v11 }
 0x121   :  { %v1182_v18 = vpop.f32.mrf.mxu2  ;;  %3756 = vmatmul.msk.f32.gmra.mxu0 %vm320_vm2, %v5209_v30  ;;  %v2708_v30 = vand.u32 2147483648, %v5258_v54  ;;  %vm2704_vm7 = vmor %vm2702_vm5, %vm2703_vm4  ;;  %v2721_v54 = vand.u32 2147483647, %v5278_v59  ;;  %v5350_v50 = vsel %vm172_vm1, %v250_v13, %v252_v38 }
 0x122   :  { %v4162_v49 = vpop.eup %4161  ;;  %3655 = vst.msk [vmem:[%s7034_s4 + $0x70] sm:$0xff] %vm3640_vm8, %v3581_v39  ;;  %v2699_v21 = vsub.f32 1.0, %v2698_v15  ;;  %v4038_v19 = vmul.f32 -1.442695, %v5304_v16  ;;  %v1363_v20 = vadd.f32 %v1182_v18, %v931_v27  ;;  %v1791_v63 = vpop.f32.mrf.mxu3 }
 0x123   :  { %v4164_v22 = vpop.eup %4163  ;;  %v5320_v25 = vadd.f32 1.0, %v4162_v49  ;;  %v2709_v35 = vor.u32 1.1754944e-38, %v2708_v30  ;;  %vm2722_vm12 = vcmp.eq.f32.partialorder %v2721_v54, 8.507059e+37 }
 0x124   :  { %v2700_v31 = vmul.f32 %v4160_v11, %v2699_v21  ;;  %v2713_v4 = vmul.f32 %v4164_v22, %v5278_v59  ;;  %4165 = vpow2.f32 %v4038_v19  ;;  %v933_v37 = vpop.f32.mrf.mxu1  ;;  %v1972_v34 = vadd.f32 %v1791_v63, %v1363_v20 }
 0x125   :  { %4167 = vrcp.f32 %v5320_v25  ;;  %vm2718_vm9 = vweird.f32 %v4164_v22  ;;  %v2738_v39 = vand.u32 2147483648, %v5320_v25  ;;  %v2736_v21 = vand.u32 2147483647, %v5320_v25 }
 0x126   :  { %v2701_v42 = vadd.f32 %v4160_v11, %v2700_v31  ;;  %v2714_v43 = vsub.f32 1.0, %v2713_v4  ;;  %3907 = vmatmul.msk.f32.gmra.mxu2 %vm320_vm2, %v5323_v24  ;;  %v548_v45 = vpop.f32.mrf.mxu0  ;;  %v2049_v56 = vmul.f32 %v5138_v58, %v1972_v34  ;;  %vm2719_vm11 = vmor %vm2717_vm10, %vm2718_vm9  ;;  %vm2732_vm14 = vweird.f32 %v5320_v25 }
 0x127   :  { %v934_v46 = vadd.f32 %v933_v37, %v548_v45  ;;  %3983 = vmatmul.msk.f32.gmra.mxu3 %vm320_vm2, %v1495_v32  ;;  %3831 = vmatmul.msk.f32.gmra.mxu1 %vm320_vm2, %v5171_v61  ;;  %v2739_v32 = vor.u32 1.1754944e-38, %v2738_v39  ;;  %vm2737_vm0 = vcmp.eq.f32.partialorder %v2736_v21, 8.507059e+37 }
 0x128   :  { %v2705_v9 = vsel %vm2704_vm7, %v4160_v11, %v2701_v42  ;;  %v2715_v41 = vmul.f32 %v4164_v22, %v2714_v43  ;;  %v5355_v55 = vadd.f32 %v5155_v57, %v2049_v56 }
 0x129   :  { %v2710_v36 = vsel %vm5331_vm6, %v2709_v35, %v2705_v9  ;;  %v1185_v48 = vpop.f32.mrf.mxu2  ;;  %3757 = vmatmul.msk.f32.gmra.mxu0 %vm320_vm2, %v5245_v1 }
 0x12a   :  { %v4166_v51 = vpop.eup %4165  ;;  %v3582_v61 = vmul.f32 %v2710_v36, %v5204_v62  ;;  %v2716_v23 = vadd.f32 %v4164_v22, %v2715_v41  ;;  %v1794_v29 = vpop.f32.mrf.mxu3  ;;  %v1364_v1 = vadd.f32 %v1185_v48, %v934_v46  ;;  %v5365_v62 = vld [vmem:[%s7031_s0 + $0x148] sm:$0xff]  ;;  %v4039_v8 = vmul.f32 -1.442695, %v5355_v55 }
 0x12b   :  { %v4168_v28 = vpop.eup %4167  ;;  %v5357_v3 = vadd.f32 1.0, %v4166_v51  ;;  %v254_v14 = vrot.slane %v5365_v62, 1  ;;  %v1498_v49 = vrot.slane %v5365_v62, 2 }
 0x12c   :  { %3656 = vst.msk [vmem:[%s7034_s4 + $0x78] sm:$0xff] %vm3640_vm8, %v3582_v61  ;;  %v2720_v59 = vsel %vm2719_vm11, %v4164_v22, %v2716_v23  ;;  %v2728_v7 = vmul.f32 %v4168_v28, %v5320_v25  ;;  %v936_v10 = vpop.f32.mrf.mxu1  ;;  %v1973_v15 = vadd.f32 %v1794_v29, %v1364_v1  ;;  %vm2733_vm13 = vweird.f32 %v4168_v28  ;;  %v5395_v22 = vld [vmem:[%s7031_s0 + $0x150] sm:$0xff] }
 0x12d   :  { %v2725_v11 = vsel %vm2722_vm12, %v2724_v60, %v2720_v59  ;;  %4169 = vrcp.f32 %v5357_v3  ;;  %vm2734_vm15 = vmor %vm2732_vm14, %vm2733_vm13  ;;  %v1499_v25 = vsel %vm1420_vm3, %v1496_v40, %v1498_v49  ;;  %v256_v54 = vrot.slane %v5395_v22, 1 }
 0x12e   :  { %v3583_v12 = vmul.f32 %v2725_v11, %v5235_v53  ;;  %v2729_v27 = vsub.f32 1.0, %v2728_v7  ;;  %4171 = vpow2.f32 %v4039_v8  ;;  %3908 = vmatmul.msk.f32.gmra.mxu2 %vm320_vm2, %v5350_v50  ;;  %v551_v13 = vpop.f32.mrf.mxu0  ;;  %v2050_v2 = vmul.f32 %v5138_v58, %v1973_v15 }
 0x12f   :  { %v937_v18 = vadd.f32 %v936_v10, %v551_v13  ;;  %3984 = vmatmul.msk.f32.gmra.mxu3 %vm320_vm2, %v1497_v6  ;;  %3832 = vmatmul.msk.f32.gmra.mxu1 %vm320_vm2, %v5201_v17  ;;  %v1500_v9 = vrot.slane %v5395_v22, 2  ;;  %v2751_v41 = vand.u32 2147483647, %v5357_v3  ;;  %v2753_v56 = vand.u32 2147483648, %v5357_v3 }
 0x130   :  { %3657 = vst.msk [vmem:[%s7034_s4 + $0x80] sm:$0xff] %vm3640_vm8, %v3583_v12  ;;  %v2730_v53 = vmul.f32 %v4168_v28, %v2729_v27  ;;  %v5398_v31 = vadd.f32 %v5155_v57, %v2050_v2  ;;  %vm2747_vm5 = vweird.f32 %v5357_v3  ;;  %v5439_v60 = vsel %vm172_vm1, %v254_v14, %v256_v54 }
 0x131   :  { %v1188_v19 = vpop.f32.mrf.mxu2  ;;  %3758 = vmatmul.msk.f32.gmra.mxu0 %vm320_vm2, %v5283_v33  ;;  %v5403_v33 = vsel %vm172_vm1, %v252_v38, %v254_v14  ;;  %v1501_v1 = vsel %vm1420_vm3, %v1498_v49, %v1500_v9  ;;  %vm2752_vm7 = vcmp.eq.f32.partialorder %v2751_v41, 8.507059e+37 }
 0x132   :  { %v2731_v20 = vadd.f32 %v4168_v28, %v2730_v53  ;;  %v1365_v17 = vadd.f32 %v1188_v19, %v937_v18  ;;  %v1797_v63 = vpop.f32.mrf.mxu3  ;;  %v4040_v35 = vmul.f32 -1.442695, %v5398_v31 }
 0x133   :  { %v4170_v30 = vpop.eup %4169 }
 0x134   :  { %v4172_v4 = vpop.eup %4171  ;;  %v2735_v37 = vsel %vm2734_vm15, %v4168_v28, %v2731_v20  ;;  %v2743_v42 = vmul.f32 %v4170_v30, %v5357_v3  ;;  %v1974_v44 = vadd.f32 %v1797_v63, %v1365_v17  ;;  %v939_v43 = vpop.f32.mrf.mxu1  ;;  %vm2748_vm4 = vweird.f32 %v4170_v30  ;;  %v5445_v3 = vld [vmem:[%s7031_s0 + $0x158] sm:$0xff] }
 0x135   :  { %v2740_v34 = vsel %vm2737_vm0, %v2739_v32, %v2735_v37  ;;  %v5409_v45 = vadd.f32 1.0, %v4172_v4  ;;  %vm2749_vm6 = vmor %vm2747_vm5, %vm2748_vm4  ;;  %v2754_v28 = vor.u32 1.1754944e-38, %v2753_v56  ;;  %v258_v15 = vrot.slane %v5445_v3, 1 }
 0x136   :  { %v3584_v38 = vmul.f32 %v2740_v34, %v5270_v26  ;;  %v2744_v47 = vsub.f32 1.0, %v2743_v42  ;;  %v2051_v46 = vmul.f32 %v5138_v58, %v1974_v44  ;;  %3909 = vmatmul.msk.f32.gmra.mxu2 %vm320_vm2, %v5403_v33  ;;  %v554_v40 = vpop.f32.mrf.mxu0  ;;  %v5484_v42 = vld [vmem:[%s7031_s0 + $0x160] sm:$0xff] }
 0x137   :  { %4173 = vrcp.f32 %v5409_v45  ;;  %3985 = vmatmul.msk.f32.gmra.mxu3 %vm320_vm2, %v1499_v25  ;;  %3833 = vmatmul.msk.f32.gmra.mxu1 %vm320_vm2, %v5251_v52  ;;  %v940_v48 = vadd.f32 %v939_v43, %v554_v40  ;;  %v2766_v53 = vand.u32 2147483647, %v5409_v45  ;;  %v2768_v21 = vand.u32 2147483648, %v5409_v45 }
 0x138   :  { %3658 = vst.msk [vmem:[%s7034_s4 + $0x88] sm:$0xff] %vm3640_vm8, %v3584_v38  ;;  %v2745_v26 = vmul.f32 %v4170_v30, %v2744_v47  ;;  %4175 = vpow2.f32 %v4040_v35  ;;  %v5429_v36 = vadd.f32 %v5155_v57, %v2051_v46  ;;  %v5477_v32 = vsel %vm172_vm1, %v256_v54, %v258_v15 }
 0x139   :  { %v1191_v51 = vpop.f32.mrf.mxu2  ;;  %3759 = vmatmul.msk.f32.gmra.mxu0 %vm320_vm2, %v5323_v24  ;;  %vm2762_vm10 = vweird.f32 %v5409_v45  ;;  %v2769_v44 = vor.u32 1.1754944e-38, %v2768_v21  ;;  %vm2767_vm12 = vcmp.eq.f32.partialorder %v2766_v53, 8.507059e+37  ;;  %v260_v47 = vrot.slane %v5484_v42, 1 }
 0x13a   :  { %v2746_v61 = vadd.f32 %v4170_v30, %v2745_v26  ;;  %v4041_v52 = vmul.f32 -1.442695, %v5429_v36  ;;  %v1366_v23 = vadd.f32 %v1191_v51, %v940_v48  ;;  %v1800_v29 = vpop.f32.mrf.mxu3  ;;  %v1504_v46 = vrot.slane %v5484_v42, 2  ;;  %v5505_v26 = vld [vmem:[%s7031_s0 + $0x168] sm:$0xff] }
 0x13c   :  { %v2750_v6 = vsel %vm2749_vm6, %v4170_v30, %v2746_v61  ;;  %4177 = vpow2.f32 %v4041_v52  ;;  %v1975_v24 = vadd.f32 %v1800_v29, %v1366_v23  ;;  %v942_v59 = vpop.f32.mrf.mxu1 }
 0x13d   :  { %v4174_v7 = vpop.eup %4173  ;;  %v2755_v8 = vsel %vm2752_vm7, %v2754_v28, %v2750_v6  ;;  %v5517_v28 = vsel %vm172_vm1, %v258_v15, %v260_v47 }
 0x13e   :  { %v4176_v10 = vpop.eup %4175  ;;  %v3585_v11 = vmul.f32 %v2755_v8, %v5304_v16  ;;  %v2758_v12 = vmul.f32 %v4174_v7, %v5409_v45  ;;  %v2052_v27 = vmul.f32 %v5138_v58, %v1975_v24  ;;  %3910 = vmatmul.msk.f32.gmra.mxu2 %vm320_vm2, %v5439_v60  ;;  %v557_v13 = vpop.f32.mrf.mxu0  ;;  %v1502_v16 = vrot.slane %v5445_v3, 2 }
 0x13f   :  { %v5452_v14 = vadd.f32 1.0, %v4176_v10  ;;  %v943_v39 = vadd.f32 %v942_v59, %v557_v13  ;;  %3986 = vmatmul.msk.f32.gmra.mxu3 %vm320_vm2, %v1501_v1  ;;  %3834 = vmatmul.msk.f32.gmra.mxu1 %vm320_vm2, %v5290_v5  ;;  %vm2763_vm9 = vweird.f32 %v4174_v7  ;;  %v1506_v8 = vrot.slane %v5505_v26, 2 }
 0x140   :  { %3659 = vst.msk [vmem:[%s7034_s4 + $0x90] sm:$0xff] %vm3640_vm8, %v3585_v11  ;;  %v2759_v18 = vsub.f32 1.0, %v2758_v12  ;;  %v5464_v49 = vadd.f32 %v5155_v57, %v2052_v27  ;;  %v1503_v25 = vsel %vm1420_vm3, %v1500_v9, %v1502_v16  ;;  %vm2764_vm11 = vmor %vm2762_vm10, %vm2763_vm9  ;;  %v1505_v1 = vsel %vm1420_vm3, %v1502_v16, %v1504_v46 }
 0x141   :  { %4179 = vrcp.f32 %v5452_v14  ;;  %v1194_v5 = vpop.f32.mrf.mxu2  ;;  %3760 = vmatmul.msk.f32.gmra.mxu0 %vm320_vm2, %v5350_v50  ;;  %v2781_v48 = vand.u32 2147483647, %v5452_v14  ;;  %vm2777_vm14 = vweird.f32 %v5452_v14 }
 0x142   :  { %v4178_v2 = vpop.eup %4177  ;;  %v2760_v19 = vmul.f32 %v4174_v7, %v2759_v18  ;;  %v4042_v20 = vmul.f32 -1.442695, %v5464_v49  ;;  %v1367_v17 = vadd.f32 %v1194_v5, %v943_v39  ;;  %v1803_v63 = vpop.f32.mrf.mxu3 }
 0x143   :  { %v5472_v30 = vadd.f32 1.0, %v4178_v2  ;;  %vm5525_vm15 = vcmp.eq.f32.partialorder %v2781_v48, 8.507059e+37 }
 0x144   :  { %v2761_v4 = vadd.f32 %v4174_v7, %v2760_v19  ;;  %4181 = vpow2.f32 %v4042_v20  ;;  %v1976_v50 = vadd.f32 %v1803_v63, %v1367_v17  ;;  %v945_v37 = vpop.f32.mrf.mxu1 }
 0x145   :  { %4183 = vrcp.f32 %v5472_v30  ;;  %v2798_v15 = vand.u32 2147483648, %v5472_v30  ;;  %vm2792_vm5 = vweird.f32 %v5472_v30 }
 0x146   :  { %v2765_v43 = vsel %vm2764_vm11, %v4174_v7, %v2761_v4  ;;  %v2053_v34 = vmul.f32 %v5138_v58, %v1976_v50  ;;  %3911 = vmatmul.msk.f32.gmra.mxu2 %vm320_vm2, %v5477_v32  ;;  %v560_v45 = vpop.f32.mrf.mxu0  ;;  %v262_v7 = vrot.slane %v5505_v26, 1 }
 0x147   :  { %v4180_v35 = vpop.eup %4179  ;;  %v2770_v54 = vsel %vm2767_vm12, %v2769_v44, %v2765_v43  ;;  %v946_v38 = vadd.f32 %v945_v37, %v560_v45  ;;  %3987 = vmatmul.msk.f32.gmra.mxu3 %vm320_vm2, %v1503_v25  ;;  %3835 = vmatmul.msk.f32.gmra.mxu1 %vm320_vm2, %v5311_v0  ;;  %v2799_v50 = vor.u32 1.1754944e-38, %v2798_v15  ;;  %v1507_v44 = vsel %vm1420_vm3, %v1504_v46, %v1506_v8 }
 0x148   :  { %v3586_v40 = vmul.f32 %v2770_v54, %v5355_v55  ;;  %v2773_v9 = vmul.f32 %v4180_v35, %v5452_v14  ;;  %v5498_v41 = vadd.f32 %v5155_v57, %v2053_v34  ;;  %vm2778_vm13 = vweird.f32 %v4180_v35 }
 0x149   :  { %v1197_v56 = vpop.f32.mrf.mxu2  ;;  %3761 = vmatmul.msk.f32.gmra.mxu0 %vm320_vm2, %v5403_v33  ;;  %v2783_v33 = vand.u32 2147483648, %v5452_v14  ;;  %vm2779_vm0 = vmor %vm2777_vm14, %vm2778_vm13  ;;  %v2796_v14 = vand.u32 2147483647, %v5472_v30  ;;  %v5544_v19 = vsel %vm172_vm1, %v260_v47, %v262_v7 }
 0x14a   :  { %v4182_v0 = vpop.eup %4181  ;;  %3660 = vst.msk [vmem:[%s7034_s4 + $0x98] sm:$0xff] %vm3640_vm8, %v3586_v40  ;;  %v2774_v55 = vsub.f32 1.0, %v2773_v9  ;;  %v4043_v51 = vmul.f32 -1.442695, %v5498_v41  ;;  %v1368_v61 = vadd.f32 %v1197_v56, %v946_v38  ;;  %v1806_v52 = vpop.f32.mrf.mxu3 }
 0x14b   :  { %v4184_v23 = vpop.eup %4183  ;;  %v5514_v29 = vadd.f32 1.0, %v4182_v0  ;;  %v2784_v39 = vor.u32 1.1754944e-38, %v2783_v33  ;;  %vm2797_vm7 = vcmp.eq.f32.partialorder %v2796_v14, 8.507059e+37 }
 0x14c   :  { %v2775_v6 = vmul.f32 %v4180_v35, %v2774_v55  ;;  %v2788_v24 = vmul.f32 %v4184_v23, %v5472_v30  ;;  %4185 = vpow2.f32 %v4043_v51  ;;  %v948_v59 = vpop.f32.mrf.mxu1  ;;  %v1977_v27 = vadd.f32 %v1806_v52, %v1368_v61 }
 0x14d   :  { %4187 = vrcp.f32 %v5514_v29  ;;  %vm2793_vm4 = vweird.f32 %v4184_v23  ;;  %v2813_v40 = vand.u32 2147483648, %v5514_v29  ;;  %v2811_v55 = vand.u32 2147483647, %v5514_v29 }
 0x14e   :  { %v2776_v10 = vadd.f32 %v4180_v35, %v2775_v6  ;;  %v2789_v12 = vsub.f32 1.0, %v2788_v24  ;;  %3912 = vmatmul.msk.f32.gmra.mxu2 %vm320_vm2, %v5517_v28  ;;  %v563_v13 = vpop.f32.mrf.mxu0  ;;  %v2054_v21 = vmul.f32 %v5138_v58, %v1977_v27  ;;  %vm2794_vm6 = vmor %vm2792_vm5, %vm2793_vm4  ;;  %vm2807_vm10 = vweird.f32 %v5514_v29 }
 0x14f   :  { %v949_v16 = vadd.f32 %v948_v59, %v563_v13  ;;  %3988 = vmatmul.msk.f32.gmra.mxu3 %vm320_vm2, %v1505_v1  ;;  %3836 = vmatmul.msk.f32.gmra.mxu1 %vm320_vm2, %v5365_v62  ;;  %v2814_v1 = vor.u32 1.1754944e-38, %v2813_v40  ;;  %vm2812_vm12 = vcmp.eq.f32.partialorder %v2811_v55, 8.507059e+37 }
 0x150   :  { %v2780_v18 = vsel %vm2779_vm0, %v4180_v35, %v2776_v10  ;;  %v2790_v53 = vmul.f32 %v4184_v23, %v2789_v12  ;;  %v5549_v63 = vadd.f32 %v5155_v57, %v2054_v21 }
 0x151   :  { %v2785_v5 = vsel %vm5525_vm15, %v2784_v39, %v2780_v18  ;;  %v1200_v2 = vpop.f32.mrf.mxu2  ;;  %3762 = vmatmul.msk.f32.gmra.mxu0 %vm320_vm2, %v5439_v60 }
 0x152   :  { %v4186_v20 = vpop.eup %4185  ;;  %v3587_v62 = vmul.f32 %v2785_v5, %v5398_v31  ;;  %v2791_v17 = vadd.f32 %v4184_v23, %v2790_v53  ;;  %v1809_v25 = vpop.f32.mrf.mxu3  ;;  %v1369_v60 = vadd.f32 %v1200_v2, %v949_v16  ;;  %v5559_v31 = vld [vmem:[%s7031_s0 + $0x170] sm:$0xff]  ;;  %v4044_v34 = vmul.f32 -1.442695, %v5549_v63 }
 0x153   :  { %v4188_v4 = vpop.eup %4187  ;;  %v5551_v37 = vadd.f32 1.0, %v4186_v20  ;;  %v264_v46 = vrot.slane %v5559_v31, 1  ;;  %v1508_v0 = vrot.slane %v5559_v31, 2 }
 0x154   :  { %3661 = vst.msk [vmem:[%s7034_s4 + $0xa0] sm:$0xff] %vm3640_vm8, %v3587_v62  ;;  %v2795_v30 = vsel %vm2794_vm6, %v4184_v23, %v2791_v17  ;;  %v2803_v43 = vmul.f32 %v4188_v4, %v5514_v29  ;;  %v951_v45 = vpop.f32.mrf.mxu1  ;;  %v1978_v9 = vadd.f32 %v1809_v25, %v1369_v60  ;;  %vm2808_vm9 = vweird.f32 %v4188_v4  ;;  %v5589_v23 = vld [vmem:[%s7031_s0 + $0x178] sm:$0xff] }
 0x155   :  { %v2800_v35 = vsel %vm2797_vm7, %v2799_v50, %v2795_v30  ;;  %4189 = vrcp.f32 %v5551_v37  ;;  %vm2809_vm11 = vmor %vm2807_vm10, %vm2808_vm9  ;;  %v1509_v29 = vsel %vm1420_vm3, %v1506_v8, %v1508_v0  ;;  %v266_v14 = vrot.slane %v5589_v23, 1 }
 0x156   :  { %v3588_v54 = vmul.f32 %v2800_v35, %v5429_v36  ;;  %v2804_v38 = vsub.f32 1.0, %v2803_v43  ;;  %4191 = vpow2.f32 %v4044_v34  ;;  %3913 = vmatmul.msk.f32.gmra.mxu2 %vm320_vm2, %v5544_v19  ;;  %v566_v47 = vpop.f32.mrf.mxu0  ;;  %v2055_v48 = vmul.f32 %v5138_v58, %v1978_v9 }
 0x157   :  { %v952_v56 = vadd.f32 %v951_v45, %v566_v47  ;;  %3989 = vmatmul.msk.f32.gmra.mxu3 %vm320_vm2, %v1507_v44  ;;  %3837 = vmatmul.msk.f32.gmra.mxu1 %vm320_vm2, %v5395_v22  ;;  %v1510_v18 = vrot.slane %v5589_v23, 2  ;;  %v2826_v53 = vand.u32 2147483647, %v5551_v37  ;;  %v2828_v21 = vand.u32 2147483648, %v5551_v37 }
 0x158   :  { %3662 = vst.msk [vmem:[%s7034_s4 + $0xa8] sm:$0xff] %vm3640_vm8, %v3588_v54  ;;  %v2805_v36 = vmul.f32 %v4188_v4, %v2804_v38  ;;  %v5592_v6 = vadd.f32 %v5155_v57, %v2055_v48  ;;  %vm2822_vm14 = vweird.f32 %v5551_v37  ;;  %v5633_v50 = vsel %vm172_vm1, %v264_v46, %v266_v14 }
 0x159   :  { %v1203_v51 = vpop.f32.mrf.mxu2  ;;  %3763 = vmatmul.msk.f32.gmra.mxu0 %vm320_vm2, %v5477_v32  ;;  %v5597_v32 = vsel %vm172_vm1, %v262_v7, %v264_v46  ;;  %v1511_v60 = vsel %vm1420_vm3, %v1508_v0, %v1510_v18  ;;  %vm2827_vm0 = vcmp.eq.f32.partialorder %v2826_v53, 8.507059e+37 }
 0x15a   :  { %v2806_v61 = vadd.f32 %v4188_v4, %v2805_v36  ;;  %v1370_v22 = vadd.f32 %v1203_v51, %v952_v56  ;;  %v1812_v52 = vpop.f32.mrf.mxu3  ;;  %v4045_v39 = vmul.f32 -1.442695, %v5592_v6 }
 0x15b   :  { %v4190_v33 = vpop.eup %4189 }
 0x15c   :  { %v4192_v24 = vpop.eup %4191  ;;  %v2810_v59 = vsel %vm2809_vm11, %v4188_v4, %v2806_v61  ;;  %v2818_v10 = vmul.f32 %v4190_v33, %v5551_v37  ;;  %v1979_v11 = vadd.f32 %v1812_v52, %v1370_v22  ;;  %v954_v12 = vpop.f32.mrf.mxu1  ;;  %vm2823_vm13 = vweird.f32 %v4190_v33  ;;  %v5639_v37 = vld [vmem:[%s7031_s0 + $0x180] sm:$0xff] }
 0x15d   :  { %v2815_v27 = vsel %vm2812_vm12, %v2814_v1, %v2810_v59  ;;  %v5603_v13 = vadd.f32 1.0, %v4192_v24  ;;  %vm2824_vm15 = vmor %vm2822_vm14, %vm2823_vm13  ;;  %v2829_v4 = vor.u32 1.1754944e-38, %v2828_v21  ;;  %v268_v9 = vrot.slane %v5639_v37, 1  ;;  %v5678_v24 = vld [vmem:[%s7031_s0 + $0x188] sm:$0xff] }
 0x15e   :  { %v3589_v7 = vmul.f32 %v2815_v27, %v5464_v49  ;;  %v2819_v15 = vsub.f32 1.0, %v2818_v10  ;;  %v2056_v16 = vmul.f32 %v5138_v58, %v1979_v11  ;;  %3914 = vmatmul.msk.f32.gmra.mxu2 %vm320_vm2, %v5597_v32  ;;  %v569_v8 = vpop.f32.mrf.mxu0  ;;  %v5684_v11 = vld [vmem:[%s7032_s2] ss:$0 sm:$0xff] }
 0x15f   :  { %4193 = vrcp.f32 %v5603_v13  ;;  %3990 = vmatmul.msk.f32.gmra.mxu3 %vm320_vm2, %v1509_v29  ;;  %3838 = vmatmul.msk.f32.gmra.mxu1 %vm320_vm2, %v5445_v3  ;;  %v955_v2 = vadd.f32 %v954_v12, %v569_v8  ;;  %v2841_v0 = vand.u32 2147483647, %v5603_v13  ;;  %v2843_v36 = vand.u32 2147483648, %v5603_v13 }
 0x160   :  { %3663 = vst.msk [vmem:[%s7034_s4 + $0xb0] sm:$0xff] %vm3640_vm8, %v3589_v7  ;;  %v2820_v49 = vmul.f32 %v4190_v33, %v2819_v15  ;;  %4195 = vpow2.f32 %v4045_v39  ;;  %v5623_v5 = vadd.f32 %v5155_v57, %v2056_v16  ;;  %vm2837_vm5 = vweird.f32 %v5603_v13 }
 0x161   :  { %v1206_v20 = vpop.f32.mrf.mxu2  ;;  %3764 = vmatmul.msk.f32.gmra.mxu0 %vm320_vm2, %v5517_v28  ;;  %v2844_v59 = vor.u32 1.1754944e-38, %v2843_v36  ;;  %vm2842_vm7 = vcmp.eq.f32.partialorder %v2841_v0, 8.507059e+37  ;;  %v270_v7 = vrot.slane %v5678_v24, 1  ;;  %v1514_v15 = vrot.slane %v5678_v24, 2 }
 0x162   :  { %v2821_v62 = vadd.f32 %v4190_v33, %v2820_v49  ;;  %v4046_v3 = vmul.f32 -1.442695, %v5623_v5  ;;  %v1371_v17 = vadd.f32 %v1206_v20, %v955_v2  ;;  %v1815_v25 = vpop.f32.mrf.mxu3 }
 0x164   :  { %v2825_v44 = vsel %vm2824_vm15, %v4190_v33, %v2821_v62  ;;  %4197 = vpow2.f32 %v4046_v3  ;;  %v1980_v28 = vadd.f32 %v1815_v25, %v1371_v17  ;;  %v957_v30 = vpop.f32.mrf.mxu1 }
 0x165   :  { %v4194_v43 = vpop.eup %4193  ;;  %v2830_v34 = vsel %vm2827_vm0, %v2829_v4, %v2825_v44  ;;  %v5721_v4 = vsel %vm172_vm1, %v268_v9, %v270_v7 }
 0x166   :  { %v4196_v45 = vpop.eup %4195  ;;  %v3590_v35 = vmul.f32 %v2830_v34, %v5498_v41  ;;  %v2833_v54 = vmul.f32 %v4194_v43, %v5603_v13  ;;  %v2057_v38 = vmul.f32 %v5138_v58, %v1980_v28  ;;  %3915 = vmatmul.msk.f32.gmra.mxu2 %vm320_vm2, %v5633_v50  ;;  %v572_v47 = vpop.f32.mrf.mxu0  ;;  %v1512_v41 = vrot.slane %v5639_v37, 2 }
 0x167   :  { %v5646_v46 = vadd.f32 1.0, %v4196_v45  ;;  %v958_v40 = vadd.f32 %v957_v30, %v572_v47  ;;  %3991 = vmatmul.msk.f32.gmra.mxu3 %vm320_vm2, %v1511_v60  ;;  %3839 = vmatmul.msk.f32.gmra.mxu1 %vm320_vm2, %v5484_v42  ;;  %vm2838_vm4 = vweird.f32 %v4194_v43 }
 0x168   :  { %3664 = vst.msk [vmem:[%s7034_s4 + $0xb8] sm:$0xff] %vm3640_vm8, %v3590_v35  ;;  %v2834_v58 = vsub.f32 1.0, %v2833_v54  ;;  %v5658_v56 = vadd.f32 %v5155_v57, %v2057_v38  ;;  %v5671_v57 = vsel %vm172_vm1, %v266_v14, %v268_v9  ;;  %v1513_v33 = vsel %vm1420_vm3, %v1510_v18, %v1512_v41  ;;  %vm2839_vm6 = vmor %vm2837_vm5, %vm2838_vm4  ;;  %v5699_v18 = vld [vmem:[%s7033_s3] ss:$0 sm:$0xff] }
 0x169   :  { %4199 = vrcp.f32 %v5646_v46  ;;  %v1209_v42 = vpop.f32.mrf.mxu2  ;;  %3765 = vmatmul.msk.f32.gmra.mxu0 %vm320_vm2, %v5544_v19  ;;  %v2856_v2 = vand.u32 2147483647, %v5646_v46  ;;  %v1515_v60 = vsel %vm1420_vm3, %v1512_v41, %v1514_v15  ;;  %vm2852_vm10 = vweird.f32 %v5646_v46 }
 0x16a   :  { %v4198_v55 = vpop.eup %4197  ;;  %v2835_v48 = vmul.f32 %v4194_v43, %v2834_v58  ;;  %v4047_v51 = vmul.f32 -1.442695, %v5658_v56  ;;  %v1372_v61 = vadd.f32 %v1209_v42, %v958_v40  ;;  %v1818_v22 = vpop.f32.mrf.mxu3 }
 0x16b   :  { %v5666_v52 = vadd.f32 1.0, %v4198_v55  ;;  %vm5729_vm11 = vcmp.eq.f32.partialorder %v2856_v2, 8.507059e+37 }
 0x16c   :  { %v2836_v1 = vadd.f32 %v4194_v43, %v2835_v48  ;;  %4201 = vpow2.f32 %v4047_v51  ;;  %v1981_v19 = vadd.f32 %v1818_v22, %v1372_v61  ;;  %v960_v29 = vpop.f32.mrf.mxu1 }
 0x16d   :  { %4203 = vrcp.f32 %v5666_v52  ;;  %v2873_v9 = vand.u32 2147483648, %v5666_v52  ;;  %vm2867_vm14 = vweird.f32 %v5666_v52 }
 0x16e   :  { %v2840_v10 = vsel %vm2839_vm6, %v4194_v43, %v2836_v1  ;;  %v2058_v12 = vmul.f32 %v5684_v11, %v1981_v19  ;;  %3916 = vmatmul.msk.f32.gmra.mxu2 %vm320_vm2, %v5671_v57  ;;  %v575_v27 = vpop.f32.mrf.mxu0 }
 0x16f   :  { %v4200_v13 = vpop.eup %4199  ;;  %v2845_v39 = vsel %vm2842_vm7, %v2844_v59, %v2840_v10  ;;  %v961_v14 = vadd.f32 %v960_v29, %v575_v27  ;;  %3992 = vmatmul.msk.f32.gmra.mxu3 %vm320_vm2, %v1513_v33  ;;  %3840 = vmatmul.msk.f32.gmra.mxu1 %vm320_vm2, %v5505_v26  ;;  %v5709_v26 = vld [vmem:[%s7031_s0 + $0x190] sm:$0xff]  ;;  %v2874_v19 = vor.u32 1.1754944e-38, %v2873_v9 }
 0x170   :  { %v3591_v16 = vmul.f32 %v2845_v39, %v5549_v63  ;;  %v2848_v8 = vmul.f32 %v4200_v13, %v5646_v46  ;;  %v5702_v53 = vadd.f32 %v5699_v18, %v2058_v12  ;;  %vm2853_vm9 = vweird.f32 %v4200_v13 }
 0x171   :  { %v1212_v21 = vpop.f32.mrf.mxu2  ;;  %3766 = vmatmul.msk.f32.gmra.mxu0 %vm320_vm2, %v5597_v32  ;;  %v2858_v32 = vand.u32 2147483648, %v5646_v46  ;;  %v272_v43 = vrot.slane %v5709_v26, 1  ;;  %v1516_v34 = vrot.slane %v5709_v26, 2  ;;  %vm2854_vm12 = vmor %vm2852_vm10, %vm2853_vm9  ;;  %v2871_v46 = vand.u32 2147483647, %v5666_v52 }
 0x172   :  { %v4202_v63 = vpop.eup %4201  ;;  %3665 = vst.msk [vmem:[%s7034_s4 + $0xc0] sm:$0xff] %vm3640_vm8, %v3591_v16  ;;  %v2849_v49 = vsub.f32 1.0, %v2848_v8  ;;  %v4048_v20 = vmul.f32 -1.442695, %v5702_v53  ;;  %v1373_v62 = vadd.f32 %v1212_v21, %v961_v14  ;;  %v1821_v3 = vpop.f32.mrf.mxu3 }
 0x173   :  { %v4204_v17 = vpop.eup %4203  ;;  %v5718_v25 = vadd.f32 1.0, %v4202_v63  ;;  %v2859_v40 = vor.u32 1.1754944e-38, %v2858_v32  ;;  %v5748_v48 = vsel %vm172_vm1, %v270_v7, %v272_v43  ;;  %v1517_v59 = vsel %vm1420_vm3, %v1514_v15, %v1516_v34 }
 0x174   :  { %v2850_v44 = vmul.f32 %v4200_v13, %v2849_v49  ;;  %v2863_v28 = vmul.f32 %v4204_v17, %v5666_v52  ;;  %4205 = vpow2.f32 %v4048_v20  ;;  %v963_v30 = vpop.f32.mrf.mxu1  ;;  %v1982_v38 = vadd.f32 %v1821_v3, %v1373_v62 }
 0x175   :  { %4207 = vrcp.f32 %v5718_v25  ;;  %vm2868_vm13 = vweird.f32 %v4204_v17  ;;  %vm2872_vm0 = vcmp.eq.f32.partialorder %v2871_v46, 8.507059e+37  ;;  %v2888_v16 = vand.u32 2147483648, %v5718_v25 }
 0x176   :  { %v2851_v45 = vadd.f32 %v4200_v13, %v2850_v44  ;;  %v2864_v54 = vsub.f32 1.0, %v2863_v28  ;;  %3917 = vmatmul.msk.f32.gmra.mxu2 %vm320_vm2, %v5721_v4  ;;  %v578_v47 = vpop.f32.mrf.mxu0  ;;  %v2059_v36 = vmul.f32 %v5684_v11, %v1982_v38  ;;  %vm2869_vm15 = vmor %vm2867_vm14, %vm2868_vm13  ;;  %v2886_v49 = vand.u32 2147483647, %v5718_v25 }
 0x177   :  { %v964_v41 = vadd.f32 %v963_v30, %v578_v47  ;;  %3993 = vmatmul.msk.f32.gmra.mxu3 %vm320_vm2, %v1515_v60  ;;  %3841 = vmatmul.msk.f32.gmra.mxu1 %vm320_vm2, %v5559_v31  ;;  %vm2882_vm5 = vweird.f32 %v5718_v25  ;;  %v2889_v60 = vor.u32 1.1754944e-38, %v2888_v16 }
 0x178   :  { %v2855_v58 = vsel %vm2854_vm12, %v4200_v13, %v2851_v45  ;;  %v2865_v0 = vmul.f32 %v4204_v17, %v2864_v54  ;;  %v5753_v22 = vadd.f32 %v5699_v18, %v2059_v36  ;;  %vm2887_vm7 = vcmp.eq.f32.partialorder %v2886_v49, 8.507059e+37 }
 0x179   :  { %v2860_v42 = vsel %vm5729_vm11, %v2859_v40, %v2855_v58  ;;  %v1215_v55 = vpop.f32.mrf.mxu2  ;;  %3767 = vmatmul.msk.f32.gmra.mxu0 %vm320_vm2, %v5633_v50 }
 0x17a   :  { %v4206_v51 = vpop.eup %4205  ;;  %v3592_v31 = vmul.f32 %v2860_v42, %v5592_v6  ;;  %v2866_v61 = vadd.f32 %v4204_v17, %v2865_v0  ;;  %v1824_v33 = vpop.f32.mrf.mxu3  ;;  %v1374_v50 = vadd.f32 %v1215_v55, %v964_v41  ;;  %v5763_v6 = vld [vmem:[%s7031_s0 + $0x198] sm:$0xff]  ;;  %v4049_v12 = vmul.f32 -1.442695, %v5753_v22 }
 0x17b   :  { %v4208_v1 = vpop.eup %4207  ;;  %v5755_v29 = vadd.f32 1.0, %v4206_v51  ;;  %v274_v15 = vrot.slane %v5763_v6, 1  ;;  %v1518_v63 = vrot.slane %v5763_v6, 2 }
 0x17c   :  { %3666 = vst.msk [vmem:[%s7034_s4 + $0xc8] sm:$0xff] %vm3640_vm8, %v3592_v31  ;;  %v2870_v52 = vsel %vm2869_vm15, %v4204_v17, %v2866_v61  ;;  %v2878_v10 = vmul.f32 %v4208_v1, %v5718_v25  ;;  %v966_v27 = vpop.f32.mrf.mxu1  ;;  %v1983_v8 = vadd.f32 %v1824_v33, %v1374_v50  ;;  %vm2883_vm4 = vweird.f32 %v4208_v1  ;;  %v5793_v17 = vld [vmem:[%s7031_s0 + $0x1a0] sm:$0xff] }
 0x17d   :  { %v2875_v13 = vsel %vm2872_vm0, %v2874_v19, %v2870_v52  ;;  %4209 = vrcp.f32 %v5755_v29  ;;  %vm2884_vm6 = vmor %vm2882_vm5, %vm2883_vm4  ;;  %v1519_v25 = vsel %vm1420_vm3, %v1516_v34, %v1518_v63  ;;  %v276_v46 = vrot.slane %v5793_v17, 1 }
 0x17e   :  { %v3593_v39 = vmul.f32 %v2875_v13, %v5623_v5  ;;  %v2879_v14 = vsub.f32 1.0, %v2878_v10  ;;  %4211 = vpow2.f32 %v4049_v12  ;;  %3918 = vmatmul.msk.f32.gmra.mxu2 %vm320_vm2, %v5748_v48  ;;  %v581_v7 = vpop.f32.mrf.mxu0  ;;  %v2060_v2 = vmul.f32 %v5684_v11, %v1983_v8 }
 0x17f   :  { %v967_v21 = vadd.f32 %v966_v27, %v581_v7  ;;  %3994 = vmatmul.msk.f32.gmra.mxu3 %vm320_vm2, %v1517_v59  ;;  %3842 = vmatmul.msk.f32.gmra.mxu1 %vm320_vm2, %v5589_v23  ;;  %v1520_v58 = vrot.slane %v5793_v17, 2  ;;  %v2901_v0 = vand.u32 2147483647, %v5755_v29  ;;  %v2903_v36 = vand.u32 2147483648, %v5755_v29 }
 0x180   :  { %3667 = vst.msk [vmem:[%s7034_s4 + $0xd0] sm:$0xff] %vm3640_vm8, %v3593_v39  ;;  %v2880_v5 = vmul.f32 %v4208_v1, %v2879_v14  ;;  %v5796_v44 = vadd.f32 %v5699_v18, %v2060_v2  ;;  %vm2897_vm10 = vweird.f32 %v5755_v29  ;;  %v5837_v19 = vsel %vm172_vm1, %v274_v15, %v276_v46 }
 0x181   :  { %v1218_v20 = vpop.f32.mrf.mxu2  ;;  %3768 = vmatmul.msk.f32.gmra.mxu0 %vm320_vm2, %v5671_v57  ;;  %v5801_v57 = vsel %vm172_vm1, %v272_v43, %v274_v15  ;;  %v1521_v50 = vsel %vm1420_vm3, %v1518_v63, %v1520_v58  ;;  %vm2902_vm12 = vcmp.eq.f32.partialorder %v2901_v0, 8.507059e+37 }
 0x182   :  { %v2881_v62 = vadd.f32 %v4208_v1, %v2880_v5  ;;  %v1375_v23 = vadd.f32 %v1218_v20, %v967_v21  ;;  %v1827_v3 = vpop.f32.mrf.mxu3  ;;  %v4050_v40 = vmul.f32 -1.442695, %v5796_v44 }
 0x183   :  { %v4210_v32 = vpop.eup %4209 }
 0x184   :  { %v4212_v28 = vpop.eup %4211  ;;  %v2885_v30 = vsel %vm2884_vm6, %v4208_v1, %v2881_v62  ;;  %v2893_v45 = vmul.f32 %v4210_v32, %v5755_v29  ;;  %v1984_v35 = vadd.f32 %v1827_v3, %v1375_v23  ;;  %v969_v54 = vpop.f32.mrf.mxu1  ;;  %vm2898_vm9 = vweird.f32 %v4210_v32  ;;  %v5843_v29 = vld [vmem:[%s7031_s0 + $0x1a8] sm:$0xff] }
 0x185   :  { %v2890_v38 = vsel %vm2887_vm7, %v2889_v60, %v2885_v30  ;;  %v5807_v47 = vadd.f32 1.0, %v4212_v28  ;;  %vm2899_vm11 = vmor %vm2897_vm10, %vm2898_vm9  ;;  %v2904_v1 = vor.u32 1.1754944e-38, %v2903_v36  ;;  %v278_v8 = vrot.slane %v5843_v29, 1 }
 0x186   :  { %v3594_v43 = vmul.f32 %v2890_v38, %v5658_v56  ;;  %v2894_v9 = vsub.f32 1.0, %v2893_v45  ;;  %v2061_v41 = vmul.f32 %v5684_v11, %v1984_v35  ;;  %3919 = vmatmul.msk.f32.gmra.mxu2 %vm320_vm2, %v5801_v57  ;;  %v584_v34 = vpop.f32.mrf.mxu0  ;;  %v5882_v45 = vld [vmem:[%s7031_s0 + $0x1b0] sm:$0xff] }
 0x187   :  { %4213 = vrcp.f32 %v5807_v47  ;;  %3995 = vmatmul.msk.f32.gmra.mxu3 %vm320_vm2, %v1519_v25  ;;  %3843 = vmatmul.msk.f32.gmra.mxu1 %vm320_vm2, %v5639_v37  ;;  %v970_v55 = vadd.f32 %v969_v54, %v584_v34  ;;  %v2916_v5 = vand.u32 2147483647, %v5807_v47  ;;  %v2918_v49 = vand.u32 2147483648, %v5807_v47 }
 0x188   :  { %3668 = vst.msk [vmem:[%s7034_s4 + $0xd8] sm:$0xff] %vm3640_vm8, %v3594_v43  ;;  %v2895_v56 = vmul.f32 %v4210_v32, %v2894_v9  ;;  %4215 = vpow2.f32 %v4050_v40  ;;  %v5827_v42 = vadd.f32 %v5699_v18, %v2061_v41  ;;  %v5875_v60 = vsel %vm172_vm1, %v276_v46, %v278_v8 }
 0x189   :  { %v1221_v51 = vpop.f32.mrf.mxu2  ;;  %3769 = vmatmul.msk.f32.gmra.mxu0 %vm320_vm2, %v5721_v4  ;;  %vm2912_vm14 = vweird.f32 %v5807_v47  ;;  %v2919_v35 = vor.u32 1.1754944e-38, %v2918_v49  ;;  %vm2917_vm0 = vcmp.eq.f32.partialorder %v2916_v5, 8.507059e+37  ;;  %v280_v9 = vrot.slane %v5882_v45, 1 }
 0x18a   :  { %v2896_v31 = vadd.f32 %v4210_v32, %v2895_v56  ;;  %v4051_v37 = vmul.f32 -1.442695, %v5827_v42  ;;  %v1376_v61 = vadd.f32 %v1221_v51, %v970_v55  ;;  %v1830_v33 = vpop.f32.mrf.mxu3  ;;  %v1524_v41 = vrot.slane %v5882_v45, 2  ;;  %v5903_v56 = vld [vmem:[%s7031_s0 + $0x1b8] sm:$0xff] }
 0x18c   :  { %v2900_v59 = vsel %vm2899_vm11, %v4210_v32, %v2896_v31  ;;  %4217 = vpow2.f32 %v4051_v37  ;;  %v1985_v4 = vadd.f32 %v1830_v33, %v1376_v61  ;;  %v972_v52 = vpop.f32.mrf.mxu1 }
 0x18d   :  { %v4214_v10 = vpop.eup %4213  ;;  %v2905_v12 = vsel %vm2902_vm12, %v2904_v1, %v2900_v59  ;;  %v5915_v1 = vsel %vm172_vm1, %v278_v8, %v280_v9 }
 0x18e   :  { %v4216_v27 = vpop.eup %4215  ;;  %v3595_v13 = vmul.f32 %v2905_v12, %v5702_v53  ;;  %v2908_v39 = vmul.f32 %v4214_v10, %v5807_v47  ;;  %v2062_v14 = vmul.f32 %v5684_v11, %v1985_v4  ;;  %3920 = vmatmul.msk.f32.gmra.mxu2 %vm320_vm2, %v5837_v19  ;;  %v587_v7 = vpop.f32.mrf.mxu0  ;;  %v1522_v53 = vrot.slane %v5843_v29, 2 }
 0x18f   :  { %v5850_v15 = vadd.f32 1.0, %v4216_v27  ;;  %v973_v16 = vadd.f32 %v972_v52, %v587_v7  ;;  %3996 = vmatmul.msk.f32.gmra.mxu3 %vm320_vm2, %v1521_v50  ;;  %3844 = vmatmul.msk.f32.gmra.mxu1 %vm320_vm2, %v5678_v24  ;;  %vm2913_vm13 = vweird.f32 %v4214_v10  ;;  %v1526_v12 = vrot.slane %v5903_v56, 2 }
 0x190   :  { %3669 = vst.msk [vmem:[%s7034_s4 + $0xe0] sm:$0xff] %vm3640_vm8, %v3595_v13  ;;  %v2909_v21 = vsub.f32 1.0, %v2908_v39  ;;  %v5862_v63 = vadd.f32 %v5699_v18, %v2062_v14  ;;  %v1523_v25 = vsel %vm1420_vm3, %v1520_v58, %v1522_v53  ;;  %vm2914_vm15 = vmor %vm2912_vm14, %vm2913_vm13  ;;  %v1525_v50 = vsel %vm1420_vm3, %v1522_v53, %v1524_v41 }
 0x191   :  { %4219 = vrcp.f32 %v5850_v15  ;;  %v1224_v24 = vpop.f32.mrf.mxu2  ;;  %3770 = vmatmul.msk.f32.gmra.mxu0 %vm320_vm2, %v5748_v48  ;;  %v2931_v55 = vand.u32 2147483647, %v5850_v15  ;;  %vm2927_vm5 = vweird.f32 %v5850_v15 }
 0x192   :  { %v4218_v2 = vpop.eup %4217  ;;  %v2910_v20 = vmul.f32 %v4214_v10, %v2909_v21  ;;  %v4052_v62 = vmul.f32 -1.442695, %v5862_v63  ;;  %v1377_v23 = vadd.f32 %v1224_v24, %v973_v16  ;;  %v1833_v3 = vpop.f32.mrf.mxu3 }
 0x193   :  { %v5870_v32 = vadd.f32 1.0, %v4218_v2  ;;  %vm5923_vm6 = vcmp.eq.f32.partialorder %v2931_v55, 8.507059e+37 }
 0x194   :  { %v2911_v28 = vadd.f32 %v4214_v10, %v2910_v20  ;;  %4221 = vpow2.f32 %v4052_v62  ;;  %v1986_v48 = vadd.f32 %v1833_v3, %v1377_v23  ;;  %v975_v30 = vpop.f32.mrf.mxu1 }
 0x195   :  { %4223 = vrcp.f32 %v5870_v32  ;;  %v2948_v8 = vand.u32 2147483648, %v5870_v32  ;;  %vm2942_vm10 = vweird.f32 %v5870_v32 }
 0x196   :  { %v2915_v54 = vsel %vm2914_vm15, %v4214_v10, %v2911_v28  ;;  %v2063_v38 = vmul.f32 %v5684_v11, %v1986_v48  ;;  %3921 = vmatmul.msk.f32.gmra.mxu2 %vm320_vm2, %v5875_v60  ;;  %v590_v47 = vpop.f32.mrf.mxu0  ;;  %v282_v10 = vrot.slane %v5903_v56, 1 }
 0x197   :  { %v4220_v40 = vpop.eup %4219  ;;  %v2920_v46 = vsel %vm2917_vm0, %v2919_v35, %v2915_v54  ;;  %v976_v43 = vadd.f32 %v975_v30, %v590_v47  ;;  %3997 = vmatmul.msk.f32.gmra.mxu3 %vm320_vm2, %v1523_v25  ;;  %3845 = vmatmul.msk.f32.gmra.mxu1 %vm320_vm2, %v5709_v26  ;;  %v2949_v48 = vor.u32 1.1754944e-38, %v2948_v8  ;;  %v1527_v35 = vsel %vm1420_vm3, %v1524_v41, %v1526_v12 }
 0x198   :  { %v3596_v34 = vmul.f32 %v2920_v46, %v5753_v22  ;;  %v2923_v58 = vmul.f32 %v4220_v40, %v5850_v15  ;;  %v5896_v0 = vadd.f32 %v5699_v18, %v2063_v38  ;;  %vm2928_vm4 = vweird.f32 %v4220_v40 }
 0x199   :  { %v1227_v36 = vpop.f32.mrf.mxu2  ;;  %3771 = vmatmul.msk.f32.gmra.mxu0 %vm320_vm2, %v5801_v57  ;;  %v2933_v57 = vand.u32 2147483648, %v5850_v15  ;;  %vm2929_vm7 = vmor %vm2927_vm5, %vm2928_vm4  ;;  %v2946_v15 = vand.u32 2147483647, %v5870_v32  ;;  %v5942_v20 = vsel %vm172_vm1, %v280_v9, %v282_v10 }
 0x19a   :  { %v4222_v26 = vpop.eup %4221  ;;  %3670 = vst.msk [vmem:[%s7034_s4 + $0xe8] sm:$0xff] %vm3640_vm8, %v3596_v34  ;;  %v2924_v22 = vsub.f32 1.0, %v2923_v58  ;;  %v4053_v51 = vmul.f32 -1.442695, %v5896_v0  ;;  %v1378_v31 = vadd.f32 %v1227_v36, %v976_v43  ;;  %v1836_v37 = vpop.f32.mrf.mxu3 }
 0x19b   :  { %v4224_v61 = vpop.eup %4223  ;;  %v5912_v33 = vadd.f32 1.0, %v4222_v26  ;;  %v2934_v16 = vor.u32 1.1754944e-38, %v2933_v57  ;;  %vm2947_vm12 = vcmp.eq.f32.partialorder %v2946_v15, 8.507059e+37 }
 0x19c   :  { %v2925_v59 = vmul.f32 %v4220_v40, %v2924_v22  ;;  %v2938_v4 = vmul.f32 %v4224_v61, %v5870_v32  ;;  %4225 = vpow2.f32 %v4053_v51  ;;  %v978_v52 = vpop.f32.mrf.mxu1  ;;  %v1987_v14 = vadd.f32 %v1836_v37, %v1378_v31 }
 0x19d   :  { %4227 = vrcp.f32 %v5912_v33  ;;  %vm2943_vm9 = vweird.f32 %v4224_v61  ;;  %v2963_v34 = vand.u32 2147483648, %v5912_v33  ;;  %v2961_v22 = vand.u32 2147483647, %v5912_v33 }
 0x19e   :  { %v2926_v27 = vadd.f32 %v4220_v40, %v2925_v59  ;;  %v2939_v39 = vsub.f32 1.0, %v2938_v4  ;;  %3922 = vmatmul.msk.f32.gmra.mxu2 %vm320_vm2, %v5915_v1  ;;  %v593_v7 = vpop.f32.mrf.mxu0  ;;  %v2064_v49 = vmul.f32 %v5684_v11, %v1987_v14  ;;  %vm2944_vm11 = vmor %vm2942_vm10, %vm2943_vm9  ;;  %vm2957_vm14 = vweird.f32 %v5912_v33 }
 0x19f   :  { %v979_v53 = vadd.f32 %v978_v52, %v593_v7  ;;  %3998 = vmatmul.msk.f32.gmra.mxu3 %vm320_vm2, %v1525_v50  ;;  %3846 = vmatmul.msk.f32.gmra.mxu1 %vm320_vm2, %v5763_v6  ;;  %v2964_v50 = vor.u32 1.1754944e-38, %v2963_v34  ;;  %vm2962_vm0 = vcmp.eq.f32.partialorder %v2961_v22, 8.507059e+37 }
 0x1a0   :  { %v2930_v21 = vsel %vm2929_vm7, %v4220_v40, %v2926_v27  ;;  %v2940_v5 = vmul.f32 %v4224_v61, %v2939_v39  ;;  %v5947_v3 = vadd.f32 %v5699_v18, %v2064_v49 }
 0x1a1   :  { %v2935_v24 = vsel %vm5923_vm6, %v2934_v16, %v2930_v21  ;;  %v1230_v2 = vpop.f32.mrf.mxu2  ;;  %3772 = vmatmul.msk.f32.gmra.mxu0 %vm320_vm2, %v5837_v19 }
 0x1a2   :  { %v4226_v62 = vpop.eup %4225  ;;  %v3597_v6 = vmul.f32 %v2935_v24, %v5796_v44  ;;  %v2941_v23 = vadd.f32 %v4224_v61, %v2940_v5  ;;  %v1839_v25 = vpop.f32.mrf.mxu3  ;;  %v1379_v19 = vadd.f32 %v1230_v2, %v979_v53  ;;  %v5957_v44 = vld [vmem:[%s7031_s0 + $0x1c0] sm:$0xff]  ;;  %v4054_v38 = vmul.f32 -1.442695, %v5947_v3 }
 0x1a3   :  { %v4228_v28 = vpop.eup %4227  ;;  %v5949_v30 = vadd.f32 1.0, %v4226_v62  ;;  %v284_v41 = vrot.slane %v5957_v44, 1  ;;  %v1528_v26 = vrot.slane %v5957_v44, 2 }
 0x1a4   :  { %3671 = vst.msk [vmem:[%s7034_s4 + $0xf0] sm:$0xff] %vm3640_vm8, %v3597_v6  ;;  %v2945_v32 = vsel %vm2944_vm11, %v4224_v61, %v2941_v23  ;;  %v2953_v54 = vmul.f32 %v4228_v28, %v5912_v33  ;;  %v981_v47 = vpop.f32.mrf.mxu1  ;;  %v1988_v58 = vadd.f32 %v1839_v25, %v1379_v19  ;;  %vm2958_vm13 = vweird.f32 %v4228_v28  ;;  %v5987_v61 = vld [vmem:[%s7031_s0 + $0x1c8] sm:$0xff] }
 0x1a5   :  { %v2950_v40 = vsel %vm2947_vm12, %v2949_v48, %v2945_v32  ;;  %4229 = vrcp.f32 %v5949_v30  ;;  %vm2959_vm15 = vmor %vm2957_vm14, %vm2958_vm13  ;;  %v1529_v33 = vsel %vm1420_vm3, %v1526_v12, %v1528_v26  ;;  %v286_v15 = vrot.slane %v5987_v61, 1 }
 0x1a6   :  { %v3598_v46 = vmul.f32 %v2950_v40, %v5827_v42  ;;  %v2954_v43 = vsub.f32 1.0, %v2953_v54  ;;  %4231 = vpow2.f32 %v4054_v38  ;;  %3923 = vmatmul.msk.f32.gmra.mxu2 %vm320_vm2, %v5942_v20  ;;  %v596_v9 = vpop.f32.mrf.mxu0  ;;  %v2065_v55 = vmul.f32 %v5684_v11, %v1988_v58 }
 0x1a7   :  { %v982_v36 = vadd.f32 %v981_v47, %v596_v9  ;;  %3999 = vmatmul.msk.f32.gmra.mxu3 %vm320_vm2, %v1527_v35  ;;  %3847 = vmatmul.msk.f32.gmra.mxu1 %vm320_vm2, %v5793_v17  ;;  %v1530_v21 = vrot.slane %v5987_v61, 2  ;;  %v2976_v5 = vand.u32 2147483647, %v5949_v30  ;;  %v2978_v49 = vand.u32 2147483648, %v5949_v30 }
 0x1a8   :  { %3672 = vst.msk [vmem:[%s7034_s4 + $0xf8] sm:$0xff] %vm3640_vm8, %v3598_v46  ;;  %v2955_v42 = vmul.f32 %v4228_v28, %v2954_v43  ;;  %v5990_v59 = vadd.f32 %v5699_v18, %v2065_v55  ;;  %vm2972_vm5 = vweird.f32 %v5949_v30  ;;  %v6031_v48 = vsel %vm172_vm1, %v284_v41, %v286_v15 }
 0x1a9   :  { %v1233_v51 = vpop.f32.mrf.mxu2  ;;  %3773 = vmatmul.msk.f32.gmra.mxu0 %vm320_vm2, %v5875_v60  ;;  %v5995_v60 = vsel %vm172_vm1, %v282_v10, %v284_v41  ;;  %v1531_v19 = vsel %vm1420_vm3, %v1528_v26, %v1530_v21  ;;  %vm2977_vm7 = vcmp.eq.f32.partialorder %v2976_v5, 8.507059e+37 }
 0x1aa   :  { %v2956_v31 = vadd.f32 %v4228_v28, %v2955_v42  ;;  %v1380_v17 = vadd.f32 %v1233_v51, %v982_v36  ;;  %v1842_v37 = vpop.f32.mrf.mxu3  ;;  %v4055_v16 = vmul.f32 -1.442695, %v5990_v59 }
 0x1ab   :  { %v4230_v57 = vpop.eup %4229 }
 0x1ac   :  { %v4232_v4 = vpop.eup %4231  ;;  %v2960_v52 = vsel %vm2959_vm15, %v4228_v28, %v2956_v31  ;;  %v2968_v27 = vmul.f32 %v4230_v57, %v5949_v30  ;;  %v1989_v13 = vadd.f32 %v1842_v37, %v1380_v17  ;;  %v984_v39 = vpop.f32.mrf.mxu1  ;;  %vm2973_vm4 = vweird.f32 %v4230_v57  ;;  %v6037_v30 = vld [vmem:[%s7031_s0 + $0x1d0] sm:$0xff] }
 0x1ad   :  { %v2965_v14 = vsel %vm2962_vm0, %v2964_v50, %v2960_v52  ;;  %v6001_v7 = vadd.f32 1.0, %v4232_v4  ;;  %vm2974_vm6 = vmor %vm2972_vm5, %vm2973_vm4  ;;  %v2979_v28 = vor.u32 1.1754944e-38, %v2978_v49  ;;  %v288_v58 = vrot.slane %v6037_v30, 1 }
 0x1ae   :  { %v3599_v10 = vmul.f32 %v2965_v14, %v5862_v63  ;;  %v2969_v8 = vsub.f32 1.0, %v2968_v27  ;;  %v2066_v53 = vmul.f32 %v5684_v11, %v1989_v13  ;;  %3924 = vmatmul.msk.f32.gmra.mxu2 %vm320_vm2, %v5995_v60  ;;  %v599_v12 = vpop.f32.mrf.mxu0  ;;  %v6076_v27 = vld [vmem:[%s7031_s0 + $0x1d8] sm:$0xff] }
 0x1af   :  { %4233 = vrcp.f32 %v6001_v7  ;;  %4000 = vmatmul.msk.f32.gmra.mxu3 %vm320_vm2, %v1529_v33  ;;  %3848 = vmatmul.msk.f32.gmra.mxu1 %vm320_vm2, %v5843_v29  ;;  %v985_v2 = vadd.f32 %v984_v39, %v599_v12  ;;  %v2991_v42 = vand.u32 2147483647, %v6001_v7  ;;  %v2993_v22 = vand.u32 2147483648, %v6001_v7 }
 0x1b0   :  { %3673 = vst.msk [vmem:[%s7034_s4 + $0x100] sm:$0xff] %vm3640_vm8, %v3599_v10  ;;  %v2970_v63 = vmul.f32 %v4230_v57, %v2969_v8  ;;  %4235 = vpow2.f32 %v4055_v16  ;;  %v6021_v24 = vadd.f32 %v5699_v18, %v2066_v53  ;;  %v6069_v50 = vsel %vm172_vm1, %v286_v15, %v288_v58 }
 0x1b1   :  { %v1236_v62 = vpop.f32.mrf.mxu2  ;;  %3774 = vmatmul.msk.f32.gmra.mxu0 %vm320_vm2, %v5915_v1  ;;  %vm2987_vm10 = vweird.f32 %v6001_v7  ;;  %v2994_v13 = vor.u32 1.1754944e-38, %v2993_v22  ;;  %vm2992_vm12 = vcmp.eq.f32.partialorder %v2991_v42, 8.507059e+37  ;;  %v290_v8 = vrot.slane %v6076_v27, 1 }
 0x1b2   :  { %v2971_v6 = vadd.f32 %v4230_v57, %v2970_v63  ;;  %v4056_v29 = vmul.f32 -1.442695, %v6021_v24  ;;  %v1381_v23 = vadd.f32 %v1236_v62, %v985_v2  ;;  %v1845_v25 = vpop.f32.mrf.mxu3  ;;  %v1534_v53 = vrot.slane %v6076_v27, 2  ;;  %v6097_v63 = vld [vmem:[%s7031_s0 + $0x1e0] sm:$0xff] }
 0x1b4   :  { %v2975_v35 = vsel %vm2974_vm6, %v4230_v57, %v2971_v6  ;;  %4237 = vpow2.f32 %v4056_v29  ;;  %v1990_v1 = vadd.f32 %v1845_v25, %v1381_v23  ;;  %v987_v32 = vpop.f32.mrf.mxu1 }
 0x1b5   :  { %v4234_v54 = vpop.eup %4233  ;;  %v2980_v38 = vsel %vm2977_vm7, %v2979_v28, %v2975_v35  ;;  %v6109_v28 = vsel %vm172_vm1, %v288_v58, %v290_v8 }
 0x1b6   :  { %v4236_v47 = vpop.eup %4235  ;;  %v3600_v40 = vmul.f32 %v2980_v38, %v5896_v0  ;;  %v2983_v46 = vmul.f32 %v4234_v54, %v6001_v7  ;;  %v2067_v43 = vmul.f32 %v5684_v11, %v1990_v1  ;;  %3925 = vmatmul.msk.f32.gmra.mxu2 %vm320_vm2, %v6031_v48  ;;  %v602_v9 = vpop.f32.mrf.mxu0  ;;  %v1532_v0 = vrot.slane %v6037_v30, 2 }
 0x1b7   :  { %v6044_v41 = vadd.f32 1.0, %v4236_v47  ;;  %v988_v34 = vadd.f32 %v987_v32, %v602_v9  ;;  %4001 = vmatmul.msk.f32.gmra.mxu3 %vm320_vm2, %v1531_v19  ;;  %3849 = vmatmul.msk.f32.gmra.mxu1 %vm320_vm2, %v5882_v45  ;;  %vm2988_vm9 = vweird.f32 %v4234_v54  ;;  %v1536_v38 = vrot.slane %v6097_v63, 2 }
 0x1b8   :  { %3674 = vst.msk [vmem:[%s7034_s4 + $0x108] sm:$0xff] %vm3640_vm8, %v3600_v40  ;;  %v2984_v36 = vsub.f32 1.0, %v2983_v46  ;;  %v6056_v26 = vadd.f32 %v5699_v18, %v2067_v43  ;;  %v1533_v33 = vsel %vm1420_vm3, %v1530_v21, %v1532_v0  ;;  %vm2989_vm11 = vmor %vm2987_vm10, %vm2988_vm9  ;;  %v1535_v19 = vsel %vm1420_vm3, %v1532_v0, %v1534_v53 }
 0x1b9   :  { %4239 = vrcp.f32 %v6044_v41  ;;  %v1239_v45 = vpop.f32.mrf.mxu2  ;;  %3775 = vmatmul.msk.f32.gmra.mxu0 %vm320_vm2, %v5942_v20  ;;  %v3006_v2 = vand.u32 2147483647, %v6044_v41  ;;  %vm3002_vm14 = vweird.f32 %v6044_v41 }
 0x1ba   :  { %v4238_v55 = vpop.eup %4237  ;;  %v2985_v51 = vmul.f32 %v4234_v54, %v2984_v36  ;;  %v4057_v31 = vmul.f32 -1.442695, %v6056_v26  ;;  %v1382_v17 = vadd.f32 %v1239_v45, %v988_v34  ;;  %v1848_v37 = vpop.f32.mrf.mxu3 }
 0x1bb   :  { %v6064_v57 = vadd.f32 1.0, %v4238_v55  ;;  %vm6117_vm15 = vcmp.eq.f32.partialorder %v3006_v2, 8.507059e+37 }
 0x1bc   :  { %v2986_v4 = vadd.f32 %v4234_v54, %v2985_v51  ;;  %4241 = vpow2.f32 %v4057_v31  ;;  %v1991_v20 = vadd.f32 %v1848_v37, %v1382_v17  ;;  %v990_v52 = vpop.f32.mrf.mxu1 }
 0x1bd   :  { %4243 = vrcp.f32 %v6064_v57  ;;  %v3023_v58 = vand.u32 2147483648, %v6064_v57  ;;  %vm3017_vm5 = vweird.f32 %v6064_v57 }
 0x1be   :  { %v2990_v39 = vsel %vm2989_vm11, %v4234_v54, %v2986_v4  ;;  %v2068_v14 = vmul.f32 %v5684_v11, %v1991_v20  ;;  %3926 = vmatmul.msk.f32.gmra.mxu2 %vm320_vm2, %v6069_v50  ;;  %v605_v7 = vpop.f32.mrf.mxu0  ;;  %v292_v54 = vrot.slane %v6097_v63, 1 }
 0x1bf   :  { %v4240_v16 = vpop.eup %4239  ;;  %v2995_v15 = vsel %vm2992_vm12, %v2994_v13, %v2990_v39  ;;  %v991_v10 = vadd.f32 %v990_v52, %v605_v7  ;;  %4002 = vmatmul.msk.f32.gmra.mxu3 %vm320_vm2, %v1533_v33  ;;  %3850 = vmatmul.msk.f32.gmra.mxu1 %vm320_vm2, %v5903_v56  ;;  %v3024_v20 = vor.u32 1.1754944e-38, %v3023_v58  ;;  %v1537_v13 = vsel %vm1420_vm3, %v1534_v53, %v1536_v38 }
 0x1c0   :  { %v3601_v12 = vmul.f32 %v2995_v15, %v5947_v3  ;;  %v2998_v21 = vmul.f32 %v4240_v16, %v6044_v41  ;;  %v6090_v5 = vadd.f32 %v5699_v18, %v2068_v14  ;;  %vm3003_vm13 = vweird.f32 %v4240_v16 }
 0x1c1   :  { %v1242_v49 = vpop.f32.mrf.mxu2  ;;  %3776 = vmatmul.msk.f32.gmra.mxu0 %vm320_vm2, %v5995_v60  ;;  %v3008_v60 = vand.u32 2147483648, %v6044_v41  ;;  %vm3004_vm0 = vmor %vm3002_vm14, %vm3003_vm13  ;;  %v3021_v41 = vand.u32 2147483647, %v6064_v57  ;;  %v6136_v51 = vsel %vm172_vm1, %v290_v8, %v292_v54 }
 0x1c2   :  { %v4242_v56 = vpop.eup %4241  ;;  %3675 = vst.msk [vmem:[%s7034_s4 + $0x110] sm:$0xff] %vm3640_vm8, %v3601_v12  ;;  %v2999_v3 = vsub.f32 1.0, %v2998_v21  ;;  %v4058_v62 = vmul.f32 -1.442695, %v6090_v5  ;;  %v1383_v6 = vadd.f32 %v1242_v49, %v991_v10  ;;  %v1851_v29 = vpop.f32.mrf.mxu3 }
 0x1c3   :  { %v4244_v23 = vpop.eup %4243  ;;  %v6106_v25 = vadd.f32 1.0, %v4242_v56  ;;  %v3009_v34 = vor.u32 1.1754944e-38, %v3008_v60  ;;  %vm3022_vm7 = vcmp.eq.f32.partialorder %v3021_v41, 8.507059e+37 }
 0x1c4   :  { %v3000_v35 = vmul.f32 %v4240_v16, %v2999_v3  ;;  %v3013_v1 = vmul.f32 %v4244_v23, %v6064_v57  ;;  %4245 = vpow2.f32 %v4058_v62  ;;  %v993_v32 = vpop.f32.mrf.mxu1  ;;  %v1992_v43 = vadd.f32 %v1851_v29, %v1383_v6 }
 0x1c5   :  { %4247 = vrcp.f32 %v6106_v25  ;;  %vm3018_vm4 = vweird.f32 %v4244_v23  ;;  %v3038_v12 = vand.u32 2147483648, %v6106_v25  ;;  %v3036_v3 = vand.u32 2147483647, %v6106_v25 }
 0x1c6   :  { %v3001_v47 = vadd.f32 %v4240_v16, %v3000_v35  ;;  %v3014_v46 = vsub.f32 1.0, %v3013_v1  ;;  %3927 = vmatmul.msk.f32.gmra.mxu2 %vm320_vm2, %v6109_v28  ;;  %v608_v9 = vpop.f32.mrf.mxu0  ;;  %v2069_v22 = vmul.f32 %v5684_v11, %v1992_v43  ;;  %vm3019_vm6 = vmor %vm3017_vm5, %vm3018_vm4  ;;  %vm3032_vm10 = vweird.f32 %v6106_v25 }
 0x1c7   :  { %v994_v0 = vadd.f32 %v993_v32, %v608_v9  ;;  %4003 = vmatmul.msk.f32.gmra.mxu3 %vm320_vm2, %v1535_v19  ;;  %3851 = vmatmul.msk.f32.gmra.mxu1 %vm320_vm2, %v5957_v44  ;;  %v3039_v19 = vor.u32 1.1754944e-38, %v3038_v12  ;;  %vm3037_vm12 = vcmp.eq.f32.partialorder %v3036_v3, 8.507059e+37 }
 0x1c8   :  { %v3005_v36 = vsel %vm3004_vm0, %v4240_v16, %v3001_v47  ;;  %v3015_v42 = vmul.f32 %v4244_v23, %v3014_v46  ;;  %v6141_v37 = vadd.f32 %v5699_v18, %v2069_v22 }
 0x1c9   :  { %v3010_v45 = vsel %vm6117_vm15, %v3009_v34, %v3005_v36  ;;  %v1245_v55 = vpop.f32.mrf.mxu2  ;;  %3777 = vmatmul.msk.f32.gmra.mxu0 %vm320_vm2, %v6031_v48 }
 0x1ca   :  { %v4246_v31 = vpop.eup %4245  ;;  %v3602_v44 = vmul.f32 %v3010_v45, %v5990_v59  ;;  %v3016_v17 = vadd.f32 %v4244_v23, %v3015_v42  ;;  %v1854_v33 = vpop.f32.mrf.mxu3  ;;  %v1384_v48 = vadd.f32 %v1245_v55, %v994_v0  ;;  %v6151_v59 = vld [vmem:[%s7031_s0 + $0x1e8] sm:$0xff]  ;;  %v4059_v14 = vmul.f32 -1.442695, %v6141_v37 }
 0x1cb   :  { %v4248_v4 = vpop.eup %4247  ;;  %v6143_v52 = vadd.f32 1.0, %v4246_v31  ;;  %v294_v53 = vrot.slane %v6151_v59, 1  ;;  %v1538_v56 = vrot.slane %v6151_v59, 2 }
 0x1cc   :  { %3676 = vst.msk [vmem:[%s7034_s4 + $0x118] sm:$0xff] %vm3640_vm8, %v3602_v44  ;;  %v3020_v57 = vsel %vm3019_vm6, %v4244_v23, %v3016_v17  ;;  %v3028_v39 = vmul.f32 %v4248_v4, %v6106_v25  ;;  %v996_v7 = vpop.f32.mrf.mxu1  ;;  %v1993_v21 = vadd.f32 %v1854_v33, %v1384_v48  ;;  %vm3033_vm9 = vweird.f32 %v4248_v4  ;;  %v6181_v23 = vld [vmem:[%s7031_s0 + $0x1f0] sm:$0xff] }
 0x1cd   :  { %v3025_v16 = vsel %vm3022_vm7, %v3024_v20, %v3020_v57  ;;  %4249 = vrcp.f32 %v6143_v52  ;;  %vm3034_vm11 = vmor %vm3032_vm10, %vm3033_vm9  ;;  %v1539_v25 = vsel %vm1420_vm3, %v1536_v38, %v1538_v56  ;;  %v296_v34 = vrot.slane %v6181_v23, 1 }
 0x1ce   :  { %v3603_v15 = vmul.f32 %v3025_v16, %v6021_v24  ;;  %v3029_v10 = vsub.f32 1.0, %v3028_v39  ;;  %4251 = vpow2.f32 %v4059_v14  ;;  %3928 = vmatmul.msk.f32.gmra.mxu2 %vm320_vm2, %v6136_v51  ;;  %v611_v8 = vpop.f32.mrf.mxu0  ;;  %v2070_v2 = vmul.f32 %v5684_v11, %v1993_v21 }
 0x1cf   :  { %v997_v49 = vadd.f32 %v996_v7, %v611_v8  ;;  %4004 = vmatmul.msk.f32.gmra.mxu3 %vm320_vm2, %v1537_v13  ;;  %3852 = vmatmul.msk.f32.gmra.mxu1 %vm320_vm2, %v5987_v61  ;;  %v1540_v0 = vrot.slane %v6181_v23, 2  ;;  %v3051_v36 = vand.u32 2147483647, %v6143_v52  ;;  %v3053_v42 = vand.u32 2147483648, %v6143_v52  ;;  %v6240_v13 = vld [vmem:[%s7031_s0 + $0x1f8] sm:$0xff] }
 0x1d0   :  { %3677 = vst.msk [vmem:[%s7034_s4 + $0x120] sm:$0xff] %vm3640_vm8, %v3603_v15  ;;  %v3030_v24 = vmul.f32 %v4248_v4, %v3029_v10  ;;  %v6184_v35 = vadd.f32 %v5699_v18, %v2070_v2  ;;  %vm3047_vm14 = vweird.f32 %v6143_v52  ;;  %v6247_v15 = vld [vmem:[%s7032_s2] ss:$0 sm:$0xff]  ;;  %v1542_v21 = vrot.slane %v6240_v13, 2 }
 0x1d1   :  { %v1248_v62 = vpop.f32.mrf.mxu2  ;;  %3778 = vmatmul.msk.f32.gmra.mxu0 %vm320_vm2, %v6069_v50  ;;  %v6191_v50 = vsel %vm172_vm1, %v292_v54, %v294_v53  ;;  %v3054_v33 = vor.u32 1.1754944e-38, %v3053_v42  ;;  %v1541_v20 = vsel %vm1420_vm3, %v1538_v56, %v1540_v0  ;;  %vm3052_vm0 = vcmp.eq.f32.partialorder %v3051_v36, 8.507059e+37 }
 0x1d2   :  { %v3031_v6 = vadd.f32 %v4248_v4, %v3030_v24  ;;  %v1385_v61 = vadd.f32 %v1248_v62, %v997_v49  ;;  %v1857_v29 = vpop.f32.mrf.mxu3  ;;  %v4060_v9 = vmul.f32 -1.442695, %v6184_v35 }
 0x1d3   :  { %v4250_v60 = vpop.eup %4249 }
 0x1d4   :  { %v4252_v1 = vpop.eup %4251  ;;  %v3035_v32 = vsel %vm3034_vm11, %v4248_v4, %v3031_v6  ;;  %v3043_v47 = vmul.f32 %v4250_v60, %v6143_v52  ;;  %v1994_v40 = vadd.f32 %v1857_v29, %v1385_v61  ;;  %v999_v46 = vpop.f32.mrf.mxu1  ;;  %vm3048_vm13 = vweird.f32 %v4250_v60 }
 0x1d5   :  { %v3040_v18 = vsel %vm3037_vm12, %v3039_v19, %v3035_v32  ;;  %v6197_v43 = vadd.f32 1.0, %v4252_v1  ;;  %vm3049_vm15 = vmor %vm3047_vm14, %vm3048_vm13  ;;  %v6234_v4 = vsel %vm172_vm1, %v294_v53, %v296_v34 }
 0x1d6   :  { %v3604_v54 = vmul.f32 %v3040_v18, %v6056_v26  ;;  %v3044_v41 = vsub.f32 1.0, %v3043_v47  ;;  %v2071_v58 = vmul.f32 %v5684_v11, %v1994_v40  ;;  %3929 = vmatmul.msk.f32.gmra.mxu2 %vm320_vm2, %v6191_v50  ;;  %v614_v38 = vpop.f32.mrf.mxu0  ;;  %v6219_v26 = vld [vmem:[%s7033_s3] ss:$0 sm:$0xff] }
 0x1d7   :  { %4253 = vrcp.f32 %v6197_v43  ;;  %4005 = vmatmul.msk.f32.gmra.mxu3 %vm320_vm2, %v1539_v25  ;;  %3853 = vmatmul.msk.f32.gmra.mxu1 %vm320_vm2, %v6037_v30  ;;  %v1000_v45 = vadd.f32 %v999_v46, %v614_v38  ;;  %v3066_v24 = vand.u32 2147483647, %v6197_v43  ;;  %v3068_v3 = vand.u32 2147483648, %v6197_v43  ;;  %v6284_v47 = vld [vmem:[%s7031_s0 + $0x200] sm:$0xff] }
 0x1d8   :  { %3678 = vst.msk [vmem:[%s7034_s4 + $0x128] sm:$0xff] %vm3640_vm8, %v3604_v54  ;;  %v3045_v11 = vmul.f32 %v4250_v60, %v3044_v41  ;;  %4255 = vpow2.f32 %v4060_v9  ;;  %v6222_v22 = vadd.f32 %v6219_v26, %v2071_v58  ;;  %v1543_v25 = vsel %vm1420_vm3, %v1540_v0, %v1542_v21 }
 0x1d9   :  { %v1251_v55 = vpop.f32.mrf.mxu2  ;;  %3779 = vmatmul.msk.f32.gmra.mxu0 %vm320_vm2, %v6109_v28  ;;  %vm3062_vm5 = vweird.f32 %v6197_v43  ;;  %v3069_v40 = vor.u32 1.1754944e-38, %v3068_v3  ;;  %vm3067_vm7 = vcmp.eq.f32.partialorder %v3066_v24, 8.507059e+37  ;;  %v300_v41 = vrot.slane %v6284_v47, 1 }
 0x1da   :  { %v3046_v30 = vadd.f32 %v4250_v60, %v3045_v11  ;;  %v4061_v31 = vmul.f32 -1.442695, %v6222_v22  ;;  %v1386_v44 = vadd.f32 %v1251_v55, %v1000_v45  ;;  %v1860_v17 = vpop.f32.mrf.mxu3  ;;  %v1544_v58 = vrot.slane %v6284_v47, 2  ;;  %v6305_v11 = vld [vmem:[%s7031_s0 + $0x208] sm:$0xff] }
 0x1dc   :  { %v3050_v28 = vsel %vm3049_vm15, %v4250_v60, %v3046_v30  ;;  %4257 = vpow2.f32 %v4061_v31  ;;  %v1995_v52 = vadd.f32 %v1860_v17, %v1386_v44  ;;  %v1002_v48 = vpop.f32.mrf.mxu1 }
 0x1dd   :  { %v4254_v57 = vpop.eup %4253  ;;  %v3055_v39 = vsel %vm3052_vm0, %v3054_v33, %v3050_v28 }
 0x1de   :  { %v4256_v14 = vpop.eup %4255  ;;  %v3605_v7 = vmul.f32 %v3055_v39, %v6090_v5  ;;  %v3058_v16 = vmul.f32 %v4254_v57, %v6197_v43  ;;  %v2072_v10 = vmul.f32 %v6247_v15, %v1995_v52  ;;  %3930 = vmatmul.msk.f32.gmra.mxu2 %vm320_vm2, %v6234_v4  ;;  %v617_v8 = vpop.f32.mrf.mxu0  ;;  %v298_v5 = vrot.slane %v6240_v13, 1 }
 0x1df   :  { %v6252_v53 = vadd.f32 1.0, %v4256_v14  ;;  %v1003_v12 = vadd.f32 %v1002_v48, %v617_v8  ;;  %4006 = vmatmul.msk.f32.gmra.mxu3 %vm320_vm2, %v1541_v20  ;;  %3854 = vmatmul.msk.f32.gmra.mxu1 %vm320_vm2, %v6076_v27  ;;  %vm3063_vm4 = vweird.f32 %v4254_v57  ;;  %v1545_v20 = vsel %vm1420_vm3, %v1542_v21, %v1544_v58 }
 0x1e0   :  { %3679 = vst.msk [vmem:[%s7034_s4 + $0x130] sm:$0xff] %vm3640_vm8, %v3605_v7  ;;  %v3059_v49 = vsub.f32 1.0, %v3058_v16  ;;  %v6264_v56 = vadd.f32 %v6219_v26, %v2072_v10  ;;  %v6277_v19 = vsel %vm172_vm1, %v296_v34, %v298_v5  ;;  %vm3064_vm6 = vmor %vm3062_vm5, %vm3063_vm4  ;;  %v6317_v33 = vsel %vm172_vm1, %v298_v5, %v300_v41 }
 0x1e1   :  { %4259 = vrcp.f32 %v6252_v53  ;;  %v1254_v27 = vpop.f32.mrf.mxu2  ;;  %3780 = vmatmul.msk.f32.gmra.mxu0 %vm320_vm2, %v6136_v51  ;;  %v3081_v45 = vand.u32 2147483647, %v6252_v53  ;;  %vm3077_vm10 = vweird.f32 %v6252_v53  ;;  %v1546_v39 = vrot.slane %v6305_v11, 2 }
 0x1e2   :  { %v4258_v2 = vpop.eup %4257  ;;  %v3060_v62 = vmul.f32 %v4254_v57, %v3059_v49  ;;  %v4062_v6 = vmul.f32 -1.442695, %v6264_v56  ;;  %v1387_v61 = vadd.f32 %v1254_v27, %v1003_v12  ;;  %v1863_v29 = vpop.f32.mrf.mxu3 }
 0x1e3   :  { %v6272_v60 = vadd.f32 1.0, %v4258_v2  ;;  %vm6325_vm11 = vcmp.eq.f32.partialorder %v3081_v45, 8.507059e+37 }
 0x1e4   :  { %v3061_v1 = vadd.f32 %v4254_v57, %v3060_v62  ;;  %4261 = vpow2.f32 %v4062_v6  ;;  %v1996_v51 = vadd.f32 %v1863_v29, %v1387_v61  ;;  %v1005_v32 = vpop.f32.mrf.mxu1 }
 0x1e5   :  { %4263 = vrcp.f32 %v6272_v60  ;;  %v3098_v5 = vand.u32 2147483648, %v6272_v60  ;;  %vm3092_vm14 = vweird.f32 %v6272_v60 }
 0x1e6   :  { %v3065_v46 = vsel %vm3064_vm6, %v4254_v57, %v3061_v1  ;;  %v2073_v18 = vmul.f32 %v6247_v15, %v1996_v51  ;;  %3931 = vmatmul.msk.f32.gmra.mxu2 %vm320_vm2, %v6277_v19  ;;  %v620_v43 = vpop.f32.mrf.mxu0  ;;  %v302_v57 = vrot.slane %v6305_v11, 1 }
 0x1e7   :  { %v4260_v9 = vpop.eup %4259  ;;  %v3070_v34 = vsel %vm3067_vm7, %v3069_v40, %v3065_v46  ;;  %v1006_v54 = vadd.f32 %v1005_v32, %v620_v43  ;;  %4007 = vmatmul.msk.f32.gmra.mxu3 %vm320_vm2, %v1543_v25  ;;  %3855 = vmatmul.msk.f32.gmra.mxu1 %vm320_vm2, %v6097_v63  ;;  %v3099_v51 = vor.u32 1.1754944e-38, %v3098_v5  ;;  %v1547_v40 = vsel %vm1420_vm3, %v1544_v58, %v1546_v39 }
 0x1e8   :  { %v3606_v38 = vmul.f32 %v3070_v34, %v6141_v37  ;;  %v3073_v0 = vmul.f32 %v4260_v9, %v6252_v53  ;;  %v6298_v36 = vadd.f32 %v6219_v26, %v2073_v18  ;;  %vm3078_vm9 = vweird.f32 %v4260_v9 }
 0x1e9   :  { %v1257_v42 = vpop.f32.mrf.mxu2  ;;  %3781 = vmatmul.msk.f32.gmra.mxu0 %vm320_vm2, %v6191_v50  ;;  %v3083_v50 = vand.u32 2147483648, %v6252_v53  ;;  %vm3079_vm12 = vmor %vm3077_vm10, %vm3078_vm9  ;;  %v3096_v53 = vand.u32 2147483647, %v6272_v60  ;;  %v6344_v62 = vsel %vm172_vm1, %v300_v41, %v302_v57 }
 0x1ea   :  { %v4262_v63 = vpop.eup %4261  ;;  %3680 = vst.msk [vmem:[%s7034_s4 + $0x138] sm:$0xff] %vm3640_vm8, %v3606_v38  ;;  %v3074_v37 = vsub.f32 1.0, %v3073_v0  ;;  %v4063_v55 = vmul.f32 -1.442695, %v6298_v36  ;;  %v1388_v30 = vadd.f32 %v1257_v42, %v1006_v54  ;;  %v1866_v31 = vpop.f32.mrf.mxu3 }
 0x1eb   :  { %v4264_v44 = vpop.eup %4263  ;;  %v6314_v17 = vadd.f32 1.0, %v4262_v63  ;;  %v3084_v12 = vor.u32 1.1754944e-38, %v3083_v50  ;;  %vm3097_vm0 = vcmp.eq.f32.partialorder %v3096_v53, 8.507059e+37 }
 0x1ec   :  { %v3075_v28 = vmul.f32 %v4260_v9, %v3074_v37  ;;  %v3088_v52 = vmul.f32 %v4264_v44, %v6272_v60  ;;  %4265 = vpow2.f32 %v4063_v55  ;;  %v1008_v48 = vpop.f32.mrf.mxu1  ;;  %v1997_v10 = vadd.f32 %v1866_v31, %v1388_v30 }
 0x1ed   :  { %4267 = vrcp.f32 %v6314_v17  ;;  %vm3093_vm13 = vweird.f32 %v4264_v44  ;;  %v3113_v38 = vand.u32 2147483648, %v6314_v17  ;;  %v3111_v37 = vand.u32 2147483647, %v6314_v17 }
 0x1ee   :  { %v3076_v14 = vadd.f32 %v4260_v9, %v3075_v28  ;;  %v3089_v16 = vsub.f32 1.0, %v3088_v52  ;;  %3932 = vmatmul.msk.f32.gmra.mxu2 %vm320_vm2, %v6317_v33  ;;  %v623_v8 = vpop.f32.mrf.mxu0  ;;  %v2074_v3 = vmul.f32 %v6247_v15, %v1997_v10  ;;  %vm3094_vm15 = vmor %vm3092_vm14, %vm3093_vm13  ;;  %vm3107_vm5 = vweird.f32 %v6314_v17 }
 0x1ef   :  { %v1009_v21 = vadd.f32 %v1008_v48, %v623_v8  ;;  %4008 = vmatmul.msk.f32.gmra.mxu3 %vm320_vm2, %v1545_v20  ;;  %3856 = vmatmul.msk.f32.gmra.mxu1 %vm320_vm2, %v6151_v59  ;;  %v3114_v20 = vor.u32 1.1754944e-38, %v3113_v38  ;;  %vm3112_vm7 = vcmp.eq.f32.partialorder %v3111_v37, 8.507059e+37 }
 0x1f0   :  { %v3080_v49 = vsel %vm3079_vm12, %v4260_v9, %v3076_v14  ;;  %v3090_v24 = vmul.f32 %v4264_v44, %v3089_v16  ;;  %v6349_v29 = vadd.f32 %v6219_v26, %v2074_v3 }
 0x1f1   :  { %v3085_v27 = vsel %vm6325_vm11, %v3084_v12, %v3080_v49  ;;  %v1260_v2 = vpop.f32.mrf.mxu2  ;;  %3782 = vmatmul.msk.f32.gmra.mxu0 %vm320_vm2, %v6234_v4 }
 0x1f2   :  { %v4266_v6 = vpop.eup %4265  ;;  %v3607_v59 = vmul.f32 %v3085_v27, %v6184_v35  ;;  %v3091_v61 = vadd.f32 %v4264_v44, %v3090_v24  ;;  %v1869_v25 = vpop.f32.mrf.mxu3  ;;  %v1389_v4 = vadd.f32 %v1260_v2, %v1009_v21  ;;  %v6359_v35 = vld [vmem:[%s7031_s0 + $0x210] sm:$0xff]  ;;  %v4064_v18 = vmul.f32 -1.442695, %v6349_v29 }
 0x1f3   :  { %v4268_v1 = vpop.eup %4267  ;;  %v6351_v32 = vadd.f32 1.0, %v4266_v6  ;;  %v304_v58 = vrot.slane %v6359_v35, 1  ;;  %v1548_v63 = vrot.slane %v6359_v35, 2 }
 0x1f4   :  { %3681 = vst.msk [vmem:[%s7034_s4 + $0x140] sm:$0xff] %vm3640_vm8, %v3607_v59  ;;  %v3095_v60 = vsel %vm3094_vm15, %v4264_v44, %v3091_v61  ;;  %v3103_v46 = vmul.f32 %v4268_v1, %v6314_v17  ;;  %v1011_v43 = vpop.f32.mrf.mxu1  ;;  %v1998_v0 = vadd.f32 %v1869_v25, %v1389_v4  ;;  %vm3108_vm4 = vweird.f32 %v4268_v1  ;;  %v6389_v44 = vld [vmem:[%s7031_s0 + $0x218] sm:$0xff] }
 0x1f5   :  { %v3100_v9 = vsel %vm3097_vm0, %v3099_v51, %v3095_v60  ;;  %4269 = vrcp.f32 %v6351_v32  ;;  %vm3109_vm6 = vmor %vm3107_vm5, %vm3108_vm4  ;;  %v1549_v17 = vsel %vm1420_vm3, %v1546_v39, %v1548_v63  ;;  %v306_v53 = vrot.slane %v6389_v44, 1 }
 0x1f6   :  { %v3608_v34 = vmul.f32 %v3100_v9, %v6222_v22  ;;  %v3104_v54 = vsub.f32 1.0, %v3103_v46  ;;  %4271 = vpow2.f32 %v4064_v18  ;;  %3933 = vmatmul.msk.f32.gmra.mxu2 %vm320_vm2, %v6344_v62  ;;  %v626_v41 = vpop.f32.mrf.mxu0  ;;  %v2075_v45 = vmul.f32 %v6247_v15, %v1998_v0 }
 0x1f7   :  { %v1012_v42 = vadd.f32 %v1011_v43, %v626_v41  ;;  %4009 = vmatmul.msk.f32.gmra.mxu3 %vm320_vm2, %v1547_v40  ;;  %3857 = vmatmul.msk.f32.gmra.mxu1 %vm320_vm2, %v6181_v23  ;;  %v1550_v49 = vrot.slane %v6389_v44, 2  ;;  %v3126_v24 = vand.u32 2147483647, %v6351_v32  ;;  %v3128_v3 = vand.u32 2147483648, %v6351_v32 }
 0x1f8   :  { %3682 = vst.msk [vmem:[%s7034_s4 + $0x148] sm:$0xff] %vm3640_vm8, %v3608_v34  ;;  %v3105_v22 = vmul.f32 %v4268_v1, %v3104_v54  ;;  %v6392_v28 = vadd.f32 %v6219_v26, %v2075_v45  ;;  %vm3122_vm10 = vweird.f32 %v6351_v32  ;;  %v6433_v51 = vsel %vm172_vm1, %v304_v58, %v306_v53 }
 0x1f9   :  { %v1263_v55 = vpop.f32.mrf.mxu2  ;;  %3783 = vmatmul.msk.f32.gmra.mxu0 %vm320_vm2, %v6277_v19  ;;  %v6397_v19 = vsel %vm172_vm1, %v302_v57, %v304_v58  ;;  %v1551_v4 = vsel %vm1420_vm3, %v1548_v63, %v1550_v49  ;;  %vm3127_vm12 = vcmp.eq.f32.partialorder %v3126_v24, 8.507059e+37 }
 0x1fa   :  { %v3106_v30 = vadd.f32 %v4268_v1, %v3105_v22  ;;  %v1390_v23 = vadd.f32 %v1263_v55, %v1012_v42  ;;  %v1872_v31 = vpop.f32.mrf.mxu3  ;;  %v4065_v12 = vmul.f32 -1.442695, %v6392_v28 }
 0x1fb   :  { %v4270_v50 = vpop.eup %4269 }
 0x1fc   :  { %v4272_v52 = vpop.eup %4271  ;;  %v3110_v48 = vsel %vm3109_vm6, %v4268_v1, %v3106_v30  ;;  %v3118_v14 = vmul.f32 %v4270_v50, %v6351_v32  ;;  %v1999_v7 = vadd.f32 %v1872_v31, %v1390_v23  ;;  %v1014_v16 = vpop.f32.mrf.mxu1  ;;  %vm3123_vm9 = vweird.f32 %v4270_v50  ;;  %v6439_v32 = vld [vmem:[%s7031_s0 + $0x220] sm:$0xff] }
 0x1fd   :  { %v3115_v10 = vsel %vm3112_vm7, %v3114_v20, %v3110_v48  ;;  %v6403_v8 = vadd.f32 1.0, %v4272_v52  ;;  %vm3124_vm11 = vmor %vm3122_vm10, %vm3123_vm9  ;;  %v3129_v1 = vor.u32 1.1754944e-38, %v3128_v3  ;;  %v308_v0 = vrot.slane %v6439_v32, 1 }
 0x1fe   :  { %v3609_v57 = vmul.f32 %v3115_v10, %v6264_v56  ;;  %v3119_v5 = vsub.f32 1.0, %v3118_v14  ;;  %v2076_v21 = vmul.f32 %v6247_v15, %v1999_v7  ;;  %3934 = vmatmul.msk.f32.gmra.mxu2 %vm320_vm2, %v6397_v19  ;;  %v629_v39 = vpop.f32.mrf.mxu0  ;;  %v6478_v14 = vld [vmem:[%s7031_s0 + $0x228] sm:$0xff] }
 0x1ff   :  { %4273 = vrcp.f32 %v6403_v8  ;;  %4010 = vmatmul.msk.f32.gmra.mxu3 %vm320_vm2, %v1549_v17  ;;  %3858 = vmatmul.msk.f32.gmra.mxu1 %vm320_vm2, %v6240_v13  ;;  %v1015_v2 = vadd.f32 %v1014_v16, %v629_v39  ;;  %v3141_v22 = vand.u32 2147483647, %v6403_v8  ;;  %v3143_v37 = vand.u32 2147483648, %v6403_v8 }
 0x200   :  { %3683 = vst.msk [vmem:[%s7034_s4 + $0x150] sm:$0xff] %vm3640_vm8, %v3609_v57  ;;  %v3120_v56 = vmul.f32 %v4270_v50, %v3119_v5  ;;  %4275 = vpow2.f32 %v4065_v12  ;;  %v6423_v27 = vadd.f32 %v6219_v26, %v2076_v21  ;;  %v6471_v20 = vsel %vm172_vm1, %v306_v53, %v308_v0 }
 0x201   :  { %v1266_v6 = vpop.f32.mrf.mxu2  ;;  %3784 = vmatmul.msk.f32.gmra.mxu0 %vm320_vm2, %v6317_v33  ;;  %vm3137_vm14 = vweird.f32 %v6403_v8  ;;  %v3144_v7 = vor.u32 1.1754944e-38, %v3143_v37  ;;  %vm3142_vm0 = vcmp.eq.f32.partialorder %v3141_v22, 8.507059e+37  ;;  %v310_v5 = vrot.slane %v6478_v14, 1 }
 0x202   :  { %v3121_v59 = vadd.f32 %v4270_v50, %v3120_v56  ;;  %v4066_v13 = vmul.f32 -1.442695, %v6423_v27  ;;  %v1391_v61 = vadd.f32 %v1266_v6, %v1015_v2  ;;  %v1875_v25 = vpop.f32.mrf.mxu3  ;;  %v1554_v21 = vrot.slane %v6478_v14, 2  ;;  %v6499_v56 = vld [vmem:[%s7031_s0 + $0x230] sm:$0xff] }
 0x204   :  { %v3125_v40 = vsel %vm3124_vm11, %v4270_v50, %v3121_v59  ;;  %4277 = vpow2.f32 %v4066_v13  ;;  %v2000_v33 = vadd.f32 %v1875_v25, %v1391_v61  ;;  %v1017_v60 = vpop.f32.mrf.mxu1 }
 0x205   :  { %v4274_v46 = vpop.eup %4273  ;;  %v3130_v18 = vsel %vm3127_vm12, %v3129_v1, %v3125_v40  ;;  %v6511_v1 = vsel %vm172_vm1, %v308_v0, %v310_v5 }
 0x206   :  { %v4276_v43 = vpop.eup %4275  ;;  %v3610_v9 = vmul.f32 %v3130_v18, %v6298_v36  ;;  %v3133_v34 = vmul.f32 %v4274_v46, %v6403_v8  ;;  %v2077_v54 = vmul.f32 %v6247_v15, %v2000_v33  ;;  %3935 = vmatmul.msk.f32.gmra.mxu2 %vm320_vm2, %v6433_v51  ;;  %v632_v41 = vpop.f32.mrf.mxu0  ;;  %v1552_v36 = vrot.slane %v6439_v32, 2 }
 0x207   :  { %v6446_v58 = vadd.f32 1.0, %v4276_v43  ;;  %v1018_v38 = vadd.f32 %v1017_v60, %v632_v41  ;;  %4011 = vmatmul.msk.f32.gmra.mxu3 %vm320_vm2, %v1551_v4  ;;  %3859 = vmatmul.msk.f32.gmra.mxu1 %vm320_vm2, %v6284_v47  ;;  %vm3138_vm13 = vweird.f32 %v4274_v46  ;;  %v1556_v18 = vrot.slane %v6499_v56, 2 }
 0x208   :  { %3684 = vst.msk [vmem:[%s7034_s4 + $0x158] sm:$0xff] %vm3640_vm8, %v3610_v9  ;;  %v3134_v42 = vsub.f32 1.0, %v3133_v34  ;;  %v6458_v63 = vadd.f32 %v6219_v26, %v2077_v54  ;;  %v1553_v17 = vsel %vm1420_vm3, %v1550_v49, %v1552_v36  ;;  %vm3139_vm15 = vmor %vm3137_vm14, %vm3138_vm13  ;;  %v1555_v4 = vsel %vm1420_vm3, %v1552_v36, %v1554_v21 }
 0x209   :  { %4279 = vrcp.f32 %v6446_v58  ;;  %v1269_v47 = vpop.f32.mrf.mxu2  ;;  %3785 = vmatmul.msk.f32.gmra.mxu0 %vm320_vm2, %v6344_v62  ;;  %v3156_v2 = vand.u32 2147483647, %v6446_v58  ;;  %vm3152_vm5 = vweird.f32 %v6446_v58 }
 0x20a   :  { %v4278_v45 = vpop.eup %4277  ;;  %v3135_v55 = vmul.f32 %v4274_v46, %v3134_v42  ;;  %v4067_v30 = vmul.f32 -1.442695, %v6458_v63  ;;  %v1392_v23 = vadd.f32 %v1269_v47, %v1018_v38  ;;  %v1878_v31 = vpop.f32.mrf.mxu3 }
 0x20b   :  { %v6466_v50 = vadd.f32 1.0, %v4278_v45  ;;  %vm6519_vm6 = vcmp.eq.f32.partialorder %v3156_v2, 8.507059e+37 }
 0x20c   :  { %v3136_v52 = vadd.f32 %v4274_v46, %v3135_v55  ;;  %4281 = vpow2.f32 %v4067_v30  ;;  %v2001_v62 = vadd.f32 %v1878_v31, %v1392_v23  ;;  %v1020_v48 = vpop.f32.mrf.mxu1 }
 0x20d   :  { %4283 = vrcp.f32 %v6466_v50  ;;  %v3173_v0 = vand.u32 2147483648, %v6466_v50  ;;  %vm3167_vm10 = vweird.f32 %v6466_v50 }
 0x20e   :  { %v3140_v16 = vsel %vm3139_vm15, %v4274_v46, %v3136_v52  ;;  %v2078_v10 = vmul.f32 %v6247_v15, %v2001_v62  ;;  %3936 = vmatmul.msk.f32.gmra.mxu2 %vm320_vm2, %v6471_v20  ;;  %v635_v8 = vpop.f32.mrf.mxu0  ;;  %v312_v46 = vrot.slane %v6499_v56, 1 }
 0x20f   :  { %v4280_v12 = vpop.eup %4279  ;;  %v3145_v53 = vsel %vm3142_vm0, %v3144_v7, %v3140_v16  ;;  %v1021_v57 = vadd.f32 %v1020_v48, %v635_v8  ;;  %4012 = vmatmul.msk.f32.gmra.mxu3 %vm320_vm2, %v1553_v17  ;;  %3860 = vmatmul.msk.f32.gmra.mxu1 %vm320_vm2, %v6305_v11  ;;  %v3174_v62 = vor.u32 1.1754944e-38, %v3173_v0  ;;  %v1557_v7 = vsel %vm1420_vm3, %v1554_v21, %v1556_v18 }
 0x210   :  { %v3611_v39 = vmul.f32 %v3145_v53, %v6349_v29  ;;  %v3148_v49 = vmul.f32 %v4280_v12, %v6446_v58  ;;  %v6492_v24 = vadd.f32 %v6219_v26, %v2078_v10  ;;  %vm3153_vm4 = vweird.f32 %v4280_v12 }
 0x211   :  { %v1272_v3 = vpop.f32.mrf.mxu2  ;;  %3786 = vmatmul.msk.f32.gmra.mxu0 %vm320_vm2, %v6397_v19  ;;  %v3158_v19 = vand.u32 2147483648, %v6446_v58  ;;  %vm3154_vm7 = vmor %vm3152_vm5, %vm3153_vm4  ;;  %v3171_v58 = vand.u32 2147483647, %v6466_v50  ;;  %v6538_v55 = vsel %vm172_vm1, %v310_v5, %v312_v46 }
 0x212   :  { %v4282_v11 = vpop.eup %4281  ;;  %3685 = vst.msk [vmem:[%s7034_s4 + $0x160] sm:$0xff] %vm3640_vm8, %v3611_v39  ;;  %v3149_v29 = vsub.f32 1.0, %v3148_v49  ;;  %v4068_v6 = vmul.f32 -1.442695, %v6492_v24  ;;  %v1393_v59 = vadd.f32 %v1272_v3, %v1021_v57  ;;  %v1881_v13 = vpop.f32.mrf.mxu3 }
 0x213   :  { %v4284_v61 = vpop.eup %4283  ;;  %v6508_v25 = vadd.f32 1.0, %v4282_v11  ;;  %v3159_v38 = vor.u32 1.1754944e-38, %v3158_v19  ;;  %vm3172_vm12 = vcmp.eq.f32.partialorder %v3171_v58, 8.507059e+37 }
 0x214   :  { %v3150_v40 = vmul.f32 %v4280_v12, %v3149_v29  ;;  %v3163_v33 = vmul.f32 %v4284_v61, %v6466_v50  ;;  %4285 = vpow2.f32 %v4068_v6  ;;  %v1023_v60 = vpop.f32.mrf.mxu1  ;;  %v2002_v54 = vadd.f32 %v1881_v13, %v1393_v59 }
 0x215   :  { %4287 = vrcp.f32 %v6508_v25  ;;  %vm3168_vm9 = vweird.f32 %v4284_v61  ;;  %v3188_v39 = vand.u32 2147483648, %v6508_v25  ;;  %v3186_v29 = vand.u32 2147483647, %v6508_v25 }
 0x216   :  { %v3151_v43 = vadd.f32 %v4280_v12, %v3150_v40  ;;  %v3164_v34 = vsub.f32 1.0, %v3163_v33  ;;  %3937 = vmatmul.msk.f32.gmra.mxu2 %vm320_vm2, %v6511_v1  ;;  %v638_v41 = vpop.f32.mrf.mxu0  ;;  %v2079_v37 = vmul.f32 %v6247_v15, %v2002_v54  ;;  %vm3169_vm11 = vmor %vm3167_vm10, %vm3168_vm9  ;;  %vm3182_vm14 = vweird.f32 %v6508_v25 }
 0x217   :  { %v1024_v36 = vadd.f32 %v1023_v60, %v638_v41  ;;  %4013 = vmatmul.msk.f32.gmra.mxu3 %vm320_vm2, %v1555_v4  ;;  %3861 = vmatmul.msk.f32.gmra.mxu1 %vm320_vm2, %v6359_v35  ;;  %v3189_v4 = vor.u32 1.1754944e-38, %v3188_v39  ;;  %vm3187_vm0 = vcmp.eq.f32.partialorder %v3186_v29, 8.507059e+37 }
 0x218   :  { %v3155_v42 = vsel %vm3154_vm7, %v4280_v12, %v3151_v43  ;;  %v3165_v22 = vmul.f32 %v4284_v61, %v3164_v34  ;;  %v6543_v31 = vadd.f32 %v6219_v26, %v2079_v37 }
 0x219   :  { %v3160_v47 = vsel %vm6519_vm6, %v3159_v38, %v3155_v42  ;;  %v1275_v45 = vpop.f32.mrf.mxu2  ;;  %3787 = vmatmul.msk.f32.gmra.mxu0 %vm320_vm2, %v6433_v51 }
 0x21a   :  { %v4286_v30 = vpop.eup %4285  ;;  %v3612_v35 = vmul.f32 %v3160_v47, %v6392_v28  ;;  %v3166_v23 = vadd.f32 %v4284_v61, %v3165_v22  ;;  %v1884_v17 = vpop.f32.mrf.mxu3  ;;  %v1394_v51 = vadd.f32 %v1275_v45, %v1024_v36  ;;  %v6553_v28 = vld [vmem:[%s7031_s0 + $0x238] sm:$0xff]  ;;  %v4069_v10 = vmul.f32 -1.442695, %v6543_v31 }
 0x21b   :  { %v4288_v52 = vpop.eup %4287  ;;  %v6545_v48 = vadd.f32 1.0, %v4286_v30  ;;  %v314_v21 = vrot.slane %v6553_v28, 1  ;;  %v1558_v11 = vrot.slane %v6553_v28, 2 }
 0x21c   :  { %3686 = vst.msk [vmem:[%s7034_s4 + $0x168] sm:$0xff] %vm3640_vm8, %v3612_v35  ;;  %v3170_v50 = vsel %vm3169_vm11, %v4284_v61, %v3166_v23  ;;  %v3178_v16 = vmul.f32 %v4288_v52, %v6508_v25  ;;  %v1026_v8 = vpop.f32.mrf.mxu1  ;;  %v2003_v49 = vadd.f32 %v1884_v17, %v1394_v51  ;;  %vm3183_vm13 = vweird.f32 %v4288_v52  ;;  %v6583_v61 = vld [vmem:[%s7031_s0 + $0x240] sm:$0xff] }
 0x21d   :  { %v3175_v12 = vsel %vm3172_vm12, %v3174_v62, %v3170_v50  ;;  %4289 = vrcp.f32 %v6545_v48  ;;  %vm3184_vm15 = vmor %vm3182_vm14, %vm3183_vm13  ;;  %v1559_v25 = vsel %vm1420_vm3, %v1556_v18, %v1558_v11  ;;  %v316_v58 = vrot.slane %v6583_v61, 1 }
 0x21e   :  { %v3613_v53 = vmul.f32 %v3175_v12, %v6423_v27  ;;  %v3179_v57 = vsub.f32 1.0, %v3178_v16  ;;  %4291 = vpow2.f32 %v4069_v10  ;;  %3938 = vmatmul.msk.f32.gmra.mxu2 %vm320_vm2, %v6538_v55  ;;  %v641_v5 = vpop.f32.mrf.mxu0  ;;  %v2080_v2 = vmul.f32 %v6247_v15, %v2003_v49 }
 0x21f   :  { %v1027_v3 = vadd.f32 %v1026_v8, %v641_v5  ;;  %4014 = vmatmul.msk.f32.gmra.mxu3 %vm320_vm2, %v1557_v7  ;;  %3862 = vmatmul.msk.f32.gmra.mxu1 %vm320_vm2, %v6389_v44  ;;  %v1560_v42 = vrot.slane %v6583_v61, 2  ;;  %v3201_v22 = vand.u32 2147483647, %v6545_v48  ;;  %v3203_v37 = vand.u32 2147483648, %v6545_v48 }
 0x220   :  { %3687 = vst.msk [vmem:[%s7034_s4 + $0x170] sm:$0xff] %vm3640_vm8, %v3613_v53  ;;  %v3180_v27 = vmul.f32 %v4288_v52, %v3179_v57  ;;  %v6586_v40 = vadd.f32 %v6219_v26, %v2080_v2  ;;  %vm3197_vm5 = vweird.f32 %v6545_v48  ;;  %v6627_v62 = vsel %vm172_vm1, %v314_v21, %v316_v58 }
 0x221   :  { %v1278_v6 = vpop.f32.mrf.mxu2  ;;  %3788 = vmatmul.msk.f32.gmra.mxu0 %vm320_vm2, %v6471_v20  ;;  %v6591_v20 = vsel %vm172_vm1, %v312_v46, %v314_v21  ;;  %v1561_v51 = vsel %vm1420_vm3, %v1558_v11, %v1560_v42  ;;  %vm3202_vm7 = vcmp.eq.f32.partialorder %v3201_v22, 8.507059e+37 }
 0x222   :  { %v3181_v59 = vadd.f32 %v4288_v52, %v3180_v27  ;;  %v1395_v44 = vadd.f32 %v1278_v6, %v1027_v3  ;;  %v1887_v13 = vpop.f32.mrf.mxu3  ;;  %v4070_v38 = vmul.f32 -1.442695, %v6586_v40 }
 0x223   :  { %v4290_v19 = vpop.eup %4289 }
 0x224   :  { %v4292_v33 = vpop.eup %4291  ;;  %v3185_v60 = vsel %vm3184_vm15, %v4288_v52, %v3181_v59  ;;  %v3193_v43 = vmul.f32 %v4290_v19, %v6545_v48  ;;  %v2004_v9 = vadd.f32 %v1887_v13, %v1395_v44  ;;  %v1029_v34 = vpop.f32.mrf.mxu1  ;;  %vm3198_vm4 = vweird.f32 %v4290_v19  ;;  %v6633_v48 = vld [vmem:[%s7031_s0 + $0x248] sm:$0xff] }
 0x225   :  { %v3190_v54 = vsel %vm3187_vm0, %v3189_v4, %v3185_v60  ;;  %v6597_v41 = vadd.f32 1.0, %v4292_v33  ;;  %vm3199_vm6 = vmor %vm3197_vm5, %vm3198_vm4  ;;  %v3204_v52 = vor.u32 1.1754944e-38, %v3203_v37  ;;  %v318_v49 = vrot.slane %v6633_v48, 1 }
 0x226   :  { %v3614_v46 = vmul.f32 %v3190_v54, %v6458_v63  ;;  %v3194_v0 = vsub.f32 1.0, %v3193_v43  ;;  %v2081_v36 = vmul.f32 %v6247_v15, %v2004_v9  ;;  %3939 = vmatmul.msk.f32.gmra.mxu2 %vm320_vm2, %v6591_v20  ;;  %v644_v18 = vpop.f32.mrf.mxu0  ;;  %v6672_v43 = vld [vmem:[%s7031_s0 + $0x250] sm:$0xff] }
 0x227   :  { %4293 = vrcp.f32 %v6597_v41  ;;  %4015 = vmatmul.msk.f32.gmra.mxu3 %vm320_vm2, %v1559_v25  ;;  %3863 = vmatmul.msk.f32.gmra.mxu1 %vm320_vm2, %v6439_v32  ;;  %v1030_v45 = vadd.f32 %v1029_v34, %v644_v18  ;;  %v3216_v27 = vand.u32 2147483647, %v6597_v41  ;;  %v3218_v29 = vand.u32 2147483648, %v6597_v41 }
 0x228   :  { %3688 = vst.msk [vmem:[%s7034_s4 + $0x178] sm:$0xff] %vm3640_vm8, %v3614_v46  ;;  %v3195_v63 = vmul.f32 %v4290_v19, %v3194_v0  ;;  %4295 = vpow2.f32 %v4070_v38  ;;  %v6617_v47 = vadd.f32 %v6219_v26, %v2081_v36  ;;  %v6665_v4 = vsel %vm172_vm1, %v316_v58, %v318_v49 }
 0x229   :  { %v1281_v30 = vpop.f32.mrf.mxu2  ;;  %3789 = vmatmul.msk.f32.gmra.mxu0 %vm320_vm2, %v6511_v1  ;;  %vm3212_vm10 = vweird.f32 %v6597_v41  ;;  %v3219_v9 = vor.u32 1.1754944e-38, %v3218_v29  ;;  %vm3217_vm12 = vcmp.eq.f32.partialorder %v3216_v27, 8.507059e+37  ;;  %v1097_v0 = vrot.slane %v6672_v43, 1 }
 0x22a   :  { %v3196_v35 = vadd.f32 %v4290_v19, %v3195_v63  ;;  %v4071_v32 = vmul.f32 -1.442695, %v6617_v47  ;;  %v1396_v23 = vadd.f32 %v1281_v30, %v1030_v45  ;;  %v1890_v17 = vpop.f32.mrf.mxu3  ;;  %v1564_v36 = vrot.slane %v6672_v43, 2  ;;  %v92_v63 = vld [vmem:[%s7031_s0 + $0x258] sm:$0x3] }
 0x22c   :  { %v3200_v7 = vsel %vm3199_vm6, %v4290_v19, %v3196_v35  ;;  %4297 = vpow2.f32 %v4071_v32  ;;  %v2005_v1 = vadd.f32 %v1890_v17, %v1396_v23  ;;  %v1032_v50 = vpop.f32.mrf.mxu1  ;;  %v1098_v17 = vsel %vm172_vm1, %v318_v49, %v1097_v0 }
 0x22d   :  { %v4294_v16 = vpop.eup %4293  ;;  %v3205_v10 = vsel %vm3202_vm7, %v3204_v52, %v3200_v7 }
 0x22e   :  { %v4296_v8 = vpop.eup %4295  ;;  %v3615_v12 = vmul.f32 %v3205_v10, %v6492_v24  ;;  %v3208_v53 = vmul.f32 %v4294_v16, %v6597_v41  ;;  %v2082_v57 = vmul.f32 %v6247_v15, %v2005_v1  ;;  %3940 = vmatmul.msk.f32.gmra.mxu2 %vm320_vm2, %v6627_v62  ;;  %v647_v5 = vpop.f32.mrf.mxu0  ;;  %v1562_v24 = vrot.slane %v6633_v48, 2 }
 0x22f   :  { %v6640_v21 = vadd.f32 1.0, %v4296_v8  ;;  %v1033_v39 = vadd.f32 %v1032_v50, %v647_v5  ;;  %4016 = vmatmul.msk.f32.gmra.mxu3 %vm320_vm2, %v1561_v51  ;;  %3864 = vmatmul.msk.f32.gmra.mxu1 %vm320_vm2, %v6478_v14  ;;  %vm3213_vm9 = vweird.f32 %v4294_v16  ;;  %v1099_v50 = vrot.slane %v92_v63, 1 }
 0x230   :  { %3689 = vst.msk [vmem:[%s7034_s4 + $0x180] sm:$0xff] %vm3640_vm8, %v3615_v12  ;;  %v3209_v3 = vsub.f32 1.0, %v3208_v53  ;;  %v6652_v11 = vadd.f32 %v6219_v26, %v2082_v57  ;;  %v1563_v25 = vsel %vm1420_vm3, %v1560_v42, %v1562_v24  ;;  %vm3214_vm11 = vmor %vm3212_vm10, %vm3213_vm9  ;;  %v1565_v52 = vsel %vm1420_vm3, %v1562_v24, %v1564_v36 }
 0x231   :  { %4299 = vrcp.f32 %v6640_v21  ;;  %v1284_v14 = vpop.f32.mrf.mxu2  ;;  %3790 = vmatmul.msk.f32.gmra.mxu0 %vm320_vm2, %v6538_v55  ;;  %v3231_v45 = vand.u32 2147483647, %v6640_v21  ;;  %vm3227_vm14 = vweird.f32 %v6640_v21  ;;  %v1566_v48 = vrot.slane %v92_v63, 2 }
 0x232   :  { %v4298_v2 = vpop.eup %4297  ;;  %v3210_v6 = vmul.f32 %v4294_v16, %v3209_v3  ;;  %v4072_v59 = vmul.f32 -1.442695, %v6652_v11  ;;  %v1397_v44 = vadd.f32 %v1284_v14, %v1033_v39  ;;  %v1893_v13 = vpop.f32.mrf.mxu3  ;;  %v1100_v14 = vsel %vm172_vm1, %v1097_v0, %v1099_v50 }
 0x233   :  { %v6660_v19 = vadd.f32 1.0, %v4298_v2  ;;  %vm6707_vm15 = vcmp.eq.f32.partialorder %v3231_v45, 8.507059e+37 }
 0x234   :  { %v3211_v33 = vadd.f32 %v4294_v16, %v3210_v6  ;;  %4301 = vpow2.f32 %v4072_v59  ;;  %v2006_v55 = vadd.f32 %v1893_v13, %v1397_v44  ;;  %v1035_v60 = vpop.f32.mrf.mxu1 }
 0x235   :  { %4303 = vrcp.f32 %v6660_v19  ;;  %v3246_v5 = vand.u32 2147483647, %v6660_v19  ;;  %vm3242_vm5 = vweird.f32 %v6660_v19 }
 0x236   :  { %v3215_v34 = vsel %vm3214_vm11, %v4294_v16, %v3211_v33  ;;  %v2083_v54 = vmul.f32 %v6247_v15, %v2006_v55  ;;  %3941 = vmatmul.msk.f32.gmra.mxu2 %vm320_vm2, %v6665_v4  ;;  %v650_v41 = vpop.f32.mrf.mxu0 }
 0x237   :  { %v4300_v38 = vpop.eup %4299  ;;  %v3220_v58 = vsel %vm3217_vm12, %v3219_v9, %v3215_v34  ;;  %v1036_v46 = vadd.f32 %v1035_v60, %v650_v41  ;;  %4017 = vmatmul.msk.f32.gmra.mxu3 %vm320_vm2, %v1563_v25  ;;  %3865 = vmatmul.msk.f32.gmra.mxu1 %vm320_vm2, %v6499_v56  ;;  %vm3247_vm1 = vcmp.eq.f32.partialorder %v3246_v5, 8.507059e+37 }
 0x238   :  { %v3616_v18 = vmul.f32 %v3220_v58, %v6543_v31  ;;  %v3223_v42 = vmul.f32 %v4300_v38, %v6640_v21  ;;  %v6686_v22 = vadd.f32 %v6219_v26, %v2083_v54  ;;  %vm3228_vm13 = vweird.f32 %v4300_v38 }
 0x239   :  { %v1287_v37 = vpop.f32.mrf.mxu2  ;;  %3791 = vmatmul.msk.f32.gmra.mxu0 %vm320_vm2, %v6591_v20  ;;  %v3233_v20 = vand.u32 2147483648, %v6640_v21  ;;  %vm3229_vm0 = vmor %vm3227_vm14, %vm3228_vm13  ;;  %v3248_v21 = vand.u32 2147483648, %v6660_v19 }
 0x23a   :  { %v4302_v56 = vpop.eup %4301  ;;  %3690 = vst.msk [vmem:[%s7034_s4 + $0x188] sm:$0xff] %vm3640_vm8, %v3616_v18  ;;  %v3224_v31 = vsub.f32 1.0, %v3223_v42  ;;  %v4073_v26 = vmul.f32 -1.442695, %v6686_v22  ;;  %v1398_v30 = vadd.f32 %v1287_v37, %v1036_v46  ;;  %v1896_v35 = vpop.f32.mrf.mxu3 }
 0x23b   :  { %v4304_v32 = vpop.eup %4303  ;;  %v6700_v23 = vadd.f32 1.0, %v4302_v56  ;;  %v3234_v57 = vor.u32 1.1754944e-38, %v3233_v20 }
 0x23c   :  { %v3225_v51 = vmul.f32 %v4300_v38, %v3224_v31  ;;  %v3238_v7 = vmul.f32 %v4304_v32, %v6660_v19  ;;  %4305 = vpow2.f32 %v4073_v26  ;;  %v1038_v1 = vpop.f32.mrf.mxu1  ;;  %v2007_v12 = vadd.f32 %v1896_v35, %v1398_v30 }
 0x23d   :  { %4307 = vrcp.f32 %v6700_v23  ;;  %vm3243_vm4 = vweird.f32 %v4304_v32  ;;  %v3261_v0 = vand.u32 2147483647, %v6700_v23  ;;  %vm3257_vm7 = vweird.f32 %v6700_v23 }
 0x23e   :  { %v3226_v16 = vadd.f32 %v4300_v38, %v3225_v51  ;;  %v3239_v8 = vsub.f32 1.0, %v3238_v7  ;;  %3942 = vmatmul.msk.f32.gmra.mxu2 %vm320_vm2, %v1098_v17  ;;  %v653_v53 = vpop.f32.mrf.mxu0  ;;  %v2084_v3 = vmul.f32 %v6247_v15, %v2007_v12  ;;  %vm3244_vm6 = vmor %vm3242_vm5, %vm3243_vm4 }
 0x23f   :  { %v1039_v39 = vadd.f32 %v1038_v1, %v653_v53  ;;  %4018 = vmatmul.msk.f32.gmra.mxu3 %vm320_vm2, %v1565_v52  ;;  %3866 = vmatmul.msk.f32.gmra.mxu1 %vm320_vm2, %v6553_v28  ;;  %v6728_v28 = vld [vmem:[%s7033_s3] ss:$0 sm:$0xff]  ;;  %vm3262_vm10 = vcmp.eq.f32.partialorder %v3261_v0, 8.507059e+37 }
 0x240   :  { %v3230_v49 = vsel %vm3229_vm0, %v4300_v38, %v3226_v16  ;;  %v3240_v24 = vmul.f32 %v4304_v32, %v3239_v8  ;;  %v6731_v15 = vadd.f32 %v6728_v28, %v2084_v3  ;;  %v3263_v38 = vand.u32 2147483648, %v6700_v23 }
 0x241   :  { %v3235_v27 = vsel %vm6707_vm15, %v3234_v57, %v3230_v49  ;;  %v1290_v29 = vpop.f32.mrf.mxu2  ;;  %3792 = vmatmul.msk.f32.gmra.mxu0 %vm320_vm2, %v6627_v62  ;;  %v3249_v62 = vor.u32 1.1754944e-38, %v3248_v21 }
 0x242   :  { %v4306_v2 = vpop.eup %4305  ;;  %v3617_v6 = vmul.f32 %v3235_v27, %v6586_v40  ;;  %v3241_v59 = vadd.f32 %v4304_v32, %v3240_v24  ;;  %v1899_v44 = vpop.f32.mrf.mxu3  ;;  %v1399_v33 = vadd.f32 %v1290_v29, %v1039_v39  ;;  %v1567_v40 = vsel %vm1420_vm3, %v1564_v36, %v1566_v48  ;;  %v6757_v36 = vld [vmem:[%s7032_s2] ss:$0 sm:$0xff] }
 0x243   :  { %v4308_v13 = vpop.eup %4307  ;;  %v6733_v25 = vadd.f32 1.0, %v4306_v2  ;;  %v4074_v60 = vmul.f32 -1.442695, %v6731_v15  ;;  %v3264_v31 = vor.u32 1.1754944e-38, %v3263_v38 }
 0x244   :  { %3691 = vst.msk [vmem:[%s7034_s4 + $0x190] sm:$0xff] %vm3640_vm8, %v3617_v6  ;;  %v3245_v19 = vsel %vm3244_vm6, %v4304_v32, %v3241_v59  ;;  %v3253_v55 = vmul.f32 %v4308_v13, %v6700_v23  ;;  %v1041_v43 = vpop.f32.mrf.mxu1  ;;  %v2008_v58 = vadd.f32 %v1899_v44, %v1399_v33  ;;  %vm3258_vm3 = vweird.f32 %v4308_v13 }
 0x245   :  { %v3250_v9 = vsel %vm3247_vm1, %v3249_v62, %v3245_v19  ;;  %4309 = vrcp.f32 %v6733_v25  ;;  %vm3259_vm9 = vmor %vm3257_vm7, %vm3258_vm3  ;;  %v3276_v50 = vand.u32 2147483647, %v6733_v25  ;;  %v3278_v48 = vand.u32 2147483648, %v6733_v25 }
 0x246   :  { %v3618_v34 = vmul.f32 %v3250_v9, %v6617_v47  ;;  %v3254_v54 = vsub.f32 1.0, %v3253_v55  ;;  %4311 = vpow2.f32 %v4074_v60  ;;  %3943 = vmatmul.msk.f32.gmra.mxu2 %vm320_vm2, %v1100_v14  ;;  %v656_v41 = vpop.f32.mrf.mxu0  ;;  %v2085_v18 = vmul.f32 %v6757_v36, %v2008_v58 }
 0x247   :  { %v1042_v46 = vadd.f32 %v1041_v43, %v656_v41  ;;  %4019 = vmatmul.msk.f32.gmra.mxu3 %vm320_vm2, %v1567_v40  ;;  %3867 = vmatmul.msk.f32.gmra.mxu1 %vm320_vm2, %v6583_v61  ;;  %vm3272_vm11 = vweird.f32 %v6733_v25  ;;  %v3279_v21 = vor.u32 1.1754944e-38, %v3278_v48  ;;  %vm3277_vm13 = vcmp.eq.f32.partialorder %v3276_v50, 8.507059e+37 }
 0x248   :  { %3692 = vst.msk [vmem:[%s7034_s4 + $0x198] sm:$0xff] %vm3640_vm8, %v3618_v34  ;;  %v3255_v47 = vmul.f32 %v4308_v13, %v3254_v54  ;;  %v6764_v45 = vadd.f32 %v6728_v28, %v2085_v18 }
 0x249   :  { %v1293_v42 = vpop.f32.mrf.mxu2  ;;  %3793 = vmatmul.msk.f32.gmra.mxu0 %vm320_vm2, %v6665_v4 }
 0x24a   :  { %v3256_v61 = vadd.f32 %v4308_v13, %v3255_v47  ;;  %v1400_v37 = vadd.f32 %v1293_v42, %v1042_v46  ;;  %v1902_v63 = vpop.f32.mrf.mxu3  ;;  %v4075_v52 = vmul.f32 -1.442695, %v6764_v45 }
 0x24b   :  { %v4310_v56 = vpop.eup %4309 }
 0x24c   :  { %v4312_v26 = vpop.eup %4311  ;;  %v3260_v30 = vsel %vm3259_vm9, %v4308_v13, %v3256_v61  ;;  %v3268_v35 = vmul.f32 %v4310_v56, %v6733_v25  ;;  %v2009_v32 = vadd.f32 %v1902_v63, %v1400_v37  ;;  %v1044_v20 = vpop.f32.mrf.mxu1  ;;  %vm3273_vm2 = vweird.f32 %v4310_v56 }
 0x24d   :  { %v3265_v17 = vsel %vm3262_vm10, %v3264_v31, %v3260_v30  ;;  %v2453_v4 = vadd.f32 1.0, %v4312_v26  ;;  %vm3274_vm12 = vmor %vm3272_vm11, %vm3273_vm2 }
 0x24e   :  { %v3619_v23 = vmul.f32 %v3265_v17, %v6652_v11  ;;  %v3269_v51 = vsub.f32 1.0, %v3268_v35  ;;  %v2086_v7 = vmul.f32 %v6757_v36, %v2009_v32  ;;  %v659_v1 = vpop.f32.mrf.mxu0 }
 0x24f   :  { %4313 = vrcp.f32 %v2453_v4  ;;  %v1045_v11 = vadd.f32 %v1044_v20, %v659_v1  ;;  %v3291_v33 = vand.u32 2147483647, %v2453_v4  ;;  %v3293_v40 = vand.u32 2147483648, %v2453_v4 }
 0x250   :  { %3693 = vst.msk [vmem:[%s7034_s4 + $0x1a0] sm:$0xff] %vm3640_vm8, %v3619_v23  ;;  %v3270_v16 = vmul.f32 %v4310_v56, %v3269_v51  ;;  %4315 = vpow2.f32 %v4075_v52  ;;  %v6777_v10 = vadd.f32 %v6728_v28, %v2086_v7  ;;  %vm3287_vm15 = vweird.f32 %v2453_v4 }
 0x251   :  { %v1296_v8 = vpop.f32.mrf.mxu2  ;;  %v3294_v58 = vor.u32 1.1754944e-38, %v3293_v40  ;;  %vm3292_vm4 = vcmp.eq.f32.partialorder %v3291_v33, 8.507059e+37 }
 0x252   :  { %v3271_v12 = vadd.f32 %v4310_v56, %v3270_v16  ;;  %v4076_v53 = vmul.f32 -1.442695, %v6777_v10  ;;  %v1401_v57 = vadd.f32 %v1296_v8, %v1045_v11  ;;  %v1905_v5 = vpop.f32.mrf.mxu3 }
 0x254   :  { %v3275_v39 = vsel %vm3274_vm12, %v4310_v56, %v3271_v12  ;;  %4317 = vpow2.f32 %v4076_v53  ;;  %v2010_v49 = vadd.f32 %v1905_v5, %v1401_v57  ;;  %v1047_v24 = vpop.f32.mrf.mxu1 }
 0x255   :  { %v4314_v3 = vpop.eup %4313  ;;  %v3280_v27 = vsel %vm3277_vm13, %v3279_v21, %v3275_v39 }
 0x256   :  { %v4316_v29 = vpop.eup %4315  ;;  %v3620_v14 = vmul.f32 %v3280_v27, %v6686_v22  ;;  %v3283_v2 = vmul.f32 %v4314_v3, %v2453_v4  ;;  %v2087_v6 = vmul.f32 %v6757_v36, %v2010_v49  ;;  %v662_v59 = vpop.f32.mrf.mxu0  ;;  %vm3288_vm14 = vweird.f32 %v4314_v3 }
 0x257   :  { %v2454_v44 = vadd.f32 1.0, %v4316_v29  ;;  %v1048_v13 = vadd.f32 %v1047_v24, %v662_v59  ;;  %vm3289_vm0 = vmor %vm3287_vm15, %vm3288_vm14 }
 0x258   :  { %3694 = vst.msk [vmem:[%s7034_s4 + $0x1a8] sm:$0xff] %vm3640_vm8, %v3620_v14  ;;  %v3284_v62 = vsub.f32 1.0, %v3283_v2  ;;  %v6789_v25 = vadd.f32 %v6728_v28, %v2087_v6 }
 0x259   :  { %4319 = vrcp.f32 %v2454_v44  ;;  %v1299_v19 = vpop.f32.mrf.mxu2  ;;  %v3306_v35 = vand.u32 2147483647, %v2454_v44  ;;  %v3308_v52 = vand.u32 2147483648, %v2454_v44  ;;  %vm3302_vm6 = vweird.f32 %v2454_v44 }
 0x25a   :  { %v4318_v22 = vpop.eup %4317  ;;  %v3285_v55 = vmul.f32 %v4314_v3, %v3284_v62  ;;  %v4077_v60 = vmul.f32 -1.442695, %v6789_v25  ;;  %v1402_v43 = vadd.f32 %v1299_v19, %v1048_v13  ;;  %v1908_v9 = vpop.f32.mrf.mxu3 }
 0x25b   :  { %v6792_v34 = vadd.f32 1.0, %v4318_v22  ;;  %vm3307_vm1 = vcmp.eq.f32.partialorder %v3306_v35, 8.507059e+37  ;;  %v3309_v11 = vor.u32 1.1754944e-38, %v3308_v52 }
 0x25c   :  { %v3286_v54 = vadd.f32 %v4314_v3, %v3285_v55  ;;  %4321 = vpow2.f32 %v4077_v60  ;;  %v2011_v41 = vadd.f32 %v1908_v9, %v1402_v43  ;;  %v1050_v38 = vpop.f32.mrf.mxu1 }
 0x25d   :  { %4323 = vrcp.f32 %v6792_v34  ;;  %v3321_v8 = vand.u32 2147483647, %v6792_v34  ;;  %v3323_v12 = vand.u32 2147483648, %v6792_v34  ;;  %vm3317_vm9 = vweird.f32 %v6792_v34 }
 0x25e   :  { %v3290_v46 = vsel %vm3289_vm0, %v4314_v3, %v3286_v54  ;;  %v2088_v47 = vmul.f32 %v6757_v36, %v2011_v41  ;;  %v665_v0 = vpop.f32.mrf.mxu0 }
 0x25f   :  { %v4320_v18 = vpop.eup %4319  ;;  %v3295_v42 = vsel %vm3292_vm4, %v3294_v58, %v3290_v46  ;;  %v1051_v61 = vadd.f32 %v1050_v38, %v665_v0  ;;  %v3324_v6 = vor.u32 1.1754944e-38, %v3323_v12  ;;  %vm3322_vm2 = vcmp.eq.f32.partialorder %v3321_v8, 8.507059e+37 }
 0x260   :  { %v3621_v37 = vmul.f32 %v3295_v42, %v6731_v15  ;;  %v3298_v63 = vmul.f32 %v4320_v18, %v2454_v44  ;;  %v6798_v56 = vadd.f32 %v6728_v28, %v2088_v47  ;;  %vm3303_vm5 = vweird.f32 %v4320_v18 }
 0x261   :  { %v1302_v31 = vpop.f32.mrf.mxu2  ;;  %vm3304_vm3 = vmor %vm3302_vm6, %vm3303_vm5 }
 0x262   :  { %v4322_v26 = vpop.eup %4321  ;;  %3695 = vst.msk [vmem:[%s7034_s4 + $0x1b0] sm:$0xff] %vm3640_vm8, %v3621_v37  ;;  %v3299_v30 = vsub.f32 1.0, %v3298_v63  ;;  %v4078_v32 = vmul.f32 -1.442695, %v6798_v56  ;;  %v1403_v20 = vadd.f32 %v1302_v31, %v1051_v61  ;;  %v1911_v17 = vpop.f32.mrf.mxu3 }
 0x263   :  { %v4324_v4 = vpop.eup %4323  ;;  %v6805_v15 = vadd.f32 1.0, %v4322_v26 }
 0x264   :  { %v3300_v23 = vmul.f32 %v4320_v18, %v3299_v30  ;;  %v3313_v51 = vmul.f32 %v4324_v4, %v6792_v34  ;;  %4325 = vpow2.f32 %v4078_v32  ;;  %v1053_v7 = vpop.f32.mrf.mxu1  ;;  %v2012_v48 = vadd.f32 %v1911_v17, %v1403_v20 }
 0x265   :  { %4327 = vrcp.f32 %v6805_v15  ;;  %vm3318_vm7 = vweird.f32 %v4324_v4  ;;  %v3338_v60 = vand.u32 2147483648, %v6805_v15  ;;  %v3336_v54 = vand.u32 2147483647, %v6805_v15 }
 0x266   :  { %v3301_v1 = vadd.f32 %v4320_v18, %v3300_v23  ;;  %v3314_v50 = vsub.f32 1.0, %v3313_v51  ;;  %v668_v16 = vpop.f32.mrf.mxu0  ;;  %v2089_v21 = vmul.f32 %v6757_v36, %v2012_v48  ;;  %vm3319_vm10 = vmor %vm3317_vm9, %vm3318_vm7  ;;  %vm3332_vm12 = vweird.f32 %v6805_v15 }
 0x267   :  { %v1054_v53 = vadd.f32 %v1053_v7, %v668_v16  ;;  %v3339_v0 = vor.u32 1.1754944e-38, %v3338_v60  ;;  %vm3337_vm14 = vcmp.eq.f32.partialorder %v3336_v54, 8.507059e+37 }
 0x268   :  { %v3305_v57 = vsel %vm3304_vm3, %v4320_v18, %v3301_v1  ;;  %v3315_v5 = vmul.f32 %v4324_v4, %v3314_v50  ;;  %v6815_v29 = vadd.f32 %v6728_v28, %v2089_v21 }
 0x269   :  { %v3310_v39 = vsel %vm3307_vm1, %v3309_v11, %v3305_v57  ;;  %v1305_v49 = vpop.f32.mrf.mxu2 }
 0x26a   :  { %v4326_v24 = vpop.eup %4325  ;;  %v3622_v3 = vmul.f32 %v3310_v39, %v6764_v45  ;;  %v3316_v27 = vadd.f32 %v4324_v4, %v3315_v5  ;;  %v1914_v14 = vpop.f32.mrf.mxu3  ;;  %v1404_v44 = vadd.f32 %v1305_v49, %v1054_v53  ;;  %v4079_v62 = vmul.f32 -1.442695, %v6815_v29 }
 0x26b   :  { %v4328_v2 = vpop.eup %4327  ;;  %v6817_v59 = vadd.f32 1.0, %v4326_v24 }
 0x26c   :  { %3696 = vst.msk [vmem:[%s7034_s4 + $0x1b8] sm:$0xff] %vm3640_vm8, %v3622_v3  ;;  %v3320_v13 = vsel %vm3319_vm10, %v4324_v4, %v3316_v27  ;;  %v3328_v45 = vmul.f32 %v4328_v2, %v6805_v15  ;;  %v1056_v33 = vpop.f32.mrf.mxu1  ;;  %v2013_v43 = vadd.f32 %v1914_v14, %v1404_v44  ;;  %vm3333_vm11 = vweird.f32 %v4328_v2 }
 0x26d   :  { %v3325_v40 = vsel %vm3322_vm2, %v3324_v6, %v3320_v13  ;;  %4329 = vrcp.f32 %v6817_v59  ;;  %vm3334_vm13 = vmor %vm3332_vm12, %vm3333_vm11  ;;  %v3351_v52 = vand.u32 2147483647, %v6817_v59  ;;  %v3353_v15 = vand.u32 2147483648, %v6817_v59 }
 0x26e   :  { %v3623_v19 = vmul.f32 %v3325_v40, %v6777_v10  ;;  %v3329_v22 = vsub.f32 1.0, %v3328_v45  ;;  %4331 = vpow2.f32 %v4079_v62  ;;  %v671_v55 = vpop.f32.mrf.mxu0  ;;  %v2090_v41 = vmul.f32 %v6757_v36, %v2013_v43 }
 0x26f   :  { %v1057_v9 = vadd.f32 %v1056_v33, %v671_v55  ;;  %vm3347_vm0 = vweird.f32 %v6817_v59  ;;  %v3354_v11 = vor.u32 1.1754944e-38, %v3353_v15  ;;  %vm3352_vm5 = vcmp.eq.f32.partialorder %v3351_v52, 8.507059e+37 }
 0x270   :  { %3697 = vst.msk [vmem:[%s7034_s4 + $0x1c0] sm:$0xff] %vm3640_vm8, %v3623_v19  ;;  %v3330_v34 = vmul.f32 %v4328_v2, %v3329_v22  ;;  %v6836_v18 = vadd.f32 %v6728_v28, %v2090_v41 }
 0x271   :  { %v1308_v38 = vpop.f32.mrf.mxu2 }
 0x272   :  { %v3331_v10 = vadd.f32 %v4328_v2, %v3330_v34  ;;  %v1405_v58 = vadd.f32 %v1308_v38, %v1057_v9  ;;  %v1917_v46 = vpop.f32.mrf.mxu3  ;;  %v4080_v35 = vmul.f32 -1.442695, %v6836_v18 }
 0x273   :  { %v4330_v47 = vpop.eup %4329 }
 0x274   :  { %v4332_v42 = vpop.eup %4331  ;;  %v3335_v61 = vsel %vm3334_vm13, %v4328_v2, %v3331_v10  ;;  %v3343_v37 = vmul.f32 %v4330_v47, %v6817_v59  ;;  %v2014_v63 = vadd.f32 %v1917_v46, %v1405_v58  ;;  %v1059_v31 = vpop.f32.mrf.mxu1  ;;  %vm3348_vm15 = vweird.f32 %v4330_v47 }
 0x275   :  { %v3340_v26 = vsel %vm3337_vm14, %v3339_v0, %v3335_v61  ;;  %v2458_v30 = vadd.f32 1.0, %v4332_v42  ;;  %vm3349_vm4 = vmor %vm3347_vm0, %vm3348_vm15 }
 0x276   :  { %v3624_v32 = vmul.f32 %v3340_v26, %v6789_v25  ;;  %v3344_v20 = vsub.f32 1.0, %v3343_v37  ;;  %v2091_v17 = vmul.f32 %v6757_v36, %v2014_v63  ;;  %v674_v4 = vpop.f32.mrf.mxu0 }
 0x277   :  { %4333 = vrcp.f32 %v2458_v30  ;;  %v1060_v25 = vadd.f32 %v1059_v31, %v674_v4  ;;  %v3366_v59 = vand.u32 2147483647, %v2458_v30  ;;  %v3368_v44 = vand.u32 2147483648, %v2458_v30 }
 0x278   :  { %3698 = vst.msk [vmem:[%s7034_s4 + $0x1c8] sm:$0xff] %vm3640_vm8, %v3624_v32  ;;  %v3345_v23 = vmul.f32 %v4330_v47, %v3344_v20  ;;  %4335 = vpow2.f32 %v4080_v35  ;;  %v6849_v51 = vadd.f32 %v6728_v28, %v2091_v17  ;;  %vm3362_vm1 = vweird.f32 %v2458_v30 }
 0x279   :  { %v1311_v7 = vpop.f32.mrf.mxu2  ;;  %v3369_v43 = vor.u32 1.1754944e-38, %v3368_v44  ;;  %vm3367_vm7 = vcmp.eq.f32.partialorder %v3366_v59, 8.507059e+37 }
 0x27a   :  { %v3346_v1 = vadd.f32 %v4330_v47, %v3345_v23  ;;  %v4081_v50 = vmul.f32 -1.442695, %v6849_v51  ;;  %v1406_v48 = vadd.f32 %v1311_v7, %v1060_v25  ;;  %v1920_v16 = vpop.f32.mrf.mxu3 }
 0x27c   :  { %v3350_v8 = vsel %vm3349_vm4, %v4330_v47, %v3346_v1  ;;  %4337 = vpow2.f32 %v4081_v50  ;;  %v2015_v12 = vadd.f32 %v1920_v16, %v1406_v48  ;;  %v1062_v53 = vpop.f32.mrf.mxu1 }
 0x27d   :  { %v4334_v57 = vpop.eup %4333  ;;  %v3355_v5 = vsel %vm3352_vm5, %v3354_v11, %v3350_v8 }
 0x27e   :  { %v4336_v21 = vpop.eup %4335  ;;  %v3625_v39 = vmul.f32 %v3355_v5, %v6798_v56  ;;  %v3358_v49 = vmul.f32 %v4334_v57, %v2458_v30  ;;  %v2092_v24 = vmul.f32 %v6757_v36, %v2015_v12  ;;  %v677_v3 = vpop.f32.mrf.mxu0  ;;  %vm3363_vm6 = vweird.f32 %v4334_v57 }
 0x27f   :  { %v2459_v27 = vadd.f32 1.0, %v4336_v21  ;;  %v1063_v14 = vadd.f32 %v1062_v53, %v677_v3  ;;  %vm3364_vm3 = vmor %vm3362_vm1, %vm3363_vm6 }
 0x280   :  { %3699 = vst.msk [vmem:[%s7034_s4 + $0x1d0] sm:$0xff] %vm3640_vm8, %v3625_v39  ;;  %v3359_v2 = vsub.f32 1.0, %v3358_v49  ;;  %v6861_v6 = vadd.f32 %v6728_v28, %v2092_v24 }
 0x281   :  { %4339 = vrcp.f32 %v2459_v27  ;;  %v1314_v13 = vpop.f32.mrf.mxu2  ;;  %v3381_v37 = vand.u32 2147483647, %v2459_v27  ;;  %v3383_v35 = vand.u32 2147483648, %v2459_v27  ;;  %vm3377_vm10 = vweird.f32 %v2459_v27 }
 0x282   :  { %v4338_v56 = vpop.eup %4337  ;;  %v3360_v45 = vmul.f32 %v4334_v57, %v3359_v2  ;;  %v4082_v62 = vmul.f32 -1.442695, %v6861_v6  ;;  %v1407_v33 = vadd.f32 %v1314_v13, %v1063_v14  ;;  %v1923_v40 = vpop.f32.mrf.mxu3 }
 0x283   :  { %v6864_v19 = vadd.f32 1.0, %v4338_v56  ;;  %vm3382_vm2 = vcmp.eq.f32.partialorder %v3381_v37, 8.507059e+37  ;;  %v3384_v25 = vor.u32 1.1754944e-38, %v3383_v35 }
 0x284   :  { %v3361_v22 = vadd.f32 %v4334_v57, %v3360_v45  ;;  %4341 = vpow2.f32 %v4082_v62  ;;  %v2016_v55 = vadd.f32 %v1923_v40, %v1407_v33  ;;  %v1065_v60 = vpop.f32.mrf.mxu1 }
 0x285   :  { %4343 = vrcp.f32 %v6864_v19  ;;  %v3396_v7 = vand.u32 2147483647, %v6864_v19  ;;  %v3398_v1 = vand.u32 2147483648, %v6864_v19  ;;  %vm3392_vm13 = vweird.f32 %v6864_v19 }
 0x286   :  { %v3365_v9 = vsel %vm3364_vm3, %v4334_v57, %v3361_v22  ;;  %v2093_v34 = vmul.f32 %v6757_v36, %v2016_v55  ;;  %v680_v54 = vpop.f32.mrf.mxu0 }
 0x287   :  { %v4340_v41 = vpop.eup %4339  ;;  %v3370_v38 = vsel %vm3367_vm7, %v3369_v43, %v3365_v9  ;;  %v1066_v10 = vadd.f32 %v1065_v60, %v680_v54  ;;  %v3399_v24 = vor.u32 1.1754944e-38, %v3398_v1  ;;  %vm3397_vm15 = vcmp.eq.f32.partialorder %v3396_v7, 8.507059e+37 }
 0x288   :  { %v3626_v58 = vmul.f32 %v3370_v38, %v6815_v29  ;;  %v3373_v46 = vmul.f32 %v4340_v41, %v2459_v27  ;;  %v6870_v47 = vadd.f32 %v6728_v28, %v2093_v34  ;;  %vm3378_vm9 = vweird.f32 %v4340_v41 }
 0x289   :  { %v1317_v0 = vpop.f32.mrf.mxu2  ;;  %vm3379_vm11 = vmor %vm3377_vm10, %vm3378_vm9 }
 0x28a   :  { %v4342_v42 = vpop.eup %4341  ;;  %3700 = vst.msk [vmem:[%s7034_s4 + $0x1d8] sm:$0xff] %vm3640_vm8, %v3626_v58  ;;  %v3374_v61 = vsub.f32 1.0, %v3373_v46  ;;  %v4083_v63 = vmul.f32 -1.442695, %v6870_v47  ;;  %v1408_v31 = vadd.f32 %v1317_v0, %v1066_v10  ;;  %v1926_v26 = vpop.f32.mrf.mxu3 }
 0x28b   :  { %v4344_v30 = vpop.eup %4343  ;;  %v6877_v29 = vadd.f32 1.0, %v4342_v42 }
 0x28c   :  { %v3375_v32 = vmul.f32 %v4340_v41, %v3374_v61  ;;  %v3388_v20 = vmul.f32 %v4344_v30, %v6864_v19  ;;  %4345 = vpow2.f32 %v4083_v63  ;;  %v1068_v17 = vpop.f32.mrf.mxu1  ;;  %v2017_v15 = vadd.f32 %v1926_v26, %v1408_v31 }
 0x28d   :  { %4347 = vrcp.f32 %v6877_v29  ;;  %vm3393_vm12 = vweird.f32 %v4344_v30  ;;  %v3413_v62 = vand.u32 2147483648, %v6877_v29  ;;  %v3411_v22 = vand.u32 2147483647, %v6877_v29 }
 0x28e   :  { %v3376_v4 = vadd.f32 %v4340_v41, %v3375_v32  ;;  %v3389_v52 = vsub.f32 1.0, %v3388_v20  ;;  %v683_v23 = vpop.f32.mrf.mxu0  ;;  %v2094_v11 = vmul.f32 %v6757_v36, %v2017_v15  ;;  %vm3394_vm14 = vmor %vm3392_vm13, %vm3393_vm12  ;;  %vm3407_vm4 = vweird.f32 %v6877_v29 }
 0x28f   :  { %v1069_v50 = vadd.f32 %v1068_v17, %v683_v23  ;;  %v3414_v54 = vor.u32 1.1754944e-38, %v3413_v62  ;;  %vm3412_vm6 = vcmp.eq.f32.partialorder %v3411_v22, 8.507059e+37 }
 0x290   :  { %v3380_v48 = vsel %vm3379_vm11, %v4340_v41, %v3376_v4  ;;  %v3390_v16 = vmul.f32 %v4344_v30, %v3389_v52  ;;  %v6887_v21 = vadd.f32 %v6728_v28, %v2094_v11 }
 0x291   :  { %v3385_v8 = vsel %vm3382_vm2, %v3384_v25, %v3380_v48  ;;  %v1320_v12 = vpop.f32.mrf.mxu2 }
 0x292   :  { %v4346_v53 = vpop.eup %4345  ;;  %v3627_v57 = vmul.f32 %v3385_v8, %v6836_v18  ;;  %v3391_v5 = vadd.f32 %v4344_v30, %v3390_v16  ;;  %v1929_v39 = vpop.f32.mrf.mxu3  ;;  %v1409_v27 = vadd.f32 %v1320_v12, %v1069_v50  ;;  %v4084_v2 = vmul.f32 -1.442695, %v6887_v21 }
 0x293   :  { %v4348_v49 = vpop.eup %4347  ;;  %v6889_v3 = vadd.f32 1.0, %v4346_v53 }
 0x294   :  { %3701 = vst.msk [vmem:[%s7034_s4 + $0x1e0] sm:$0xff] %vm3640_vm8, %v3627_v57  ;;  %v3395_v14 = vsel %vm3394_vm14, %v4344_v30, %v3391_v5  ;;  %v3403_v18 = vmul.f32 %v4348_v49, %v6877_v29  ;;  %v1071_v59 = vpop.f32.mrf.mxu1  ;;  %v2018_v33 = vadd.f32 %v1929_v39, %v1409_v27  ;;  %vm3408_vm0 = vweird.f32 %v4348_v49 }
 0x295   :  { %v3400_v44 = vsel %vm3397_vm15, %v3399_v24, %v3395_v14  ;;  %4349 = vrcp.f32 %v6889_v3  ;;  %vm3409_vm5 = vmor %vm3407_vm4, %vm3408_vm0  ;;  %v3426_v35 = vand.u32 2147483647, %v6889_v3  ;;  %v3428_v29 = vand.u32 2147483648, %v6889_v3 }
 0x296   :  { %v3628_v13 = vmul.f32 %v3400_v44, %v6849_v51  ;;  %v3404_v56 = vsub.f32 1.0, %v3403_v18  ;;  %4351 = vpow2.f32 %v4084_v2  ;;  %v686_v45 = vpop.f32.mrf.mxu0  ;;  %v2095_v55 = vmul.f32 %v6757_v36, %v2018_v33 }
 0x297   :  { %v1072_v40 = vadd.f32 %v1071_v59, %v686_v45  ;;  %vm3422_vm3 = vweird.f32 %v6889_v3  ;;  %v3429_v25 = vor.u32 1.1754944e-38, %v3428_v29  ;;  %vm3427_vm9 = vcmp.eq.f32.partialorder %v3426_v35, 8.507059e+37 }
 0x298   :  { %3702 = vst.msk [vmem:[%s7034_s4 + $0x1e8] sm:$0xff] %vm3640_vm8, %v3628_v13  ;;  %v3405_v19 = vmul.f32 %v4348_v49, %v3404_v56  ;;  %v6908_v41 = vadd.f32 %v6728_v28, %v2095_v55 }
 0x299   :  { %v1323_v60 = vpop.f32.mrf.mxu2 }
 0x29a   :  { %v3406_v51 = vadd.f32 %v4348_v49, %v3405_v19  ;;  %v1410_v43 = vadd.f32 %v1323_v60, %v1072_v40  ;;  %v1932_v9 = vpop.f32.mrf.mxu3  ;;  %v4085_v37 = vmul.f32 -1.442695, %v6908_v41 }
 0x29b   :  { %v4350_v34 = vpop.eup %4349 }
 0x29c   :  { %v4352_v38 = vpop.eup %4351  ;;  %v3410_v10 = vsel %vm3409_vm5, %v4348_v49, %v3406_v51  ;;  %v3418_v58 = vmul.f32 %v4350_v34, %v6889_v3  ;;  %v2019_v46 = vadd.f32 %v1932_v9, %v1410_v43  ;;  %v1074_v0 = vpop.f32.mrf.mxu1  ;;  %vm3423_vm1 = vweird.f32 %v4350_v34 }
 0x29d   :  { %v3415_v42 = vsel %vm3412_vm6, %v3414_v54, %v3410_v10  ;;  %v2463_v61 = vadd.f32 1.0, %v4352_v38  ;;  %vm3424_vm7 = vmor %vm3422_vm3, %vm3423_vm1 }
 0x29e   :  { %v3629_v63 = vmul.f32 %v3415_v42, %v6861_v6  ;;  %v3419_v31 = vsub.f32 1.0, %v3418_v58  ;;  %v2096_v26 = vmul.f32 %v6757_v36, %v2019_v46  ;;  %v689_v30 = vpop.f32.mrf.mxu0 }
 0x29f   :  { %4353 = vrcp.f32 %v2463_v61  ;;  %v1075_v6 = vadd.f32 %v1074_v0, %v689_v30  ;;  %v3441_v3 = vand.u32 2147483647, %v2463_v61  ;;  %v3443_v27 = vand.u32 2147483648, %v2463_v61 }
 0x2a0   :  { %3703 = vst.msk [vmem:[%s7034_s4 + $0x1f0] sm:$0xff] %vm3640_vm8, %v3629_v63  ;;  %v3420_v32 = vmul.f32 %v4350_v34, %v3419_v31  ;;  %4355 = vpow2.f32 %v4085_v37  ;;  %v6921_v20 = vadd.f32 %v6728_v28, %v2096_v26  ;;  %vm3437_vm2 = vweird.f32 %v2463_v61 }
 0x2a1   :  { %v1326_v17 = vpop.f32.mrf.mxu2  ;;  %v3444_v33 = vor.u32 1.1754944e-38, %v3443_v27  ;;  %vm3442_vm12 = vcmp.eq.f32.partialorder %v3441_v3, 8.507059e+37 }
 0x2a2   :  { %v3421_v4 = vadd.f32 %v4350_v34, %v3420_v32  ;;  %v4086_v52 = vmul.f32 -1.442695, %v6921_v20  ;;  %v1411_v15 = vadd.f32 %v1326_v17, %v1075_v6  ;;  %v1935_v23 = vpop.f32.mrf.mxu3 }
 0x2a4   :  { %v3425_v7 = vsel %vm3424_vm7, %v4350_v34, %v3421_v4  ;;  %4357 = vpow2.f32 %v4086_v52  ;;  %v2020_v1 = vadd.f32 %v1935_v23, %v1411_v15  ;;  %v1077_v50 = vpop.f32.mrf.mxu1 }
 0x2a5   :  { %v4354_v48 = vpop.eup %4353  ;;  %v3430_v16 = vsel %vm3427_vm9, %v3429_v25, %v3425_v7 }
 0x2a6   :  { %v4356_v11 = vpop.eup %4355  ;;  %v3630_v8 = vmul.f32 %v3430_v16, %v6870_v47  ;;  %v3433_v12 = vmul.f32 %v4354_v48, %v2463_v61  ;;  %v2097_v53 = vmul.f32 %v6757_v36, %v2020_v1  ;;  %v692_v57 = vpop.f32.mrf.mxu0  ;;  %vm3438_vm10 = vweird.f32 %v4354_v48 }
 0x2a7   :  { %v2464_v5 = vadd.f32 1.0, %v4356_v11  ;;  %v1078_v39 = vadd.f32 %v1077_v50, %v692_v57  ;;  %vm3439_vm11 = vmor %vm3437_vm2, %vm3438_vm10 }
 0x2a8   :  { %3704 = vst.msk [vmem:[%s7034_s4 + $0x1f8] sm:$0xff] %vm3640_vm8, %v3630_v8  ;;  %v3434_v49 = vsub.f32 1.0, %v3433_v12  ;;  %v6933_v24 = vadd.f32 %v6728_v28, %v2097_v53 }
 0x2a9   :  { %4359 = vrcp.f32 %v2464_v5  ;;  %v1329_v14 = vpop.f32.mrf.mxu2  ;;  %v3456_v58 = vand.u32 2147483647, %v2464_v5  ;;  %v3458_v37 = vand.u32 2147483648, %v2464_v5  ;;  %vm3452_vm14 = vweird.f32 %v2464_v5 }
 0x2aa   :  { %v4358_v47 = vpop.eup %4357  ;;  %v3435_v18 = vmul.f32 %v4354_v48, %v3434_v49  ;;  %v4087_v2 = vmul.f32 -1.442695, %v6933_v24  ;;  %v1412_v59 = vadd.f32 %v1329_v14, %v1078_v39  ;;  %v1938_v44 = vpop.f32.mrf.mxu3 }
 0x2ab   :  { %v6936_v13 = vadd.f32 1.0, %v4358_v47  ;;  %vm3457_vm15 = vcmp.eq.f32.partialorder %v3456_v58, 8.507059e+37  ;;  %v3459_v6 = vor.u32 1.1754944e-38, %v3458_v37 }
 0x2ac   :  { %v3436_v56 = vadd.f32 %v4354_v48, %v3435_v18  ;;  %4361 = vpow2.f32 %v4087_v2  ;;  %v2021_v45 = vadd.f32 %v1938_v44, %v1412_v59  ;;  %v1080_v62 = vpop.f32.mrf.mxu1 }
 0x2ad   :  { %4363 = vrcp.f32 %v6936_v13  ;;  %v3471_v17 = vand.u32 2147483647, %v6936_v13  ;;  %v3473_v4 = vand.u32 2147483648, %v6936_v13  ;;  %vm3467_vm5 = vweird.f32 %v6936_v13 }
 0x2ae   :  { %v3440_v40 = vsel %vm3439_vm11, %v4354_v48, %v3436_v56  ;;  %v2098_v19 = vmul.f32 %v6757_v36, %v2021_v45  ;;  %v695_v22 = vpop.f32.mrf.mxu0 }
 0x2af   :  { %v4360_v55 = vpop.eup %4359  ;;  %v3445_v60 = vsel %vm3442_vm12, %v3444_v33, %v3440_v40  ;;  %v1081_v51 = vadd.f32 %v1080_v62, %v695_v22  ;;  %v3474_v53 = vor.u32 1.1754944e-38, %v3473_v4  ;;  %vm3472_vm1 = vcmp.eq.f32.partialorder %v3471_v17, 8.507059e+37 }
 0x2b0   :  { %v3631_v43 = vmul.f32 %v3445_v60, %v6887_v21  ;;  %v3448_v9 = vmul.f32 %v4360_v55, %v2464_v5  ;;  %v6942_v34 = vadd.f32 %v6728_v28, %v2098_v19  ;;  %vm3453_vm13 = vweird.f32 %v4360_v55 }
 0x2b1   :  { %v1332_v54 = vpop.f32.mrf.mxu2  ;;  %vm3454_vm0 = vmor %vm3452_vm14, %vm3453_vm13 }
 0x2b2   :  { %v4362_v38 = vpop.eup %4361  ;;  %3705 = vst.msk [vmem:[%s7034_s4 + $0x200] sm:$0xff] %vm3640_vm8, %v3631_v43  ;;  %v3449_v10 = vsub.f32 1.0, %v3448_v9  ;;  %v4088_v46 = vmul.f32 -1.442695, %v6942_v34  ;;  %v1413_v0 = vadd.f32 %v1332_v54, %v1081_v51  ;;  %v1941_v42 = vpop.f32.mrf.mxu3 }
 0x2b3   :  { %v4364_v61 = vpop.eup %4363  ;;  %v6949_v21 = vadd.f32 1.0, %v4362_v38 }
 0x2b4   :  { %v3450_v63 = vmul.f32 %v4360_v55, %v3449_v10  ;;  %v3463_v31 = vmul.f32 %v4364_v61, %v6936_v13  ;;  %4365 = vpow2.f32 %v4088_v46  ;;  %v1083_v26 = vpop.f32.mrf.mxu1  ;;  %v2022_v29 = vadd.f32 %v1941_v42, %v1413_v0 }
 0x2b5   :  { %4367 = vrcp.f32 %v6949_v21  ;;  %vm3468_vm4 = vweird.f32 %v4364_v61  ;;  %v3488_v2 = vand.u32 2147483648, %v6949_v21  ;;  %v3486_v56 = vand.u32 2147483647, %v6949_v21 }
 0x2b6   :  { %v3451_v30 = vadd.f32 %v4360_v55, %v3450_v63  ;;  %v3464_v35 = vsub.f32 1.0, %v3463_v31  ;;  %v698_v32 = vpop.f32.mrf.mxu0  ;;  %v2099_v25 = vmul.f32 %v6757_v36, %v2022_v29  ;;  %vm3469_vm6 = vmor %vm3467_vm5, %vm3468_vm4  ;;  %vm3482_vm7 = vweird.f32 %v6949_v21 }
 0x2b7   :  { %v1084_v52 = vadd.f32 %v1083_v26, %v698_v32  ;;  %v3489_v22 = vor.u32 1.1754944e-38, %v3488_v2  ;;  %vm3487_vm10 = vcmp.eq.f32.partialorder %v3486_v56, 8.507059e+37 }
 0x2b8   :  { %v3455_v15 = vsel %vm3454_vm0, %v4360_v55, %v3451_v30  ;;  %v3465_v23 = vmul.f32 %v4364_v61, %v3464_v35  ;;  %v6959_v11 = vadd.f32 %v6728_v28, %v2099_v25 }
 0x2b9   :  { %v3460_v7 = vsel %vm3457_vm15, %v3459_v6, %v3455_v15  ;;  %v1335_v1 = vpop.f32.mrf.mxu2 }
 0x2ba   :  { %v4366_v50 = vpop.eup %4365  ;;  %v3632_v48 = vmul.f32 %v3460_v7, %v6908_v41  ;;  %v3466_v16 = vadd.f32 %v4364_v61, %v3465_v23  ;;  %v1944_v8 = vpop.f32.mrf.mxu3  ;;  %v1414_v5 = vadd.f32 %v1335_v1, %v1084_v52  ;;  %v4089_v49 = vmul.f32 -1.442695, %v6959_v11 }
 0x2bb   :  { %v4368_v12 = vpop.eup %4367  ;;  %v6961_v57 = vadd.f32 1.0, %v4366_v50 }
 0x2bc   :  { %3706 = vst.msk [vmem:[%s7034_s4 + $0x208] sm:$0xff] %vm3640_vm8, %v3632_v48  ;;  %v3470_v39 = vsel %vm3469_vm6, %v4364_v61, %v3466_v16  ;;  %v3478_v41 = vmul.f32 %v4368_v12, %v6949_v21  ;;  %v1086_v3 = vpop.f32.mrf.mxu1  ;;  %v2023_v59 = vadd.f32 %v1944_v8, %v1414_v5  ;;  %vm3483_vm3 = vweird.f32 %v4368_v12  ;;  %v4395_v48 = vld [vmem:[%s7033_s3] ss:$0 sm:$0xff] }
 0x2bd   :  { %v3475_v27 = vsel %vm3472_vm1, %v3474_v53, %v3470_v39  ;;  %4369 = vrcp.f32 %v6961_v57  ;;  %vm3484_vm9 = vmor %vm3482_vm7, %vm3483_vm3  ;;  %v3501_v37 = vand.u32 2147483647, %v6961_v57  ;;  %v3503_v21 = vand.u32 2147483648, %v6961_v57 }
 0x2be   :  { %v3633_v14 = vmul.f32 %v3475_v27, %v6921_v20  ;;  %v3479_v47 = vsub.f32 1.0, %v3478_v41  ;;  %4371 = vpow2.f32 %v4089_v49  ;;  %v701_v18 = vpop.f32.mrf.mxu0  ;;  %v2100_v45 = vmul.f32 %v6757_v36, %v2023_v59 }
 0x2bf   :  { %v1087_v44 = vadd.f32 %v1086_v3, %v701_v18  ;;  %vm3497_vm11 = vweird.f32 %v6961_v57  ;;  %v3504_v6 = vor.u32 1.1754944e-38, %v3503_v21  ;;  %vm3502_vm13 = vcmp.eq.f32.partialorder %v3501_v37, 8.507059e+37 }
 0x2c0   :  { %3707 = vst.msk [vmem:[%s7034_s4 + $0x210] sm:$0xff] %vm3640_vm8, %v3633_v14  ;;  %v3480_v13 = vmul.f32 %v4368_v12, %v3479_v47  ;;  %v6980_v55 = vadd.f32 %v6728_v28, %v2100_v45 }
 0x2c1   :  { %v1338_v62 = vpop.f32.mrf.mxu2 }
 0x2c2   :  { %v3481_v20 = vadd.f32 %v4368_v12, %v3480_v13  ;;  %v1415_v33 = vadd.f32 %v1338_v62, %v1087_v44  ;;  %v1947_v40 = vpop.f32.mrf.mxu3  ;;  %v4090_v10 = vmul.f32 -1.442695, %v6980_v55 }
 0x2c3   :  { %v4370_v19 = vpop.eup %4369 }
 0x2c4   :  { %v4372_v60 = vpop.eup %4371  ;;  %v3485_v51 = vsel %vm3484_vm9, %v4368_v12, %v3481_v20  ;;  %v3493_v43 = vmul.f32 %v4370_v19, %v6961_v57  ;;  %v2024_v9 = vadd.f32 %v1947_v40, %v1415_v33  ;;  %v1089_v58 = vpop.f32.mrf.mxu1  ;;  %vm3498_vm2 = vweird.f32 %v4370_v19 }
 0x2c5   :  { %v3490_v54 = vsel %vm3487_vm10, %v3489_v22, %v3485_v51  ;;  %v2468_v38 = vadd.f32 1.0, %v4372_v60  ;;  %vm3499_vm12 = vmor %vm3497_vm11, %vm3498_vm2 }
 0x2c6   :  { %v3634_v46 = vmul.f32 %v3490_v54, %v6933_v24  ;;  %v3494_v0 = vsub.f32 1.0, %v3493_v43  ;;  %v2101_v42 = vmul.f32 %v6757_v36, %v2024_v9  ;;  %v704_v61 = vpop.f32.mrf.mxu0 }
 0x2c7   :  { %4373 = vrcp.f32 %v2468_v38  ;;  %v1090_v24 = vadd.f32 %v1089_v58, %v704_v61  ;;  %v3518_v8 = vand.u32 2147483648, %v2468_v38  ;;  %v3516_v53 = vand.u32 2147483647, %v2468_v38 }
 0x2c8   :  { %3708 = vst.msk [vmem:[%s7034_s4 + $0x218] sm:$0xff] %vm3640_vm8, %v3634_v46  ;;  %v3495_v63 = vmul.f32 %v4370_v19, %v3494_v0  ;;  %4375 = vpow2.f32 %v4090_v10  ;;  %v6993_v31 = vadd.f32 %v6728_v28, %v2101_v42  ;;  %vm3512_vm15 = vweird.f32 %v2468_v38 }
 0x2c9   :  { %v1341_v26 = vpop.f32.mrf.mxu2  ;;  %v3519_v39 = vor.u32 1.1754944e-38, %v3518_v8  ;;  %vm3517_vm4 = vcmp.eq.f32.partialorder %v3516_v53, 8.507059e+37 }
 0x2ca   :  { %v3496_v30 = vadd.f32 %v4370_v19, %v3495_v63  ;;  %v4091_v35 = vmul.f32 -1.442695, %v6993_v31  ;;  %v1416_v29 = vadd.f32 %v1341_v26, %v1090_v24  ;;  %v1950_v32 = vpop.f32.mrf.mxu3 }
 0x2cc   :  { %v3500_v17 = vsel %vm3499_vm12, %v4370_v19, %v3496_v30  ;;  %4377 = vpow2.f32 %v4091_v35  ;;  %v2025_v4 = vadd.f32 %v1950_v32, %v1416_v29 }
 0x2cd   :  { %v4374_v52 = vpop.eup %4373  ;;  %v3505_v15 = vsel %vm3502_vm13, %v3504_v6, %v3500_v17 }
 0x2ce   :  { %v4376_v28 = vpop.eup %4375  ;;  %v3635_v23 = vmul.f32 %v3505_v15, %v6942_v34  ;;  %v3508_v25 = vmul.f32 %v4374_v52, %v2468_v38  ;;  %v2102_v7 = vmul.f32 %v6757_v36, %v2025_v4  ;;  %vm3513_vm14 = vweird.f32 %v4374_v52 }
 0x2cf   :  { %v2469_v1 = vadd.f32 1.0, %v4376_v28  ;;  %vm3514_vm0 = vmor %vm3512_vm15, %vm3513_vm14 }
 0x2d0   :  { %3709 = vst.msk [vmem:[%s7034_s4 + $0x220] sm:$0xff] %vm3640_vm8, %v3635_v23  ;;  %v3509_v50 = vsub.f32 1.0, %v3508_v25  ;;  %v7007_v16 = vadd.f32 %v4395_v48, %v2102_v7 }
 0x2d1   :  { %4379 = vrcp.f32 %v2469_v1  ;;  %v3531_v59 = vand.u32 2147483647, %v2469_v1  ;;  %v3533_v44 = vand.u32 2147483648, %v2469_v1  ;;  %vm3527_vm6 = vweird.f32 %v2469_v1 }
 0x2d2   :  { %v4378_v12 = vpop.eup %4377  ;;  %v3510_v34 = vmul.f32 %v4374_v52, %v3509_v50  ;;  %v4092_v36 = vmul.f32 -1.442695, %v7007_v16 }
 0x2d3   :  { %v2470_v57 = vadd.f32 1.0, %v4378_v12  ;;  %vm3532_vm3 = vcmp.eq.f32.partialorder %v3531_v59, 8.507059e+37 }
 0x2d4   :  { %v3511_v5 = vadd.f32 %v4374_v52, %v3510_v34  ;;  %4381 = vpow2.f32 %v4092_v36 }
 0x2d5   :  { %4383 = vrcp.f32 %v2470_v57  ;;  %v3548_v33 = vand.u32 2147483648, %v2470_v57  ;;  %v3546_v22 = vand.u32 2147483647, %v2470_v57  ;;  %vm3542_vm9 = vweird.f32 %v2470_v57 }
 0x2d6   :  { %v3515_v41 = vsel %vm3514_vm0, %v4374_v52, %v3511_v5 }
 0x2d7   :  { %v4380_v49 = vpop.eup %4379  ;;  %v3520_v3 = vsel %vm3517_vm4, %v3519_v39, %v3515_v41  ;;  %v3549_v54 = vor.u32 1.1754944e-38, %v3548_v33  ;;  %vm3547_vm2 = vcmp.eq.f32.partialorder %v3546_v22, 8.507059e+37 }
 0x2d8   :  { %v3636_v27 = vmul.f32 %v3520_v3, %v6959_v11  ;;  %v3523_v14 = vmul.f32 %v4380_v49, %v2469_v1  ;;  %vm3528_vm5 = vweird.f32 %v4380_v49  ;;  %v3534_v11 = vor.u32 1.1754944e-38, %v3533_v44 }
 0x2d9   :  { %vm3529_vm1 = vmor %vm3527_vm6, %vm3528_vm5 }
 0x2da   :  { %v4382_v47 = vpop.eup %4381  ;;  %3710 = vst.msk [vmem:[%s7034_s4 + $0x228] sm:$0xff] %vm3640_vm8, %v3636_v27  ;;  %v3524_v18 = vsub.f32 1.0, %v3523_v14 }
 0x2db   :  { %v4384_v2 = vpop.eup %4383  ;;  %v2471_v13 = vadd.f32 1.0, %v4382_v47 }
 0x2dc   :  { %v3525_v56 = vmul.f32 %v4380_v49, %v3524_v18  ;;  %v3538_v45 = vmul.f32 %v4384_v2, %v2470_v57  ;;  %vm3543_vm7 = vweird.f32 %v4384_v2 }
 0x2dd   :  { %4385 = vrcp.f32 %v2471_v13  ;;  %vm3544_vm10 = vmor %vm3542_vm9, %vm3543_vm7  ;;  %v3563_v42 = vand.u32 2147483648, %v2471_v13  ;;  %v3561_v61 = vand.u32 2147483647, %v2471_v13  ;;  %vm3557_vm12 = vweird.f32 %v2471_v13 }
 0x2de   :  { %v3526_v62 = vadd.f32 %v4380_v49, %v3525_v56  ;;  %v3539_v20 = vsub.f32 1.0, %v3538_v45 }
 0x2df   :  { %v3564_v21 = vor.u32 1.1754944e-38, %v3563_v42  ;;  %vm3562_vm14 = vcmp.eq.f32.partialorder %v3561_v61, 8.507059e+37 }
 0x2e0   :  { %v3530_v40 = vsel %vm3529_vm1, %v4380_v49, %v3526_v62  ;;  %v3540_v19 = vmul.f32 %v4384_v2, %v3539_v20 }
 0x2e1   :  { %v3535_v60 = vsel %vm3532_vm3, %v3534_v11, %v3530_v40 }
 0x2e2   :  { %v3637_v51 = vmul.f32 %v3535_v60, %v6980_v55  ;;  %v3541_v43 = vadd.f32 %v4384_v2, %v3540_v19 }
 0x2e3   :  { %v4386_v9 = vpop.eup %4385 }
 0x2e4   :  { %3711 = vst.msk [vmem:[%s7034_s4 + $0x230] sm:$0xff] %vm3640_vm8, %v3637_v51  ;;  %v3545_v38 = vsel %vm3544_vm10, %v4384_v2, %v3541_v43  ;;  %v3553_v10 = vmul.f32 %v4386_v9, %v2471_v13  ;;  %vm3558_vm11 = vweird.f32 %v4386_v9 }
 0x2e5   :  { %v3550_v58 = vsel %vm3547_vm2, %v3549_v54, %v3545_v38  ;;  %vm3559_vm13 = vmor %vm3557_vm12, %vm3558_vm11 }
 0x2e6   :  { %v3638_v46 = vmul.f32 %v3550_v58, %v6993_v31  ;;  %v3554_v0 = vsub.f32 1.0, %v3553_v10 }
 0x2e8   :  { %3712 = vst.msk [vmem:[%s7034_s4 + $0x238] sm:$0xff] %vm3640_vm8, %v3638_v46  ;;  %v3555_v55 = vmul.f32 %v4386_v9, %v3554_v0 }
 0x2ea   :  { %v3556_v37 = vadd.f32 %v4386_v9, %v3555_v55 }
 0x2ec   :  { %v3560_v63 = vsel %vm3559_vm13, %v4386_v9, %v3556_v37 }
 0x2ed   :  { %v3565_v24 = vsel %vm3562_vm14, %v3564_v21, %v3560_v63 }
 0x2ee   :  { %v3639_v26 = vmul.f32 %v3565_v24, %v7007_v16 }
 0x2f0   :  { %3713 = vst.msk [vmem:[%s7034_s4 + $0x240] sm:$0xff] %vm3640_vm8, %v3639_v26 }

// kernel: _lambda_.5
= control target key start
LH: loop header
LB: loop body
LE: loop exit
PB: predicated region body
PF: predicated region fallthrough
CT: control target
= control target key end

     0   :  { %vm79_vm0 = vcmask 1046528   ;;  %vm492_vm1 = vcmask 1045504   ;;  %vm123_vm2 = vcmask 523264   ;;  %vm1149_vm7 = vcmask 261120   ;;  %s2029_s1 = inlined_call_operand.vmem [shape: f32[4,64,32], index: 1, kind: input, shape index: {}]   ;;  %s2030_s0 = inlined_call_operand.vmem [shape: f32[178,64], index: 0, kind: input, shape index: {}]   ;;  %s2031_s2 = inlined_call_operand.vmem [shape: f32[1,32], index: 2, kind: input, shape index: {}]   ;;  %s2032_s3 = inlined_call_operand.vmem [shape: f32[1,32], index: 3, kind: input, shape index: {}]   ;;  %s2033_s4 = inlined_call_operand.vmem [shape: f32[168,32], index: 4, kind: output, shape index: {}]  }
   0x1   :  { %v1232_v0 = vld [vmem:[%s2029_s1 + $0xb8] sm:$0xff]  ;;  %v1231_v1 = vld [vmem:[%s2029_s1 + $0xb0] sm:$0xff]  ;;  %v1230_v5 = vld [vmem:[%s2029_s1 + $0xa8] sm:$0xff] }
   0x2   :  { %v1261_v2 = vld [vmem:[%s2029_s1 + $0xf8] sm:$0xff]  ;;  %390 = vmatpush.msra.mxu2 %v1232_v0  ;;  %v1260_v6 = vld [vmem:[%s2029_s1 + $0xf0] sm:$0xff]  ;;  %v1259_v9 = vld [vmem:[%s2029_s1 + $0xe8] sm:$0xff] }
   0x3   :  { %586 = vmatpush.msra.mxu3 %v1261_v2  ;;  %v1182_v3 = vld [vmem:[%s2029_s1 + $0x78] sm:$0xff]  ;;  %v1181_v7 = vld [vmem:[%s2029_s1 + $0x70] sm:$0xff]  ;;  %v1180_v10 = vld [vmem:[%s2029_s1 + $0x68] sm:$0xff] }
   0x4   :  { %v47_v4 = vld [vmem:[%s2029_s1 + $0x38] sm:$0xff]  ;;  %174 = vmatpush.msra.mxu0 %v1182_v3  ;;  %v46_v8 = vld [vmem:[%s2029_s1 + $0x30] sm:$0xff]  ;;  %391 = vmatpush.msra.mxu2 %v1231_v1  ;;  %v1229_v11 = vld [vmem:[%s2029_s1 + $0xa0] sm:$0xff] }
   0x5   :  { %296 = vmatpush.msra.mxu1 %v47_v4  ;;  %587 = vmatpush.msra.mxu3 %v1260_v6  ;;  %v45_v12 = vld [vmem:[%s2029_s1 + $0x28] sm:$0xff]  ;;  %v1258_v13 = vld [vmem:[%s2029_s1 + $0xe0] sm:$0xff]  ;;  %v1228_v16 = vld [vmem:[%s2029_s1 + $0x98] sm:$0xff] }
   0x6   :  { %175 = vmatpush.msra.mxu0 %v1181_v7  ;;  %392 = vmatpush.msra.mxu2 %v1230_v5  ;;  %v1179_v14 = vld [vmem:[%s2029_s1 + $0x60] sm:$0xff]  ;;  %v1257_v17 = vld [vmem:[%s2029_s1 + $0xd8] sm:$0xff]  ;;  %v1227_v20 = vld [vmem:[%s2029_s1 + $0x90] sm:$0xff] }
   0x7   :  { %297 = vmatpush.msra.mxu1 %v46_v8  ;;  %588 = vmatpush.msra.mxu3 %v1259_v9  ;;  %v44_v15 = vld [vmem:[%s2029_s1 + $0x20] sm:$0xff]  ;;  %v1178_v18 = vld [vmem:[%s2029_s1 + $0x58] sm:$0xff]  ;;  %v1256_v21 = vld [vmem:[%s2029_s1 + $0xd0] sm:$0xff] }
   0x8   :  { %176 = vmatpush.msra.mxu0 %v1180_v10  ;;  %393 = vmatpush.msra.mxu2 %v1229_v11  ;;  %v43_v19 = vld [vmem:[%s2029_s1 + $0x18] sm:$0xff]  ;;  %v1177_v22 = vld [vmem:[%s2029_s1 + $0x50] sm:$0xff]  ;;  %v18_v24 = vld [vmem:[%s2030_s0 + $0x8] sm:$0xff] }
   0x9   :  { %298 = vmatpush.msra.mxu1 %v45_v12  ;;  %589 = vmatpush.msra.mxu3 %v1258_v13  ;;  %v42_v23 = vld [vmem:[%s2029_s1 + $0x10] sm:$0xff]  ;;  %v1226_v26 = vld [vmem:[%s2029_s1 + $0x88] sm:$0xff]  ;;  %v81_v28 = vrot.slane %v18_v24, 1  ;;  %v493_v30 = vrot.slane %v18_v24, 2  ;;  %v17_v34 = vld [vmem:[%s2030_s0] sm:$0xff] }
   0xa   :  { %177 = vmatpush.msra.mxu0 %v1179_v14  ;;  %394 = vmatpush.msra.mxu2 %v1228_v16  ;;  %v19_v25 = vld [vmem:[%s2030_s0 + $0x10] sm:$0xff]  ;;  %v1255_v27 = vld [vmem:[%s2029_s1 + $0xc8] sm:$0xff]  ;;  %v1225_v35 = vld [vmem:[%s2029_s1 + $0x80] sm:$0xff]  ;;  %v80_v37 = vrot.slane %v17_v34, 1 }
   0xb   :  { %299 = vmatpush.msra.mxu1 %v44_v15  ;;  %590 = vmatpush.msra.mxu3 %v1257_v17  ;;  %v83_v29 = vrot.slane %v19_v25, 1  ;;  %v494_v31 = vrot.slane %v19_v25, 2  ;;  %v1176_v32 = vld [vmem:[%s2029_s1 + $0x48] sm:$0xff]  ;;  %v1254_v36 = vld [vmem:[%s2029_s1 + $0xc0] sm:$0xff]  ;;  %v20_v42 = vld [vmem:[%s2030_s0 + $0x18] sm:$0xff] }
   0xc   :  { %178 = vmatpush.msra.mxu0 %v1178_v18  ;;  %395 = vmatpush.msra.mxu2 %v1227_v20  ;;  %v41_v33 = vld [vmem:[%s2029_s1 + $0x8] sm:$0xff]  ;;  %v1175_v40 = vld [vmem:[%s2029_s1 + $0x40] sm:$0xff]  ;;  %v82_v43 = vsel %vm79_vm0, %v80_v37, %v81_v28  ;;  %v85_v44 = vrot.slane %v20_v42, 1  ;;  %v496_v45 = vrot.slane %v20_v42, 2  ;;  %v23_v58 = vld [vmem:[%s2030_s0 + $0x30] sm:$0xff] }
   0xd   :  { %300 = vmatpush.msra.mxu1 %v43_v19  ;;  %591 = vmatpush.msra.mxu3 %v1256_v21  ;;  %v84_v38 = vsel %vm79_vm0, %v81_v28, %v83_v29  ;;  %v495_v39 = vsel %vm492_vm1, %v493_v30, %v494_v31  ;;  %v40_v41 = vld [vmem:[%s2029_s1] sm:$0xff]  ;;  %v22_v53 = vld [vmem:[%s2030_s0 + $0x28] sm:$0xff]  ;;  %v91_v59 = vrot.slane %v23_v58, 1  ;;  %v502_v60 = vrot.slane %v23_v58, 2  ;;  %v24_v63 = vld [vmem:[%s2030_s0 + $0x38] sm:$0xff] }
   0xe   :  { %179 = vmatpush.msra.mxu0 %v1177_v22  ;;  %396 = vmatpush.msra.mxu2 %v1226_v26  ;;  %v86_v46 = vsel %vm79_vm0, %v83_v29, %v85_v44  ;;  %v497_v47 = vsel %vm492_vm1, %v494_v31, %v496_v45  ;;  %v21_v48 = vld [vmem:[%s2030_s0 + $0x20] sm:$0xff]  ;;  %v89_v54 = vrot.slane %v22_v53, 1  ;;  %v500_v55 = vrot.slane %v22_v53, 2  ;;  %v26_v9 = vld [vmem:[%s2030_s0 + $0x48] sm:$0xff]  ;;  %v27_v14 = vld [vmem:[%s2030_s0 + $0x50] sm:$0xff] }
   0xf   :  { %301 = vmatpush.msra.mxu1 %v42_v23  ;;  %592 = vmatpush.msra.mxu3 %v1255_v27  ;;  %v87_v49 = vrot.slane %v21_v48, 1  ;;  %v498_v50 = vrot.slane %v21_v48, 2  ;;  %v93_v0 = vrot.slane %v24_v63, 1  ;;  %v504_v1 = vrot.slane %v24_v63, 2  ;;  %v25_v4 = vld [vmem:[%s2030_s0 + $0x40] sm:$0xff]  ;;  %v28_v19 = vld [vmem:[%s2030_s0 + $0x58] sm:$0xff] }
  0x10   :  { %180 = vmatpush.msra.mxu0 %v1176_v32  ;;  %397 = vmatpush.msra.mxu2 %v1225_v35  ;;  %v92_v61 = vsel %vm79_vm0, %v89_v54, %v91_v59  ;;  %v503_v62 = vsel %vm492_vm1, %v500_v55, %v502_v60  ;;  %v95_v5 = vrot.slane %v25_v4, 1  ;;  %v506_v6 = vrot.slane %v25_v4, 2  ;;  %v30_v29 = vld [vmem:[%s2030_s0 + $0x68] sm:$0xff] }
  0x11   :  { %302 = vmatpush.msra.mxu1 %v41_v33  ;;  %593 = vmatpush.msra.mxu3 %v1254_v36  ;;  %v88_v51 = vsel %vm79_vm0, %v85_v44, %v87_v49  ;;  %v499_v52 = vsel %vm492_vm1, %v496_v45, %v498_v50  ;;  %v90_v56 = vsel %vm79_vm0, %v87_v49, %v89_v54  ;;  %v97_v10 = vrot.slane %v26_v9, 1  ;;  %v33_v44 = vld [vmem:[%s2030_s0 + $0x80] sm:$0xff]  ;;  %v34_v49 = vld [vmem:[%s2030_s0 + $0x88] sm:$0xff]  ;;  %v35_v54 = vld [vmem:[%s2030_s0 + $0x90] sm:$0xff] }
  0x12   :  { %1233 = vmatmul.msk.f32.vlgmr.msra.gmra.mxu2 %vm123_vm2, %v84_v38  ;;  %1262 = vmatmul.msk.f32.vlgmr.msra.gmra.mxu3 %vm123_vm2, %v495_v39  ;;  %v501_v57 = vsel %vm492_vm1, %v498_v50, %v500_v55  ;;  %v94_v2 = vsel %vm79_vm0, %v91_v59, %v93_v0  ;;  %v505_v3 = vsel %vm492_vm1, %v502_v60, %v504_v1  ;;  %v508_v11 = vrot.slane %v26_v9, 2  ;;  %v32_v39 = vld [vmem:[%s2030_s0 + $0x78] sm:$0xff] }
  0x13   :  { %181 = vmatpush.msra.mxu0 %v1175_v40  ;;  %303 = vmatpush.msra.mxu1 %v40_v41  ;;  %v96_v7 = vsel %vm79_vm0, %v93_v0, %v95_v5  ;;  %v507_v8 = vsel %vm492_vm1, %v504_v1, %v506_v6  ;;  %v98_v12 = vsel %vm79_vm0, %v95_v5, %v97_v10  ;;  %v99_v15 = vrot.slane %v27_v14, 1  ;;  %v1672_v59 = vld [vmem:[%s2030_s0 + $0x98] sm:$0xff] }
  0x14   :  { %1183 = vmatmul.msk.f32.vlgmr.msra.gmra.mxu0 %vm123_vm2, %v82_v43  ;;  %1204 = vmatmul.msk.f32.vlgmr.msra.gmra.mxu1 %vm123_vm2, %v17_v34  ;;  %v509_v13 = vsel %vm492_vm1, %v506_v6, %v508_v11  ;;  %v510_v16 = vrot.slane %v27_v14, 2  ;;  %v101_v20 = vrot.slane %v28_v19, 1  ;;  %v512_v21 = vrot.slane %v28_v19, 2  ;;  %v31_v34 = vld [vmem:[%s2030_s0 + $0x70] sm:$0xff] }
  0x15   :  { %v100_v17 = vsel %vm79_vm0, %v97_v10, %v99_v15  ;;  %v105_v30 = vrot.slane %v30_v29, 1  ;;  %v516_v31 = vrot.slane %v30_v29, 2  ;;  %v107_v35 = vrot.slane %v31_v34, 1 }
  0x16   :  { %v511_v18 = vsel %vm492_vm1, %v508_v11, %v510_v16  ;;  %v102_v22 = vsel %vm79_vm0, %v99_v15, %v101_v20  ;;  %v513_v23 = vsel %vm492_vm1, %v510_v16, %v512_v21  ;;  %v518_v36 = vrot.slane %v31_v34, 2 }
  0x17   :  { %v108_v37 = vsel %vm79_vm0, %v105_v30, %v107_v35  ;;  %v109_v40 = vrot.slane %v32_v39, 1  ;;  %v520_v41 = vrot.slane %v32_v39, 2  ;;  %v111_v45 = vrot.slane %v33_v44, 1 }
  0x18   :  { %v113_v50 = vrot.slane %v34_v49, 1  ;;  %v115_v55 = vrot.slane %v35_v54, 1  ;;  %v528_v0 = vrot.slane %v1672_v59, 2 }
  0x19   :  { %v521_v43 = vsel %vm492_vm1, %v518_v36, %v520_v41 }
  0x1a   :  { %1234 = vmatmul.msk.f32.gmra.mxu2 %vm123_vm2, %v86_v46  ;;  %1263 = vmatmul.msk.f32.gmra.mxu3 %vm123_vm2, %v497_v47  ;;  %v112_v47 = vsel %vm79_vm0, %v109_v40, %v111_v45 }
  0x1c   :  { %1184 = vmatmul.msk.f32.gmra.mxu0 %vm123_vm2, %v84_v38  ;;  %1205 = vmatmul.msk.f32.gmra.mxu1 %vm123_vm2, %v18_v24  ;;  %v29_v24 = vld [vmem:[%s2030_s0 + $0x60] sm:$0xff]  ;;  %v519_v38 = vsel %vm492_vm1, %v516_v31, %v518_v36 }
  0x1d   :  { %v514_v26 = vrot.slane %v29_v24, 2 }
  0x1f   :  { %v515_v28 = vsel %vm492_vm1, %v512_v21, %v514_v26  ;;  %v517_v33 = vsel %vm492_vm1, %v514_v26, %v516_v31 }
  0x22   :  { %1235 = vmatmul.msk.f32.gmra.mxu2 %vm123_vm2, %v88_v51  ;;  %1264 = vmatmul.msk.f32.gmra.mxu3 %vm123_vm2, %v499_v52  ;;  %v114_v52 = vsel %vm79_vm0, %v111_v45, %v113_v50 }
  0x24   :  { %1185 = vmatmul.msk.f32.gmra.mxu0 %vm123_vm2, %v86_v46  ;;  %1206 = vmatmul.msk.f32.gmra.mxu1 %vm123_vm2, %v19_v25  ;;  %v103_v25 = vrot.slane %v29_v24, 1  ;;  %v522_v46 = vrot.slane %v33_v44, 2 }
  0x26   :  { %v104_v27 = vsel %vm79_vm0, %v101_v20, %v103_v25  ;;  %v106_v32 = vsel %vm79_vm0, %v103_v25, %v105_v30 }
  0x2a   :  { %1236 = vmatmul.msk.f32.gmra.mxu2 %vm123_vm2, %v90_v56  ;;  %1265 = vmatmul.msk.f32.gmra.mxu3 %vm123_vm2, %v501_v57  ;;  %v116_v57 = vsel %vm79_vm0, %v113_v50, %v115_v55 }
  0x2c   :  { %1186 = vmatmul.msk.f32.gmra.mxu0 %vm123_vm2, %v88_v51  ;;  %1207 = vmatmul.msk.f32.gmra.mxu1 %vm123_vm2, %v20_v42  ;;  %v110_v42 = vsel %vm79_vm0, %v107_v35, %v109_v40  ;;  %v524_v51 = vrot.slane %v34_v49, 2 }
  0x32   :  { %1237 = vmatmul.msk.f32.gmra.mxu2 %vm123_vm2, %v92_v61  ;;  %1266 = vmatmul.msk.f32.gmra.mxu3 %vm123_vm2, %v503_v62 }
  0x34   :  { %1187 = vmatmul.msk.f32.gmra.mxu0 %vm123_vm2, %v90_v56  ;;  %1208 = vmatmul.msk.f32.gmra.mxu1 %vm123_vm2, %v21_v48  ;;  %v523_v48 = vsel %vm492_vm1, %v520_v41, %v522_v46  ;;  %v526_v56 = vrot.slane %v35_v54, 2  ;;  %v39_v41 = vld [vmem:[%s2030_s0 + $0xb0] sm:$0x3] }
  0x36   :  { %v529_v6 = vsel %vm492_vm1, %v526_v56, %v528_v0 }
  0x3a   :  { %1238 = vmatmul.msk.f32.gmra.mxu2 %vm123_vm2, %v94_v2  ;;  %1267 = vmatmul.msk.f32.gmra.mxu3 %vm123_vm2, %v505_v3 }
  0x3c   :  { %1188 = vmatmul.msk.f32.gmra.mxu0 %vm123_vm2, %v92_v61  ;;  %1209 = vmatmul.msk.f32.gmra.mxu1 %vm123_vm2, %v22_v53  ;;  %v525_v53 = vsel %vm492_vm1, %v522_v46, %v524_v51  ;;  %v378_v46 = vrot.slane %v39_v41, 1 }
  0x42   :  { %1239 = vmatmul.msk.f32.gmra.mxu2 %vm123_vm2, %v96_v7  ;;  %1268 = vmatmul.msk.f32.gmra.mxu3 %vm123_vm2, %v507_v8  ;;  %v1690_v8 = vld [vmem:[%s2032_s3] ss:$0 sm:$0xff] }
  0x44   :  { %1189 = vmatmul.msk.f32.gmra.mxu0 %vm123_vm2, %v94_v2  ;;  %1210 = vmatmul.msk.f32.gmra.mxu1 %vm123_vm2, %v23_v58  ;;  %v527_v58 = vsel %vm492_vm1, %v524_v51, %v526_v56 }
  0x4a   :  { %1240 = vmatmul.msk.f32.gmra.mxu2 %vm123_vm2, %v98_v12  ;;  %1269 = vmatmul.msk.f32.gmra.mxu3 %vm123_vm2, %v509_v13 }
  0x4c   :  { %1190 = vmatmul.msk.f32.gmra.mxu0 %vm123_vm2, %v96_v7  ;;  %1211 = vmatmul.msk.f32.gmra.mxu1 %vm123_vm2, %v24_v63  ;;  %v117_v63 = vrot.slane %v1672_v59, 1 }
  0x4e   :  { %v118_v5 = vsel %vm79_vm0, %v115_v55, %v117_v63 }
  0x52   :  { %1241 = vmatmul.msk.f32.gmra.mxu2 %vm123_vm2, %v100_v17  ;;  %1270 = vmatmul.msk.f32.gmra.mxu3 %vm123_vm2, %v511_v18 }
  0x54   :  { %1191 = vmatmul.msk.f32.gmra.mxu0 %vm123_vm2, %v98_v12  ;;  %1212 = vmatmul.msk.f32.gmra.mxu1 %vm123_vm2, %v25_v4  ;;  %v1683_v4 = vld [vmem:[%s2031_s2] ss:$0 sm:$0xff] }
  0x5a   :  { %1242 = vmatmul.msk.f32.gmra.mxu2 %vm123_vm2, %v102_v22  ;;  %1271 = vmatmul.msk.f32.gmra.mxu3 %vm123_vm2, %v513_v23 }
  0x5c   :  { %1192 = vmatmul.msk.f32.gmra.mxu0 %vm123_vm2, %v100_v17  ;;  %1213 = vmatmul.msk.f32.gmra.mxu1 %vm123_vm2, %v26_v9  ;;  %v1695_v9 = vld [vmem:[%s2030_s0 + $0xa0] sm:$0xff] }
  0x5d   :  { %v530_v15 = vrot.slane %v1695_v9, 2 }
  0x62   :  { %1243 = vmatmul.msk.f32.gmra.mxu2 %vm123_vm2, %v104_v27  ;;  %1272 = vmatmul.msk.f32.gmra.mxu3 %vm123_vm2, %v515_v28 }
  0x64   :  { %1193 = vmatmul.msk.f32.gmra.mxu0 %vm123_vm2, %v102_v22  ;;  %1214 = vmatmul.msk.f32.gmra.mxu1 %vm123_vm2, %v27_v14  ;;  %v119_v14 = vrot.slane %v1695_v9, 1  ;;  %v531_v22 = vsel %vm492_vm1, %v528_v0, %v530_v15 }
  0x66   :  { %v120_v21 = vsel %vm79_vm0, %v117_v63, %v119_v14 }
  0x6a   :  { %1244 = vmatmul.msk.f32.gmra.mxu2 %vm123_vm2, %v106_v32  ;;  %1273 = vmatmul.msk.f32.gmra.mxu3 %vm123_vm2, %v517_v33 }
  0x6c   :  { %1194 = vmatmul.msk.f32.gmra.mxu0 %vm123_vm2, %v104_v27  ;;  %1215 = vmatmul.msk.f32.gmra.mxu1 %vm123_vm2, %v28_v19 }
  0x72   :  { %1245 = vmatmul.msk.f32.gmra.mxu2 %vm123_vm2, %v108_v37  ;;  %1274 = vmatmul.msk.f32.gmra.mxu3 %vm123_vm2, %v519_v38 }
  0x74   :  { %1195 = vmatmul.msk.f32.gmra.mxu0 %vm123_vm2, %v106_v32  ;;  %1216 = vmatmul.msk.f32.gmra.mxu1 %vm123_vm2, %v29_v24  ;;  %v38_v24 = vld [vmem:[%s2030_s0 + $0xa8] sm:$0xff] }
  0x75   :  { %v532_v30 = vrot.slane %v38_v24, 2 }
  0x7a   :  { %1246 = vmatmul.msk.f32.gmra.mxu2 %vm123_vm2, %v110_v42  ;;  %1275 = vmatmul.msk.f32.gmra.mxu3 %vm123_vm2, %v521_v43 }
  0x7c   :  { %1196 = vmatmul.msk.f32.gmra.mxu0 %vm123_vm2, %v108_v37  ;;  %1217 = vmatmul.msk.f32.gmra.mxu1 %vm123_vm2, %v30_v29  ;;  %v121_v29 = vrot.slane %v38_v24, 1 }
  0x7e   :  { %v122_v38 = vsel %vm79_vm0, %v119_v14, %v121_v29  ;;  %v379_v56 = vsel %vm79_vm0, %v121_v29, %v378_v46 }
  0x82   :  { %1247 = vmatmul.msk.f32.gmra.mxu2 %vm123_vm2, %v112_v47  ;;  %1276 = vmatmul.msk.f32.gmra.mxu3 %vm123_vm2, %v523_v48 }
  0x84   :  { %1197 = vmatmul.msk.f32.gmra.mxu0 %vm123_vm2, %v110_v42  ;;  %1218 = vmatmul.msk.f32.gmra.mxu1 %vm123_vm2, %v31_v34 }
  0x8a   :  { %1248 = vmatmul.msk.f32.gmra.mxu2 %vm123_vm2, %v114_v52  ;;  %1277 = vmatmul.msk.f32.gmra.mxu3 %vm123_vm2, %v525_v53 }
  0x8c   :  { %1198 = vmatmul.msk.f32.gmra.mxu0 %vm123_vm2, %v112_v47  ;;  %1219 = vmatmul.msk.f32.gmra.mxu1 %vm123_vm2, %v32_v39  ;;  %v533_v39 = vsel %vm492_vm1, %v530_v15, %v532_v30  ;;  %v534_v47 = vrot.slane %v39_v41, 2 }
  0x91   :  { %v183_v60 = vpop.f32.mrf.mxu0  ;;  %v305_v61 = vpop.f32.mrf.mxu1 }
  0x92   :  { %1249 = vmatmul.msk.f32.gmra.mxu2 %vm123_vm2, %v116_v57  ;;  %v306_v62 = vadd.f32 %v305_v61, %v183_v60  ;;  %1278 = vmatmul.msk.f32.gmra.mxu3 %vm123_vm2, %v527_v58 }
  0x94   :  { %1199 = vmatmul.msk.f32.gmra.mxu0 %vm123_vm2, %v114_v52  ;;  %1220 = vmatmul.msk.f32.gmra.mxu1 %vm123_vm2, %v33_v44 }
  0x95   :  { %v399_v1 = vpop.f32.mrf.mxu2  ;;  %v595_v2 = vpop.f32.mrf.mxu3 }
  0x96   :  { %v462_v3 = vadd.f32 %v399_v1, %v306_v62 }
  0x98   :  { %v658_v7 = vadd.f32 %v595_v2, %v462_v3 }
  0x99   :  { %v186_v10 = vpop.f32.mrf.mxu0  ;;  %v308_v11 = vpop.f32.mrf.mxu1 }
  0x9a   :  { %v683_v12 = vmul.f32 %v1683_v4, %v658_v7  ;;  %1250 = vmatmul.msk.f32.gmra.mxu2 %vm123_vm2, %v118_v5  ;;  %v309_v13 = vadd.f32 %v308_v11, %v186_v10  ;;  %1279 = vmatmul.msk.f32.gmra.mxu3 %vm123_vm2, %v529_v6 }
  0x9c   :  { %v1703_v16 = vadd.f32 %v1690_v8, %v683_v12  ;;  %1200 = vmatmul.msk.f32.gmra.mxu0 %vm123_vm2, %v116_v57  ;;  %1221 = vmatmul.msk.f32.gmra.mxu1 %vm123_vm2, %v34_v49  ;;  %v535_v57 = vsel %vm492_vm1, %v532_v30, %v534_v47 }
  0x9d   :  { %v402_v17 = vpop.f32.mrf.mxu2  ;;  %v598_v18 = vpop.f32.mrf.mxu3 }
  0x9e   :  { %v1283_v19 = vmul.f32 -1.442695, %v1703_v16  ;;  %v463_v20 = vadd.f32 %v402_v17, %v309_v13 }
  0xa0   :  { %1306 = vpow2.f32 %v1283_v19  ;;  %v659_v23 = vadd.f32 %v598_v18, %v463_v20 }
  0xa1   :  { %v189_v25 = vpop.f32.mrf.mxu0  ;;  %v311_v26 = vpop.f32.mrf.mxu1 }
  0xa2   :  { %v684_v27 = vmul.f32 %v1683_v4, %v659_v23  ;;  %1251 = vmatmul.msk.f32.gmra.mxu2 %vm123_vm2, %v120_v21  ;;  %v312_v28 = vadd.f32 %v311_v26, %v189_v25  ;;  %1280 = vmatmul.msk.f32.gmra.mxu3 %vm123_vm2, %v531_v22 }
  0xa4   :  { %v1717_v31 = vadd.f32 %v1690_v8, %v684_v27  ;;  %1201 = vmatmul.msk.f32.gmra.mxu0 %vm123_vm2, %v118_v5  ;;  %1222 = vmatmul.msk.f32.gmra.mxu1 %vm123_vm2, %v35_v54 }
  0xa5   :  { %v405_v32 = vpop.f32.mrf.mxu2  ;;  %v601_v33 = vpop.f32.mrf.mxu3 }
  0xa6   :  { %v1307_v34 = vpop.eup %1306  ;;  %v1284_v35 = vmul.f32 -1.442695, %v1717_v31  ;;  %v464_v36 = vadd.f32 %v405_v32, %v312_v28 }
  0xa7   :  { %v792_v37 = vadd.f32 1.0, %v1307_v34 }
  0xa8   :  { %1308 = vpow2.f32 %v1284_v35  ;;  %v660_v40 = vadd.f32 %v601_v33, %v464_v36 }
  0xa9   :  { %1310 = vrcp.f32 %v792_v37  ;;  %v192_v42 = vpop.f32.mrf.mxu0  ;;  %v314_v43 = vpop.f32.mrf.mxu1  ;;  %v824_v1 = vand.u32 2147483648, %v792_v37  ;;  %v822_v3 = vand.u32 2147483647, %v792_v37  ;;  %vm818_vm4 = vweird.f32 %v792_v37 }
  0xaa   :  { %v685_v44 = vmul.f32 %v1683_v4, %v660_v40  ;;  %1252 = vmatmul.msk.f32.gmra.mxu2 %vm123_vm2, %v122_v38  ;;  %v315_v45 = vadd.f32 %v314_v43, %v192_v42  ;;  %1281 = vmatmul.msk.f32.gmra.mxu3 %vm123_vm2, %v533_v39 }
  0xab   :  { %v825_v15 = vor.u32 1.1754944e-38, %v824_v1  ;;  %vm823_vm6 = vcmp.eq.f32.partialorder %v822_v3, 8.507059e+37 }
  0xac   :  { %v1731_v48 = vadd.f32 %v1690_v8, %v685_v44  ;;  %1202 = vmatmul.msk.f32.gmra.mxu0 %vm123_vm2, %v120_v21  ;;  %1223 = vmatmul.msk.f32.gmra.mxu1 %vm123_vm2, %v1672_v59 }
  0xad   :  { %v408_v49 = vpop.f32.mrf.mxu2  ;;  %v604_v50 = vpop.f32.mrf.mxu3 }
  0xae   :  { %v1309_v51 = vpop.eup %1308  ;;  %v1285_v52 = vmul.f32 -1.442695, %v1731_v48  ;;  %v465_v53 = vadd.f32 %v408_v49, %v315_v45 }
  0xaf   :  { %v1311_v54 = vpop.eup %1310  ;;  %v1737_v55 = vadd.f32 1.0, %v1309_v51 }
  0xb0   :  { %v814_v58 = vmul.f32 %v1311_v54, %v792_v37  ;;  %1312 = vpow2.f32 %v1285_v52  ;;  %v661_v60 = vadd.f32 %v604_v50, %v465_v53  ;;  %vm819_vm3 = vweird.f32 %v1311_v54 }
  0xb1   :  { %1314 = vrcp.f32 %v1737_v55  ;;  %v195_v61 = vpop.f32.mrf.mxu0  ;;  %v317_v59 = vpop.f32.mrf.mxu1  ;;  %vm820_vm5 = vmor %vm818_vm4, %vm819_vm3  ;;  %v839_v25 = vand.u32 2147483648, %v1737_v55  ;;  %v837_v28 = vand.u32 2147483647, %v1737_v55  ;;  %vm833_vm9 = vweird.f32 %v1737_v55 }
  0xb2   :  { %v815_v62 = vsub.f32 1.0, %v814_v58  ;;  %v686_v63 = vmul.f32 %v1683_v4, %v661_v60  ;;  %1253 = vmatmul.msk.f32.gmra.mxu2 %vm123_vm2, %v379_v56  ;;  %v318_v0 = vadd.f32 %v317_v59, %v195_v61  ;;  %1282 = vmatmul.msk.f32.gmra.mxu3 %vm123_vm2, %v535_v57 }
  0xb3   :  { %v840_v36 = vor.u32 1.1754944e-38, %v839_v25  ;;  %vm838_vm11 = vcmp.eq.f32.partialorder %v837_v28, 8.507059e+37 }
  0xb4   :  { %v816_v2 = vmul.f32 %v1311_v54, %v815_v62  ;;  %v1746_v5 = vadd.f32 %v1690_v8, %v686_v63  ;;  %1203 = vmatmul.msk.f32.gmra.mxu0 %vm123_vm2, %v122_v38  ;;  %1224 = vmatmul.msk.f32.gmra.mxu1 %vm123_vm2, %v1695_v9 }
  0xb5   :  { %v411_v6 = vpop.f32.mrf.mxu2  ;;  %v607_v7 = vpop.f32.mrf.mxu3 }
  0xb6   :  { %v1313_v10 = vpop.eup %1312  ;;  %v817_v11 = vadd.f32 %v1311_v54, %v816_v2  ;;  %v1286_v12 = vmul.f32 -1.442695, %v1746_v5  ;;  %v466_v13 = vadd.f32 %v411_v6, %v318_v0 }
  0xb7   :  { %v1315_v14 = vpop.eup %1314  ;;  %v1752_v17 = vadd.f32 1.0, %v1313_v10 }
  0xb8   :  { %v821_v18 = vsel %vm820_vm5, %v1311_v54, %v817_v11  ;;  %v829_v19 = vmul.f32 %v1315_v14, %v1737_v55  ;;  %1316 = vpow2.f32 %v1286_v12  ;;  %v662_v24 = vadd.f32 %v607_v7, %v466_v13 }
  0xb9   :  { %v826_v20 = vsel %vm823_vm6, %v825_v15, %v821_v18  ;;  %1318 = vrcp.f32 %v1752_v17  ;;  %v198_v9 = vpop.f32.mrf.mxu0  ;;  %v320_v21 = vpop.f32.mrf.mxu1  ;;  %vm834_vm8 = vweird.f32 %v1315_v14  ;;  %v854_v47 = vand.u32 2147483648, %v1752_v17 }
  0xba   :  { %v1128_v22 = vmul.f32 %v826_v20, %v1703_v16  ;;  %v830_v23 = vsub.f32 1.0, %v829_v19  ;;  %v321_v26 = vadd.f32 %v320_v21, %v198_v9  ;;  %v687_v29 = vmul.f32 %v1683_v4, %v662_v24  ;;  %vm835_vm10 = vmor %vm833_vm9, %vm834_vm8 }
  0xbb   :  { %v852_v52 = vand.u32 2147483647, %v1752_v17  ;;  %vm848_vm13 = vweird.f32 %v1752_v17  ;;  %v855_v58 = vor.u32 1.1754944e-38, %v854_v47 }
  0xbc   :  { %1150 = vst.msk [vmem:[%s2033_s4] sm:$0xff] %vm1149_vm7, %v1128_v22  ;;  %v831_v27 = vmul.f32 %v1315_v14, %v830_v23  ;;  %v1766_v34 = vadd.f32 %v1690_v8, %v687_v29 }
  0xbd   :  { %v414_v30 = vpop.f32.mrf.mxu2  ;;  %v610_v32 = vpop.f32.mrf.mxu3  ;;  %vm853_vm15 = vcmp.eq.f32.partialorder %v852_v52, 8.507059e+37 }
  0xbe   :  { %v1317_v33 = vpop.eup %1316  ;;  %v832_v16 = vadd.f32 %v1315_v14, %v831_v27  ;;  %v467_v38 = vadd.f32 %v414_v30, %v321_v26  ;;  %v1287_v41 = vmul.f32 -1.442695, %v1766_v34 }
  0xbf   :  { %v1319_v35 = vpop.eup %1318  ;;  %v795_v37 = vadd.f32 1.0, %v1317_v33 }
  0xc0   :  { %v836_v39 = vsel %vm835_vm10, %v1315_v14, %v832_v16  ;;  %v844_v40 = vmul.f32 %v1319_v35, %v1752_v17  ;;  %v663_v49 = vadd.f32 %v610_v32, %v467_v38  ;;  %vm849_vm12 = vweird.f32 %v1319_v35 }
  0xc1   :  { %v841_v42 = vsel %vm838_vm11, %v840_v36, %v836_v39  ;;  %1320 = vrcp.f32 %v795_v37  ;;  %v201_v43 = vpop.f32.mrf.mxu0  ;;  %v323_v44 = vpop.f32.mrf.mxu1  ;;  %vm850_vm14 = vmor %vm848_vm13, %vm849_vm12  ;;  %v867_v13 = vand.u32 2147483647, %v795_v37  ;;  %v869_v14 = vand.u32 2147483648, %v795_v37 }
  0xc2   :  { %v1129_v45 = vmul.f32 %v841_v42, %v1717_v31  ;;  %v845_v46 = vsub.f32 1.0, %v844_v40  ;;  %1322 = vpow2.f32 %v1287_v41  ;;  %v324_v50 = vadd.f32 %v323_v44, %v201_v43 }
  0xc3   :  { %v688_v53 = vmul.f32 %v1683_v4, %v663_v49  ;;  %vm863_vm1 = vweird.f32 %v795_v37  ;;  %v870_v21 = vor.u32 1.1754944e-38, %v869_v14  ;;  %vm868_vm3 = vcmp.eq.f32.partialorder %v867_v13, 8.507059e+37 }
  0xc4   :  { %1151 = vst.msk [vmem:[%s2033_s4 + $0x8] sm:$0xff] %vm1149_vm7, %v1129_v45  ;;  %v846_v51 = vmul.f32 %v1319_v35, %v845_v46 }
  0xc5   :  { %v417_v54 = vpop.f32.mrf.mxu2  ;;  %v613_v55 = vpop.f32.mrf.mxu3  ;;  %v1780_v60 = vadd.f32 %v1690_v8, %v688_v53 }
  0xc6   :  { %v847_v31 = vadd.f32 %v1319_v35, %v846_v51  ;;  %v468_v56 = vadd.f32 %v417_v54, %v324_v50 }
  0xc7   :  { %v1321_v57 = vpop.eup %1320  ;;  %v1288_v2 = vmul.f32 -1.442695, %v1780_v60 }
  0xc8   :  { %v1323_v61 = vpop.eup %1322  ;;  %v851_v59 = vsel %vm850_vm14, %v1319_v35, %v847_v31  ;;  %v859_v62 = vmul.f32 %v1321_v57, %v795_v37  ;;  %v664_v63 = vadd.f32 %v613_v55, %v468_v56  ;;  %vm864_vm0 = vweird.f32 %v1321_v57 }
  0xc9   :  { %v856_v0 = vsel %vm853_vm15, %v855_v58, %v851_v59  ;;  %v1782_v1 = vadd.f32 1.0, %v1323_v61  ;;  %v204_v3 = vpop.f32.mrf.mxu0  ;;  %v326_v6 = vpop.f32.mrf.mxu1  ;;  %vm865_vm2 = vmor %vm863_vm1, %vm864_vm0 }
  0xca   :  { %v1130_v7 = vmul.f32 %v856_v0, %v1731_v48  ;;  %v860_v10 = vsub.f32 1.0, %v859_v62  ;;  %v689_v11 = vmul.f32 %v1683_v4, %v664_v63  ;;  %v327_v12 = vadd.f32 %v326_v6, %v204_v3 }
  0xcb   :  { %1324 = vrcp.f32 %v1782_v1  ;;  %v882_v37 = vand.u32 2147483647, %v1782_v1  ;;  %v884_v38 = vand.u32 2147483648, %v1782_v1  ;;  %vm878_vm5 = vweird.f32 %v1782_v1 }
  0xcc   :  { %1152 = vst.msk [vmem:[%s2033_s4 + $0x10] sm:$0xff] %vm1149_vm7, %v1130_v7  ;;  %v861_v15 = vmul.f32 %v1321_v57, %v860_v10  ;;  %1326 = vpow2.f32 %v1288_v2  ;;  %v1793_v17 = vadd.f32 %v1690_v8, %v689_v11 }
  0xcd   :  { %v420_v48 = vpop.f32.mrf.mxu2  ;;  %v616_v18 = vpop.f32.mrf.mxu3  ;;  %v885_v47 = vor.u32 1.1754944e-38, %v884_v38  ;;  %vm883_vm8 = vcmp.eq.f32.partialorder %v882_v37, 8.507059e+37 }
  0xce   :  { %v862_v19 = vadd.f32 %v1321_v57, %v861_v15  ;;  %v1289_v20 = vmul.f32 -1.442695, %v1793_v17  ;;  %v469_v9 = vadd.f32 %v420_v48, %v327_v12 }
  0xd0   :  { %v866_v22 = vsel %vm865_vm2, %v1321_v57, %v862_v19  ;;  %1328 = vpow2.f32 %v1289_v20  ;;  %v665_v23 = vadd.f32 %v616_v18, %v469_v9 }
  0xd1   :  { %v1325_v24 = vpop.eup %1324  ;;  %v871_v25 = vsel %vm868_vm3, %v870_v21, %v866_v22  ;;  %v207_v26 = vpop.f32.mrf.mxu0 }
  0xd2   :  { %v329_v27 = vpop.f32.mrf.mxu1  ;;  %v1327_v28 = vpop.eup %1326  ;;  %v1131_v29 = vmul.f32 %v871_v25, %v1746_v5  ;;  %v874_v30 = vmul.f32 %v1325_v24, %v1782_v1  ;;  %v690_v32 = vmul.f32 %v1683_v4, %v665_v23  ;;  %vm879_vm4 = vweird.f32 %v1325_v24 }
  0xd3   :  { %v797_v33 = vadd.f32 1.0, %v1327_v28  ;;  %v330_v16 = vadd.f32 %v329_v27, %v207_v26  ;;  %vm880_vm6 = vmor %vm878_vm5, %vm879_vm4 }
  0xd4   :  { %1153 = vst.msk [vmem:[%s2033_s4 + $0x18] sm:$0xff] %vm1149_vm7, %v1131_v29  ;;  %v875_v35 = vsub.f32 1.0, %v874_v30  ;;  %v1804_v36 = vadd.f32 %v1690_v8, %v690_v32 }
  0xd5   :  { %1330 = vrcp.f32 %v797_v33  ;;  %v423_v5 = vpop.f32.mrf.mxu2  ;;  %v619_v39 = vpop.f32.mrf.mxu3  ;;  %v897_v63 = vand.u32 2147483647, %v797_v33  ;;  %v899_v3 = vand.u32 2147483648, %v797_v33  ;;  %vm893_vm10 = vweird.f32 %v797_v33 }
  0xd6   :  { %v1329_v40 = vpop.eup %1328  ;;  %v876_v41 = vmul.f32 %v1325_v24, %v875_v35  ;;  %v1290_v42 = vmul.f32 -1.442695, %v1804_v36  ;;  %v470_v43 = vadd.f32 %v423_v5, %v330_v16 }
  0xd7   :  { %v1809_v44 = vadd.f32 1.0, %v1329_v40  ;;  %vm898_vm11 = vcmp.eq.f32.partialorder %v897_v63, 8.507059e+37  ;;  %v900_v15 = vor.u32 1.1754944e-38, %v899_v3 }
  0xd8   :  { %v877_v45 = vadd.f32 %v1325_v24, %v876_v41  ;;  %1332 = vpow2.f32 %v1290_v42  ;;  %v666_v46 = vadd.f32 %v619_v39, %v470_v43 }
  0xd9   :  { %1334 = vrcp.f32 %v1809_v44  ;;  %v210_v49 = vpop.f32.mrf.mxu0  ;;  %v912_v48 = vand.u32 2147483647, %v1809_v44  ;;  %v914_v18 = vand.u32 2147483648, %v1809_v44  ;;  %vm908_vm14 = vweird.f32 %v1809_v44 }
  0xda   :  { %v332_v50 = vpop.f32.mrf.mxu1  ;;  %v881_v51 = vsel %vm880_vm6, %v1325_v24, %v877_v45  ;;  %v691_v52 = vmul.f32 %v1683_v4, %v666_v46 }
  0xdb   :  { %v333_v53 = vadd.f32 %v332_v50, %v210_v49  ;;  %v1331_v54 = vpop.eup %1330  ;;  %v886_v55 = vsel %vm883_vm8, %v885_v47, %v881_v51  ;;  %v915_v30 = vor.u32 1.1754944e-38, %v914_v18  ;;  %vm913_vm0 = vcmp.eq.f32.partialorder %v912_v48, 8.507059e+37 }
  0xdc   :  { %v1132_v31 = vmul.f32 %v886_v55, %v1766_v34  ;;  %v889_v56 = vmul.f32 %v1331_v54, %v797_v33  ;;  %v1816_v57 = vadd.f32 %v1690_v8, %v691_v52  ;;  %vm894_vm9 = vweird.f32 %v1331_v54 }
  0xdd   :  { %v426_v58 = vpop.f32.mrf.mxu2  ;;  %v622_v61 = vpop.f32.mrf.mxu3  ;;  %vm895_vm12 = vmor %vm893_vm10, %vm894_vm9 }
  0xde   :  { %v1333_v59 = vpop.eup %1332  ;;  %1154 = vst.msk [vmem:[%s2033_s4 + $0x20] sm:$0xff] %vm1149_vm7, %v1132_v31  ;;  %v890_v62 = vsub.f32 1.0, %v889_v56  ;;  %v1291_v0 = vmul.f32 -1.442695, %v1816_v57  ;;  %v471_v1 = vadd.f32 %v426_v58, %v333_v53 }
  0xdf   :  { %v1335_v2 = vpop.eup %1334  ;;  %v1823_v34 = vadd.f32 1.0, %v1333_v59 }
  0xe0   :  { %v891_v6 = vmul.f32 %v1331_v54, %v890_v62  ;;  %v904_v7 = vmul.f32 %v1335_v2, %v1809_v44  ;;  %1336 = vpow2.f32 %v1291_v0  ;;  %v667_v14 = vadd.f32 %v622_v61, %v471_v1 }
  0xe1   :  { %1338 = vrcp.f32 %v1823_v34  ;;  %v213_v10 = vpop.f32.mrf.mxu0  ;;  %vm909_vm13 = vweird.f32 %v1335_v2  ;;  %v929_v41 = vand.u32 2147483648, %v1823_v34  ;;  %v927_v45 = vand.u32 2147483647, %v1823_v34 }
  0xe2   :  { %v335_v11 = vpop.f32.mrf.mxu1  ;;  %v892_v12 = vadd.f32 %v1331_v54, %v891_v6  ;;  %v905_v13 = vsub.f32 1.0, %v904_v7  ;;  %v692_v21 = vmul.f32 %v1683_v4, %v667_v14  ;;  %vm910_vm15 = vmor %vm908_vm14, %vm909_vm13  ;;  %vm923_vm2 = vweird.f32 %v1823_v34 }
  0xe3   :  { %v336_v19 = vadd.f32 %v335_v11, %v213_v10  ;;  %v930_v52 = vor.u32 1.1754944e-38, %v929_v41  ;;  %vm928_vm4 = vcmp.eq.f32.partialorder %v927_v45, 8.507059e+37 }
  0xe4   :  { %v896_v20 = vsel %vm895_vm12, %v1331_v54, %v892_v12  ;;  %v906_v9 = vmul.f32 %v1335_v2, %v905_v13  ;;  %v1833_v28 = vadd.f32 %v1690_v8, %v692_v21 }
  0xe5   :  { %v901_v22 = vsel %vm898_vm11, %v900_v15, %v896_v20  ;;  %v429_v23 = vpop.f32.mrf.mxu2  ;;  %v625_v24 = vpop.f32.mrf.mxu3 }
  0xe6   :  { %v1337_v25 = vpop.eup %1336  ;;  %v1133_v26 = vmul.f32 %v901_v22, %v1780_v60  ;;  %v907_v27 = vadd.f32 %v1335_v2, %v906_v9  ;;  %v472_v33 = vadd.f32 %v429_v23, %v336_v19  ;;  %v1292_v35 = vmul.f32 -1.442695, %v1833_v28 }
  0xe7   :  { %v1339_v29 = vpop.eup %1338  ;;  %v1835_v32 = vadd.f32 1.0, %v1337_v25 }
  0xe8   :  { %1155 = vst.msk [vmem:[%s2033_s4 + $0x28] sm:$0xff] %vm1149_vm7, %v1133_v26  ;;  %v911_v16 = vsel %vm910_vm15, %v1335_v2, %v907_v27  ;;  %v919_v60 = vmul.f32 %v1339_v29, %v1823_v34  ;;  %v668_v42 = vadd.f32 %v625_v24, %v472_v33  ;;  %vm924_vm1 = vweird.f32 %v1339_v29 }
  0xe9   :  { %v916_v37 = vsel %vm913_vm0, %v915_v30, %v911_v16  ;;  %1340 = vrcp.f32 %v1835_v32  ;;  %v216_v38 = vpop.f32.mrf.mxu0  ;;  %vm925_vm3 = vmor %vm923_vm2, %vm924_vm1  ;;  %v942_v34 = vand.u32 2147483647, %v1835_v32  ;;  %v944_v6 = vand.u32 2147483648, %v1835_v32 }
  0xea   :  { %v338_v5 = vpop.f32.mrf.mxu1  ;;  %v1134_v39 = vmul.f32 %v916_v37, %v1793_v17  ;;  %v920_v40 = vsub.f32 1.0, %v919_v60  ;;  %1342 = vpow2.f32 %v1292_v35  ;;  %v693_v46 = vmul.f32 %v1683_v4, %v668_v42 }
  0xeb   :  { %v339_v43 = vadd.f32 %v338_v5, %v216_v38  ;;  %vm938_vm6 = vweird.f32 %v1835_v32  ;;  %v945_v15 = vor.u32 1.1754944e-38, %v944_v6  ;;  %vm943_vm9 = vcmp.eq.f32.partialorder %v942_v34, 8.507059e+37 }
  0xec   :  { %1156 = vst.msk [vmem:[%s2033_s4 + $0x30] sm:$0xff] %vm1149_vm7, %v1134_v39  ;;  %v921_v44 = vmul.f32 %v1339_v29, %v920_v40  ;;  %v1854_v53 = vadd.f32 %v1690_v8, %v693_v46 }
  0xed   :  { %v432_v47 = vpop.f32.mrf.mxu2  ;;  %v628_v49 = vpop.f32.mrf.mxu3 }
  0xee   :  { %v922_v17 = vadd.f32 %v1339_v29, %v921_v44  ;;  %v473_v50 = vadd.f32 %v432_v47, %v339_v43  ;;  %v1293_v59 = vmul.f32 -1.442695, %v1854_v53 }
  0xef   :  { %v1341_v51 = vpop.eup %1340 }
  0xf0   :  { %v1343_v54 = vpop.eup %1342  ;;  %v926_v55 = vsel %vm925_vm3, %v1339_v29, %v922_v17  ;;  %v934_v31 = vmul.f32 %v1341_v51, %v1835_v32  ;;  %v669_v56 = vadd.f32 %v628_v49, %v473_v50  ;;  %vm939_vm5 = vweird.f32 %v1341_v51 }
  0xf1   :  { %v931_v58 = vsel %vm928_vm4, %v930_v52, %v926_v55  ;;  %v1857_v61 = vadd.f32 1.0, %v1343_v54  ;;  %v219_v62 = vpop.f32.mrf.mxu0  ;;  %vm940_vm8 = vmor %vm938_vm6, %vm939_vm5 }
  0xf2   :  { %v341_v63 = vpop.f32.mrf.mxu1  ;;  %v1135_v0 = vmul.f32 %v931_v58, %v1804_v36  ;;  %v935_v1 = vsub.f32 1.0, %v934_v31  ;;  %v694_v2 = vmul.f32 %v1683_v4, %v669_v56 }
  0xf3   :  { %v342_v3 = vadd.f32 %v341_v63, %v219_v62  ;;  %1344 = vrcp.f32 %v1857_v61  ;;  %v957_v32 = vand.u32 2147483647, %v1857_v61  ;;  %v959_v33 = vand.u32 2147483648, %v1857_v61 }
  0xf4   :  { %1157 = vst.msk [vmem:[%s2033_s4 + $0x38] sm:$0xff] %vm1149_vm7, %v1135_v0  ;;  %v936_v7 = vmul.f32 %v1341_v51, %v935_v1  ;;  %1346 = vpow2.f32 %v1293_v59  ;;  %v1870_v36 = vadd.f32 %v1690_v8, %v694_v2  ;;  %vm953_vm11 = vweird.f32 %v1857_v61 }
  0xf5   :  { %v435_v10 = vpop.f32.mrf.mxu2  ;;  %v631_v11 = vpop.f32.mrf.mxu3  ;;  %v960_v41 = vor.u32 1.1754944e-38, %v959_v33  ;;  %vm958_vm13 = vcmp.eq.f32.partialorder %v957_v32, 8.507059e+37 }
  0xf6   :  { %v937_v12 = vadd.f32 %v1341_v51, %v936_v7  ;;  %v1294_v13 = vmul.f32 -1.442695, %v1870_v36  ;;  %v474_v14 = vadd.f32 %v435_v10, %v342_v3 }
  0xf8   :  { %v941_v48 = vsel %vm940_vm8, %v1341_v51, %v937_v12  ;;  %1348 = vpow2.f32 %v1294_v13  ;;  %v670_v18 = vadd.f32 %v631_v11, %v474_v14 }
  0xf9   :  { %v1345_v19 = vpop.eup %1344  ;;  %v946_v20 = vsel %vm943_vm9, %v945_v15, %v941_v48  ;;  %v222_v9 = vpop.f32.mrf.mxu0 }
  0xfa   :  { %v344_v21 = vpop.f32.mrf.mxu1  ;;  %v1347_v22 = vpop.eup %1346  ;;  %v1136_v23 = vmul.f32 %v946_v20, %v1816_v57  ;;  %v949_v24 = vmul.f32 %v1345_v19, %v1857_v61  ;;  %v695_v25 = vmul.f32 %v1683_v4, %v670_v18  ;;  %vm954_vm10 = vweird.f32 %v1345_v19 }
  0xfb   :  { %v802_v26 = vadd.f32 1.0, %v1347_v22  ;;  %v345_v27 = vadd.f32 %v344_v21, %v222_v9  ;;  %vm955_vm12 = vmor %vm953_vm11, %vm954_vm10 }
  0xfc   :  { %1158 = vst.msk [vmem:[%s2033_s4 + $0x40] sm:$0xff] %vm1149_vm7, %v1136_v23  ;;  %v950_v29 = vsub.f32 1.0, %v949_v24  ;;  %v1882_v30 = vadd.f32 %v1690_v8, %v695_v25 }
  0xfd   :  { %1350 = vrcp.f32 %v802_v26  ;;  %v438_v57 = vpop.f32.mrf.mxu2  ;;  %v634_v16 = vpop.f32.mrf.mxu3  ;;  %v972_v56 = vand.u32 2147483647, %v802_v26  ;;  %v974_v62 = vand.u32 2147483648, %v802_v26  ;;  %vm968_vm15 = vweird.f32 %v802_v26 }
  0xfe   :  { %v1349_v60 = vpop.eup %1348  ;;  %v951_v35 = vmul.f32 %v1345_v19, %v950_v29  ;;  %v1295_v37 = vmul.f32 -1.442695, %v1882_v30  ;;  %v475_v38 = vadd.f32 %v438_v57, %v345_v27 }
  0xff   :  { %v1887_v5 = vadd.f32 1.0, %v1349_v60  ;;  %vm973_vm0 = vcmp.eq.f32.partialorder %v972_v56, 8.507059e+37  ;;  %v975_v7 = vor.u32 1.1754944e-38, %v974_v62 }
 0x100   :  { %v952_v39 = vadd.f32 %v1345_v19, %v951_v35  ;;  %1352 = vpow2.f32 %v1295_v37  ;;  %v671_v40 = vadd.f32 %v634_v16, %v475_v38 }
 0x101   :  { %1354 = vrcp.f32 %v1887_v5  ;;  %v225_v42 = vpop.f32.mrf.mxu0  ;;  %v987_v10 = vand.u32 2147483647, %v1887_v5  ;;  %v989_v11 = vand.u32 2147483648, %v1887_v5  ;;  %vm983_vm3 = vweird.f32 %v1887_v5 }
 0x102   :  { %v347_v43 = vpop.f32.mrf.mxu1  ;;  %v956_v44 = vsel %vm955_vm12, %v1345_v19, %v952_v39  ;;  %v696_v45 = vmul.f32 %v1683_v4, %v671_v40 }
 0x103   :  { %v348_v46 = vadd.f32 %v347_v43, %v225_v42  ;;  %v1351_v47 = vpop.eup %1350  ;;  %v961_v49 = vsel %vm958_vm13, %v960_v41, %v956_v44  ;;  %v990_v24 = vor.u32 1.1754944e-38, %v989_v11  ;;  %vm988_vm5 = vcmp.eq.f32.partialorder %v987_v10, 8.507059e+37 }
 0x104   :  { %v1137_v17 = vmul.f32 %v961_v49, %v1833_v28  ;;  %v964_v50 = vmul.f32 %v1351_v47, %v802_v26  ;;  %v1894_v51 = vadd.f32 %v1690_v8, %v696_v45  ;;  %vm969_vm14 = vweird.f32 %v1351_v47 }
 0x105   :  { %v441_v52 = vpop.f32.mrf.mxu2  ;;  %v637_v54 = vpop.f32.mrf.mxu3  ;;  %vm970_vm1 = vmor %vm968_vm15, %vm969_vm14 }
 0x106   :  { %v1353_v55 = vpop.eup %1352  ;;  %1159 = vst.msk [vmem:[%s2033_s4 + $0x48] sm:$0xff] %vm1149_vm7, %v1137_v17  ;;  %v965_v31 = vsub.f32 1.0, %v964_v50  ;;  %v1296_v58 = vmul.f32 -1.442695, %v1894_v51  ;;  %v476_v61 = vadd.f32 %v441_v52, %v348_v46 }
 0x107   :  { %v1355_v59 = vpop.eup %1354  ;;  %v1901_v28 = vadd.f32 1.0, %v1353_v55 }
 0x108   :  { %v966_v63 = vmul.f32 %v1351_v47, %v965_v31  ;;  %v979_v0 = vmul.f32 %v1355_v59, %v1887_v5  ;;  %1356 = vpow2.f32 %v1296_v58  ;;  %v672_v6 = vadd.f32 %v637_v54, %v476_v61 }
 0x109   :  { %1358 = vrcp.f32 %v1901_v28  ;;  %v228_v1 = vpop.f32.mrf.mxu0  ;;  %vm984_vm2 = vweird.f32 %v1355_v59  ;;  %v1004_v35 = vand.u32 2147483648, %v1901_v28  ;;  %v1002_v39 = vand.u32 2147483647, %v1901_v28 }
 0x10a   :  { %v350_v2 = vpop.f32.mrf.mxu1  ;;  %v967_v3 = vadd.f32 %v1351_v47, %v966_v63  ;;  %v980_v34 = vsub.f32 1.0, %v979_v0  ;;  %v697_v15 = vmul.f32 %v1683_v4, %v672_v6  ;;  %vm985_vm4 = vmor %vm983_vm3, %vm984_vm2  ;;  %vm998_vm8 = vweird.f32 %v1901_v28 }
 0x10b   :  { %v351_v12 = vadd.f32 %v350_v2, %v228_v1  ;;  %v1005_v45 = vor.u32 1.1754944e-38, %v1004_v35  ;;  %vm1003_vm10 = vcmp.eq.f32.partialorder %v1002_v39, 8.507059e+37 }
 0x10c   :  { %v971_v13 = vsel %vm970_vm1, %v1351_v47, %v967_v3  ;;  %v981_v14 = vmul.f32 %v1355_v59, %v980_v34  ;;  %v1911_v22 = vadd.f32 %v1690_v8, %v697_v15 }
 0x10d   :  { %v976_v48 = vsel %vm973_vm0, %v975_v7, %v971_v13  ;;  %v444_v18 = vpop.f32.mrf.mxu2  ;;  %v640_v19 = vpop.f32.mrf.mxu3 }
 0x10e   :  { %v1357_v20 = vpop.eup %1356  ;;  %v1138_v9 = vmul.f32 %v976_v48, %v1854_v53  ;;  %v982_v21 = vadd.f32 %v1355_v59, %v981_v14  ;;  %v477_v26 = vadd.f32 %v444_v18, %v351_v12  ;;  %v1297_v29 = vmul.f32 -1.442695, %v1911_v22 }
 0x10f   :  { %v1359_v23 = vpop.eup %1358  ;;  %v1913_v25 = vadd.f32 1.0, %v1357_v20 }
 0x110   :  { %1160 = vst.msk [vmem:[%s2033_s4 + $0x50] sm:$0xff] %vm1149_vm7, %v1138_v9  ;;  %v986_v27 = vsel %vm985_vm4, %v1355_v59, %v982_v21  ;;  %v994_v53 = vmul.f32 %v1359_v23, %v1901_v28  ;;  %v673_v37 = vadd.f32 %v640_v19, %v477_v26  ;;  %vm999_vm6 = vweird.f32 %v1359_v23 }
 0x111   :  { %v991_v32 = vsel %vm988_vm5, %v990_v24, %v986_v27  ;;  %1360 = vrcp.f32 %v1913_v25  ;;  %v231_v33 = vpop.f32.mrf.mxu0  ;;  %vm1000_vm9 = vmor %vm998_vm8, %vm999_vm6  ;;  %v1017_v28 = vand.u32 2147483647, %v1913_v25  ;;  %v1019_v63 = vand.u32 2147483648, %v1913_v25 }
 0x112   :  { %v353_v57 = vpop.f32.mrf.mxu1  ;;  %v1139_v16 = vmul.f32 %v991_v32, %v1870_v36  ;;  %v995_v60 = vsub.f32 1.0, %v994_v53  ;;  %1362 = vpow2.f32 %v1297_v29  ;;  %v698_v40 = vmul.f32 %v1683_v4, %v673_v37 }
 0x113   :  { %v354_v38 = vadd.f32 %v353_v57, %v231_v33  ;;  %vm1013_vm12 = vweird.f32 %v1913_v25  ;;  %v1020_v7 = vor.u32 1.1754944e-38, %v1019_v63  ;;  %vm1018_vm14 = vcmp.eq.f32.partialorder %v1017_v28, 8.507059e+37 }
 0x114   :  { %1161 = vst.msk [vmem:[%s2033_s4 + $0x58] sm:$0xff] %vm1149_vm7, %v1139_v16  ;;  %v996_v5 = vmul.f32 %v1359_v23, %v995_v60  ;;  %v1932_v46 = vadd.f32 %v1690_v8, %v698_v40 }
 0x115   :  { %v447_v41 = vpop.f32.mrf.mxu2  ;;  %v643_v42 = vpop.f32.mrf.mxu3 }
 0x116   :  { %v997_v36 = vadd.f32 %v1359_v23, %v996_v5  ;;  %v478_v43 = vadd.f32 %v447_v41, %v354_v38  ;;  %v1298_v55 = vmul.f32 -1.442695, %v1932_v46  ;;  %v1972_v38 = vld [vmem:[%s2031_s2] ss:$0 sm:$0xff] }
 0x117   :  { %v1361_v44 = vpop.eup %1360 }
 0x118   :  { %v1363_v47 = vpop.eup %1362  ;;  %v1001_v49 = vsel %vm1000_vm9, %v1359_v23, %v997_v36  ;;  %v1009_v17 = vmul.f32 %v1361_v44, %v1913_v25  ;;  %v674_v50 = vadd.f32 %v643_v42, %v478_v43  ;;  %vm1014_vm11 = vweird.f32 %v1361_v44  ;;  %v1979_v43 = vld [vmem:[%s2032_s3] ss:$0 sm:$0xff] }
 0x119   :  { %v1006_v52 = vsel %vm1003_vm10, %v1005_v45, %v1001_v49  ;;  %v1935_v54 = vadd.f32 1.0, %v1363_v47  ;;  %v234_v31 = vpop.f32.mrf.mxu0  ;;  %vm1015_vm13 = vmor %vm1013_vm12, %vm1014_vm11 }
 0x11a   :  { %v356_v56 = vpop.f32.mrf.mxu1  ;;  %v1140_v58 = vmul.f32 %v1006_v52, %v1882_v30  ;;  %v1010_v61 = vsub.f32 1.0, %v1009_v17  ;;  %v699_v59 = vmul.f32 %v1683_v4, %v674_v50 }
 0x11b   :  { %v357_v62 = vadd.f32 %v356_v56, %v234_v31  ;;  %1364 = vrcp.f32 %v1935_v54  ;;  %v1032_v25 = vand.u32 2147483647, %v1935_v54  ;;  %v1034_v26 = vand.u32 2147483648, %v1935_v54 }
 0x11c   :  { %1162 = vst.msk [vmem:[%s2033_s4 + $0x60] sm:$0xff] %vm1149_vm7, %v1140_v58  ;;  %v1011_v0 = vmul.f32 %v1361_v44, %v1010_v61  ;;  %1366 = vpow2.f32 %v1298_v55  ;;  %v1948_v30 = vadd.f32 %v1690_v8, %v699_v59  ;;  %vm1028_vm0 = vweird.f32 %v1935_v54 }
 0x11d   :  { %v450_v1 = vpop.f32.mrf.mxu2  ;;  %v646_v2 = vpop.f32.mrf.mxu3  ;;  %v1035_v16 = vor.u32 1.1754944e-38, %v1034_v26  ;;  %vm1033_vm2 = vcmp.eq.f32.partialorder %v1032_v25, 8.507059e+37 }
 0x11e   :  { %v1012_v3 = vadd.f32 %v1361_v44, %v1011_v0  ;;  %v1299_v34 = vmul.f32 -1.442695, %v1948_v30  ;;  %v479_v6 = vadd.f32 %v450_v1, %v357_v62 }
 0x120   :  { %v1016_v10 = vsel %vm1015_vm13, %v1361_v44, %v1012_v3  ;;  %1368 = vpow2.f32 %v1299_v34  ;;  %v675_v11 = vadd.f32 %v646_v2, %v479_v6 }
 0x121   :  { %v1365_v12 = vpop.eup %1364  ;;  %v1021_v13 = vsel %vm1018_vm14, %v1020_v7, %v1016_v10  ;;  %v237_v14 = vpop.f32.mrf.mxu0 }
 0x122   :  { %v359_v15 = vpop.f32.mrf.mxu1  ;;  %v1367_v48 = vpop.eup %1366  ;;  %v1141_v18 = vmul.f32 %v1021_v13, %v1894_v51  ;;  %v1024_v19 = vmul.f32 %v1365_v12, %v1935_v54  ;;  %v700_v20 = vmul.f32 %v1683_v4, %v675_v11  ;;  %vm1029_vm15 = vweird.f32 %v1365_v12 }
 0x123   :  { %v807_v9 = vadd.f32 1.0, %v1367_v48  ;;  %v360_v21 = vadd.f32 %v359_v15, %v237_v14  ;;  %vm1030_vm1 = vmor %vm1028_vm0, %vm1029_vm15 }
 0x124   :  { %1163 = vst.msk [vmem:[%s2033_s4 + $0x68] sm:$0xff] %vm1149_vm7, %v1141_v18  ;;  %v1025_v23 = vsub.f32 1.0, %v1024_v19  ;;  %v1960_v24 = vadd.f32 %v1690_v8, %v700_v20 }
 0x125   :  { %1370 = vrcp.f32 %v807_v9  ;;  %v453_v51 = vpop.f32.mrf.mxu2  ;;  %v649_v27 = vpop.f32.mrf.mxu3  ;;  %v1047_v17 = vand.u32 2147483647, %v807_v9  ;;  %v1049_v55 = vand.u32 2147483648, %v807_v9  ;;  %vm1043_vm4 = vweird.f32 %v807_v9 }
 0x126   :  { %v1369_v53 = vpop.eup %1368  ;;  %v1026_v4 = vmul.f32 %v1365_v12, %v1025_v23  ;;  %v1300_v29 = vmul.f32 -1.442695, %v1960_v24  ;;  %v480_v32 = vadd.f32 %v453_v51, %v360_v21 }
 0x127   :  { %v1965_v33 = vadd.f32 1.0, %v1369_v53  ;;  %vm1048_vm5 = vcmp.eq.f32.partialorder %v1047_v17, 8.507059e+37  ;;  %v1050_v0 = vor.u32 1.1754944e-38, %v1049_v55 }
 0x128   :  { %v1027_v57 = vadd.f32 %v1365_v12, %v1026_v4  ;;  %1372 = vpow2.f32 %v1300_v29  ;;  %v676_v8 = vadd.f32 %v649_v27, %v480_v32 }
 0x129   :  { %1374 = vrcp.f32 %v1965_v33  ;;  %v240_v60 = vpop.f32.mrf.mxu0  ;;  %v1062_v1 = vand.u32 2147483647, %v1965_v33  ;;  %v1064_v2 = vand.u32 2147483648, %v1965_v33  ;;  %vm1058_vm9 = vweird.f32 %v1965_v33 }
 0x12a   :  { %v362_v35 = vpop.f32.mrf.mxu1  ;;  %v1031_v37 = vsel %vm1030_vm1, %v1365_v12, %v1027_v57  ;;  %v701_v5 = vmul.f32 %v1972_v38, %v676_v8 }
 0x12b   :  { %v363_v39 = vadd.f32 %v362_v35, %v240_v60  ;;  %v1371_v40 = vpop.eup %1370  ;;  %v1036_v41 = vsel %vm1033_vm2, %v1035_v16, %v1031_v37  ;;  %v1065_v18 = vor.u32 1.1754944e-38, %v1064_v2  ;;  %vm1063_vm11 = vcmp.eq.f32.partialorder %v1062_v1, 8.507059e+37 }
 0x12c   :  { %v1142_v42 = vmul.f32 %v1036_v41, %v1911_v22  ;;  %v1039_v36 = vmul.f32 %v1371_v40, %v807_v9  ;;  %v1982_v44 = vadd.f32 %v1979_v43, %v701_v5  ;;  %vm1044_vm3 = vweird.f32 %v1371_v40 }
 0x12d   :  { %v456_v45 = vpop.f32.mrf.mxu2  ;;  %v652_v52 = vpop.f32.mrf.mxu3  ;;  %vm1045_vm6 = vmor %vm1043_vm4, %vm1044_vm3 }
 0x12e   :  { %v1373_v47 = vpop.eup %1372  ;;  %1164 = vst.msk [vmem:[%s2033_s4 + $0x70] sm:$0xff] %vm1149_vm7, %v1142_v42  ;;  %v1040_v49 = vsub.f32 1.0, %v1039_v36  ;;  %v1301_v22 = vmul.f32 -1.442695, %v1982_v44  ;;  %v481_v50 = vadd.f32 %v456_v45, %v363_v39 }
 0x12f   :  { %v1375_v54 = vpop.eup %1374  ;;  %v809_v31 = vadd.f32 1.0, %v1373_v47 }
 0x130   :  { %v1041_v56 = vmul.f32 %v1371_v40, %v1040_v49  ;;  %v1054_v58 = vmul.f32 %v1375_v54, %v1965_v33  ;;  %1376 = vpow2.f32 %v1301_v22  ;;  %v677_v63 = vadd.f32 %v652_v52, %v481_v50 }
 0x131   :  { %1378 = vrcp.f32 %v809_v31  ;;  %v243_v61 = vpop.f32.mrf.mxu0  ;;  %vm1059_vm8 = vweird.f32 %v1375_v54  ;;  %v1079_v27 = vand.u32 2147483648, %v809_v31  ;;  %v1077_v29 = vand.u32 2147483647, %v809_v31 }
 0x132   :  { %v365_v59 = vpop.f32.mrf.mxu1  ;;  %v1042_v62 = vadd.f32 %v1371_v40, %v1041_v56  ;;  %v1055_v28 = vsub.f32 1.0, %v1054_v58  ;;  %v702_v7 = vmul.f32 %v1972_v38, %v677_v63  ;;  %vm1060_vm10 = vmor %vm1058_vm9, %vm1059_vm8  ;;  %vm1073_vm13 = vweird.f32 %v809_v31 }
 0x133   :  { %v366_v3 = vadd.f32 %v365_v59, %v243_v61  ;;  %v1080_v8 = vor.u32 1.1754944e-38, %v1079_v27  ;;  %vm1078_vm15 = vcmp.eq.f32.partialorder %v1077_v29, 8.507059e+37 }
 0x134   :  { %v1046_v34 = vsel %vm1045_vm6, %v1371_v40, %v1042_v62  ;;  %v1056_v6 = vmul.f32 %v1375_v54, %v1055_v28  ;;  %v1996_v15 = vadd.f32 %v1979_v43, %v702_v7 }
 0x135   :  { %v1051_v10 = vsel %vm1048_vm5, %v1050_v0, %v1046_v34  ;;  %v459_v11 = vpop.f32.mrf.mxu2  ;;  %v655_v23 = vpop.f32.mrf.mxu3 }
 0x136   :  { %v1377_v12 = vpop.eup %1376  ;;  %v1143_v13 = vmul.f32 %v1051_v10, %v1932_v46  ;;  %v1057_v14 = vadd.f32 %v1375_v54, %v1056_v6  ;;  %v482_v20 = vadd.f32 %v459_v11, %v366_v3  ;;  %v1302_v46 = vmul.f32 -1.442695, %v1996_v15 }
 0x137   :  { %v1379_v48 = vpop.eup %1378  ;;  %v810_v19 = vadd.f32 1.0, %v1377_v12 }
 0x138   :  { %1165 = vst.msk [vmem:[%s2033_s4 + $0x78] sm:$0xff] %vm1149_vm7, %v1143_v13  ;;  %v1061_v9 = vsel %vm1060_vm10, %v1375_v54, %v1057_v14  ;;  %v1069_v21 = vmul.f32 %v1379_v48, %v809_v31  ;;  %v678_v53 = vadd.f32 %v655_v23, %v482_v20  ;;  %vm1074_vm12 = vweird.f32 %v1379_v48 }
 0x139   :  { %v1066_v25 = vsel %vm1063_vm11, %v1065_v18, %v1061_v9  ;;  %1380 = vrcp.f32 %v810_v19  ;;  %vm1075_vm14 = vmor %vm1073_vm13, %vm1074_vm12  ;;  %v1094_v42 = vand.u32 2147483648, %v810_v19  ;;  %v1092_v36 = vand.u32 2147483647, %v810_v19 }
 0x13a   :  { %v1144_v26 = vmul.f32 %v1066_v25, %v1948_v30  ;;  %v1070_v51 = vsub.f32 1.0, %v1069_v21  ;;  %1382 = vpow2.f32 %v1302_v46  ;;  %v703_v32 = vmul.f32 %v1972_v38, %v678_v53 }
 0x13b   :  { %vm1088_vm1 = vweird.f32 %v810_v19  ;;  %v1095_v45 = vor.u32 1.1754944e-38, %v1094_v42  ;;  %vm1093_vm3 = vcmp.eq.f32.partialorder %v1092_v36, 8.507059e+37 }
 0x13c   :  { %1166 = vst.msk [vmem:[%s2033_s4 + $0x80] sm:$0xff] %vm1149_vm7, %v1144_v26  ;;  %v1071_v4 = vmul.f32 %v1379_v48, %v1070_v51  ;;  %v728_v30 = vadd.f32 %v1979_v43, %v703_v32 }
 0x13e   :  { %v1072_v33 = vadd.f32 %v1379_v48, %v1071_v4  ;;  %v1303_v39 = vmul.f32 -1.442695, %v728_v30 }
 0x13f   :  { %v1381_v57 = vpop.eup %1380 }
 0x140   :  { %v1383_v16 = vpop.eup %1382  ;;  %v1076_v60 = vsel %vm1075_vm14, %v1379_v48, %v1072_v33  ;;  %v1084_v35 = vmul.f32 %v1381_v57, %v810_v19  ;;  %vm1089_vm0 = vweird.f32 %v1381_v57 }
 0x141   :  { %v1081_v37 = vsel %vm1078_vm15, %v1080_v8, %v1076_v60  ;;  %v811_v5 = vadd.f32 1.0, %v1383_v16  ;;  %vm1090_vm2 = vmor %vm1088_vm1, %vm1089_vm0 }
 0x142   :  { %v1145_v40 = vmul.f32 %v1081_v37, %v1960_v24  ;;  %v1085_v41 = vsub.f32 1.0, %v1084_v35 }
 0x143   :  { %1384 = vrcp.f32 %v811_v5  ;;  %v1109_v55 = vand.u32 2147483648, %v811_v5  ;;  %v1107_v56 = vand.u32 2147483647, %v811_v5  ;;  %vm1103_vm5 = vweird.f32 %v811_v5 }
 0x144   :  { %1167 = vst.msk [vmem:[%s2033_s4 + $0x88] sm:$0xff] %vm1149_vm7, %v1145_v40  ;;  %v1086_v38 = vmul.f32 %v1381_v57, %v1085_v41  ;;  %1386 = vpow2.f32 %v1303_v39 }
 0x145   :  { %v1110_v61 = vor.u32 1.1754944e-38, %v1109_v55  ;;  %vm1108_vm8 = vcmp.eq.f32.partialorder %v1107_v56, 8.507059e+37 }
 0x146   :  { %v1087_v43 = vadd.f32 %v1381_v57, %v1086_v38 }
 0x148   :  { %v1091_v47 = vsel %vm1090_vm2, %v1381_v57, %v1087_v43 }
 0x149   :  { %v1385_v49 = vpop.eup %1384  ;;  %v1096_v24 = vsel %vm1093_vm3, %v1095_v45, %v1091_v47 }
 0x14a   :  { %v1387_v17 = vpop.eup %1386  ;;  %v1146_v22 = vmul.f32 %v1096_v24, %v1982_v44  ;;  %v1099_v50 = vmul.f32 %v1385_v49, %v811_v5  ;;  %vm1104_vm4 = vweird.f32 %v1385_v49 }
 0x14b   :  { %v812_v52 = vadd.f32 1.0, %v1387_v17  ;;  %vm1105_vm6 = vmor %vm1103_vm5, %vm1104_vm4 }
 0x14c   :  { %1168 = vst.msk [vmem:[%s2033_s4 + $0x90] sm:$0xff] %vm1149_vm7, %v1146_v22  ;;  %v1100_v54 = vsub.f32 1.0, %v1099_v50 }
 0x14d   :  { %1388 = vrcp.f32 %v812_v52  ;;  %v1124_v1 = vand.u32 2147483648, %v812_v52  ;;  %v1122_v3 = vand.u32 2147483647, %v812_v52  ;;  %vm1118_vm10 = vweird.f32 %v812_v52 }
 0x14e   :  { %v1101_v31 = vmul.f32 %v1385_v49, %v1100_v54 }
 0x14f   :  { %v1125_v6 = vor.u32 1.1754944e-38, %v1124_v1  ;;  %vm1123_vm12 = vcmp.eq.f32.partialorder %v1122_v3, 8.507059e+37 }
 0x150   :  { %v1102_v58 = vadd.f32 %v1385_v49, %v1101_v31 }
 0x152   :  { %v1106_v59 = vsel %vm1105_vm6, %v1385_v49, %v1102_v58 }
 0x153   :  { %v1389_v44 = vpop.eup %1388  ;;  %v1111_v62 = vsel %vm1108_vm8, %v1110_v61, %v1106_v59 }
 0x154   :  { %v1147_v28 = vmul.f32 %v1111_v62, %v1996_v15  ;;  %v1114_v63 = vmul.f32 %v1389_v44, %v812_v52  ;;  %vm1119_vm9 = vweird.f32 %v1389_v44 }
 0x155   :  { %vm1120_vm11 = vmor %vm1118_vm10, %vm1119_vm9 }
 0x156   :  { %1169 = vst.msk [vmem:[%s2033_s4 + $0x98] sm:$0xff] %vm1149_vm7, %v1147_v28  ;;  %v1115_v0 = vsub.f32 1.0, %v1114_v63 }
 0x158   :  { %v1116_v2 = vmul.f32 %v1389_v44, %v1115_v0 }
 0x15a   :  { %v1117_v34 = vadd.f32 %v1389_v44, %v1116_v2 }
 0x15c   :  { %v1121_v7 = vsel %vm1120_vm11, %v1389_v44, %v1117_v34 }
 0x15d   :  { %v1126_v10 = vsel %vm1123_vm12, %v1125_v6, %v1121_v7 }
 0x15e   :  { %v1148_v11 = vmul.f32 %v1126_v10, %v728_v30 }
 0x160   :  { %1170 = vst.msk [vmem:[%s2033_s4 + $0xa0] sm:$0xff] %vm1149_vm7, %v1148_v11 }

// kernel: squeeze.5
= control target key start
LH: loop header
LB: loop body
LE: loop exit
PB: predicated region body
PF: predicated region fallthrough
CT: control target
= control target key end

     0   :  { %s1025_s10 = smov 120   ;;  %s1026_s11 = smov 112   ;;  %vm3_vm0 = vcmask 64512   ;;  %s2066_s0 = inlined_call_operand.vmem [shape: f32[1,128,27], index: 0, kind: input, shape index: {}]   ;;  %s2067_s1 = inlined_call_operand.vmem [shape: f32[2,8,8,3,9], index: 1, kind: output, shape index: {}]  }
   0x1   :  { %v1053_v0 = vld [vmem:[%s2066_s0 + $0x10] sm:$0xff]   ;;  %v1058_v1 = vld [vmem:[%s2066_s0] sm:$0xff]   ;;  %v769_v2 = vld [vmem:[%s2066_s0 + $0x18] sm:$0x7]   ;;  %s1027_s18 = smov 104   ;;  %s1028_s21 = smov 96  }
   0x2   :  { %64 = vrot.lane.b32.xlu1 %v1053_v0, %s1025_s10  ;;  %38 = vrot.lane.b32.xlu0 %v1058_v1, %s1025_s10  ;;  %v1069_v3 = vld [vmem:[%s2066_s0 + $0x8] sm:$0xff]   ;;  %v786_v4 = vld [vmem:[%s2066_s0 + $0x18] sm:$0x7]   ;;  %s1029_s24 = smov 88   ;;  %s1030_s27 = smov 80  }
   0x3   :  { %85 = vrot.lane.b32.xlu2 %v1058_v1, %s1026_s11  ;;  %v803_v5 = vld [vmem:[%s2066_s0 + $0x18] sm:$0x7]   ;;  %s1031_s30 = smov 72   ;;  %s1032_s4 = smov 64  }
   0x4   :  { %v820_v6 = vld [vmem:[%s2066_s0 + $0x18] sm:$0x7]   ;;  %s1033_s7 = smov 56   ;;  %4 = vst.msk [vmem:[%s2067_s1] ss:$16 sm:$0x3] %vm3_vm0, %v1058_v1  }
   0x5   :  { %v837_v7 = vld [vmem:[%s2066_s0 + $0x18] sm:$0x7]   ;;  %5 = vst.msk [vmem:[%s2067_s1] ss:$16 sm:$0xc] %vm3_vm0, %v1058_v1   ;;  %s1036_s6 = smov 32  }
   0x6   :  { %v854_v8 = vld [vmem:[%s2066_s0 + $0x18] sm:$0x7]   ;;  %6 = vst.msk [vmem:[%s2067_s1] ss:$16 sm:$0x30] %vm3_vm0, %v1058_v1   ;;  %s1037_s8 = smov 24  }
   0x7   :  { %v871_v9 = vld [vmem:[%s2066_s0 + $0x18] sm:$0x7]   ;;  %7 = vst.msk [vmem:[%s2067_s1] ss:$16 sm:$0xc0] %vm3_vm0, %v1058_v1   ;;  %s1039_s19 = smov 8  }
   0x8   :  { %v888_v10 = vld [vmem:[%s2066_s0 + $0x18] sm:$0x7]   ;;  %743 = vst.msk [vmem:[%s2067_s1 + $0x80] ss:$16 sm:$0x3] %vm3_vm0, %v1069_v3  }
   0x9   :  { %v905_v11 = vld [vmem:[%s2066_s0 + $0x18] sm:$0x7]   ;;  %744 = vst.msk [vmem:[%s2067_s1 + $0x80] ss:$16 sm:$0xc] %vm3_vm0, %v1069_v3  }
   0xa   :  { %77 = vrot.lane.b32.xlu1 %v769_v2, %s1025_s10  ;;  %51 = vrot.lane.b32.xlu0 %v1069_v3, %s1025_s10  ;;  %745 = vst.msk [vmem:[%s2067_s1 + $0x80] ss:$16 sm:$0x30] %vm3_vm0, %v1069_v3   ;;  %v922_v14 = vld [vmem:[%s2066_s0 + $0x18] sm:$0x7]  }
   0xb   :  { %98 = vrot.lane.b32.xlu2 %v1069_v3, %s1026_s11  ;;  %746 = vst.msk [vmem:[%s2067_s1 + $0x80] ss:$16 sm:$0xc0] %vm3_vm0, %v1069_v3   ;;  %v939_v16 = vld [vmem:[%s2066_s0 + $0x18] sm:$0x7]  }
   0xc   :  { %748 = vst.msk [vmem:[%s2067_s1 + $0x100] ss:$16 sm:$0x3] %vm3_vm0, %v1053_v0   ;;  %v956_v20 = vld [vmem:[%s2066_s0 + $0x18] sm:$0x7]  }
   0xd   :  { %749 = vst.msk [vmem:[%s2067_s1 + $0x100] ss:$16 sm:$0xc] %vm3_vm0, %v1053_v0   ;;  %v973_v27 = vld [vmem:[%s2066_s0 + $0x18] sm:$0x7]  }
   0xe   :  { %750 = vst.msk [vmem:[%s2067_s1 + $0x100] ss:$16 sm:$0x30] %vm3_vm0, %v1053_v0   ;;  %v990_v31 = vld [vmem:[%s2066_s0 + $0x18] sm:$0x7]  }
   0xf   :  { %751 = vst.msk [vmem:[%s2067_s1 + $0x100] ss:$16 sm:$0xc0] %vm3_vm0, %v1053_v0   ;;  %v1007_v37 = vld [vmem:[%s2066_s0 + $0x18] sm:$0x7]  }
  0x12   :  { %124 = vrot.lane.b32.xlu1 %v786_v4, %s1026_s11  ;;  %111 = vrot.lane.b32.xlu0 %v1053_v0, %s1026_s11  ;;  %s1034_s11 = smov 48  }
  0x13   :  { %132 = vrot.lane.b32.xlu2 %v1058_v1, %s1027_s18 }
  0x1a   :  { %158 = vrot.lane.b32.xlu1 %v1053_v0, %s1027_s18  ;;  %145 = vrot.lane.b32.xlu0 %v1069_v3, %s1027_s18 }
  0x1b   :  { %171 = vrot.lane.b32.xlu2 %v803_v5, %s1027_s18 }
  0x22   :  { %192 = vrot.lane.b32.xlu1 %v1069_v3, %s1028_s21  ;;  %179 = vrot.lane.b32.xlu0 %v1058_v1, %s1028_s21 }
  0x23   :  { %205 = vrot.lane.b32.xlu2 %v1053_v0, %s1028_s21 }
  0x2a   :  { %226 = vrot.lane.b32.xlu1 %v1058_v1, %s1029_s24  ;;  %218 = vrot.lane.b32.xlu0 %v820_v6, %s1028_s21 }
  0x2b   :  { %239 = vrot.lane.b32.xlu2 %v1069_v3, %s1029_s24 }
  0x32   :  { %265 = vrot.lane.b32.xlu1 %v837_v7, %s1029_s24  ;;  %252 = vrot.lane.b32.xlu0 %v1053_v0, %s1029_s24  ;;  %s1035_s24 = smov 40  }
  0x33   :  { %273 = vrot.lane.b32.xlu2 %v1058_v1, %s1030_s27 }
  0x3a   :  { %299 = vrot.lane.b32.xlu1 %v1053_v0, %s1030_s27  ;;  %286 = vrot.lane.b32.xlu0 %v1069_v3, %s1030_s27 }
  0x3b   :  { %312 = vrot.lane.b32.xlu2 %v854_v8, %s1030_s27  ;;  %s1038_s27 = smov 16  }
  0x42   :  { %333 = vrot.lane.b32.xlu1 %v1069_v3, %s1031_s30  ;;  %320 = vrot.lane.b32.xlu0 %v1058_v1, %s1031_s30 }
  0x43   :  { %346 = vrot.lane.b32.xlu2 %v1053_v0, %s1031_s30 }
  0x4a   :  { %367 = vrot.lane.b32.xlu1 %v1058_v1, %s1032_s4  ;;  %359 = vrot.lane.b32.xlu0 %v871_v9, %s1031_s30 }
  0x4b   :  { %380 = vrot.lane.b32.xlu2 %v1069_v3, %s1032_s4 }
  0x52   :  { %406 = vrot.lane.b32.xlu1 %v888_v10, %s1032_s4  ;;  %393 = vrot.lane.b32.xlu0 %v1053_v0, %s1032_s4 }
  0x53   :  { %414 = vrot.lane.b32.xlu2 %v1058_v1, %s1033_s7 }
  0x5a   :  { %440 = vrot.lane.b32.xlu1 %v1053_v0, %s1033_s7  ;;  %427 = vrot.lane.b32.xlu0 %v1069_v3, %s1033_s7 }
  0x5b   :  { %453 = vrot.lane.b32.xlu2 %v905_v11, %s1033_s7 }
  0x5d   :  { %v86_v12 = vpop.permute.xlu2 %85  }
  0x5e   :  { %772 = vst.msk [vmem:[%s2067_s1 + $0x2] ss:$16 sm:$0x3] %vm3_vm0, %v86_v12  }
  0x5f   :  { %773 = vst.msk [vmem:[%s2067_s1 + $0x2] ss:$16 sm:$0xc] %vm3_vm0, %v86_v12  }
  0x60   :  { %774 = vst.msk [vmem:[%s2067_s1 + $0x2] ss:$16 sm:$0x30] %vm3_vm0, %v86_v12  }
  0x61   :  { %775 = vst.msk [vmem:[%s2067_s1 + $0x2] ss:$16 sm:$0xc0] %vm3_vm0, %v86_v12  }
  0x62   :  { %474 = vrot.lane.b32.xlu1 %v1069_v3, %s1034_s11  ;;  %461 = vrot.lane.b32.xlu0 %v1058_v1, %s1034_s11 }
  0x63   :  { %487 = vrot.lane.b32.xlu2 %v1053_v0, %s1034_s11 }
  0x65   :  { %v99_v13 = vpop.permute.xlu2 %98  }
  0x66   :  { %777 = vst.msk [vmem:[%s2067_s1 + $0x82] ss:$16 sm:$0x3] %vm3_vm0, %v99_v13  }
  0x67   :  { %778 = vst.msk [vmem:[%s2067_s1 + $0x82] ss:$16 sm:$0xc] %vm3_vm0, %v99_v13  }
  0x68   :  { %779 = vst.msk [vmem:[%s2067_s1 + $0x82] ss:$16 sm:$0x30] %vm3_vm0, %v99_v13  }
  0x69   :  { %780 = vst.msk [vmem:[%s2067_s1 + $0x82] ss:$16 sm:$0xc0] %vm3_vm0, %v99_v13  }
  0x6a   :  { %508 = vrot.lane.b32.xlu1 %v1058_v1, %s1035_s24  ;;  %500 = vrot.lane.b32.xlu0 %v922_v14, %s1034_s11  ;;  %v752_v14 = vld [vmem:[%s2066_s0 + $0x18] sm:$0x7]  }
  0x6b   :  { %521 = vrot.lane.b32.xlu2 %v1069_v3, %s1035_s24  ;;  %753 = vst.msk [vmem:[%s2067_s1 + $0x180] ss:$16 sm:$0x3] %vm3_vm0, %v752_v14  }
  0x6c   :  { %754 = vst.msk [vmem:[%s2067_s1 + $0x19e] sm:$0x4] %vm3_vm0, %v752_v14  }
  0x6d   :  { %v133_v15 = vpop.permute.xlu2 %132  }
  0x6e   :  { %789 = vst.msk [vmem:[%s2067_s1 + $0x3] ss:$16 sm:$0x3] %vm3_vm0, %v133_v15  }
  0x6f   :  { %790 = vst.msk [vmem:[%s2067_s1 + $0x3] ss:$16 sm:$0xc] %vm3_vm0, %v133_v15  }
  0x70   :  { %791 = vst.msk [vmem:[%s2067_s1 + $0x3] ss:$16 sm:$0x30] %vm3_vm0, %v133_v15  }
  0x71   :  { %792 = vst.msk [vmem:[%s2067_s1 + $0x3] ss:$16 sm:$0xc0] %vm3_vm0, %v133_v15  }
  0x72   :  { %547 = vrot.lane.b32.xlu1 %v939_v16, %s1035_s24  ;;  %534 = vrot.lane.b32.xlu0 %v1053_v0, %s1035_s24 }
  0x73   :  { %555 = vrot.lane.b32.xlu2 %v1058_v1, %s1036_s6 }
  0x74   :  { %v65_v17 = vpop.permute.xlu1 %64   ;;  %v39_v18 = vpop.permute.xlu0 %38  }
  0x75   :  { %765 = vst.msk [vmem:[%s2067_s1 + $0x101] ss:$16 sm:$0x3] %vm3_vm0, %v65_v17   ;;  %v172_v19 = vpop.permute.xlu2 %171  }
  0x76   :  { %766 = vst.msk [vmem:[%s2067_s1 + $0x101] ss:$16 sm:$0xc] %vm3_vm0, %v65_v17  }
  0x77   :  { %767 = vst.msk [vmem:[%s2067_s1 + $0x101] ss:$16 sm:$0x30] %vm3_vm0, %v65_v17  }
  0x78   :  { %768 = vst.msk [vmem:[%s2067_s1 + $0x101] ss:$16 sm:$0xc0] %vm3_vm0, %v65_v17  }
  0x79   :  { %755 = vst.msk [vmem:[%s2067_s1 + $0x1] ss:$16 sm:$0x3] %vm3_vm0, %v39_v18  }
  0x7a   :  { %756 = vst.msk [vmem:[%s2067_s1 + $0x1] ss:$16 sm:$0xc] %vm3_vm0, %v39_v18   ;;  %581 = vrot.lane.b32.xlu1 %v1053_v0, %s1036_s6  ;;  %568 = vrot.lane.b32.xlu0 %v1069_v3, %s1036_s6 }
  0x7b   :  { %757 = vst.msk [vmem:[%s2067_s1 + $0x1] ss:$16 sm:$0x30] %vm3_vm0, %v39_v18   ;;  %594 = vrot.lane.b32.xlu2 %v956_v20, %s1036_s6 }
  0x7c   :  { %758 = vst.msk [vmem:[%s2067_s1 + $0x1] ss:$16 sm:$0xc0] %vm3_vm0, %v39_v18   ;;  %v78_v21 = vpop.permute.xlu1 %77   ;;  %v52_v22 = vpop.permute.xlu0 %51  }
  0x7d   :  { %770 = vst.msk [vmem:[%s2067_s1 + $0x181] ss:$16 sm:$0x3] %vm3_vm0, %v78_v21   ;;  %v206_v23 = vpop.permute.xlu2 %205  }
  0x7e   :  { %771 = vst.msk [vmem:[%s2067_s1 + $0x19f] sm:$0x4] %vm3_vm0, %v78_v21  }
  0x7f   :  { %760 = vst.msk [vmem:[%s2067_s1 + $0x81] ss:$16 sm:$0x3] %vm3_vm0, %v52_v22  }
  0x80   :  { %761 = vst.msk [vmem:[%s2067_s1 + $0x81] ss:$16 sm:$0xc] %vm3_vm0, %v52_v22  }
  0x81   :  { %762 = vst.msk [vmem:[%s2067_s1 + $0x81] ss:$16 sm:$0x30] %vm3_vm0, %v52_v22  }
  0x82   :  { %763 = vst.msk [vmem:[%s2067_s1 + $0x81] ss:$16 sm:$0xc0] %vm3_vm0, %v52_v22   ;;  %615 = vrot.lane.b32.xlu1 %v1069_v3, %s1037_s8  ;;  %602 = vrot.lane.b32.xlu0 %v1058_v1, %s1037_s8 }
  0x83   :  { %804 = vst.msk [vmem:[%s2067_s1 + $0x183] ss:$16 sm:$0x3] %vm3_vm0, %v172_v19   ;;  %628 = vrot.lane.b32.xlu2 %v1053_v0, %s1037_s8 }
  0x84   :  { %v125_v24 = vpop.permute.xlu1 %124   ;;  %v112_v25 = vpop.permute.xlu0 %111   ;;  %805 = vst.msk [vmem:[%s2067_s1 + $0x1a1] sm:$0x4] %vm3_vm0, %v172_v19  }
  0x85   :  { %787 = vst.msk [vmem:[%s2067_s1 + $0x182] ss:$16 sm:$0x3] %vm3_vm0, %v125_v24   ;;  %v240_v26 = vpop.permute.xlu2 %239  }
  0x86   :  { %788 = vst.msk [vmem:[%s2067_s1 + $0x1a0] sm:$0x4] %vm3_vm0, %v125_v24  }
  0x87   :  { %782 = vst.msk [vmem:[%s2067_s1 + $0x102] ss:$16 sm:$0x3] %vm3_vm0, %v112_v25  }
  0x88   :  { %783 = vst.msk [vmem:[%s2067_s1 + $0x102] ss:$16 sm:$0xc] %vm3_vm0, %v112_v25  }
  0x89   :  { %784 = vst.msk [vmem:[%s2067_s1 + $0x102] ss:$16 sm:$0x30] %vm3_vm0, %v112_v25  }
  0x8a   :  { %785 = vst.msk [vmem:[%s2067_s1 + $0x102] ss:$16 sm:$0xc0] %vm3_vm0, %v112_v25   ;;  %649 = vrot.lane.b32.xlu1 %v1058_v1, %s1038_s27  ;;  %641 = vrot.lane.b32.xlu0 %v973_v27, %s1037_s8 }
  0x8b   :  { %816 = vst.msk [vmem:[%s2067_s1 + $0x104] ss:$16 sm:$0x3] %vm3_vm0, %v206_v23   ;;  %662 = vrot.lane.b32.xlu2 %v1069_v3, %s1038_s27 }
  0x8c   :  { %v159_v28 = vpop.permute.xlu1 %158   ;;  %v146_v29 = vpop.permute.xlu0 %145   ;;  %817 = vst.msk [vmem:[%s2067_s1 + $0x104] ss:$16 sm:$0xc] %vm3_vm0, %v206_v23  }
  0x8d   :  { %799 = vst.msk [vmem:[%s2067_s1 + $0x103] ss:$16 sm:$0x3] %vm3_vm0, %v159_v28   ;;  %v274_v30 = vpop.permute.xlu2 %273  }
  0x8e   :  { %800 = vst.msk [vmem:[%s2067_s1 + $0x103] ss:$16 sm:$0xc] %vm3_vm0, %v159_v28  }
  0x8f   :  { %801 = vst.msk [vmem:[%s2067_s1 + $0x103] ss:$16 sm:$0x30] %vm3_vm0, %v159_v28  }
  0x90   :  { %802 = vst.msk [vmem:[%s2067_s1 + $0x103] ss:$16 sm:$0xc0] %vm3_vm0, %v159_v28  }
  0x91   :  { %794 = vst.msk [vmem:[%s2067_s1 + $0x83] ss:$16 sm:$0x3] %vm3_vm0, %v146_v29  }
  0x92   :  { %795 = vst.msk [vmem:[%s2067_s1 + $0x83] ss:$16 sm:$0xc] %vm3_vm0, %v146_v29   ;;  %688 = vrot.lane.b32.xlu1 %v990_v31, %s1038_s27  ;;  %675 = vrot.lane.b32.xlu0 %v1053_v0, %s1038_s27 }
  0x93   :  { %796 = vst.msk [vmem:[%s2067_s1 + $0x83] ss:$16 sm:$0x30] %vm3_vm0, %v146_v29   ;;  %696 = vrot.lane.b32.xlu2 %v1058_v1, %s1039_s19 }
  0x94   :  { %797 = vst.msk [vmem:[%s2067_s1 + $0x83] ss:$16 sm:$0xc0] %vm3_vm0, %v146_v29   ;;  %v193_v32 = vpop.permute.xlu1 %192   ;;  %v180_v33 = vpop.permute.xlu0 %179  }
  0x95   :  { %818 = vst.msk [vmem:[%s2067_s1 + $0x104] ss:$16 sm:$0x30] %vm3_vm0, %v206_v23   ;;  %v313_v34 = vpop.permute.xlu2 %312  }
  0x96   :  { %819 = vst.msk [vmem:[%s2067_s1 + $0x104] ss:$16 sm:$0xc0] %vm3_vm0, %v206_v23  }
  0x97   :  { %811 = vst.msk [vmem:[%s2067_s1 + $0x84] ss:$16 sm:$0x3] %vm3_vm0, %v193_v32  }
  0x98   :  { %812 = vst.msk [vmem:[%s2067_s1 + $0x84] ss:$16 sm:$0xc] %vm3_vm0, %v193_v32  }
  0x99   :  { %813 = vst.msk [vmem:[%s2067_s1 + $0x84] ss:$16 sm:$0x30] %vm3_vm0, %v193_v32  }
  0x9a   :  { %814 = vst.msk [vmem:[%s2067_s1 + $0x84] ss:$16 sm:$0xc0] %vm3_vm0, %v193_v32   ;;  %722 = vrot.lane.b32.xlu1 %v1053_v0, %s1039_s19  ;;  %709 = vrot.lane.b32.xlu0 %v1069_v3, %s1039_s19 }
  0x9b   :  { %806 = vst.msk [vmem:[%s2067_s1 + $0x4] ss:$16 sm:$0x3] %vm3_vm0, %v180_v33   ;;  %735 = vrot.lane.b32.xlu2 %v1007_v37, %s1039_s19 }
  0x9c   :  { %807 = vst.msk [vmem:[%s2067_s1 + $0x4] ss:$16 sm:$0xc] %vm3_vm0, %v180_v33   ;;  %v227_v35 = vpop.permute.xlu1 %226   ;;  %v219_v36 = vpop.permute.xlu0 %218  }
  0x9d   :  { %808 = vst.msk [vmem:[%s2067_s1 + $0x4] ss:$16 sm:$0x30] %vm3_vm0, %v180_v33   ;;  %v347_v38 = vpop.permute.xlu2 %346  }
  0x9e   :  { %809 = vst.msk [vmem:[%s2067_s1 + $0x4] ss:$16 sm:$0xc0] %vm3_vm0, %v180_v33  }
  0x9f   :  { %828 = vst.msk [vmem:[%s2067_s1 + $0x85] ss:$16 sm:$0x3] %vm3_vm0, %v240_v26  }
  0xa0   :  { %829 = vst.msk [vmem:[%s2067_s1 + $0x85] ss:$16 sm:$0xc] %vm3_vm0, %v240_v26  }
  0xa1   :  { %830 = vst.msk [vmem:[%s2067_s1 + $0x85] ss:$16 sm:$0x30] %vm3_vm0, %v240_v26  }
  0xa2   :  { %831 = vst.msk [vmem:[%s2067_s1 + $0x85] ss:$16 sm:$0xc0] %vm3_vm0, %v240_v26  }
  0xa3   :  { %823 = vst.msk [vmem:[%s2067_s1 + $0x5] ss:$16 sm:$0x3] %vm3_vm0, %v227_v35  }
  0xa4   :  { %824 = vst.msk [vmem:[%s2067_s1 + $0x5] ss:$16 sm:$0xc] %vm3_vm0, %v227_v35   ;;  %v266_v39 = vpop.permute.xlu1 %265   ;;  %v253_v40 = vpop.permute.xlu0 %252  }
  0xa5   :  { %825 = vst.msk [vmem:[%s2067_s1 + $0x5] ss:$16 sm:$0x30] %vm3_vm0, %v227_v35   ;;  %v381_v41 = vpop.permute.xlu2 %380  }
  0xa6   :  { %826 = vst.msk [vmem:[%s2067_s1 + $0x5] ss:$16 sm:$0xc0] %vm3_vm0, %v227_v35  }
  0xa7   :  { %821 = vst.msk [vmem:[%s2067_s1 + $0x184] ss:$16 sm:$0x3] %vm3_vm0, %v219_v36  }
  0xa8   :  { %822 = vst.msk [vmem:[%s2067_s1 + $0x1a2] sm:$0x4] %vm3_vm0, %v219_v36  }
  0xa9   :  { %840 = vst.msk [vmem:[%s2067_s1 + $0x6] ss:$16 sm:$0x3] %vm3_vm0, %v274_v30  }
  0xaa   :  { %841 = vst.msk [vmem:[%s2067_s1 + $0x6] ss:$16 sm:$0xc] %vm3_vm0, %v274_v30  }
  0xab   :  { %842 = vst.msk [vmem:[%s2067_s1 + $0x6] ss:$16 sm:$0x30] %vm3_vm0, %v274_v30  }
  0xac   :  { %843 = vst.msk [vmem:[%s2067_s1 + $0x6] ss:$16 sm:$0xc0] %vm3_vm0, %v274_v30   ;;  %v300_v42 = vpop.permute.xlu1 %299   ;;  %v287_v43 = vpop.permute.xlu0 %286  }
  0xad   :  { %838 = vst.msk [vmem:[%s2067_s1 + $0x185] ss:$16 sm:$0x3] %vm3_vm0, %v266_v39   ;;  %v415_v44 = vpop.permute.xlu2 %414  }
  0xae   :  { %839 = vst.msk [vmem:[%s2067_s1 + $0x1a3] sm:$0x4] %vm3_vm0, %v266_v39  }
  0xaf   :  { %833 = vst.msk [vmem:[%s2067_s1 + $0x105] ss:$16 sm:$0x3] %vm3_vm0, %v253_v40  }
  0xb0   :  { %834 = vst.msk [vmem:[%s2067_s1 + $0x105] ss:$16 sm:$0xc] %vm3_vm0, %v253_v40  }
  0xb1   :  { %835 = vst.msk [vmem:[%s2067_s1 + $0x105] ss:$16 sm:$0x30] %vm3_vm0, %v253_v40  }
  0xb2   :  { %836 = vst.msk [vmem:[%s2067_s1 + $0x105] ss:$16 sm:$0xc0] %vm3_vm0, %v253_v40  }
  0xb3   :  { %855 = vst.msk [vmem:[%s2067_s1 + $0x186] ss:$16 sm:$0x3] %vm3_vm0, %v313_v34  }
  0xb4   :  { %856 = vst.msk [vmem:[%s2067_s1 + $0x1a4] sm:$0x4] %vm3_vm0, %v313_v34   ;;  %v334_v45 = vpop.permute.xlu1 %333   ;;  %v321_v46 = vpop.permute.xlu0 %320  }
  0xb5   :  { %850 = vst.msk [vmem:[%s2067_s1 + $0x106] ss:$16 sm:$0x3] %vm3_vm0, %v300_v42   ;;  %v454_v49 = vpop.permute.xlu2 %453  }
  0xb6   :  { %851 = vst.msk [vmem:[%s2067_s1 + $0x106] ss:$16 sm:$0xc] %vm3_vm0, %v300_v42  }
  0xb7   :  { %852 = vst.msk [vmem:[%s2067_s1 + $0x106] ss:$16 sm:$0x30] %vm3_vm0, %v300_v42  }
  0xb8   :  { %853 = vst.msk [vmem:[%s2067_s1 + $0x106] ss:$16 sm:$0xc0] %vm3_vm0, %v300_v42  }
  0xb9   :  { %845 = vst.msk [vmem:[%s2067_s1 + $0x86] ss:$16 sm:$0x3] %vm3_vm0, %v287_v43  }
  0xba   :  { %846 = vst.msk [vmem:[%s2067_s1 + $0x86] ss:$16 sm:$0xc] %vm3_vm0, %v287_v43  }
  0xbb   :  { %847 = vst.msk [vmem:[%s2067_s1 + $0x86] ss:$16 sm:$0x30] %vm3_vm0, %v287_v43  }
  0xbc   :  { %848 = vst.msk [vmem:[%s2067_s1 + $0x86] ss:$16 sm:$0xc0] %vm3_vm0, %v287_v43   ;;  %v368_v47 = vpop.permute.xlu1 %367   ;;  %v360_v48 = vpop.permute.xlu0 %359  }
  0xbd   :  { %867 = vst.msk [vmem:[%s2067_s1 + $0x107] ss:$16 sm:$0x3] %vm3_vm0, %v347_v38   ;;  %v488_v52 = vpop.permute.xlu2 %487  }
  0xbe   :  { %868 = vst.msk [vmem:[%s2067_s1 + $0x107] ss:$16 sm:$0xc] %vm3_vm0, %v347_v38  }
  0xbf   :  { %869 = vst.msk [vmem:[%s2067_s1 + $0x107] ss:$16 sm:$0x30] %vm3_vm0, %v347_v38  }
  0xc0   :  { %870 = vst.msk [vmem:[%s2067_s1 + $0x107] ss:$16 sm:$0xc0] %vm3_vm0, %v347_v38  }
  0xc1   :  { %862 = vst.msk [vmem:[%s2067_s1 + $0x87] ss:$16 sm:$0x3] %vm3_vm0, %v334_v45  }
  0xc2   :  { %863 = vst.msk [vmem:[%s2067_s1 + $0x87] ss:$16 sm:$0xc] %vm3_vm0, %v334_v45  }
  0xc3   :  { %864 = vst.msk [vmem:[%s2067_s1 + $0x87] ss:$16 sm:$0x30] %vm3_vm0, %v334_v45  }
  0xc4   :  { %865 = vst.msk [vmem:[%s2067_s1 + $0x87] ss:$16 sm:$0xc0] %vm3_vm0, %v334_v45   ;;  %v407_v50 = vpop.permute.xlu1 %406   ;;  %v394_v51 = vpop.permute.xlu0 %393  }
  0xc5   :  { %857 = vst.msk [vmem:[%s2067_s1 + $0x7] ss:$16 sm:$0x3] %vm3_vm0, %v321_v46   ;;  %v522_v55 = vpop.permute.xlu2 %521  }
  0xc6   :  { %858 = vst.msk [vmem:[%s2067_s1 + $0x7] ss:$16 sm:$0xc] %vm3_vm0, %v321_v46  }
  0xc7   :  { %859 = vst.msk [vmem:[%s2067_s1 + $0x7] ss:$16 sm:$0x30] %vm3_vm0, %v321_v46  }
  0xc8   :  { %860 = vst.msk [vmem:[%s2067_s1 + $0x7] ss:$16 sm:$0xc0] %vm3_vm0, %v321_v46  }
  0xc9   :  { %879 = vst.msk [vmem:[%s2067_s1 + $0x88] ss:$16 sm:$0x3] %vm3_vm0, %v381_v41  }
  0xca   :  { %880 = vst.msk [vmem:[%s2067_s1 + $0x88] ss:$16 sm:$0xc] %vm3_vm0, %v381_v41  }
  0xcb   :  { %881 = vst.msk [vmem:[%s2067_s1 + $0x88] ss:$16 sm:$0x30] %vm3_vm0, %v381_v41  }
  0xcc   :  { %882 = vst.msk [vmem:[%s2067_s1 + $0x88] ss:$16 sm:$0xc0] %vm3_vm0, %v381_v41   ;;  %v441_v53 = vpop.permute.xlu1 %440   ;;  %v428_v54 = vpop.permute.xlu0 %427  }
  0xcd   :  { %874 = vst.msk [vmem:[%s2067_s1 + $0x8] ss:$16 sm:$0x3] %vm3_vm0, %v368_v47   ;;  %v556_v60 = vpop.permute.xlu2 %555  }
  0xce   :  { %875 = vst.msk [vmem:[%s2067_s1 + $0x8] ss:$16 sm:$0xc] %vm3_vm0, %v368_v47  }
  0xcf   :  { %876 = vst.msk [vmem:[%s2067_s1 + $0x8] ss:$16 sm:$0x30] %vm3_vm0, %v368_v47  }
  0xd0   :  { %877 = vst.msk [vmem:[%s2067_s1 + $0x8] ss:$16 sm:$0xc0] %vm3_vm0, %v368_v47  }
  0xd1   :  { %872 = vst.msk [vmem:[%s2067_s1 + $0x187] ss:$16 sm:$0x3] %vm3_vm0, %v360_v48  }
  0xd2   :  { %873 = vst.msk [vmem:[%s2067_s1 + $0x1a5] sm:$0x4] %vm3_vm0, %v360_v48  }
  0xd3   :  { %891 = vst.msk [vmem:[%s2067_s1 + $0x9] ss:$16 sm:$0x3] %vm3_vm0, %v415_v44  }
  0xd4   :  { %892 = vst.msk [vmem:[%s2067_s1 + $0x9] ss:$16 sm:$0xc] %vm3_vm0, %v415_v44   ;;  %v475_v56 = vpop.permute.xlu1 %474   ;;  %v462_v57 = vpop.permute.xlu0 %461  }
  0xd5   :  { %893 = vst.msk [vmem:[%s2067_s1 + $0x9] ss:$16 sm:$0x30] %vm3_vm0, %v415_v44   ;;  %v595_v63 = vpop.permute.xlu2 %594  }
  0xd6   :  { %894 = vst.msk [vmem:[%s2067_s1 + $0x9] ss:$16 sm:$0xc0] %vm3_vm0, %v415_v44  }
  0xd7   :  { %889 = vst.msk [vmem:[%s2067_s1 + $0x188] ss:$16 sm:$0x3] %vm3_vm0, %v407_v50  }
  0xd8   :  { %890 = vst.msk [vmem:[%s2067_s1 + $0x1a6] sm:$0x4] %vm3_vm0, %v407_v50  }
  0xd9   :  { %884 = vst.msk [vmem:[%s2067_s1 + $0x108] ss:$16 sm:$0x3] %vm3_vm0, %v394_v51  }
  0xda   :  { %885 = vst.msk [vmem:[%s2067_s1 + $0x108] ss:$16 sm:$0xc] %vm3_vm0, %v394_v51  }
  0xdb   :  { %886 = vst.msk [vmem:[%s2067_s1 + $0x108] ss:$16 sm:$0x30] %vm3_vm0, %v394_v51  }
  0xdc   :  { %887 = vst.msk [vmem:[%s2067_s1 + $0x108] ss:$16 sm:$0xc0] %vm3_vm0, %v394_v51   ;;  %v509_v58 = vpop.permute.xlu1 %508   ;;  %v501_v59 = vpop.permute.xlu0 %500  }
  0xdd   :  { %906 = vst.msk [vmem:[%s2067_s1 + $0x189] ss:$16 sm:$0x3] %vm3_vm0, %v454_v49   ;;  %v629_v2 = vpop.permute.xlu2 %628  }
  0xde   :  { %907 = vst.msk [vmem:[%s2067_s1 + $0x1a7] sm:$0x4] %vm3_vm0, %v454_v49  }
  0xdf   :  { %901 = vst.msk [vmem:[%s2067_s1 + $0x109] ss:$16 sm:$0x3] %vm3_vm0, %v441_v53  }
  0xe0   :  { %902 = vst.msk [vmem:[%s2067_s1 + $0x109] ss:$16 sm:$0xc] %vm3_vm0, %v441_v53  }
  0xe1   :  { %903 = vst.msk [vmem:[%s2067_s1 + $0x109] ss:$16 sm:$0x30] %vm3_vm0, %v441_v53  }
  0xe2   :  { %904 = vst.msk [vmem:[%s2067_s1 + $0x109] ss:$16 sm:$0xc0] %vm3_vm0, %v441_v53  }
  0xe3   :  { %896 = vst.msk [vmem:[%s2067_s1 + $0x89] ss:$16 sm:$0x3] %vm3_vm0, %v428_v54  }
  0xe4   :  { %897 = vst.msk [vmem:[%s2067_s1 + $0x89] ss:$16 sm:$0xc] %vm3_vm0, %v428_v54   ;;  %v548_v61 = vpop.permute.xlu1 %547   ;;  %v535_v62 = vpop.permute.xlu0 %534  }
  0xe5   :  { %898 = vst.msk [vmem:[%s2067_s1 + $0x89] ss:$16 sm:$0x30] %vm3_vm0, %v428_v54   ;;  %v663_v5 = vpop.permute.xlu2 %662  }
  0xe6   :  { %899 = vst.msk [vmem:[%s2067_s1 + $0x89] ss:$16 sm:$0xc0] %vm3_vm0, %v428_v54  }
  0xe7   :  { %918 = vst.msk [vmem:[%s2067_s1 + $0x10a] ss:$16 sm:$0x3] %vm3_vm0, %v488_v52  }
  0xe8   :  { %919 = vst.msk [vmem:[%s2067_s1 + $0x10a] ss:$16 sm:$0xc] %vm3_vm0, %v488_v52  }
  0xe9   :  { %920 = vst.msk [vmem:[%s2067_s1 + $0x10a] ss:$16 sm:$0x30] %vm3_vm0, %v488_v52  }
  0xea   :  { %921 = vst.msk [vmem:[%s2067_s1 + $0x10a] ss:$16 sm:$0xc0] %vm3_vm0, %v488_v52  }
  0xeb   :  { %913 = vst.msk [vmem:[%s2067_s1 + $0x8a] ss:$16 sm:$0x3] %vm3_vm0, %v475_v56  }
  0xec   :  { %914 = vst.msk [vmem:[%s2067_s1 + $0x8a] ss:$16 sm:$0xc] %vm3_vm0, %v475_v56   ;;  %v582_v0 = vpop.permute.xlu1 %581   ;;  %v569_v1 = vpop.permute.xlu0 %568  }
  0xed   :  { %915 = vst.msk [vmem:[%s2067_s1 + $0x8a] ss:$16 sm:$0x30] %vm3_vm0, %v475_v56   ;;  %v697_v8 = vpop.permute.xlu2 %696  }
  0xee   :  { %916 = vst.msk [vmem:[%s2067_s1 + $0x8a] ss:$16 sm:$0xc0] %vm3_vm0, %v475_v56  }
  0xef   :  { %908 = vst.msk [vmem:[%s2067_s1 + $0xa] ss:$16 sm:$0x3] %vm3_vm0, %v462_v57  }
  0xf0   :  { %909 = vst.msk [vmem:[%s2067_s1 + $0xa] ss:$16 sm:$0xc] %vm3_vm0, %v462_v57  }
  0xf1   :  { %910 = vst.msk [vmem:[%s2067_s1 + $0xa] ss:$16 sm:$0x30] %vm3_vm0, %v462_v57  }
  0xf2   :  { %911 = vst.msk [vmem:[%s2067_s1 + $0xa] ss:$16 sm:$0xc0] %vm3_vm0, %v462_v57  }
  0xf3   :  { %930 = vst.msk [vmem:[%s2067_s1 + $0x8b] ss:$16 sm:$0x3] %vm3_vm0, %v522_v55  }
  0xf4   :  { %931 = vst.msk [vmem:[%s2067_s1 + $0x8b] ss:$16 sm:$0xc] %vm3_vm0, %v522_v55   ;;  %v616_v3 = vpop.permute.xlu1 %615   ;;  %v603_v4 = vpop.permute.xlu0 %602  }
  0xf5   :  { %932 = vst.msk [vmem:[%s2067_s1 + $0x8b] ss:$16 sm:$0x30] %vm3_vm0, %v522_v55   ;;  %v736_v11 = vpop.permute.xlu2 %735  }
  0xf6   :  { %933 = vst.msk [vmem:[%s2067_s1 + $0x8b] ss:$16 sm:$0xc0] %vm3_vm0, %v522_v55  }
  0xf7   :  { %925 = vst.msk [vmem:[%s2067_s1 + $0xb] ss:$16 sm:$0x3] %vm3_vm0, %v509_v58  }
  0xf8   :  { %926 = vst.msk [vmem:[%s2067_s1 + $0xb] ss:$16 sm:$0xc] %vm3_vm0, %v509_v58  }
  0xf9   :  { %927 = vst.msk [vmem:[%s2067_s1 + $0xb] ss:$16 sm:$0x30] %vm3_vm0, %v509_v58  }
  0xfa   :  { %928 = vst.msk [vmem:[%s2067_s1 + $0xb] ss:$16 sm:$0xc0] %vm3_vm0, %v509_v58  }
  0xfb   :  { %923 = vst.msk [vmem:[%s2067_s1 + $0x18a] ss:$16 sm:$0x3] %vm3_vm0, %v501_v59  }
  0xfc   :  { %924 = vst.msk [vmem:[%s2067_s1 + $0x1a8] sm:$0x4] %vm3_vm0, %v501_v59   ;;  %v650_v6 = vpop.permute.xlu1 %649   ;;  %v642_v7 = vpop.permute.xlu0 %641  }
  0xfd   :  { %942 = vst.msk [vmem:[%s2067_s1 + $0xc] ss:$16 sm:$0x3] %vm3_vm0, %v556_v60  }
  0xfe   :  { %943 = vst.msk [vmem:[%s2067_s1 + $0xc] ss:$16 sm:$0xc] %vm3_vm0, %v556_v60  }
  0xff   :  { %944 = vst.msk [vmem:[%s2067_s1 + $0xc] ss:$16 sm:$0x30] %vm3_vm0, %v556_v60  }
 0x100   :  { %945 = vst.msk [vmem:[%s2067_s1 + $0xc] ss:$16 sm:$0xc0] %vm3_vm0, %v556_v60  }
 0x101   :  { %940 = vst.msk [vmem:[%s2067_s1 + $0x18b] ss:$16 sm:$0x3] %vm3_vm0, %v548_v61  }
 0x102   :  { %941 = vst.msk [vmem:[%s2067_s1 + $0x1a9] sm:$0x4] %vm3_vm0, %v548_v61  }
 0x103   :  { %935 = vst.msk [vmem:[%s2067_s1 + $0x10b] ss:$16 sm:$0x3] %vm3_vm0, %v535_v62  }
 0x104   :  { %936 = vst.msk [vmem:[%s2067_s1 + $0x10b] ss:$16 sm:$0xc] %vm3_vm0, %v535_v62   ;;  %v689_v9 = vpop.permute.xlu1 %688   ;;  %v676_v10 = vpop.permute.xlu0 %675  }
 0x105   :  { %937 = vst.msk [vmem:[%s2067_s1 + $0x10b] ss:$16 sm:$0x30] %vm3_vm0, %v535_v62  }
 0x106   :  { %938 = vst.msk [vmem:[%s2067_s1 + $0x10b] ss:$16 sm:$0xc0] %vm3_vm0, %v535_v62  }
 0x107   :  { %957 = vst.msk [vmem:[%s2067_s1 + $0x18c] ss:$16 sm:$0x3] %vm3_vm0, %v595_v63  }
 0x108   :  { %958 = vst.msk [vmem:[%s2067_s1 + $0x1aa] sm:$0x4] %vm3_vm0, %v595_v63  }
 0x109   :  { %952 = vst.msk [vmem:[%s2067_s1 + $0x10c] ss:$16 sm:$0x3] %vm3_vm0, %v582_v0  }
 0x10a   :  { %953 = vst.msk [vmem:[%s2067_s1 + $0x10c] ss:$16 sm:$0xc] %vm3_vm0, %v582_v0  }
 0x10b   :  { %954 = vst.msk [vmem:[%s2067_s1 + $0x10c] ss:$16 sm:$0x30] %vm3_vm0, %v582_v0  }
 0x10c   :  { %955 = vst.msk [vmem:[%s2067_s1 + $0x10c] ss:$16 sm:$0xc0] %vm3_vm0, %v582_v0   ;;  %v723_v12 = vpop.permute.xlu1 %722   ;;  %v710_v13 = vpop.permute.xlu0 %709  }
 0x10d   :  { %947 = vst.msk [vmem:[%s2067_s1 + $0x8c] ss:$16 sm:$0x3] %vm3_vm0, %v569_v1  }
 0x10e   :  { %948 = vst.msk [vmem:[%s2067_s1 + $0x8c] ss:$16 sm:$0xc] %vm3_vm0, %v569_v1  }
 0x10f   :  { %949 = vst.msk [vmem:[%s2067_s1 + $0x8c] ss:$16 sm:$0x30] %vm3_vm0, %v569_v1  }
 0x110   :  { %950 = vst.msk [vmem:[%s2067_s1 + $0x8c] ss:$16 sm:$0xc0] %vm3_vm0, %v569_v1  }
 0x111   :  { %969 = vst.msk [vmem:[%s2067_s1 + $0x10d] ss:$16 sm:$0x3] %vm3_vm0, %v629_v2  }
 0x112   :  { %970 = vst.msk [vmem:[%s2067_s1 + $0x10d] ss:$16 sm:$0xc] %vm3_vm0, %v629_v2  }
 0x113   :  { %971 = vst.msk [vmem:[%s2067_s1 + $0x10d] ss:$16 sm:$0x30] %vm3_vm0, %v629_v2  }
 0x114   :  { %972 = vst.msk [vmem:[%s2067_s1 + $0x10d] ss:$16 sm:$0xc0] %vm3_vm0, %v629_v2  }
 0x115   :  { %964 = vst.msk [vmem:[%s2067_s1 + $0x8d] ss:$16 sm:$0x3] %vm3_vm0, %v616_v3  }
 0x116   :  { %965 = vst.msk [vmem:[%s2067_s1 + $0x8d] ss:$16 sm:$0xc] %vm3_vm0, %v616_v3  }
 0x117   :  { %966 = vst.msk [vmem:[%s2067_s1 + $0x8d] ss:$16 sm:$0x30] %vm3_vm0, %v616_v3  }
 0x118   :  { %967 = vst.msk [vmem:[%s2067_s1 + $0x8d] ss:$16 sm:$0xc0] %vm3_vm0, %v616_v3  }
 0x119   :  { %959 = vst.msk [vmem:[%s2067_s1 + $0xd] ss:$16 sm:$0x3] %vm3_vm0, %v603_v4  }
 0x11a   :  { %960 = vst.msk [vmem:[%s2067_s1 + $0xd] ss:$16 sm:$0xc] %vm3_vm0, %v603_v4  }
 0x11b   :  { %961 = vst.msk [vmem:[%s2067_s1 + $0xd] ss:$16 sm:$0x30] %vm3_vm0, %v603_v4  }
 0x11c   :  { %962 = vst.msk [vmem:[%s2067_s1 + $0xd] ss:$16 sm:$0xc0] %vm3_vm0, %v603_v4  }
 0x11d   :  { %981 = vst.msk [vmem:[%s2067_s1 + $0x8e] ss:$16 sm:$0x3] %vm3_vm0, %v663_v5  }
 0x11e   :  { %982 = vst.msk [vmem:[%s2067_s1 + $0x8e] ss:$16 sm:$0xc] %vm3_vm0, %v663_v5  }
 0x11f   :  { %983 = vst.msk [vmem:[%s2067_s1 + $0x8e] ss:$16 sm:$0x30] %vm3_vm0, %v663_v5  }
 0x120   :  { %984 = vst.msk [vmem:[%s2067_s1 + $0x8e] ss:$16 sm:$0xc0] %vm3_vm0, %v663_v5  }
 0x121   :  { %976 = vst.msk [vmem:[%s2067_s1 + $0xe] ss:$16 sm:$0x3] %vm3_vm0, %v650_v6  }
 0x122   :  { %977 = vst.msk [vmem:[%s2067_s1 + $0xe] ss:$16 sm:$0xc] %vm3_vm0, %v650_v6  }
 0x123   :  { %978 = vst.msk [vmem:[%s2067_s1 + $0xe] ss:$16 sm:$0x30] %vm3_vm0, %v650_v6  }
 0x124   :  { %979 = vst.msk [vmem:[%s2067_s1 + $0xe] ss:$16 sm:$0xc0] %vm3_vm0, %v650_v6  }
 0x125   :  { %974 = vst.msk [vmem:[%s2067_s1 + $0x18d] ss:$16 sm:$0x3] %vm3_vm0, %v642_v7  }
 0x126   :  { %975 = vst.msk [vmem:[%s2067_s1 + $0x1ab] sm:$0x4] %vm3_vm0, %v642_v7  }
 0x127   :  { %993 = vst.msk [vmem:[%s2067_s1 + $0xf] ss:$16 sm:$0x3] %vm3_vm0, %v697_v8  }
 0x128   :  { %994 = vst.msk [vmem:[%s2067_s1 + $0xf] ss:$16 sm:$0xc] %vm3_vm0, %v697_v8  }
 0x129   :  { %995 = vst.msk [vmem:[%s2067_s1 + $0xf] ss:$16 sm:$0x30] %vm3_vm0, %v697_v8  }
 0x12a   :  { %996 = vst.msk [vmem:[%s2067_s1 + $0xf] ss:$16 sm:$0xc0] %vm3_vm0, %v697_v8  }
 0x12b   :  { %991 = vst.msk [vmem:[%s2067_s1 + $0x18e] ss:$16 sm:$0x3] %vm3_vm0, %v689_v9  }
 0x12c   :  { %992 = vst.msk [vmem:[%s2067_s1 + $0x1ac] sm:$0x4] %vm3_vm0, %v689_v9  }
 0x12d   :  { %986 = vst.msk [vmem:[%s2067_s1 + $0x10e] ss:$16 sm:$0x3] %vm3_vm0, %v676_v10  }
 0x12e   :  { %987 = vst.msk [vmem:[%s2067_s1 + $0x10e] ss:$16 sm:$0xc] %vm3_vm0, %v676_v10  }
 0x12f   :  { %988 = vst.msk [vmem:[%s2067_s1 + $0x10e] ss:$16 sm:$0x30] %vm3_vm0, %v676_v10  }
 0x130   :  { %989 = vst.msk [vmem:[%s2067_s1 + $0x10e] ss:$16 sm:$0xc0] %vm3_vm0, %v676_v10  }
 0x131   :  { %1008 = vst.msk [vmem:[%s2067_s1 + $0x18f] ss:$16 sm:$0x3] %vm3_vm0, %v736_v11  }
 0x132   :  { %1009 = vst.msk [vmem:[%s2067_s1 + $0x1ad] sm:$0x4] %vm3_vm0, %v736_v11  }
 0x133   :  { %1003 = vst.msk [vmem:[%s2067_s1 + $0x10f] ss:$16 sm:$0x3] %vm3_vm0, %v723_v12  }
 0x134   :  { %1004 = vst.msk [vmem:[%s2067_s1 + $0x10f] ss:$16 sm:$0xc] %vm3_vm0, %v723_v12  }
 0x135   :  { %1005 = vst.msk [vmem:[%s2067_s1 + $0x10f] ss:$16 sm:$0x30] %vm3_vm0, %v723_v12  }
 0x136   :  { %1006 = vst.msk [vmem:[%s2067_s1 + $0x10f] ss:$16 sm:$0xc0] %vm3_vm0, %v723_v12  }
 0x137   :  { %998 = vst.msk [vmem:[%s2067_s1 + $0x8f] ss:$16 sm:$0x3] %vm3_vm0, %v710_v13  }
 0x138   :  { %999 = vst.msk [vmem:[%s2067_s1 + $0x8f] ss:$16 sm:$0xc] %vm3_vm0, %v710_v13  }
 0x139   :  { %1000 = vst.msk [vmem:[%s2067_s1 + $0x8f] ss:$16 sm:$0x30] %vm3_vm0, %v710_v13  }
 0x13a   :  { %1001 = vst.msk [vmem:[%s2067_s1 + $0x8f] ss:$16 sm:$0xc0] %vm3_vm0, %v710_v13  }

// kernel: _lambda_.6
= control target key start
LH: loop header
LB: loop body
LE: loop exit
PB: predicated region body
PF: predicated region fallthrough
CT: control target
= control target key end

     0   :  { %vm182_vm0 = vcmask 1042432   ;;  %vm267_vm1 = vcmask 1041408   ;;  %vm66_vm2 = vcmask 1046528   ;;  %vm497_vm7 = vcmask 523264   ;;  %s949_s1 = inlined_call_operand.vmem [shape: f32[4,128,64], index: 1, kind: input, shape index: {}]   ;;  %s950_s0 = inlined_call_operand.vmem [shape: f32[62,128], index: 0, kind: input, shape index: {}]   ;;  %s951_s2 = inlined_call_operand.vmem [shape: f32[1,64], index: 2, kind: input, shape index: {}]   ;;  %s952_s3 = inlined_call_operand.vmem [shape: f32[1,64], index: 3, kind: input, shape index: {}]   ;;  %s953_s4 = inlined_call_operand.vmem [shape: f32[56,64], index: 4, kind: output, shape index: {}]  }
   0x1   :  { %v540_v0 = vld [vmem:[%s949_s1 + $0x178] sm:$0xff]  ;;  %v539_v1 = vld [vmem:[%s949_s1 + $0x170] sm:$0xff]  ;;  %v538_v5 = vld [vmem:[%s949_s1 + $0x168] sm:$0xff] }
   0x2   :  { %v556_v2 = vld [vmem:[%s949_s1 + $0x1f8] sm:$0xff]  ;;  %205 = vmatpush.msra.mxu2 %v540_v0  ;;  %v555_v6 = vld [vmem:[%s949_s1 + $0x1f0] sm:$0xff]  ;;  %v554_v9 = vld [vmem:[%s949_s1 + $0x1e8] sm:$0xff] }
   0x3   :  { %290 = vmatpush.msra.mxu3 %v556_v2  ;;  %v524_v3 = vld [vmem:[%s949_s1 + $0xf8] sm:$0xff]  ;;  %v523_v7 = vld [vmem:[%s949_s1 + $0xf0] sm:$0xff]  ;;  %v522_v10 = vld [vmem:[%s949_s1 + $0xe8] sm:$0xff] }
   0x4   :  { %v40_v4 = vld [vmem:[%s949_s1 + $0x78] sm:$0xff]  ;;  %89 = vmatpush.msra.mxu0 %v524_v3  ;;  %v39_v8 = vld [vmem:[%s949_s1 + $0x70] sm:$0xff]  ;;  %206 = vmatpush.msra.mxu2 %v539_v1  ;;  %v537_v11 = vld [vmem:[%s949_s1 + $0x160] sm:$0xff] }
   0x5   :  { %127 = vmatpush.msra.mxu1 %v40_v4  ;;  %291 = vmatpush.msra.mxu3 %v555_v6  ;;  %v38_v12 = vld [vmem:[%s949_s1 + $0x68] sm:$0xff]  ;;  %v553_v13 = vld [vmem:[%s949_s1 + $0x1e0] sm:$0xff]  ;;  %v536_v16 = vld [vmem:[%s949_s1 + $0x158] sm:$0xff] }
   0x6   :  { %90 = vmatpush.msra.mxu0 %v523_v7  ;;  %207 = vmatpush.msra.mxu2 %v538_v5  ;;  %v521_v14 = vld [vmem:[%s949_s1 + $0xe0] sm:$0xff]  ;;  %v552_v17 = vld [vmem:[%s949_s1 + $0x1d8] sm:$0xff]  ;;  %v535_v20 = vld [vmem:[%s949_s1 + $0x150] sm:$0xff] }
   0x7   :  { %128 = vmatpush.msra.mxu1 %v39_v8  ;;  %292 = vmatpush.msra.mxu3 %v554_v9  ;;  %v37_v15 = vld [vmem:[%s949_s1 + $0x60] sm:$0xff]  ;;  %v520_v18 = vld [vmem:[%s949_s1 + $0xd8] sm:$0xff]  ;;  %v551_v21 = vld [vmem:[%s949_s1 + $0x1d0] sm:$0xff] }
   0x8   :  { %91 = vmatpush.msra.mxu0 %v522_v10  ;;  %208 = vmatpush.msra.mxu2 %v537_v11  ;;  %v36_v19 = vld [vmem:[%s949_s1 + $0x58] sm:$0xff]  ;;  %v519_v22 = vld [vmem:[%s949_s1 + $0xd0] sm:$0xff]  ;;  %v534_v24 = vld [vmem:[%s949_s1 + $0x148] sm:$0xff] }
   0x9   :  { %129 = vmatpush.msra.mxu1 %v38_v12  ;;  %293 = vmatpush.msra.mxu3 %v553_v13  ;;  %v35_v23 = vld [vmem:[%s949_s1 + $0x50] sm:$0xff]  ;;  %v550_v25 = vld [vmem:[%s949_s1 + $0x1c8] sm:$0xff]  ;;  %v533_v28 = vld [vmem:[%s949_s1 + $0x140] sm:$0xff] }
   0xa   :  { %92 = vmatpush.msra.mxu0 %v521_v14  ;;  %209 = vmatpush.msra.mxu2 %v536_v16  ;;  %v518_v26 = vld [vmem:[%s949_s1 + $0xc8] sm:$0xff]  ;;  %v549_v29 = vld [vmem:[%s949_s1 + $0x1c0] sm:$0xff]  ;;  %v532_v32 = vld [vmem:[%s949_s1 + $0x138] sm:$0xff] }
   0xb   :  { %130 = vmatpush.msra.mxu1 %v37_v15  ;;  %294 = vmatpush.msra.mxu3 %v552_v17  ;;  %v34_v27 = vld [vmem:[%s949_s1 + $0x48] sm:$0xff]  ;;  %v517_v30 = vld [vmem:[%s949_s1 + $0xc0] sm:$0xff]  ;;  %v548_v33 = vld [vmem:[%s949_s1 + $0x1b8] sm:$0xff] }
   0xc   :  { %93 = vmatpush.msra.mxu0 %v520_v18  ;;  %210 = vmatpush.msra.mxu2 %v535_v20  ;;  %v33_v31 = vld [vmem:[%s949_s1 + $0x40] sm:$0xff]  ;;  %v516_v34 = vld [vmem:[%s949_s1 + $0xb8] sm:$0xff]  ;;  %v531_v36 = vld [vmem:[%s949_s1 + $0x130] sm:$0xff] }
   0xd   :  { %131 = vmatpush.msra.mxu1 %v36_v19  ;;  %295 = vmatpush.msra.mxu3 %v551_v21  ;;  %v32_v35 = vld [vmem:[%s949_s1 + $0x38] sm:$0xff]  ;;  %v547_v37 = vld [vmem:[%s949_s1 + $0x1b0] sm:$0xff]  ;;  %v530_v40 = vld [vmem:[%s949_s1 + $0x128] sm:$0xff] }
   0xe   :  { %94 = vmatpush.msra.mxu0 %v519_v22  ;;  %211 = vmatpush.msra.mxu2 %v534_v24  ;;  %v515_v38 = vld [vmem:[%s949_s1 + $0xb0] sm:$0xff]  ;;  %v546_v41 = vld [vmem:[%s949_s1 + $0x1a8] sm:$0xff]  ;;  %v529_v44 = vld [vmem:[%s949_s1 + $0x120] sm:$0xff] }
   0xf   :  { %132 = vmatpush.msra.mxu1 %v35_v23  ;;  %296 = vmatpush.msra.mxu3 %v550_v25  ;;  %v31_v39 = vld [vmem:[%s949_s1 + $0x30] sm:$0xff]  ;;  %v514_v42 = vld [vmem:[%s949_s1 + $0xa8] sm:$0xff]  ;;  %v545_v45 = vld [vmem:[%s949_s1 + $0x1a0] sm:$0xff] }
  0x10   :  { %95 = vmatpush.msra.mxu0 %v518_v26  ;;  %212 = vmatpush.msra.mxu2 %v533_v28  ;;  %v30_v43 = vld [vmem:[%s949_s1 + $0x28] sm:$0xff]  ;;  %v528_v46 = vld [vmem:[%s949_s1 + $0x118] sm:$0xff]  ;;  %v513_v47 = vld [vmem:[%s949_s1 + $0xa0] sm:$0xff] }
  0x11   :  { %133 = vmatpush.msra.mxu1 %v34_v27  ;;  %297 = vmatpush.msra.mxu3 %v549_v29  ;;  %v29_v48 = vld [vmem:[%s949_s1 + $0x20] sm:$0xff]  ;;  %v544_v49 = vld [vmem:[%s949_s1 + $0x198] sm:$0xff]  ;;  %v775_v51 = vld [vmem:[%s950_s0 + $0x8] sm:$0xff] }
  0x12   :  { %96 = vmatpush.msra.mxu0 %v517_v30  ;;  %213 = vmatpush.msra.mxu2 %v532_v32  ;;  %v17_v50 = vld [vmem:[%s950_s0] sm:$0xff]  ;;  %v512_v52 = vld [vmem:[%s949_s1 + $0x98] sm:$0xff]  ;;  %v527_v54 = vld [vmem:[%s949_s1 + $0x110] sm:$0xff]  ;;  %v184_v59 = vrot.slane %v775_v51, 5  ;;  %v269_v61 = vrot.slane %v775_v51, 6  ;;  %v68_v3 = vrot.slane %v775_v51, 1 }
  0x13   :  { %134 = vmatpush.msra.mxu1 %v33_v31  ;;  %298 = vmatpush.msra.mxu3 %v548_v33  ;;  %v28_v53 = vld [vmem:[%s949_s1 + $0x18] sm:$0xff]  ;;  %v543_v55 = vld [vmem:[%s949_s1 + $0x190] sm:$0xff]  ;;  %v183_v58 = vrot.slane %v17_v50, 5  ;;  %v268_v60 = vrot.slane %v17_v50, 6  ;;  %v526_v62 = vld [vmem:[%s949_s1 + $0x108] sm:$0xff]  ;;  %v67_v2 = vrot.slane %v17_v50, 1 }
  0x14   :  { %97 = vmatpush.msra.mxu0 %v516_v34  ;;  %214 = vmatpush.msra.mxu2 %v531_v36  ;;  %v511_v56 = vld [vmem:[%s949_s1 + $0x90] sm:$0xff]  ;;  %v542_v63 = vld [vmem:[%s949_s1 + $0x188] sm:$0xff]  ;;  %v525_v4 = vld [vmem:[%s949_s1 + $0x100] sm:$0xff] }
  0x15   :  { %135 = vmatpush.msra.mxu1 %v32_v35  ;;  %299 = vmatpush.msra.mxu3 %v547_v37  ;;  %v27_v57 = vld [vmem:[%s949_s1 + $0x10] sm:$0xff]  ;;  %v510_v0 = vld [vmem:[%s949_s1 + $0x88] sm:$0xff]  ;;  %v541_v5 = vld [vmem:[%s949_s1 + $0x180] sm:$0xff]  ;;  %v185_v6 = vsel %vm182_vm0, %v183_v58, %v184_v59  ;;  %v270_v7 = vsel %vm267_vm1, %v268_v60, %v269_v61  ;;  %v69_v11 = vsel %vm66_vm2, %v67_v2, %v68_v3 }
  0x16   :  { %98 = vmatpush.msra.mxu0 %v515_v38  ;;  %215 = vmatpush.msra.mxu2 %v530_v40  ;;  %v26_v1 = vld [vmem:[%s949_s1 + $0x8] sm:$0xff]  ;;  %v509_v8 = vld [vmem:[%s949_s1 + $0x80] sm:$0xff]  ;;  %v19_v10 = vld [vmem:[%s950_s0 + $0x10] sm:$0xff] }
  0x17   :  { %136 = vmatpush.msra.mxu1 %v31_v39  ;;  %300 = vmatpush.msra.mxu3 %v546_v41  ;;  %v25_v9 = vld [vmem:[%s949_s1] sm:$0xff]  ;;  %v186_v12 = vrot.slane %v19_v10, 5  ;;  %v271_v13 = vrot.slane %v19_v10, 6  ;;  %v70_v14 = vrot.slane %v19_v10, 1  ;;  %v20_v17 = vld [vmem:[%s950_s0 + $0x18] sm:$0xff]  ;;  %v22_v31 = vld [vmem:[%s950_s0 + $0x28] sm:$0xff] }
  0x18   :  { %99 = vmatpush.msra.mxu0 %v514_v42  ;;  %216 = vmatpush.msra.mxu2 %v529_v44  ;;  %v188_v19 = vrot.slane %v20_v17, 5  ;;  %v273_v20 = vrot.slane %v20_v17, 6  ;;  %v72_v21 = vrot.slane %v20_v17, 1  ;;  %v21_v24 = vld [vmem:[%s950_s0 + $0x20] sm:$0xff]  ;;  %v192_v33 = vrot.slane %v22_v31, 5  ;;  %v23_v38 = vld [vmem:[%s950_s0 + $0x30] sm:$0xff] }
  0x19   :  { %137 = vmatpush.msra.mxu1 %v30_v43  ;;  %301 = vmatpush.msra.mxu3 %v545_v45  ;;  %v187_v15 = vsel %vm182_vm0, %v184_v59, %v186_v12  ;;  %v272_v16 = vsel %vm267_vm1, %v269_v61, %v271_v13  ;;  %v71_v18 = vsel %vm66_vm2, %v68_v3, %v70_v14  ;;  %v190_v26 = vrot.slane %v21_v24, 5  ;;  %v24_v45 = vld [vmem:[%s950_s0 + $0x38] sm:$0x3f]  ;;  %v865_v59 = vld [vmem:[%s951_s2] ss:$0 sm:$0xff] }
  0x1a   :  { %100 = vmatpush.msra.mxu0 %v513_v47  ;;  %217 = vmatpush.msra.mxu2 %v528_v46  ;;  %v189_v22 = vsel %vm182_vm0, %v186_v12, %v188_v19  ;;  %v274_v23 = vsel %vm267_vm1, %v271_v13, %v273_v20  ;;  %v73_v25 = vsel %vm66_vm2, %v70_v14, %v72_v21  ;;  %v275_v27 = vrot.slane %v21_v24, 6  ;;  %v870_v61 = vld [vmem:[%s952_s3] ss:$0 sm:$0xff] }
  0x1b   :  { %138 = vmatpush.msra.mxu1 %v29_v48  ;;  %302 = vmatpush.msra.mxu3 %v544_v49  ;;  %v74_v28 = vrot.slane %v21_v24, 1  ;;  %v191_v29 = vsel %vm182_vm0, %v188_v19, %v190_v26  ;;  %v277_v34 = vrot.slane %v22_v31, 6  ;;  %v76_v35 = vrot.slane %v22_v31, 1 }
  0x1c   :  { %101 = vmatpush.msra.mxu0 %v512_v52  ;;  %218 = vmatpush.msra.mxu2 %v527_v54  ;;  %v276_v30 = vsel %vm267_vm1, %v273_v20, %v275_v27  ;;  %v193_v36 = vsel %vm182_vm0, %v190_v26, %v192_v33  ;;  %v194_v40 = vrot.slane %v23_v38, 5  ;;  %v279_v41 = vrot.slane %v23_v38, 6 }
  0x1d   :  { %139 = vmatpush.msra.mxu1 %v28_v53  ;;  %303 = vmatpush.msra.mxu3 %v543_v55  ;;  %v75_v32 = vsel %vm66_vm2, %v72_v21, %v74_v28  ;;  %v278_v37 = vsel %vm267_vm1, %v275_v27, %v277_v34  ;;  %v77_v39 = vsel %vm66_vm2, %v74_v28, %v76_v35  ;;  %v78_v42 = vrot.slane %v23_v38, 1 }
  0x1e   :  { %102 = vmatpush.msra.mxu0 %v511_v56  ;;  %219 = vmatpush.msra.mxu2 %v526_v62  ;;  %v195_v43 = vsel %vm182_vm0, %v192_v33, %v194_v40  ;;  %v280_v44 = vsel %vm267_vm1, %v277_v34, %v279_v41  ;;  %v196_v47 = vrot.slane %v24_v45, 5  ;;  %v281_v48 = vrot.slane %v24_v45, 6 }
  0x1f   :  { %140 = vmatpush.msra.mxu1 %v27_v57  ;;  %304 = vmatpush.msra.mxu3 %v542_v63  ;;  %v79_v46 = vsel %vm66_vm2, %v76_v35, %v78_v42  ;;  %v80_v49 = vrot.slane %v24_v45, 1 }
  0x20   :  { %103 = vmatpush.msra.mxu0 %v510_v0  ;;  %220 = vmatpush.msra.mxu2 %v525_v4 }
  0x21   :  { %141 = vmatpush.msra.mxu1 %v26_v1  ;;  %305 = vmatpush.msra.mxu3 %v541_v5  ;;  %v81_v52 = vsel %vm66_vm2, %v78_v42, %v80_v49 }
  0x22   :  { %221 = vmatmul.f32.vlgmr.msra.gmra.mxu2 %v185_v6  ;;  %306 = vmatmul.f32.vlgmr.msra.gmra.mxu3 %v270_v7 }
  0x23   :  { %104 = vmatpush.msra.mxu0 %v509_v8  ;;  %142 = vmatpush.msra.mxu1 %v25_v9 }
  0x24   :  { %105 = vmatmul.f32.vlgmr.msra.gmra.mxu0 %v69_v11  ;;  %143 = vmatmul.f32.vlgmr.msra.gmra.mxu1 %v17_v50  ;;  %v197_v50 = vsel %vm182_vm0, %v194_v40, %v196_v47 }
  0x2a   :  { %224 = vmatmul.f32.gmra.mxu2 %v187_v15  ;;  %309 = vmatmul.f32.gmra.mxu3 %v272_v16 }
  0x2c   :  { %108 = vmatmul.f32.gmra.mxu0 %v71_v18  ;;  %146 = vmatmul.f32.gmra.mxu1 %v775_v51  ;;  %v282_v51 = vsel %vm267_vm1, %v279_v41, %v281_v48 }
  0x32   :  { %227 = vmatmul.f32.gmra.mxu2 %v189_v22  ;;  %312 = vmatmul.f32.gmra.mxu3 %v274_v23 }
  0x34   :  { %111 = vmatmul.f32.gmra.mxu0 %v73_v25  ;;  %149 = vmatmul.f32.gmra.mxu1 %v19_v10 }
  0x3a   :  { %230 = vmatmul.f32.gmra.mxu2 %v191_v29  ;;  %315 = vmatmul.f32.gmra.mxu3 %v276_v30 }
  0x3c   :  { %114 = vmatmul.f32.gmra.mxu0 %v75_v32  ;;  %152 = vmatmul.f32.gmra.mxu1 %v20_v17 }
  0x42   :  { %233 = vmatmul.f32.gmra.mxu2 %v193_v36  ;;  %318 = vmatmul.f32.gmra.mxu3 %v278_v37 }
  0x44   :  { %117 = vmatmul.f32.gmra.mxu0 %v77_v39  ;;  %155 = vmatmul.f32.gmra.mxu1 %v21_v24 }
  0x4a   :  { %236 = vmatmul.f32.gmra.mxu2 %v195_v43  ;;  %321 = vmatmul.f32.gmra.mxu3 %v280_v44 }
  0x4c   :  { %120 = vmatmul.f32.gmra.mxu0 %v79_v46  ;;  %158 = vmatmul.f32.gmra.mxu1 %v22_v31 }
  0x52   :  { %239 = vmatmul.f32.gmra.mxu2 %v197_v50  ;;  %324 = vmatmul.f32.gmra.mxu3 %v282_v51 }
  0x54   :  { %123 = vmatmul.f32.gmra.mxu0 %v81_v52  ;;  %161 = vmatmul.f32.gmra.mxu1 %v23_v38 }
  0xa1   :  { %v106_v53 = vpop.f32.mrf.mxu0  ;;  %v144_v54 = vpop.f32.mrf.mxu1 }
  0xa2   :  { %v145_v55 = vadd.f32 %v144_v54, %v106_v53 }
  0xa5   :  { %v222_v56 = vpop.f32.mrf.mxu2  ;;  %v307_v57 = vpop.f32.mrf.mxu3 }
  0xa6   :  { %v243_v58 = vadd.f32 %v222_v56, %v145_v55 }
  0xa8   :  { %v328_v60 = vadd.f32 %v307_v57, %v243_v58 }
  0xa9   :  { %v109_v62 = vpop.f32.mrf.mxu0  ;;  %v147_v63 = vpop.f32.mrf.mxu1 }
  0xaa   :  { %v339_v0 = vmul.f32 %v865_v59, %v328_v60  ;;  %v148_v1 = vadd.f32 %v147_v63, %v109_v62 }
  0xac   :  { %v874_v2 = vadd.f32 %v870_v61, %v339_v0 }
  0xad   :  { %v225_v3 = vpop.f32.mrf.mxu2  ;;  %v310_v4 = vpop.f32.mrf.mxu3 }
  0xae   :  { %v557_v5 = vmul.f32 -1.442695, %v874_v2  ;;  %v244_v6 = vadd.f32 %v225_v3, %v148_v1 }
  0xb0   :  { %566 = vpow2.f32 %v557_v5  ;;  %v329_v7 = vadd.f32 %v310_v4, %v244_v6 }
  0xb1   :  { %v112_v8 = vpop.f32.mrf.mxu0  ;;  %v150_v9 = vpop.f32.mrf.mxu1 }
  0xb2   :  { %v340_v10 = vmul.f32 %v865_v59, %v329_v7  ;;  %v151_v11 = vadd.f32 %v150_v9, %v112_v8 }
  0xb4   :  { %v879_v12 = vadd.f32 %v870_v61, %v340_v10 }
  0xb5   :  { %v228_v13 = vpop.f32.mrf.mxu2  ;;  %v313_v14 = vpop.f32.mrf.mxu3 }
  0xb6   :  { %v567_v15 = vpop.eup %566  ;;  %v558_v16 = vmul.f32 -1.442695, %v879_v12  ;;  %v245_v17 = vadd.f32 %v228_v13, %v151_v11 }
  0xb7   :  { %v378_v18 = vadd.f32 1.0, %v567_v15 }
  0xb8   :  { %568 = vpow2.f32 %v558_v16  ;;  %v330_v19 = vadd.f32 %v313_v14, %v245_v17 }
  0xb9   :  { %570 = vrcp.f32 %v378_v18  ;;  %v115_v20 = vpop.f32.mrf.mxu0  ;;  %v153_v21 = vpop.f32.mrf.mxu1  ;;  %v396_v39 = vand.u32 2147483648, %v378_v18  ;;  %v394_v41 = vand.u32 2147483647, %v378_v18  ;;  %vm390_vm4 = vweird.f32 %v378_v18 }
  0xba   :  { %v341_v22 = vmul.f32 %v865_v59, %v330_v19  ;;  %v154_v23 = vadd.f32 %v153_v21, %v115_v20 }
  0xbb   :  { %v397_v50 = vor.u32 1.1754944e-38, %v396_v39  ;;  %vm395_vm6 = vcmp.eq.f32.partialorder %v394_v41, 8.507059e+37 }
  0xbc   :  { %v884_v24 = vadd.f32 %v870_v61, %v341_v22 }
  0xbd   :  { %v231_v25 = vpop.f32.mrf.mxu2  ;;  %v316_v26 = vpop.f32.mrf.mxu3 }
  0xbe   :  { %v569_v27 = vpop.eup %568  ;;  %v559_v28 = vmul.f32 -1.442695, %v884_v24  ;;  %v246_v29 = vadd.f32 %v231_v25, %v154_v23 }
  0xbf   :  { %v571_v30 = vpop.eup %570  ;;  %v379_v31 = vadd.f32 1.0, %v569_v27 }
  0xc0   :  { %v386_v32 = vmul.f32 %v571_v30, %v378_v18  ;;  %572 = vpow2.f32 %v559_v28  ;;  %v331_v33 = vadd.f32 %v316_v26, %v246_v29  ;;  %vm391_vm3 = vweird.f32 %v571_v30 }
  0xc1   :  { %574 = vrcp.f32 %v379_v31  ;;  %v118_v34 = vpop.f32.mrf.mxu0  ;;  %v156_v35 = vpop.f32.mrf.mxu1  ;;  %vm392_vm5 = vmor %vm390_vm4, %vm391_vm3  ;;  %v411_v62 = vand.u32 2147483648, %v379_v31  ;;  %v409_v1 = vand.u32 2147483647, %v379_v31  ;;  %vm405_vm9 = vweird.f32 %v379_v31 }
  0xc2   :  { %v387_v36 = vsub.f32 1.0, %v386_v32  ;;  %v342_v37 = vmul.f32 %v865_v59, %v331_v33  ;;  %v157_v38 = vadd.f32 %v156_v35, %v118_v34 }
  0xc3   :  { %v412_v9 = vor.u32 1.1754944e-38, %v411_v62  ;;  %vm410_vm11 = vcmp.eq.f32.partialorder %v409_v1, 8.507059e+37 }
  0xc4   :  { %v388_v40 = vmul.f32 %v571_v30, %v387_v36  ;;  %v889_v42 = vadd.f32 %v870_v61, %v342_v37 }
  0xc5   :  { %v234_v43 = vpop.f32.mrf.mxu2  ;;  %v319_v44 = vpop.f32.mrf.mxu3 }
  0xc6   :  { %v573_v45 = vpop.eup %572  ;;  %v389_v46 = vadd.f32 %v571_v30, %v388_v40  ;;  %v560_v47 = vmul.f32 -1.442695, %v889_v42  ;;  %v247_v48 = vadd.f32 %v234_v43, %v157_v38 }
  0xc7   :  { %v575_v49 = vpop.eup %574  ;;  %v892_v51 = vadd.f32 1.0, %v573_v45 }
  0xc8   :  { %v393_v52 = vsel %vm392_vm5, %v571_v30, %v389_v46  ;;  %v401_v53 = vmul.f32 %v575_v49, %v379_v31  ;;  %576 = vpow2.f32 %v560_v47  ;;  %v332_v60 = vadd.f32 %v319_v44, %v247_v48 }
  0xc9   :  { %v398_v54 = vsel %vm395_vm6, %v397_v50, %v393_v52  ;;  %578 = vrcp.f32 %v892_v51  ;;  %v121_v55 = vpop.f32.mrf.mxu0  ;;  %v159_v56 = vpop.f32.mrf.mxu1  ;;  %vm406_vm8 = vweird.f32 %v575_v49  ;;  %v426_v21 = vand.u32 2147483648, %v892_v51 }
  0xca   :  { %v490_v57 = vmul.f32 %v398_v54, %v874_v2  ;;  %v402_v58 = vsub.f32 1.0, %v401_v53  ;;  %v160_v63 = vadd.f32 %v159_v56, %v121_v55  ;;  %v343_v3 = vmul.f32 %v865_v59, %v332_v60  ;;  %vm407_vm10 = vmor %vm405_vm9, %vm406_vm8 }
  0xcb   :  { %v424_v26 = vand.u32 2147483647, %v892_v51  ;;  %vm420_vm13 = vweird.f32 %v892_v51  ;;  %v427_v32 = vor.u32 1.1754944e-38, %v426_v21 }
  0xcc   :  { %498 = vst.msk [vmem:[%s953_s4] sm:$0xff] %vm497_vm7, %v490_v57  ;;  %v403_v0 = vmul.f32 %v575_v49, %v402_v58  ;;  %v902_v2 = vadd.f32 %v870_v61, %v343_v3 }
  0xcd   :  { %v237_v4 = vpop.f32.mrf.mxu2  ;;  %v322_v5 = vpop.f32.mrf.mxu3  ;;  %vm425_vm15 = vcmp.eq.f32.partialorder %v424_v26, 8.507059e+37 }
  0xce   :  { %v577_v6 = vpop.eup %576  ;;  %v404_v7 = vadd.f32 %v575_v49, %v403_v0  ;;  %v248_v11 = vadd.f32 %v237_v4, %v160_v63  ;;  %v561_v15 = vmul.f32 -1.442695, %v902_v2 }
  0xcf   :  { %v579_v8 = vpop.eup %578  ;;  %v381_v10 = vadd.f32 1.0, %v577_v6 }
  0xd0   :  { %v408_v13 = vsel %vm407_vm10, %v575_v49, %v404_v7  ;;  %v416_v14 = vmul.f32 %v579_v8, %v892_v51  ;;  %v333_v22 = vadd.f32 %v322_v5, %v248_v11  ;;  %vm421_vm12 = vweird.f32 %v579_v8 }
  0xd1   :  { %v413_v16 = vsel %vm410_vm11, %v412_v9, %v408_v13  ;;  %580 = vrcp.f32 %v381_v10  ;;  %v124_v17 = vpop.f32.mrf.mxu0  ;;  %v162_v18 = vpop.f32.mrf.mxu1  ;;  %vm422_vm14 = vmor %vm420_vm13, %vm421_vm12  ;;  %v439_v45 = vand.u32 2147483647, %v381_v10  ;;  %v441_v46 = vand.u32 2147483648, %v381_v10 }
  0xd2   :  { %v491_v19 = vmul.f32 %v413_v16, %v879_v12  ;;  %v417_v20 = vsub.f32 1.0, %v416_v14  ;;  %582 = vpow2.f32 %v561_v15  ;;  %v163_v23 = vadd.f32 %v162_v18, %v124_v17 }
  0xd3   :  { %v344_v27 = vmul.f32 %v865_v59, %v333_v22  ;;  %vm435_vm1 = vweird.f32 %v381_v10  ;;  %vm440_vm3 = vcmp.eq.f32.partialorder %v439_v45, 8.507059e+37 }
  0xd4   :  { %499 = vst.msk [vmem:[%s953_s4 + $0x8] sm:$0xff] %vm497_vm7, %v491_v19  ;;  %v418_v25 = vmul.f32 %v579_v8, %v417_v20 }
  0xd5   :  { %v240_v28 = vpop.f32.mrf.mxu2  ;;  %v325_v29 = vpop.f32.mrf.mxu3  ;;  %v916_v33 = vadd.f32 %v870_v61, %v344_v27 }
  0xd6   :  { %v419_v12 = vadd.f32 %v579_v8, %v418_v25  ;;  %v249_v30 = vadd.f32 %v240_v28, %v163_v23 }
  0xd7   :  { %v581_v31 = vpop.eup %580  ;;  %v562_v40 = vmul.f32 -1.442695, %v916_v33 }
  0xd8   :  { %v583_v34 = vpop.eup %582  ;;  %v423_v35 = vsel %vm422_vm14, %v579_v8, %v419_v12  ;;  %v431_v36 = vmul.f32 %v581_v31, %v381_v10  ;;  %v334_v37 = vadd.f32 %v325_v29, %v249_v30  ;;  %vm436_vm0 = vweird.f32 %v581_v31 }
  0xd9   :  { %v428_v38 = vsel %vm425_vm15, %v427_v32, %v423_v35  ;;  %v382_v39 = vadd.f32 1.0, %v583_v34  ;;  %vm437_vm2 = vmor %vm435_vm1, %vm436_vm0 }
  0xda   :  { %v492_v41 = vmul.f32 %v428_v38, %v884_v24  ;;  %v432_v43 = vsub.f32 1.0, %v431_v36  ;;  %v345_v44 = vmul.f32 %v865_v59, %v334_v37  ;;  %v442_v59 = vor.u32 1.1754944e-38, %v441_v46 }
  0xdb   :  { %584 = vrcp.f32 %v382_v39  ;;  %v456_v57 = vand.u32 2147483648, %v382_v39  ;;  %v454_v62 = vand.u32 2147483647, %v382_v39  ;;  %vm450_vm5 = vweird.f32 %v382_v39 }
  0xdc   :  { %500 = vst.msk [vmem:[%s953_s4 + $0x10] sm:$0xff] %vm497_vm7, %v492_v41  ;;  %v433_v47 = vmul.f32 %v581_v31, %v432_v43  ;;  %586 = vpow2.f32 %v562_v40  ;;  %v926_v48 = vadd.f32 %v870_v61, %v345_v44 }
  0xdd   :  { %v457_v1 = vor.u32 1.1754944e-38, %v456_v57  ;;  %vm455_vm8 = vcmp.eq.f32.partialorder %v454_v62, 8.507059e+37 }
  0xde   :  { %v434_v49 = vadd.f32 %v581_v31, %v433_v47  ;;  %v563_v24 = vmul.f32 -1.442695, %v926_v48 }
  0xe0   :  { %v438_v50 = vsel %vm437_vm2, %v581_v31, %v434_v49  ;;  %588 = vpow2.f32 %v563_v24 }
  0xe1   :  { %v585_v51 = vpop.eup %584  ;;  %v443_v52 = vsel %vm440_vm3, %v442_v59, %v438_v50 }
  0xe2   :  { %v587_v53 = vpop.eup %586  ;;  %v493_v54 = vmul.f32 %v443_v52, %v889_v42  ;;  %v446_v55 = vmul.f32 %v585_v51, %v382_v39  ;;  %vm451_vm4 = vweird.f32 %v585_v51 }
  0xe3   :  { %v383_v56 = vadd.f32 1.0, %v587_v53  ;;  %vm452_vm6 = vmor %vm450_vm5, %vm451_vm4 }
  0xe4   :  { %501 = vst.msk [vmem:[%s953_s4 + $0x18] sm:$0xff] %vm497_vm7, %v493_v54  ;;  %v447_v61 = vsub.f32 1.0, %v446_v55 }
  0xe5   :  { %590 = vrcp.f32 %v383_v56  ;;  %v469_v9 = vand.u32 2147483647, %v383_v56  ;;  %v471_v10 = vand.u32 2147483648, %v383_v56  ;;  %vm465_vm10 = vweird.f32 %v383_v56 }
  0xe6   :  { %v589_v58 = vpop.eup %588  ;;  %v448_v60 = vmul.f32 %v585_v51, %v447_v61 }
  0xe7   :  { %v384_v63 = vadd.f32 1.0, %v589_v58  ;;  %vm470_vm12 = vcmp.eq.f32.partialorder %v469_v9, 8.507059e+37  ;;  %v472_v16 = vor.u32 1.1754944e-38, %v471_v10 }
  0xe8   :  { %v449_v0 = vadd.f32 %v585_v51, %v448_v60 }
  0xe9   :  { %592 = vrcp.f32 %v384_v63  ;;  %v484_v19 = vand.u32 2147483647, %v384_v63  ;;  %vm480_vm14 = vweird.f32 %v384_v63 }
  0xea   :  { %v453_v42 = vsel %vm452_vm6, %v585_v51, %v449_v0 }
  0xeb   :  { %v591_v3 = vpop.eup %590  ;;  %v458_v4 = vsel %vm455_vm8, %v457_v1, %v453_v42  ;;  %vm485_vm0 = vcmp.eq.f32.partialorder %v484_v19, 8.507059e+37 }
  0xec   :  { %v494_v5 = vmul.f32 %v458_v4, %v902_v2  ;;  %v461_v6 = vmul.f32 %v591_v3, %v383_v56  ;;  %vm466_vm9 = vweird.f32 %v591_v3  ;;  %v486_v2 = vand.u32 2147483648, %v384_v63 }
  0xed   :  { %vm467_vm11 = vmor %vm465_vm10, %vm466_vm9 }
  0xee   :  { %502 = vst.msk [vmem:[%s953_s4 + $0x20] sm:$0xff] %vm497_vm7, %v494_v5  ;;  %v462_v7 = vsub.f32 1.0, %v461_v6  ;;  %v487_v23 = vor.u32 1.1754944e-38, %v486_v2 }
  0xef   :  { %v593_v8 = vpop.eup %592 }
  0xf0   :  { %v463_v11 = vmul.f32 %v591_v3, %v462_v7  ;;  %v476_v13 = vmul.f32 %v593_v8, %v384_v63  ;;  %vm481_vm13 = vweird.f32 %v593_v8 }
  0xf1   :  { %vm482_vm15 = vmor %vm480_vm14, %vm481_vm13 }
  0xf2   :  { %v464_v14 = vadd.f32 %v591_v3, %v463_v11  ;;  %v477_v15 = vsub.f32 1.0, %v476_v13 }
  0xf4   :  { %v468_v17 = vsel %vm467_vm11, %v591_v3, %v464_v14  ;;  %v478_v18 = vmul.f32 %v593_v8, %v477_v15 }
  0xf5   :  { %v473_v20 = vsel %vm470_vm12, %v472_v16, %v468_v17 }
  0xf6   :  { %v495_v21 = vmul.f32 %v473_v20, %v916_v33  ;;  %v479_v22 = vadd.f32 %v593_v8, %v478_v18 }
  0xf8   :  { %503 = vst.msk [vmem:[%s953_s4 + $0x28] sm:$0xff] %vm497_vm7, %v495_v21  ;;  %v483_v25 = vsel %vm482_vm15, %v593_v8, %v479_v22 }
  0xf9   :  { %v488_v26 = vsel %vm485_vm0, %v487_v23, %v483_v25 }
  0xfa   :  { %v496_v27 = vmul.f32 %v488_v26, %v926_v48 }
  0xfc   :  { %504 = vst.msk [vmem:[%s953_s4 + $0x30] sm:$0xff] %vm497_vm7, %v496_v27 }

// kernel: squeeze.7
= control target key start
LH: loop header
LB: loop body
LE: loop exit
PB: predicated region body
PF: predicated region fallthrough
CT: control target
= control target key end

     0   :  { %s331_s10 = smov 119   ;;  %s332_s11 = smov 110   ;;  %vm3_vm0 = vcmask 72704   ;;  %s475_s0 = inlined_call_operand.vmem [shape: f32[1,32,27], index: 0, kind: input, shape index: {}]   ;;  %s476_s1 = inlined_call_operand.vmem [shape: f32[2,4,4,3,9], index: 1, kind: output, shape index: {}]  }
   0x1   :  { %v293_v0 = vld [vmem:[%s475_s0 + $0x10] sm:$0xff]   ;;  %v27_v1 = vld [vmem:[%s475_s0] sm:$0xff]   ;;  %v294_v2 = vld [vmem:[%s475_s0 + $0x18] sm:$0xff]  }
   0x2   :  { %46 = vrot.lane.b32.xlu1 %v293_v0, %s331_s10  ;;  %28 = vrot.lane.b32.xlu0 %v27_v1, %s331_s10  ;;  %v292_v3 = vld [vmem:[%s475_s0 + $0x8] sm:$0xff]   ;;  %4 = vst.msk [vmem:[#allocation0] ss:$8 sm:$0xf] %vm3_vm0, %v27_v1  }
   0x3   :  { %63 = vrot.lane.b32.xlu2 %v27_v1, %s332_s11  ;;  %5 = vst.msk [vmem:[#allocation0] ss:$8 sm:$0xf0] %vm3_vm0, %v27_v1  }
   0x4   :  { %10 = vst.msk [vmem:[#allocation0 + $0x40] ss:$8 sm:$0xf] %vm3_vm0, %v292_v3  }
   0x5   :  { %12 = vst.msk [vmem:[#allocation0 + $0x40] ss:$8 sm:$0xf0] %vm3_vm0, %v292_v3  }
   0x6   :  { %24 = vst.msk [vmem:[#allocation0 + $0xc0] ss:$8 sm:$0xf] %vm3_vm0, %v294_v2  }
   0x7   :  { %26 = vst.msk [vmem:[#allocation0 + $0xc0] ss:$8 sm:$0xf0] %vm3_vm0, %v294_v2  }
   0x8   :  { %17 = vst.msk [vmem:[#allocation0 + $0x80] ss:$8 sm:$0xf] %vm3_vm0, %v293_v0  }
   0x9   :  { %19 = vst.msk [vmem:[#allocation0 + $0x80] ss:$8 sm:$0xf0] %vm3_vm0, %v293_v0  }
   0xa   :  { %55 = vrot.lane.b32.xlu1 %v294_v2, %s331_s10  ;;  %37 = vrot.lane.b32.xlu0 %v292_v3, %s331_s10 }
   0xb   :  { %72 = vrot.lane.b32.xlu2 %v292_v3, %s332_s11 }
  0x12   :  { %90 = vrot.lane.b32.xlu1 %v294_v2, %s332_s11  ;;  %81 = vrot.lane.b32.xlu0 %v293_v0, %s332_s11 }
  0x5d   :  { %v64_v4 = vpop.permute.xlu2 %63  }
  0x5e   :  { %67 = vst.msk [vmem:[#allocation0 + $0x2] ss:$8 sm:$0xf] %vm3_vm0, %v64_v4  }
  0x5f   :  { %69 = vst.msk [vmem:[#allocation0 + $0x2] ss:$8 sm:$0xf0] %vm3_vm0, %v64_v4  }
  0x65   :  { %v73_v5 = vpop.permute.xlu2 %72  }
  0x66   :  { %76 = vst.msk [vmem:[#allocation0 + $0x42] ss:$8 sm:$0xf] %vm3_vm0, %v73_v5  }
  0x67   :  { %78 = vst.msk [vmem:[#allocation0 + $0x42] ss:$8 sm:$0xf0] %vm3_vm0, %v73_v5  }
  0x74   :  { %v47_v6 = vpop.permute.xlu1 %46   ;;  %v29_v7 = vpop.permute.xlu0 %28  }
  0x75   :  { %50 = vst.msk [vmem:[#allocation0 + $0x81] ss:$8 sm:$0xf] %vm3_vm0, %v47_v6  }
  0x76   :  { %52 = vst.msk [vmem:[#allocation0 + $0x81] ss:$8 sm:$0xf0] %vm3_vm0, %v47_v6  }
  0x77   :  { %32 = vst.msk [vmem:[#allocation0 + $0x1] ss:$8 sm:$0xf] %vm3_vm0, %v29_v7  }
  0x78   :  { %34 = vst.msk [vmem:[#allocation0 + $0x1] ss:$8 sm:$0xf0] %vm3_vm0, %v29_v7  }
  0x7c   :  { %v56_v8 = vpop.permute.xlu1 %55   ;;  %v38_v9 = vpop.permute.xlu0 %37  }
  0x7d   :  { %59 = vst.msk [vmem:[#allocation0 + $0xc1] ss:$8 sm:$0xf] %vm3_vm0, %v56_v8  }
  0x7e   :  { %v99_v14 = vld [vmem:[#allocation0] sm:$0xf]  ;;  %v104_v15 = vld [vmem:[#allocation0 + $0x8] sm:$0xf]  ;;  %v110_v16 = vld [vmem:[#allocation0 + $0x10] sm:$0xf] }
  0x7f   :  { %v122_v10 = vld [vmem:[#allocation0 + $0x20] sm:$0xf]  ;;  %v128_v11 = vld [vmem:[#allocation0 + $0x28] sm:$0xf]  ;;  %v134_v12 = vld [vmem:[#allocation0 + $0x30] sm:$0xf] }
  0x80   :  { %301 = vst [vmem:[%s476_s1 + $0x10] sm:$0xf] %v122_v10  ;;  %v140_v13 = vld [vmem:[#allocation0 + $0x38] sm:$0xf] }
  0x81   :  { %302 = vst [vmem:[%s476_s1 + $0x14] sm:$0xf] %v128_v11  ;;  %v116_v17 = vld [vmem:[#allocation0 + $0x18] sm:$0xf] }
  0x82   :  { %303 = vst [vmem:[%s476_s1 + $0x18] sm:$0xf] %v134_v12 }
  0x83   :  { %304 = vst [vmem:[%s476_s1 + $0x1c] sm:$0xf] %v140_v13 }
  0x84   :  { %102 = vst [vmem:[%s476_s1] sm:$0xf] %v99_v14  ;;  %v91_v18 = vpop.permute.xlu1 %90   ;;  %v82_v19 = vpop.permute.xlu0 %81  }
  0x85   :  { %298 = vst [vmem:[%s476_s1 + $0x4] sm:$0xf] %v104_v15 }
  0x86   :  { %299 = vst [vmem:[%s476_s1 + $0x8] sm:$0xf] %v110_v16 }
  0x87   :  { %300 = vst [vmem:[%s476_s1 + $0xc] sm:$0xf] %v116_v17 }
  0x88   :  { %61 = vst.msk [vmem:[#allocation0 + $0xc1] ss:$8 sm:$0xf0] %vm3_vm0, %v56_v8  }
  0x89   :  { %41 = vst.msk [vmem:[#allocation0 + $0x41] ss:$8 sm:$0xf] %vm3_vm0, %v38_v9  }
  0x8a   :  { %43 = vst.msk [vmem:[#allocation0 + $0x41] ss:$8 sm:$0xf0] %vm3_vm0, %v38_v9  }
  0x8b   :  { %94 = vst.msk [vmem:[#allocation0 + $0xc2] ss:$8 sm:$0xf] %vm3_vm0, %v91_v18  }
  0x8c   :  { %96 = vst.msk [vmem:[#allocation0 + $0xc2] ss:$8 sm:$0xf0] %vm3_vm0, %v91_v18  }
  0x8d   :  { %85 = vst.msk [vmem:[#allocation0 + $0x82] ss:$8 sm:$0xf] %vm3_vm0, %v82_v19  }
  0x8e   :  { %87 = vst.msk [vmem:[#allocation0 + $0x82] ss:$8 sm:$0xf0] %vm3_vm0, %v82_v19  }
  0x90   :  { %v146_v28 = vld [vmem:[#allocation0 + $0x40] sm:$0xf]  ;;  %v152_v29 = vld [vmem:[#allocation0 + $0x48] sm:$0xf]  ;;  %v158_v30 = vld [vmem:[#allocation0 + $0x50] sm:$0xf] }
  0x91   :  { %v164_v31 = vld [vmem:[#allocation0 + $0x58] sm:$0xf]  ;;  %305 = vst [vmem:[%s476_s1 + $0x20] sm:$0xf] %v146_v28  ;;  %v170_v32 = vld [vmem:[#allocation0 + $0x60] sm:$0xf] }
  0x92   :  { %v242_v20 = vld [vmem:[#allocation0 + $0xc0] sm:$0xf]  ;;  %v248_v21 = vld [vmem:[#allocation0 + $0xc8] sm:$0xf]  ;;  %v254_v22 = vld [vmem:[#allocation0 + $0xd0] sm:$0xf] }
  0x93   :  { %321 = vst [vmem:[%s476_s1 + $0x60] sm:$0xf] %v242_v20  ;;  %v260_v23 = vld [vmem:[#allocation0 + $0xd8] sm:$0xf]  ;;  %v266_v24 = vld [vmem:[#allocation0 + $0xe0] sm:$0xf] }
  0x94   :  { %322 = vst [vmem:[%s476_s1 + $0x64] sm:$0xf] %v248_v21  ;;  %v272_v25 = vld [vmem:[#allocation0 + $0xe8] sm:$0xf]  ;;  %v278_v26 = vld [vmem:[#allocation0 + $0xf0] sm:$0xf] }
  0x95   :  { %323 = vst [vmem:[%s476_s1 + $0x68] sm:$0xf] %v254_v22  ;;  %v284_v27 = vld [vmem:[#allocation0 + $0xf8] sm:$0xf]  ;;  %v176_v33 = vld [vmem:[#allocation0 + $0x68] sm:$0xf] }
  0x96   :  { %324 = vst [vmem:[%s476_s1 + $0x6c] sm:$0xf] %v260_v23  ;;  %v182_v34 = vld [vmem:[#allocation0 + $0x70] sm:$0xf]  ;;  %v188_v35 = vld [vmem:[#allocation0 + $0x78] sm:$0xf] }
  0x97   :  { %325 = vst [vmem:[%s476_s1 + $0x70] sm:$0xf] %v266_v24  ;;  %v194_v36 = vld [vmem:[#allocation0 + $0x80] sm:$0xf]  ;;  %v200_v37 = vld [vmem:[#allocation0 + $0x88] sm:$0xf] }
  0x98   :  { %326 = vst [vmem:[%s476_s1 + $0x74] sm:$0xf] %v272_v25  ;;  %v206_v38 = vld [vmem:[#allocation0 + $0x90] sm:$0xf]  ;;  %v212_v39 = vld [vmem:[#allocation0 + $0x98] sm:$0xf] }
  0x99   :  { %327 = vst [vmem:[%s476_s1 + $0x78] sm:$0xf] %v278_v26  ;;  %v218_v40 = vld [vmem:[#allocation0 + $0xa0] sm:$0xf]  ;;  %v224_v41 = vld [vmem:[#allocation0 + $0xa8] sm:$0xf] }
  0x9a   :  { %328 = vst [vmem:[%s476_s1 + $0x7c] sm:$0xf] %v284_v27  ;;  %v230_v42 = vld [vmem:[#allocation0 + $0xb0] sm:$0xf]  ;;  %v236_v43 = vld [vmem:[#allocation0 + $0xb8] sm:$0xf] }
  0x9b   :  { %306 = vst [vmem:[%s476_s1 + $0x24] sm:$0xf] %v152_v29 }
  0x9c   :  { %307 = vst [vmem:[%s476_s1 + $0x28] sm:$0xf] %v158_v30 }
  0x9d   :  { %308 = vst [vmem:[%s476_s1 + $0x2c] sm:$0xf] %v164_v31 }
  0x9e   :  { %309 = vst [vmem:[%s476_s1 + $0x30] sm:$0xf] %v170_v32 }
  0x9f   :  { %310 = vst [vmem:[%s476_s1 + $0x34] sm:$0xf] %v176_v33 }
  0xa0   :  { %311 = vst [vmem:[%s476_s1 + $0x38] sm:$0xf] %v182_v34 }
  0xa1   :  { %312 = vst [vmem:[%s476_s1 + $0x3c] sm:$0xf] %v188_v35 }
  0xa2   :  { %313 = vst [vmem:[%s476_s1 + $0x40] sm:$0xf] %v194_v36 }
  0xa3   :  { %314 = vst [vmem:[%s476_s1 + $0x44] sm:$0xf] %v200_v37 }
  0xa4   :  { %315 = vst [vmem:[%s476_s1 + $0x48] sm:$0xf] %v206_v38 }
  0xa5   :  { %316 = vst [vmem:[%s476_s1 + $0x4c] sm:$0xf] %v212_v39 }
  0xa6   :  { %317 = vst [vmem:[%s476_s1 + $0x50] sm:$0xf] %v218_v40 }
  0xa7   :  { %318 = vst [vmem:[%s476_s1 + $0x54] sm:$0xf] %v224_v41 }
  0xa8   :  { %319 = vst [vmem:[%s476_s1 + $0x58] sm:$0xf] %v230_v42 }
  0xa9   :  { %320 = vst [vmem:[%s476_s1 + $0x5c] sm:$0xf] %v236_v43 }

// kernel: _lambda_.7
= control target key start
LH: loop header
LB: loop body
LE: loop exit
PB: predicated region body
PF: predicated region fallthrough
CT: control target
= control target key end

     0   :  { %s1280_s24 = smov 0   ;;  %s1720_s0 = inlined_call_operand.vmem [shape: f32[2,128,64], index: 0, kind: input, shape index: {}]   ;;  %s1721_s1 = inlined_call_operand.vmem [shape: f32[2,64,128], index: 1, kind: input, shape index: {}]   ;;  %s1722_s2 = inlined_call_operand.vmem [shape: f32[2,1,128], index: 2, kind: input, shape index: {}]   ;;  %s1723_s3 = inlined_call_operand.vmem [shape: f32[2,1,128], index: 3, kind: input, shape index: {}]   ;;  %s1724_s4 = inlined_call_operand.vmem [shape: f32[2,1,128], index: 4, kind: input, shape index: {}]   ;;  %s1725_s5 = inlined_call_operand.vmem [shape: f32[2,128,128], index: 5, kind: input, shape index: {}]   ;;  %s1726_s6 = inlined_call_operand.vmem [shape: f32[2,128,128], index: 6, kind: output, shape index: {0}]   ;;  %s1727_s7 = inlined_call_operand.vmem [shape: f32[2,128,128], index: 7, kind: output, shape index: {1}]  }
   0x1 LB: > { %s1079_s25 = sadd.s32 4294967295, %s1238_s24   ;;  %p1083_p0 = scmp.ge.s32.totalorder %s1238_s24, 1  ;;  %s1238_s24 = sphi %s1280_s24, %s18_s24  }
   0x2   : > { %p284_p1 = scmp.lt.s32.totalorder %s1238_s24, 3 }
   0x4   : > { %p285_p2 = pnand %p1083_p0, %p284_p1 }
   0x5   : > { %p340_p3 = scmp.lt.s32.totalorder (!%p285_p2), %s1079_s25, 1 }
   0x6   : > { %288 = sbr.rel (%p285_p2) target bundleno = 263 (0x107), region = 44 }
   0xb   : > { %s1749_s25 = smov (!%p340_p3, %s1079_s25), 1  ;;  %vm402_vm0 = vcmask 523264  }
   0xc   : > { %s1129_s26 = sshll.u32 %s1749_s25, 6  ;;  %s352_s9 = scalar_lea.vmem %s1722_s2, %s1749_s25 }
   0xd   : > { %s1294_s29 = scalar_lea.vmem %s1721_s1, %s1129_s26  ;;  %s355_s12 = scalar_lea.vmem %s1723_s3, %s1749_s25  ;;  %v1362_v24 = vld [vmem:[%s352_s9] ss:$0 sm:$0xff] }
   0xe   : > { %v397_v0 = vld [vmem:[%s1294_s29 + $0x38] sm:$0xff]  ;;  %v396_v1 = vld [vmem:[%s1294_s29 + $0x30] sm:$0xff]  ;;  %s358_s15 = scalar_lea.vmem %s1724_s4, %s1749_s25  ;;  %v395_v2 = vld [vmem:[%s1294_s29 + $0x28] sm:$0xff]  ;;  %s1314_s16 = sshll.u32 %s1749_s25, 7 }
   0xf   : > { %459 = vmatpush.msra.mxu0 %v397_v0  ;;  %1133 = vmatpush.msra.mxu1 %v397_v0  ;;  %v394_v3 = vld [vmem:[%s1294_s29 + $0x20] sm:$0xff]  ;;  %v393_v4 = vld [vmem:[%s1294_s29 + $0x18] sm:$0xff]  ;;  %v392_v5 = vld [vmem:[%s1294_s29 + $0x10] sm:$0xff]  ;;  %s1322_s19 = scalar_lea.vmem %s1720_s0, %s1314_s16  ;;  %s1368_s26 = scalar_lea.vmem %s1726_s6, %s1314_s16 }
  0x10   : > { %1134 = vmatpush.msra.mxu2 %v397_v0  ;;  %1135 = vmatpush.msra.mxu3 %v397_v0  ;;  %v391_v6 = vld [vmem:[%s1294_s29 + $0x8] sm:$0xff]  ;;  %v390_v7 = vld [vmem:[%s1294_s29] sm:$0xff]  ;;  %v376_v16 = vld [vmem:[%s1322_s19 + $0x10] sm:$0xff]  ;;  %s1470_s9 = scalar_lea.vmem %s1725_s5, %s1314_s16 }
  0x11   : > { %460 = vmatpush.msra.mxu0 %v396_v1  ;;  %1136 = vmatpush.msra.mxu1 %v396_v1  ;;  %v374_v8 = vld [vmem:[%s1322_s19] sm:$0xff]  ;;  %v375_v12 = vld [vmem:[%s1322_s19 + $0x8] sm:$0xff]  ;;  %v380_v17 = vld [vmem:[%s1322_s19 + $0x30] sm:$0xff] }
  0x12   : > { %1137 = vmatpush.msra.mxu2 %v396_v1  ;;  %1138 = vmatpush.msra.mxu3 %v396_v1  ;;  %v378_v9 = vld [vmem:[%s1322_s19 + $0x20] sm:$0xff]  ;;  %v379_v13 = vld [vmem:[%s1322_s19 + $0x28] sm:$0xff]  ;;  %v384_v18 = vld [vmem:[%s1322_s19 + $0x50] sm:$0xff] }
  0x13   : > { %461 = vmatpush.msra.mxu0 %v395_v2  ;;  %1139 = vmatpush.msra.mxu1 %v395_v2  ;;  %v382_v10 = vld [vmem:[%s1322_s19 + $0x40] sm:$0xff]  ;;  %v383_v14 = vld [vmem:[%s1322_s19 + $0x48] sm:$0xff]  ;;  %v388_v19 = vld [vmem:[%s1322_s19 + $0x70] sm:$0xff] }
  0x14   : > { %1140 = vmatpush.msra.mxu2 %v395_v2  ;;  %1141 = vmatpush.msra.mxu3 %v395_v2  ;;  %v386_v11 = vld [vmem:[%s1322_s19 + $0x60] sm:$0xff]  ;;  %v387_v15 = vld [vmem:[%s1322_s19 + $0x68] sm:$0xff]  ;;  %v377_v20 = vld [vmem:[%s1322_s19 + $0x18] sm:$0xff] }
  0x15   : > { %462 = vmatpush.msra.mxu0 %v394_v3  ;;  %1142 = vmatpush.msra.mxu1 %v394_v3  ;;  %v381_v21 = vld [vmem:[%s1322_s19 + $0x38] sm:$0xff] }
  0x16   : > { %1143 = vmatpush.msra.mxu2 %v394_v3  ;;  %1144 = vmatpush.msra.mxu3 %v394_v3  ;;  %v385_v22 = vld [vmem:[%s1322_s19 + $0x58] sm:$0xff] }
  0x17   : > { %463 = vmatpush.msra.mxu0 %v393_v4  ;;  %1145 = vmatpush.msra.mxu1 %v393_v4  ;;  %v389_v23 = vld [vmem:[%s1322_s19 + $0x78] sm:$0xff] }
  0x18   : > { %1146 = vmatpush.msra.mxu2 %v393_v4  ;;  %1147 = vmatpush.msra.mxu3 %v393_v4 }
  0x19   : > { %464 = vmatpush.msra.mxu0 %v392_v5  ;;  %1148 = vmatpush.msra.mxu1 %v392_v5 }
  0x1a   : > { %1149 = vmatpush.msra.mxu2 %v392_v5  ;;  %1150 = vmatpush.msra.mxu3 %v392_v5 }
  0x1b   : > { %465 = vmatpush.msra.mxu0 %v391_v6  ;;  %1151 = vmatpush.msra.mxu1 %v391_v6 }
  0x1c   : > { %1152 = vmatpush.msra.mxu2 %v391_v6  ;;  %1153 = vmatpush.msra.mxu3 %v391_v6 }
  0x1d   : > { %466 = vmatpush.msra.mxu0 %v390_v7  ;;  %1154 = vmatpush.msra.mxu1 %v390_v7 }
  0x1e   : > { %1155 = vmatpush.msra.mxu2 %v390_v7  ;;  %1156 = vmatpush.msra.mxu3 %v390_v7 }
  0x1f   : > { %1094 = vmatmul.msk.f32.vlgmr.msra.gmra.mxu0 %vm402_vm0, %v374_v8  ;;  %1098 = vmatmul.msk.f32.vlgmr.msra.gmra.mxu1 %vm402_vm0, %v378_v9 }
  0x20   : > { %1102 = vmatmul.msk.f32.vlgmr.msra.gmra.mxu2 %vm402_vm0, %v382_v10  ;;  %1106 = vmatmul.msk.f32.vlgmr.msra.gmra.mxu3 %vm402_vm0, %v386_v11 }
  0x27   : > { %1095 = vmatmul.msk.f32.gmra.mxu0 %vm402_vm0, %v375_v12  ;;  %1099 = vmatmul.msk.f32.gmra.mxu1 %vm402_vm0, %v379_v13 }
  0x28   : > { %1103 = vmatmul.msk.f32.gmra.mxu2 %vm402_vm0, %v383_v14  ;;  %1107 = vmatmul.msk.f32.gmra.mxu3 %vm402_vm0, %v387_v15 }
  0x2f   : > { %1096 = vmatmul.msk.f32.gmra.mxu0 %vm402_vm0, %v376_v16  ;;  %1100 = vmatmul.msk.f32.gmra.mxu1 %vm402_vm0, %v380_v17 }
  0x30   : > { %1104 = vmatmul.msk.f32.gmra.mxu2 %vm402_vm0, %v384_v18  ;;  %1108 = vmatmul.msk.f32.gmra.mxu3 %vm402_vm0, %v388_v19 }
  0x37   : > { %1097 = vmatmul.msk.f32.gmra.mxu0 %vm402_vm0, %v377_v20  ;;  %1101 = vmatmul.msk.f32.gmra.mxu1 %vm402_vm0, %v381_v21 }
  0x38   : > { %1105 = vmatmul.msk.f32.gmra.mxu2 %vm402_vm0, %v385_v22  ;;  %1109 = vmatmul.msk.f32.gmra.mxu3 %vm402_vm0, %v389_v23  ;;  %v1431_v22 = vld [vmem:[%s355_s12] ss:$0 sm:$0xff]  ;;  %s1499_s12 = scalar_lea.vmem %s1727_s7, %s1314_s16 }
  0x9c   : > { %v468_v25 = vpop.f32.mrf.mxu0  ;;  %v480_v26 = vpop.f32.mrf.mxu1 }
  0x9d   : > { %v469_v27 = vadd.f32 %v1362_v24, %v468_v25  ;;  %v481_v28 = vadd.f32 %v1362_v24, %v480_v26 }
  0x9f   : > { %516 = vst [vmem:[%s1368_s26] sm:$0xff] %v469_v27  ;;  %v1110_v29 = vmul.f32 -1.442695, %v469_v27  ;;  %v1114_v30 = vmul.f32 -1.442695, %v481_v28 }
  0xa0   : > { %520 = vst [vmem:[%s1368_s26 + $0x20] sm:$0xff] %v481_v28 }
  0xa1   : > { %1168 = vpow2.f32 %v1110_v29  ;;  %v904_v29 = vld [vmem:[%s1470_s9 + $0x60] sm:$0xff] }
  0xa2   : > { %1170 = vpow2.f32 %v1114_v30 }
  0xa3   : > { %v492_v31 = vpop.f32.mrf.mxu2  ;;  %v504_v32 = vpop.f32.mrf.mxu3 }
  0xa4   : > { %v493_v33 = vadd.f32 %v1362_v24, %v492_v31  ;;  %v505_v34 = vadd.f32 %v1362_v24, %v504_v32  ;;  %v471_v35 = vpop.f32.mrf.mxu0  ;;  %v483_v36 = vpop.f32.mrf.mxu1  ;;  %v1451_v32 = vld [vmem:[%s358_s15] ss:$0 sm:$0xff] }
  0xa5   : > { %v472_v37 = vadd.f32 %v1362_v24, %v471_v35  ;;  %v484_v38 = vadd.f32 %v1362_v24, %v483_v36 }
  0xa6   : > { %524 = vst [vmem:[%s1368_s26 + $0x40] sm:$0xff] %v493_v33  ;;  %v1118_v39 = vmul.f32 -1.442695, %v493_v33  ;;  %v1122_v40 = vmul.f32 -1.442695, %v505_v34 }
  0xa7   : > { %v1169_v41 = vpop.eup %1168  ;;  %528 = vst [vmem:[%s1368_s26 + $0x60] sm:$0xff] %v505_v34  ;;  %v1111_v44 = vmul.f32 -1.442695, %v472_v37  ;;  %v1115_v46 = vmul.f32 -1.442695, %v484_v38 }
  0xa8   : > { %v1171_v42 = vpop.eup %1170  ;;  %v1380_v43 = vadd.f32 1.0, %v1169_v41  ;;  %1172 = vpow2.f32 %v1118_v39  ;;  %517 = vst [vmem:[%s1368_s26 + $0x8] sm:$0xff] %v472_v37 }
  0xa9   : > { %v1383_v45 = vadd.f32 1.0, %v1171_v42  ;;  %1174 = vpow2.f32 %v1122_v40  ;;  %521 = vst [vmem:[%s1368_s26 + $0x28] sm:$0xff] %v484_v38 }
  0xaa   : > { %1176 = vrcp.f32 %v1380_v43  ;;  %v605_v52 = vand.u32 2147483647, %v1380_v43  ;;  %v607_v55 = vand.u32 2147483648, %v1380_v43  ;;  %vm601_vm1 = vweird.f32 %v1380_v43 }
  0xab   : > { %1178 = vrcp.f32 %v1383_v45  ;;  %v495_v47 = vpop.f32.mrf.mxu2  ;;  %v507_v48 = vpop.f32.mrf.mxu3  ;;  %v665_v59 = vand.u32 2147483647, %v1383_v45  ;;  %v667_v60 = vand.u32 2147483648, %v1383_v45  ;;  %vm661_vm3 = vweird.f32 %v1383_v45 }
  0xac   : > { %1180 = vpow2.f32 %v1111_v44  ;;  %v496_v49 = vadd.f32 %v1362_v24, %v495_v47  ;;  %v474_v50 = vpop.f32.mrf.mxu0  ;;  %v486_v51 = vpop.f32.mrf.mxu1  ;;  %v508_v53 = vadd.f32 %v1362_v24, %v507_v48  ;;  %vm1405_vm2 = vcmp.eq.f32.partialorder %v605_v52, 8.507059e+37 }
  0xad   : > { %1182 = vpow2.f32 %v1115_v46  ;;  %v475_v57 = vadd.f32 %v1362_v24, %v474_v50  ;;  %v487_v62 = vadd.f32 %v1362_v24, %v486_v51  ;;  %v608_v5 = vor.u32 1.1754944e-38, %v607_v55  ;;  %v892_v51 = vld [vmem:[%s1470_s9] sm:$0xff] }
  0xae   : > { %v1173_v54 = vpop.eup %1172  ;;  %525 = vst [vmem:[%s1368_s26 + $0x48] sm:$0xff] %v496_v49  ;;  %v1119_v56 = vmul.f32 -1.442695, %v496_v49  ;;  %v1123_v7 = vmul.f32 -1.442695, %v508_v53  ;;  %vm1413_vm4 = vcmp.eq.f32.partialorder %v665_v59, 8.507059e+37 }
  0xaf   : > { %v1175_v58 = vpop.eup %1174  ;;  %v1396_v61 = vadd.f32 1.0, %v1173_v54  ;;  %529 = vst [vmem:[%s1368_s26 + $0x68] sm:$0xff] %v508_v53  ;;  %v668_v11 = vor.u32 1.1754944e-38, %v667_v60  ;;  %v1435_v25 = vmul.f32 -1.442695, %v475_v57 }
  0xb0   : > { %v1177_v63 = vpop.eup %1176  ;;  %v1401_v0 = vadd.f32 1.0, %v1175_v58  ;;  %518 = vst [vmem:[%s1368_s26 + $0x10] sm:$0xff] %v475_v57  ;;  %v1457_v35 = vmul.f32 -1.442695, %v487_v62  ;;  %v896_v58 = vld [vmem:[%s1470_s9 + $0x20] sm:$0xff] }
  0xb1   : > { %v1179_v1 = vpop.eup %1178  ;;  %v597_v2 = vmul.f32 %v1177_v63, %v1380_v43  ;;  %1184 = vrcp.f32 %v1396_v61  ;;  %522 = vst [vmem:[%s1368_s26 + $0x30] sm:$0xff] %v487_v62  ;;  %vm602_vm5 = vweird.f32 %v1177_v63  ;;  %v725_v13 = vand.u32 2147483647, %v1396_v61 }
  0xb2   : > { %v1181_v4 = vpop.eup %1180  ;;  %v657_v6 = vmul.f32 %v1179_v1, %v1383_v45  ;;  %1186 = vpow2.f32 %v1119_v56  ;;  %v727_v14 = vand.u32 2147483648, %v1396_v61  ;;  %v787_v16 = vand.u32 2147483648, %v1401_v0  ;;  %vm603_vm8 = vmor %vm601_vm1, %vm602_vm5 }
  0xb3   : > { %v1183_v8 = vpop.eup %1182  ;;  %v598_v9 = vsub.f32 1.0, %v597_v2  ;;  %1188 = vrcp.f32 %v1401_v0  ;;  %v1421_v17 = vadd.f32 1.0, %v1181_v4  ;;  %vm662_vm6 = vweird.f32 %v1179_v1 }
  0xb4   : > { %v658_v12 = vsub.f32 1.0, %v657_v6  ;;  %v1423_v18 = vadd.f32 1.0, %v1183_v8  ;;  %v785_v20 = vand.u32 2147483647, %v1401_v0  ;;  %1190 = vpow2.f32 %v1123_v7  ;;  %vm663_vm11 = vmor %vm661_vm3, %vm662_vm6 }
  0xb5   : > { %v599_v15 = vmul.f32 %v1177_v63, %v598_v9  ;;  %vm721_vm7 = vweird.f32 %v1396_v61  ;;  %1192 = vrcp.f32 %v1421_v17  ;;  %vm1441_vm9 = vcmp.eq.f32.partialorder %v725_v13, 8.507059e+37 }
  0xb6   : > { %v659_v19 = vmul.f32 %v1179_v1, %v658_v12  ;;  %v728_v30 = vor.u32 1.1754944e-38, %v727_v14  ;;  %vm781_vm10 = vweird.f32 %v1401_v0  ;;  %v788_v34 = vor.u32 1.1754944e-38, %v787_v16  ;;  %v498_v16 = vpop.f32.mrf.mxu2 }
  0xb7   : > { %v1185_v21 = vpop.eup %1184  ;;  %v600_v23 = vadd.f32 %v1177_v63, %v599_v15  ;;  %1194 = vrcp.f32 %v1423_v18  ;;  %vm1462_vm12 = vcmp.eq.f32.partialorder %v785_v20, 8.507059e+37  ;;  %vm616_vm13 = vweird.f32 %v1421_v17  ;;  %v900_v20 = vld [vmem:[%s1470_s9 + $0x40] sm:$0xff] }
  0xb8   : > { %v1187_v26 = vpop.eup %1186  ;;  %v660_v27 = vadd.f32 %v1179_v1, %v659_v19  ;;  %v717_v28 = vmul.f32 %v1185_v21, %v1396_v61  ;;  %v620_v43 = vand.u32 2147483647, %v1421_v17  ;;  %vm722_vm14 = vweird.f32 %v1185_v21  ;;  %v510_v19 = vpop.f32.mrf.mxu3 }
  0xb9   : > { %v1189_v31 = vpop.eup %1188  ;;  %v604_v33 = vsel %vm603_vm8, %v1177_v63, %v600_v23  ;;  %v622_v50 = vand.u32 2147483648, %v1421_v17  ;;  %vm676_vm0 = vweird.f32 %v1423_v18  ;;  %vm723_vm1 = vmor %vm721_vm7, %vm722_vm14  ;;  %v680_v59 = vand.u32 2147483647, %v1423_v18 }
  0xba   : > { %v609_v36 = vsel %vm1405_vm2, %v608_v5, %v604_v33  ;;  %v664_v37 = vsel %vm663_vm11, %v1179_v1, %v660_v27  ;;  %v718_v38 = vsub.f32 1.0, %v717_v28  ;;  %v777_v39 = vmul.f32 %v1189_v31, %v1401_v0  ;;  %v1191_v44 = vpop.eup %1190 }
  0xbb   : > { %v840_v41 = vmul.f32 %v1431_v22, %v609_v36  ;;  %v669_v42 = vsel %vm1413_vm4, %v668_v11, %v664_v37  ;;  %v1193_v48 = vpop.eup %1192  ;;  %vm782_vm15 = vweird.f32 %v1189_v31  ;;  %v1491_v60 = vadd.f32 1.0, %v1187_v26 }
  0xbc   : > { %v844_v45 = vmul.f32 %v1431_v22, %v669_v42  ;;  %v719_v46 = vmul.f32 %v1185_v21, %v718_v38  ;;  %v778_v47 = vsub.f32 1.0, %v777_v39  ;;  %v612_v55 = vmul.f32 %v1193_v48, %v1421_v17  ;;  %vm783_vm2 = vmor %vm781_vm10, %vm782_vm15 }
  0xbd   : > { %v860_v49 = vadd.f32 %v1451_v32, %v840_v41  ;;  %v1484_v56 = vpop.eup %1194  ;;  %v1493_v62 = vadd.f32 1.0, %v1191_v44  ;;  %vm617_vm3 = vweird.f32 %v1193_v48  ;;  %v682_v12 = vand.u32 2147483648, %v1423_v18 }
  0xbe   : > { %v864_v52 = vadd.f32 %v1451_v32, %v844_v45  ;;  %v720_v53 = vadd.f32 %v1185_v21, %v719_v46  ;;  %v779_v54 = vmul.f32 %v1189_v31, %v778_v47  ;;  %v613_v3 = vsub.f32 1.0, %v612_v55  ;;  %vm618_vm4 = vmor %vm616_vm13, %vm617_vm3  ;;  %v477_v46 = vpop.f32.mrf.mxu0 }
  0xbf   : > { %v876_v57 = vmul.f32 %v860_v49, %v609_v36  ;;  %v672_v5 = vmul.f32 %v1484_v56, %v1423_v18  ;;  %1196 = vrcp.f32 %v1491_v60  ;;  %v623_v15 = vor.u32 1.1754944e-38, %v622_v50 }
  0xc0   : > { %v880_v63 = vmul.f32 %v864_v52, %v669_v42  ;;  %v724_v1 = vsel %vm723_vm1, %v1185_v21, %v720_v53  ;;  %v780_v2 = vadd.f32 %v1189_v31, %v779_v54  ;;  %v614_v9 = vmul.f32 %v1193_v48, %v613_v3  ;;  %v489_v54 = vpop.f32.mrf.mxu1  ;;  %v513_v3 = vpop.f32.mrf.mxu3 }
  0xc1   : > { %v908_v4 = vadd.f32 %v892_v51, %v876_v57  ;;  %v729_v61 = vsel %vm1441_vm9, %v728_v30, %v724_v1  ;;  %v673_v11 = vsub.f32 1.0, %v672_v5  ;;  %vm677_vm5 = vweird.f32 %v1484_v56 }
  0xc2   : > { %v912_v6 = vadd.f32 %v896_v58, %v880_v63  ;;  %v848_v7 = vmul.f32 %v1431_v22, %v729_v61  ;;  %v784_v8 = vsel %vm783_vm2, %v1189_v31, %v780_v2  ;;  %v615_v14 = vadd.f32 %v1193_v48, %v614_v9  ;;  %vm678_vm8 = vmor %vm676_vm0, %vm677_vm5  ;;  %v897_v63 = vld [vmem:[%s1470_s9 + $0x28] sm:$0xff]  ;;  %v501_v2 = vpop.f32.mrf.mxu2 }
  0xc3   : > { %924 = vst [vmem:[%s1499_s12] sm:$0xff] %v908_v4  ;;  %v789_v10 = vsel %vm1462_vm12, %v788_v34, %v784_v8  ;;  %v674_v21 = vmul.f32 %v1484_v56, %v673_v11  ;;  %v742_v23 = vand.u32 2147483648, %v1491_v60  ;;  %1198 = vrcp.f32 %v1493_v62 }
  0xc4   : > { %928 = vst [vmem:[%s1499_s12 + $0x20] sm:$0xff] %v912_v6  ;;  %v868_v0 = vadd.f32 %v1451_v32, %v848_v7  ;;  %v852_v13 = vmul.f32 %v1431_v22, %v789_v10  ;;  %v619_v28 = vsel %vm618_vm4, %v1193_v48, %v615_v14  ;;  %vm621_vm6 = vcmp.eq.f32.partialorder %v620_v43, 8.507059e+37  ;;  %v893_v48 = vld [vmem:[%s1470_s9 + $0x8] sm:$0xff] }
  0xc5   : > { %v624_v30 = vsel %vm621_vm6, %v623_v15, %v619_v28  ;;  %v675_v31 = vadd.f32 %v1484_v56, %v674_v21  ;;  %vm1528_vm7 = vcmp.eq.f32.partialorder %v680_v59, 8.507059e+37  ;;  %v683_v33 = vor.u32 1.1754944e-38, %v682_v12  ;;  %v1197_v39 = vpop.eup %1196 }
  0xc6   : > { %v884_v26 = vmul.f32 %v868_v0, %v729_v61  ;;  %v872_v27 = vadd.f32 %v1451_v32, %v852_v13  ;;  %v841_v37 = vmul.f32 %v1431_v22, %v624_v30  ;;  %vm736_vm9 = vweird.f32 %v1491_v60 }
  0xc7   : > { %v740_v38 = vand.u32 2147483647, %v1491_v60  ;;  %v679_v40 = vsel %vm678_vm8, %v1484_v56, %v675_v31  ;;  %v743_v41 = vor.u32 1.1754944e-38, %v742_v23  ;;  %1200 = vpow2.f32 %v1435_v25 }
  0xc8   : > { %v916_v34 = vadd.f32 %v900_v20, %v884_v26  ;;  %v888_v36 = vmul.f32 %v872_v27, %v789_v10  ;;  %v499_v42 = vadd.f32 %v1362_v24, %v498_v16  ;;  %v861_v18 = vadd.f32 %v1451_v32, %v841_v37 }
  0xc9   : > { %v684_v44 = vsel %vm1528_vm7, %v683_v33, %v679_v40  ;;  %v732_v45 = vmul.f32 %v1197_v39, %v1491_v60  ;;  %vm796_vm10 = vweird.f32 %v1493_v62  ;;  %v1199_v47 = vpop.eup %1198  ;;  %v800_v25 = vand.u32 2147483647, %v1493_v62 }
  0xca   : > { %932 = vst [vmem:[%s1499_s12 + $0x40] sm:$0xff] %v916_v34  ;;  %v920_v43 = vadd.f32 %v904_v29, %v888_v36  ;;  %v845_v49 = vmul.f32 %v1431_v22, %v684_v44  ;;  %v802_v50 = vand.u32 2147483648, %v1493_v62  ;;  %1202 = vpow2.f32 %v1457_v35  ;;  %v901_v29 = vld [vmem:[%s1470_s9 + $0x48] sm:$0xff] }
  0xcb   : > { %526 = vst [vmem:[%s1368_s26 + $0x50] sm:$0xff] %v499_v42  ;;  %v877_v51 = vmul.f32 %v861_v18, %v624_v30  ;;  %v733_v52 = vsub.f32 1.0, %v732_v45  ;;  %vm737_vm11 = vweird.f32 %v1197_v39  ;;  %v792_v53 = vmul.f32 %v1199_v47, %v1493_v62 }
  0xcc   : > { %936 = vst [vmem:[%s1499_s12 + $0x60] sm:$0xff] %v920_v43  ;;  %v865_v55 = vadd.f32 %v1451_v32, %v845_v49  ;;  %v1120_v56 = vmul.f32 -1.442695, %v499_v42  ;;  %v511_v57 = vadd.f32 %v1362_v24, %v510_v19  ;;  %v478_v58 = vadd.f32 %v1362_v24, %v477_v46  ;;  %vm738_vm13 = vmor %vm736_vm9, %vm737_vm11 }
  0xcd   : > { %v909_v59 = vadd.f32 %v893_v48, %v877_v51  ;;  %v734_v35 = vmul.f32 %v1197_v39, %v733_v52  ;;  %v793_v1 = vsub.f32 1.0, %v792_v53  ;;  %vm797_vm12 = vweird.f32 %v1199_v47  ;;  %v1201_v4 = vpop.eup %1200 }
  0xce   : > { %v881_v61 = vmul.f32 %v865_v55, %v684_v44  ;;  %1204 = vpow2.f32 %v1120_v56  ;;  %530 = vst [vmem:[%s1368_s26 + $0x70] sm:$0xff] %v511_v57  ;;  %v1124_v5 = vmul.f32 -1.442695, %v511_v57  ;;  %v490_v6 = vadd.f32 %v1362_v24, %v489_v54  ;;  %vm798_vm15 = vmor %vm796_vm10, %vm797_vm12 }
  0xcf   : > { %925 = vst [vmem:[%s1499_s12 + $0x8] sm:$0xff] %v909_v59  ;;  %v735_v7 = vadd.f32 %v1197_v39, %v734_v35  ;;  %v794_v8 = vmul.f32 %v1199_v47, %v793_v1  ;;  %v1563_v9 = vadd.f32 1.0, %v1201_v4  ;;  %v1113_v10 = vmul.f32 -1.442695, %v478_v58 }
  0xd0   : > { %v1203_v11 = vpop.eup %1202  ;;  %v913_v12 = vadd.f32 %v897_v63, %v881_v61  ;;  %1206 = vpow2.f32 %v1124_v5  ;;  %519 = vst [vmem:[%s1368_s26 + $0x18] sm:$0xff] %v478_v58  ;;  %v502_v0 = vadd.f32 %v1362_v24, %v501_v2  ;;  %v514_v13 = vadd.f32 %v1362_v24, %v513_v3 }
  0xd1   : > { %v739_v14 = vsel %vm738_vm13, %v1197_v39, %v735_v7  ;;  %vm741_vm14 = vcmp.eq.f32.partialorder %v740_v38, 8.507059e+37  ;;  %v795_v15 = vadd.f32 %v1199_v47, %v794_v8  ;;  %1208 = vrcp.f32 %v1563_v9  ;;  %523 = vst [vmem:[%s1368_s26 + $0x38] sm:$0xff] %v490_v6  ;;  %v905_v38 = vld [vmem:[%s1470_s9 + $0x68] sm:$0xff] }
  0xd2   : > { %929 = vst [vmem:[%s1499_s12 + $0x28] sm:$0xff] %v913_v12  ;;  %v744_v16 = vsel %vm741_vm14, %v743_v41, %v739_v14  ;;  %v803_v60 = vor.u32 1.1754944e-38, %v802_v50  ;;  %v1577_v19 = vadd.f32 1.0, %v1203_v11  ;;  %v1117_v20 = vmul.f32 -1.442695, %v490_v6 }
  0xd3   : > { %v849_v24 = vmul.f32 %v1431_v22, %v744_v16  ;;  %v799_v21 = vsel %vm798_vm15, %v1199_v47, %v795_v15  ;;  %vm801_vm0 = vcmp.eq.f32.partialorder %v800_v25, 8.507059e+37  ;;  %1210 = vpow2.f32 %v1113_v10  ;;  %527 = vst [vmem:[%s1368_s26 + $0x58] sm:$0xff] %v502_v0 }
  0xd4   : > { %v1205_v23 = vpop.eup %1204  ;;  %v804_v26 = vsel %vm801_vm0, %v803_v60, %v799_v21  ;;  %1212 = vrcp.f32 %v1577_v19  ;;  %531 = vst [vmem:[%s1368_s26 + $0x78] sm:$0xff] %v514_v13  ;;  %v635_v30 = vand.u32 2147483647, %v1563_v9  ;;  %v637_v31 = vand.u32 2147483648, %v1563_v9 }
  0xd5   : > { %v869_v62 = vadd.f32 %v1451_v32, %v849_v24  ;;  %v853_v27 = vmul.f32 %v1431_v22, %v804_v26  ;;  %v1588_v17 = vadd.f32 1.0, %v1205_v23  ;;  %1214 = vpow2.f32 %v1117_v20  ;;  %v894_v23 = vld [vmem:[%s1470_s9 + $0x10] sm:$0xff] }
  0xd6   : > { %v1207_v28 = vpop.eup %1206  ;;  %vm631_vm1 = vweird.f32 %v1563_v9  ;;  %v695_v40 = vand.u32 2147483647, %v1577_v19  ;;  %v697_v18 = vand.u32 2147483648, %v1577_v19  ;;  %v1121_v44 = vmul.f32 -1.442695, %v502_v0 }
  0xd7   : > { %v1209_v33 = vpop.eup %1208  ;;  %v885_v34 = vmul.f32 %v869_v62, %v744_v16  ;;  %v873_v36 = vadd.f32 %v1451_v32, %v853_v27  ;;  %v1591_v37 = vadd.f32 1.0, %v1207_v28  ;;  %1216 = vrcp.f32 %v1588_v17 }
  0xd8   : > { %v627_v39 = vmul.f32 %v1209_v33, %v1563_v9  ;;  %vm1599_vm2 = vcmp.eq.f32.partialorder %v635_v30, 8.507059e+37  ;;  %v638_v48 = vor.u32 1.1754944e-38, %v637_v31  ;;  %vm691_vm3 = vweird.f32 %v1577_v19 }
  0xd9   : > { %v1211_v41 = vpop.eup %1210  ;;  %v917_v42 = vadd.f32 %v901_v29, %v885_v34  ;;  %v889_v43 = vmul.f32 %v873_v36, %v804_v26  ;;  %1218 = vrcp.f32 %v1591_v37  ;;  %v755_v50 = vand.u32 2147483647, %v1588_v17 }
  0xda   : > { %v1213_v45 = vpop.eup %1212  ;;  %v628_v46 = vsub.f32 1.0, %v627_v39  ;;  %vm632_vm4 = vweird.f32 %v1209_v33  ;;  %vm1608_vm5 = vcmp.eq.f32.partialorder %v695_v40, 8.507059e+37  ;;  %v1125_v54 = vmul.f32 -1.442695, %v514_v13  ;;  %v898_v40 = vld [vmem:[%s1470_s9 + $0x30] sm:$0xff] }
  0xdb   : > { %933 = vst [vmem:[%s1499_s12 + $0x48] sm:$0xff] %v917_v42  ;;  %v921_v49 = vadd.f32 %v905_v38, %v889_v43  ;;  %v687_v25 = vmul.f32 %v1213_v45, %v1577_v19  ;;  %v1215_v51 = vpop.eup %1214  ;;  %v698_v56 = vor.u32 1.1754944e-38, %v697_v18  ;;  %vm751_vm6 = vweird.f32 %v1588_v17  ;;  %vm633_vm8 = vmor %vm631_vm1, %vm632_vm4 }
  0xdc   : > { %v629_v52 = vmul.f32 %v1209_v33, %v628_v46  ;;  %v1614_v57 = vadd.f32 1.0, %v1211_v41  ;;  %vm692_vm7 = vweird.f32 %v1213_v45  ;;  %v757_v63 = vand.u32 2147483648, %v1588_v17 }
  0xdd   : > { %937 = vst [vmem:[%s1499_s12 + $0x68] sm:$0xff] %v921_v49  ;;  %v688_v55 = vsub.f32 1.0, %v687_v25  ;;  %v1217_v58 = vpop.eup %1216  ;;  %1220 = vpow2.f32 %v1121_v44  ;;  %vm1620_vm9 = vcmp.eq.f32.partialorder %v755_v50, 8.507059e+37  ;;  %vm811_vm10 = vweird.f32 %v1591_v37  ;;  %vm693_vm11 = vmor %vm691_vm3, %vm692_vm7 }
  0xde   : > { %v630_v59 = vadd.f32 %v1209_v33, %v629_v52  ;;  %v747_v1 = vmul.f32 %v1217_v58, %v1588_v17  ;;  %1222 = vrcp.f32 %v1614_v57  ;;  %v1626_v3 = vadd.f32 1.0, %v1215_v51  ;;  %v902_v51 = vld [vmem:[%s1470_s9 + $0x50] sm:$0xff] }
  0xdf   : > { %v689_v35 = vmul.f32 %v1213_v45, %v688_v55  ;;  %v1219_v4 = vpop.eup %1218  ;;  %v815_v5 = vand.u32 2147483647, %v1591_v37  ;;  %v817_v6 = vand.u32 2147483648, %v1591_v37  ;;  %1224 = vpow2.f32 %v1125_v54 }
  0xe0   : > { %v634_v61 = vsel %vm633_vm8, %v1209_v33, %v630_v59  ;;  %v748_v9 = vsub.f32 1.0, %v747_v1  ;;  %v807_v10 = vmul.f32 %v1219_v4, %v1591_v37  ;;  %vm752_vm12 = vweird.f32 %v1217_v58  ;;  %v906_v59 = vld [vmem:[%s1470_s9 + $0x70] sm:$0xff] }
  0xe1   : > { %v639_v7 = vsel %vm1599_vm2, %v638_v48, %v634_v61  ;;  %v690_v8 = vadd.f32 %v1213_v45, %v689_v35  ;;  %v758_v12 = vor.u32 1.1754944e-38, %v757_v63  ;;  %v650_v0 = vand.u32 2147483647, %v1614_v57  ;;  %vm753_vm15 = vmor %vm751_vm6, %vm752_vm12 }
  0xe2   : > { %v842_v11 = vmul.f32 %v1431_v22, %v639_v7  ;;  %v749_v14 = vmul.f32 %v1217_v58, %v748_v9  ;;  %v808_v15 = vsub.f32 1.0, %v807_v10  ;;  %1226 = vrcp.f32 %v1626_v3 }
  0xe3   : > { %v694_v13 = vsel %vm693_vm11, %v1213_v45, %v690_v8  ;;  %v1221_v16 = vpop.eup %1220  ;;  %vm1642_vm13 = vcmp.eq.f32.partialorder %v815_v5, 8.507059e+37  ;;  %v818_v19 = vor.u32 1.1754944e-38, %v817_v6  ;;  %vm812_vm14 = vweird.f32 %v1219_v4 }
  0xe4   : > { %v862_v60 = vadd.f32 %v1451_v32, %v842_v11  ;;  %v699_v20 = vsel %vm1608_vm5, %v698_v56, %v694_v13  ;;  %v1223_v21 = vpop.eup %1222  ;;  %v750_v62 = vadd.f32 %v1217_v58, %v749_v14  ;;  %v809_v27 = vmul.f32 %v1219_v4, %v808_v15  ;;  %vm813_vm2 = vmor %vm811_vm10, %vm812_vm14 }
  0xe5   : > { %v846_v26 = vmul.f32 %v1431_v22, %v699_v20  ;;  %v1225_v28 = vpop.eup %1224  ;;  %v642_v30 = vmul.f32 %v1223_v21, %v1614_v57  ;;  %vm646_vm0 = vweird.f32 %v1614_v57  ;;  %v652_v31 = vand.u32 2147483648, %v1614_v57 }
  0xe6   : > { %v878_v29 = vmul.f32 %v862_v60, %v639_v7  ;;  %v754_v34 = vsel %vm753_vm15, %v1217_v58, %v750_v62  ;;  %v810_v36 = vadd.f32 %v1219_v4, %v809_v27  ;;  %vm1655_vm1 = vcmp.eq.f32.partialorder %v650_v0, 8.507059e+37  ;;  %v895_v0 = vld [vmem:[%s1470_s9 + $0x18] sm:$0xff] }
  0xe7   : > { %v866_v33 = vadd.f32 %v1451_v32, %v846_v26  ;;  %v759_v17 = vsel %vm1620_vm9, %v758_v12, %v754_v34  ;;  %v643_v41 = vsub.f32 1.0, %v642_v30  ;;  %v1664_v42 = vadd.f32 1.0, %v1221_v16  ;;  %v899_v26 = vld [vmem:[%s1470_s9 + $0x38] sm:$0xff] }
  0xe8   : > { %v910_v39 = vadd.f32 %v894_v23, %v878_v29  ;;  %v1227_v43 = vpop.eup %1226  ;;  %v850_v44 = vmul.f32 %v1431_v22, %v759_v17  ;;  %v814_v45 = vsel %vm813_vm2, %v1219_v4, %v810_v36  ;;  %v1667_v46 = vadd.f32 1.0, %v1225_v28 }
  0xe9   : > { %v882_v18 = vmul.f32 %v866_v33, %v699_v20  ;;  %v819_v47 = vsel %vm1642_vm13, %v818_v19, %v814_v45  ;;  %v644_v48 = vmul.f32 %v1223_v21, %v643_v41  ;;  %vm647_vm3 = vweird.f32 %v1223_v21 }
  0xea   : > { %926 = vst [vmem:[%s1499_s12 + $0x10] sm:$0xff] %v910_v39  ;;  %v702_v37 = vmul.f32 %v1227_v43, %v1626_v3  ;;  %v870_v25 = vadd.f32 %v1451_v32, %v850_v44  ;;  %v854_v50 = vmul.f32 %v1431_v22, %v819_v47  ;;  %1228 = vrcp.f32 %v1664_v42  ;;  %vm648_vm5 = vmor %vm646_vm0, %vm647_vm3 }
  0xeb   : > { %v914_v49 = vadd.f32 %v898_v40, %v882_v18  ;;  %v645_v52 = vadd.f32 %v1223_v21, %v644_v48  ;;  %v653_v53 = vor.u32 1.1754944e-38, %v652_v31  ;;  %vm706_vm4 = vweird.f32 %v1626_v3  ;;  %v903_v18 = vld [vmem:[%s1470_s9 + $0x58] sm:$0xff] }
  0xec   : > { %v703_v54 = vsub.f32 1.0, %v702_v37  ;;  %v886_v55 = vmul.f32 %v870_v25, %v759_v17  ;;  %v874_v56 = vadd.f32 %v1451_v32, %v854_v50  ;;  %v712_v58 = vand.u32 2147483648, %v1626_v3 }
  0xed   : > { %930 = vst [vmem:[%s1499_s12 + $0x30] sm:$0xff] %v914_v49  ;;  %1230 = vrcp.f32 %v1667_v46  ;;  %v649_v63 = vsel %vm648_vm5, %v1223_v21, %v645_v52  ;;  %vm707_vm6 = vweird.f32 %v1227_v43  ;;  %v710_v1 = vand.u32 2147483647, %v1626_v3 }
  0xee   : > { %v704_v35 = vmul.f32 %v1227_v43, %v703_v54  ;;  %v918_v2 = vadd.f32 %v902_v51, %v886_v55  ;;  %v890_v4 = vmul.f32 %v874_v56, %v819_v47  ;;  %v654_v61 = vsel %vm1655_vm1, %v653_v53, %v649_v63  ;;  %vm708_vm7 = vmor %vm706_vm4, %vm707_vm6 }
  0xef   : > { %v843_v57 = vmul.f32 %v1431_v22, %v654_v61  ;;  %v713_v8 = vor.u32 1.1754944e-38, %v712_v58  ;;  %vm711_vm8 = vcmp.eq.f32.partialorder %v710_v1, 8.507059e+37  ;;  %v770_v60 = vand.u32 2147483647, %v1664_v42 }
  0xf0   : > { %v705_v5 = vadd.f32 %v1227_v43, %v704_v35  ;;  %v1229_v6 = vpop.eup %1228  ;;  %934 = vst [vmem:[%s1499_s12 + $0x50] sm:$0xff] %v918_v2  ;;  %v922_v7 = vadd.f32 %v906_v59, %v890_v4  ;;  %v772_v20 = vand.u32 2147483648, %v1664_v42  ;;  %vm766_vm10 = vweird.f32 %v1664_v42 }
  0xf1   : > { %v863_v9 = vadd.f32 %v1451_v32, %v843_v57  ;;  %v762_v11 = vmul.f32 %v1229_v6, %v1664_v42  ;;  %vm767_vm9 = vweird.f32 %v1229_v6  ;;  %v830_v62 = vand.u32 2147483647, %v1667_v46 }
  0xf2   : > { %v709_v10 = vsel %vm708_vm7, %v1227_v43, %v705_v5  ;;  %938 = vst [vmem:[%s1499_s12 + $0x70] sm:$0xff] %v922_v7  ;;  %v832_v27 = vand.u32 2147483648, %v1667_v46  ;;  %vm768_vm12 = vmor %vm766_vm10, %vm767_vm9  ;;  %vm771_vm13 = vcmp.eq.f32.partialorder %v770_v60, 8.507059e+37  ;;  %v773_v31 = vor.u32 1.1754944e-38, %v772_v20 }
  0xf3   : > { %v1231_v12 = vpop.eup %1230  ;;  %v714_v13 = vsel %vm711_vm8, %v713_v8, %v709_v10  ;;  %v879_v14 = vmul.f32 %v863_v9, %v654_v61  ;;  %v763_v16 = vsub.f32 1.0, %v762_v11  ;;  %vm826_vm14 = vweird.f32 %v1667_v46 }
  0xf4   : > { %v847_v15 = vmul.f32 %v1431_v22, %v714_v13  ;;  %v822_v3 = vmul.f32 %v1231_v12, %v1667_v46  ;;  %vm827_vm11 = vweird.f32 %v1231_v12  ;;  %v833_v39 = vor.u32 1.1754944e-38, %v832_v27  ;;  %v907_v46 = vld [vmem:[%s1470_s9 + $0x78] sm:$0xff] }
  0xf5   : > { %v911_v24 = vadd.f32 %v895_v0, %v879_v14  ;;  %v764_v21 = vmul.f32 %v1229_v6, %v763_v16  ;;  %vm828_vm15 = vmor %vm826_vm14, %vm827_vm11  ;;  %vm831_vm0 = vcmp.eq.f32.partialorder %v830_v62, 8.507059e+37 }
  0xf6   : > { %v867_v19 = vadd.f32 %v1451_v32, %v847_v15  ;;  %v823_v23 = vsub.f32 1.0, %v822_v3 }
  0xf7   : > { %927 = vst [vmem:[%s1499_s12 + $0x18] sm:$0xff] %v911_v24  ;;  %v765_v29 = vadd.f32 %v1229_v6, %v764_v21 }
  0xf8   : > { %v883_v28 = vmul.f32 %v867_v19, %v714_v13  ;;  %v824_v30 = vmul.f32 %v1231_v12, %v823_v23 }
  0xf9   : > { %v769_v34 = vsel %vm768_vm12, %v1229_v6, %v765_v29 }
  0xfa   : > { %v915_v33 = vadd.f32 %v899_v26, %v883_v28  ;;  %v825_v36 = vadd.f32 %v1231_v12, %v824_v30  ;;  %v774_v38 = vsel %vm771_vm13, %v773_v31, %v769_v34 }
  0xfb   : > { %v851_v40 = vmul.f32 %v1431_v22, %v774_v38 }
  0xfc   : > { %931 = vst [vmem:[%s1499_s12 + $0x38] sm:$0xff] %v915_v33  ;;  %v829_v17 = vsel %vm828_vm15, %v1231_v12, %v825_v36 }
  0xfd   : > { %v834_v41 = vsel %vm831_vm0, %v833_v39, %v829_v17  ;;  %v871_v42 = vadd.f32 %v1451_v32, %v851_v40 }
  0xfe   : > { %v855_v43 = vmul.f32 %v1431_v22, %v834_v41 }
  0xff   : > { %v887_v44 = vmul.f32 %v871_v42, %v774_v38 }
 0x100   : > { %v875_v45 = vadd.f32 %v1451_v32, %v855_v43 }
 0x101   : > { %v919_v47 = vadd.f32 %v903_v18, %v887_v44 }
 0x102   : > { %v891_v48 = vmul.f32 %v875_v45, %v834_v41 }
 0x103   : > { %935 = vst [vmem:[%s1499_s12 + $0x58] sm:$0xff] %v919_v47 }
 0x104   : > { %v923_v37 = vadd.f32 %v907_v46, %v891_v48 }
 0x106   : > { %939 = vst [vmem:[%s1499_s12 + $0x78] sm:$0xff] %v923_v37 }
 0x107 PF: > { %s18_s24 = sadd.s32 1, %s1238_s24  }
 0x108   : > { %p15_p4 = scmp.ge.s32.totalorder %s18_s24, 4  }
 0x10a   :  { %17 = sbr.rel (!%p15_p4) target bundleno = 1 (0x1), region = 101 }

</bundles_post_ra>
